<compile_context>
chip_gen: v7x
topology: tpu7x:2x2x1
jax: 0.10.0
libtpu: 0.0.40
codegen_flags: <defaults>
</compile_context>

<pallas_src>
import jax
import jax.numpy as jnp
from jax import lax
from jax.experimental import pallas as pl
from jax.experimental.pallas import tpu as pltpu

_LANES = 128
_EPS = 1e-5
_CHUNK_H = 8            # output rows of H per accumulation chunk (8*W = 128 rows here)


def _vgg_block_kernel(x_ref, w1_ref, g1_ref, b1_ref, w2_ref, g2_ref, b2_ref,
                      out_ref, xpad_ref):
    """Fused VGGBlock forward: conv1 -> bn1 -> relu -> conv2 -> bn2 -> relu.

    x_ref:    (N, H, W, Cin) input
    w*_ref:   (9, CP, CP) tap-major conv weights, zero-padded on both channel dims
    g*/b*:    (1, CP) BN gamma/beta (zero-padded)
    out_ref:  (N*H*W, CP) lane-dense f32 output (also used as temp storage for raw conv out)
    xpad_ref: (N, H+2, Wp, CP) zero-haloed activation scratch, Wp = round_up(W+2, 8)
    """
    N, H, W, Cin = x_ref.shape
    CP = out_ref.shape[-1]
    HB = H // _CHUNK_H
    CH = _CHUNK_H
    rows = CH * W                       # rows of the (rows, CP) chunk matrices
    M = N * H * W

    # Zero the haloed scratch ONCE (halo ring + padded channel lanes must be 0; the
    # meaningful interior lanes are overwritten below).  No other zero-stores in the kernel.
    xpad_ref[...] = jnp.zeros(xpad_ref.shape, jnp.float32)

    # Stage-1 input: place x into the interior (lanes >= Cin stay zero).
    xpad_ref[:, 1:H + 1, 1:W + 1, :Cin] = x_ref[...].astype(jnp.float32)

    def conv_pass(w_ref):
        """3x3 same-conv over the current xpad contents.

        Writes RAW (pre-BN) outputs chunk-by-chunk into out_ref (used as temp storage)
        and returns per-channel (sum, sum_of_squares).  The accumulator lives in vregs
        (16 per chunk), initialized by the first tap's dot -> no scratch RMW, no zeroing.
        """
        s = jnp.zeros((1, CP), jnp.float32)
        ss = jnp.zeros((1, CP), jnp.float32)
        for n in range(N):
            for hb in range(HB):
                h0 = hb * CH
                acc = None
                tap = 0
                for dy in range(3):
                    for dx in range(3):
                        win = xpad_ref[n:n + 1, h0 + dy:h0 + dy + CH, dx:dx + W, :]
                        lhs = win.reshape(rows, CP)
                        d = jnp.dot(lhs, w_ref[tap],
                                    preferred_element_type=jnp.float32)
                        acc = d if acc is None else acc + d
                        tap += 1
                r0 = (n * H + h0) * W
                out_ref[r0:r0 + rows, :] = acc          # full 128-lane dense store
                s = s + jnp.sum(acc, axis=0, keepdims=True)
                ss = ss + jnp.sum(acc * acc, axis=0, keepdims=True)
        return s, ss

    def bn_scale_shift(s, ss, gamma, beta):
        inv_m = 1.0 / M
        mean = s * inv_m
        var = jnp.maximum(ss * inv_m - mean * mean, 0.0)   # biased batch variance
        scale = lax.rsqrt(var + _EPS) * gamma
        shift = beta - mean * scale
        return scale, shift

    # ---------------- Stage 1: conv1 -> bn1 -> relu ----------------
    s1, ss1 = conv_pass(w1_ref)
    scale1, shift1 = bn_scale_shift(s1, ss1, g1_ref[...], b1_ref[...])
    # Normalize + ReLU, writing y1 into the xpad interior for stage 2.  Padded channel
    # lanes come out exactly 0 (zero weight columns, gamma/beta padded with 0), so the
    # full-lane store keeps the scratch consistent for the stage-2 window reads.
    for n in range(N):
        for hb in range(HB):
            h0 = hb * CH
            r0 = (n * H + h0) * W
            raw = out_ref[r0:r0 + rows, :]
            y1 = jnp.maximum(raw * scale1 + shift1, 0.0)
            xpad_ref[n:n + 1, 1 + h0:1 + h0 + CH, 1:W + 1, :] = (
                y1.reshape(1, CH, W, CP))

    # ---------------- Stage 2: conv2 -> bn2 -> relu ----------------
    s2, ss2 = conv_pass(w2_ref)
    scale2, shift2 = bn_scale_shift(s2, ss2, g2_ref[...], b2_ref[...])
    for n in range(N):
        for hb in range(HB):
            r0 = (n * H + hb * CH) * W
            out_ref[r0:r0 + rows, :] = jnp.maximum(
                out_ref[r0:r0 + rows, :] * scale2 + shift2, 0.0)


def _pad_weight(w, cp):
    """(3, 3, Cin, Cout) HWIO -> (9, cp, cp) tap-major, zero-padded on both channel dims."""
    kh, kw, ci, co = w.shape
    wp = jnp.zeros((kh * kw, cp, cp), jnp.float32)
    return wp.at[:, :ci, :co].set(w.reshape(kh * kw, ci, co).astype(jnp.float32))


def _pad_vec(v, cp):
    c = v.shape[0]
    out = jnp.zeros((1, cp), jnp.float32)
    return out.at[0, :c].set(v.astype(jnp.float32))


def vgg_block_pallas(x_nhwc, params):
    N, H, W, Cin = x_nhwc.shape
    Cout = params["w2"].shape[-1]
    cmax = max(Cin, params["w1"].shape[-1], Cout)
    cp = max(_LANES, -(-cmax // _LANES) * _LANES)
    assert H % _CHUNK_H == 0, "toy-shape kernel assumes H % 8 == 0"
    wp = -(-(W + 2) // 8) * 8            # pad haloed W (18) to a sublane multiple (24)

    vmem = pl.BlockSpec(memory_space=pltpu.MemorySpace.VMEM)
    out2d = pl.pallas_call(
        _vgg_block_kernel,
        out_shape=jax.ShapeDtypeStruct((N * H * W, cp), jnp.float32),  # lane-dense output
        in_specs=[vmem] * 7,
        out_specs=vmem,
        scratch_shapes=[
            pltpu.VMEM((N, H + 2, wp, cp), jnp.float32),   # haloed activation scratch
        ],
    )(
        x_nhwc.astype(jnp.float32),
        _pad_weight(params["w1"], cp),
        _pad_vec(params["g1"], cp),
        _pad_vec(params["be1"], cp),
        _pad_weight(params["w2"], cp),
        _pad_vec(params["g2"], cp),
        _pad_vec(params["be2"], cp),
    )
    # Cout slice + layout restore are cheap XLA ops on the lane-dense kernel output.
    return out2d.reshape(N, H, W, cp)[..., :Cout]


@jax.jit
def vgg_block_forward(x_nchw, params):
    """Matches VGGBlock.forward: conv1 -> bn1 -> relu -> conv2 -> bn2 -> relu (NCHW I/O)."""
    x = jnp.transpose(x_nchw, (0, 2, 3, 1))   # NCHW -> NHWC (channels on lanes)
    y = vgg_block_pallas(x, params)
    return jnp.transpose(y, (0, 3, 1, 2))     # NHWC -> NCHW


def init_vgg_block_params(key, in_channels, middle_channels, out_channels):
    """Deterministic synthetic params (PyTorch-like uniform(-1/sqrt(fan_in), +...))."""
    k1, k2, k3, k4 = jax.random.split(key, 4)
    fan1 = in_channels * 9
    fan2 = middle_channels * 9
    b1 = 1.0 / jnp.sqrt(fan1)
    b2 = 1.0 / jnp.sqrt(fan2)
    return {
        "w1": jax.random.uniform(k1, (3, 3, in_channels, middle_channels),
                                 jnp.float32, -b1, b1),
        "b1": jax.random.uniform(k2, (middle_channels,), jnp.float32, -b1, b1),
        "g1": jnp.ones((middle_channels,), jnp.float32),
        "be1": jnp.zeros((middle_channels,), jnp.float32),
        "w2": jax.random.uniform(k3, (3, 3, middle_channels, out_channels),
                                 jnp.float32, -b2, b2),
        "b2": jax.random.uniform(k4, (out_channels,), jnp.float32, -b2, b2),
        "g2": jnp.ones((out_channels,), jnp.float32),
        "be2": jnp.zeros((out_channels,), jnp.float32),
    }


def _reference_forward(x_nchw, params):
    """Pure-JAX reference (lax.conv, with conv bias, standard two-pass batch-stat BN)."""
    def step(x, w, b, g, be):
        y = lax.conv_general_dilated(
            x, w, window_strides=(1, 1), padding="SAME",
            dimension_numbers=("NHWC", "HWIO", "NHWC"))
        y = y + b.reshape(1, 1, 1, -1)
        mean = jnp.mean(y, axis=(0, 1, 2), keepdims=True)
        var = jnp.mean((y - mean) ** 2, axis=(0, 1, 2), keepdims=True)
        y = (y - mean) * lax.rsqrt(var + _EPS) * g.reshape(1, 1, 1, -1) \
            + be.reshape(1, 1, 1, -1)
        return jnp.maximum(y, 0.0)

    x = jnp.transpose(x_nchw, (0, 2, 3, 1))
    x = step(x, params["w1"], params["b1"], params["g1"], params["be1"])
    x = step(x, params["w2"], params["b2"], params["g2"], params["be2"])
    return jnp.transpose(x, (0, 3, 1, 2))


if __name__ == "__main__":
    key = jax.random.PRNGKey(0)
    kx, kp = jax.random.split(key)

    # Small shapes consistent with the module: N=2, Cin=4, 16x16 spatial.
    in_channels, middle_channels, out_channels = 4, 8, 4
    x = jax.random.normal(kx, (2, in_channels, 16, 16), jnp.float32)  # NCHW like PyTorch

    params = init_vgg_block_params(kp, in_channels, middle_channels, out_channels)

    out = vgg_block_forward(x, params)
    out = jax.block_until_ready(out)

    ref = _reference_forward(x, params)
    assert out.shape == (2, out_channels, 16, 16)
    assert jnp.allclose(out, ref, atol=2e-4, rtol=2e-4), \
        float(jnp.max(jnp.abs(out - ref)))

    print("KERNEL_OK")
</pallas_src>

<mosaic_0001>
module attributes {stable_mosaic.version = 11 : i64} {
  func.func @_vgg_block_kernel(%arg0: memref<2x16x16x4xf32, #tpu.memory_space<vmem>>, %arg1: memref<9x128x128xf32, #tpu.memory_space<vmem>>, %arg2: memref<1x128xf32, #tpu.memory_space<vmem>>, %arg3: memref<1x128xf32, #tpu.memory_space<vmem>>, %arg4: memref<9x128x128xf32, #tpu.memory_space<vmem>>, %arg5: memref<1x128xf32, #tpu.memory_space<vmem>>, %arg6: memref<1x128xf32, #tpu.memory_space<vmem>>, %arg7: memref<512x128xf32, #tpu.memory_space<vmem>>, %arg8: memref<2x18x24x128xf32, #tpu.memory_space<vmem>>) attributes {dimension_semantics = [], scalar_prefetch = 0 : i64, scratch_operands = 1 : i64, tpu.core_type = #tpu.core_type<tc>} {
    %cst = arith.constant 0.000000e+00 : f32
    %0 = vector.broadcast %cst : f32 to vector<2x18x24x128xf32>
    %c0 = arith.constant 0 : index
    %c0_0 = arith.constant 0 : index
    %c0_1 = arith.constant 0 : index
    %c0_2 = arith.constant 0 : index
    %1 = vector.load %arg8[%c0, %c0_0, %c0_1, %c0_2] : memref<2x18x24x128xf32, #tpu.memory_space<vmem>>, vector<2x18x24x128xf32>
    tpu.vector_store %arg8[%c0, %c0_0, %c0_1, %c0_2], %0 {strides = array<i32>} : memref<2x18x24x128xf32, #tpu.memory_space<vmem>>, vector<2x18x24x128xf32>,
    %c0_3 = arith.constant 0 : index
    %c0_4 = arith.constant 0 : index
    %c0_5 = arith.constant 0 : index
    %c0_6 = arith.constant 0 : index
    %2 = vector.load %arg0[%c0_3, %c0_4, %c0_5, %c0_6] : memref<2x16x16x4xf32, #tpu.memory_space<vmem>>, vector<2x16x16x4xf32>
    %c0_7 = arith.constant 0 : index
    %c1 = arith.constant 1 : index
    %c1_8 = arith.constant 1 : index
    %c0_9 = arith.constant 0 : index
    %3 = vector.load %arg8[%c0_7, %c1, %c1_8, %c0_9] : memref<2x18x24x128xf32, #tpu.memory_space<vmem>>, vector<2x16x16x4xf32>
    tpu.vector_store %arg8[%c0_7, %c1, %c1_8, %c0_9], %2 {strides = array<i32>} : memref<2x18x24x128xf32, #tpu.memory_space<vmem>>, vector<2x16x16x4xf32>,
    %cst_10 = arith.constant 0.000000e+00 : f32
    %4 = vector.broadcast %cst_10 : f32 to vector<1x128xf32>
    %cst_11 = arith.constant 0.000000e+00 : f32
    %5 = vector.broadcast %cst_11 : f32 to vector<1x128xf32>
    %c0_12 = arith.constant 0 : index
    %c0_13 = arith.constant 0 : index
    %c0_14 = arith.constant 0 : index
    %c0_15 = arith.constant 0 : index
    %6 = vector.load %arg8[%c0_12, %c0_13, %c0_14, %c0_15] : memref<2x18x24x128xf32, #tpu.memory_space<vmem>>, vector<1x8x16x128xf32>
    %7 = vector.shape_cast %6 : vector<1x8x16x128xf32> to vector<128x128xf32>
    %c0_16 = arith.constant 0 : index
    %c0_17 = arith.constant 0 : index
    %c0_18 = arith.constant 0 : index
    %8 = vector.load %arg1[%c0_16, %c0_17, %c0_18] : memref<9x128x128xf32, #tpu.memory_space<vmem>>, vector<1x128x128xf32>
    %9 = vector.shape_cast %8 : vector<1x128x128xf32> to vector<128x128xf32>
    %cst_19 = arith.constant dense<0.000000e+00> : vector<128x128xf32>
    %10 = tpu.matmul %7, %9, %cst_19 {dimension_numbers = #tpu.dot_dimension_numbers<[1], [0], [0], [1], [0, 0, 1, 1], [], []>} : vector<128x128xf32>, vector<128x128xf32>, vector<128x128xf32> -> vector<128x128xf32>
    %c0_20 = arith.constant 0 : index
    %c0_21 = arith.constant 0 : index
    %c1_22 = arith.constant 1 : index
    %c0_23 = arith.constant 0 : index
    %11 = vector.load %arg8[%c0_20, %c0_21, %c1_22, %c0_23] : memref<2x18x24x128xf32, #tpu.memory_space<vmem>>, vector<1x8x16x128xf32>
    %12 = vector.shape_cast %11 : vector<1x8x16x128xf32> to vector<128x128xf32>
    %c1_24 = arith.constant 1 : index
    %c0_25 = arith.constant 0 : index
    %c0_26 = arith.constant 0 : index
    %13 = vector.load %arg1[%c1_24, %c0_25, %c0_26] : memref<9x128x128xf32, #tpu.memory_space<vmem>>, vector<1x128x128xf32>
    %14 = vector.shape_cast %13 : vector<1x128x128xf32> to vector<128x128xf32>
    %cst_27 = arith.constant dense<0.000000e+00> : vector<128x128xf32>
    %15 = tpu.matmul %12, %14, %cst_27 {dimension_numbers = #tpu.dot_dimension_numbers<[1], [0], [0], [1], [0, 0, 1, 1], [], []>} : vector<128x128xf32>, vector<128x128xf32>, vector<128x128xf32> -> vector<128x128xf32>
    %16 = arith.addf %10, %15 : vector<128x128xf32>
    %c0_28 = arith.constant 0 : index
    %c0_29 = arith.constant 0 : index
    %c2 = arith.constant 2 : index
    %c0_30 = arith.constant 0 : index
    %17 = vector.load %arg8[%c0_28, %c0_29, %c2, %c0_30] : memref<2x18x24x128xf32, #tpu.memory_space<vmem>>, vector<1x8x16x128xf32>
    %18 = vector.shape_cast %17 : vector<1x8x16x128xf32> to vector<128x128xf32>
    %c2_31 = arith.constant 2 : index
    %c0_32 = arith.constant 0 : index
    %c0_33 = arith.constant 0 : index
    %19 = vector.load %arg1[%c2_31, %c0_32, %c0_33] : memref<9x128x128xf32, #tpu.memory_space<vmem>>, vector<1x128x128xf32>
    %20 = vector.shape_cast %19 : vector<1x128x128xf32> to vector<128x128xf32>
    %cst_34 = arith.constant dense<0.000000e+00> : vector<128x128xf32>
    %21 = tpu.matmul %18, %20, %cst_34 {dimension_numbers = #tpu.dot_dimension_numbers<[1], [0], [0], [1], [0, 0, 1, 1], [], []>} : vector<128x128xf32>, vector<128x128xf32>, vector<128x128xf32> -> vector<128x128xf32>
    %22 = arith.addf %16, %21 : vector<128x128xf32>
    %c0_35 = arith.constant 0 : index
    %c1_36 = arith.constant 1 : index
    %c0_37 = arith.constant 0 : index
    %c0_38 = arith.constant 0 : index
    %23 = vector.load %arg8[%c0_35, %c1_36, %c0_37, %c0_38] : memref<2x18x24x128xf32, #tpu.memory_space<vmem>>, vector<1x8x16x128xf32>
    %24 = vector.shape_cast %23 : vector<1x8x16x128xf32> to vector<128x128xf32>
    %c3 = arith.constant 3 : index
    %c0_39 = arith.constant 0 : index
    %c0_40 = arith.constant 0 : index
    %25 = vector.load %arg1[%c3, %c0_39, %c0_40] : memref<9x128x128xf32, #tpu.memory_space<vmem>>, vector<1x128x128xf32>
    %26 = vector.shape_cast %25 : vector<1x128x128xf32> to vector<128x128xf32>
    %cst_41 = arith.constant dense<0.000000e+00> : vector<128x128xf32>
    %27 = tpu.matmul %24, %26, %cst_41 {dimension_numbers = #tpu.dot_dimension_numbers<[1], [0], [0], [1], [0, 0, 1, 1], [], []>} : vector<128x128xf32>, vector<128x128xf32>, vector<128x128xf32> -> vector<128x128xf32>
    %28 = arith.addf %22, %27 : vector<128x128xf32>
    %c0_42 = arith.constant 0 : index
    %c1_43 = arith.constant 1 : index
    %c1_44 = arith.constant 1 : index
    %c0_45 = arith.constant 0 : index
    %29 = vector.load %arg8[%c0_42, %c1_43, %c1_44, %c0_45] : memref<2x18x24x128xf32, #tpu.memory_space<vmem>>, vector<1x8x16x128xf32>
    %30 = vector.shape_cast %29 : vector<1x8x16x128xf32> to vector<128x128xf32>
    %c4 = arith.constant 4 : index
    %c0_46 = arith.constant 0 : index
    %c0_47 = arith.constant 0 : index
    %31 = vector.load %arg1[%c4, %c0_46, %c0_47] : memref<9x128x128xf32, #tpu.memory_space<vmem>>, vector<1x128x128xf32>
    %32 = vector.shape_cast %31 : vector<1x128x128xf32> to vector<128x128xf32>
    %cst_48 = arith.constant dense<0.000000e+00> : vector<128x128xf32>
    %33 = tpu.matmul %30, %32, %cst_48 {dimension_numbers = #tpu.dot_dimension_numbers<[1], [0], [0], [1], [0, 0, 1, 1], [], []>} : vector<128x128xf32>, vector<128x128xf32>, vector<128x128xf32> -> vector<128x128xf32>
    %34 = arith.addf %28, %33 : vector<128x128xf32>
    %c0_49 = arith.constant 0 : index
    %c1_50 = arith.constant 1 : index
    %c2_51 = arith.constant 2 : index
    %c0_52 = arith.constant 0 : index
    %35 = vector.load %arg8[%c0_49, %c1_50, %c2_51, %c0_52] : memref<2x18x24x128xf32, #tpu.memory_space<vmem>>, vector<1x8x16x128xf32>
    %36 = vector.shape_cast %35 : vector<1x8x16x128xf32> to vector<128x128xf32>
    %c5 = arith.constant 5 : index
    %c0_53 = arith.constant 0 : index
    %c0_54 = arith.constant 0 : index
    %37 = vector.load %arg1[%c5, %c0_53, %c0_54] : memref<9x128x128xf32, #tpu.memory_space<vmem>>, vector<1x128x128xf32>
    %38 = vector.shape_cast %37 : vector<1x128x128xf32> to vector<128x128xf32>
    %cst_55 = arith.constant dense<0.000000e+00> : vector<128x128xf32>
    %39 = tpu.matmul %36, %38, %cst_55 {dimension_numbers = #tpu.dot_dimension_numbers<[1], [0], [0], [1], [0, 0, 1, 1], [], []>} : vector<128x128xf32>, vector<128x128xf32>, vector<128x128xf32> -> vector<128x128xf32>
    %40 = arith.addf %34, %39 : vector<128x128xf32>
    %c0_56 = arith.constant 0 : index
    %c2_57 = arith.constant 2 : index
    %c0_58 = arith.constant 0 : index
    %c0_59 = arith.constant 0 : index
    %41 = vector.load %arg8[%c0_56, %c2_57, %c0_58, %c0_59] : memref<2x18x24x128xf32, #tpu.memory_space<vmem>>, vector<1x8x16x128xf32>
    %42 = vector.shape_cast %41 : vector<1x8x16x128xf32> to vector<128x128xf32>
    %c6 = arith.constant 6 : index
    %c0_60 = arith.constant 0 : index
    %c0_61 = arith.constant 0 : index
    %43 = vector.load %arg1[%c6, %c0_60, %c0_61] : memref<9x128x128xf32, #tpu.memory_space<vmem>>, vector<1x128x128xf32>
    %44 = vector.shape_cast %43 : vector<1x128x128xf32> to vector<128x128xf32>
    %cst_62 = arith.constant dense<0.000000e+00> : vector<128x128xf32>
    %45 = tpu.matmul %42, %44, %cst_62 {dimension_numbers = #tpu.dot_dimension_numbers<[1], [0], [0], [1], [0, 0, 1, 1], [], []>} : vector<128x128xf32>, vector<128x128xf32>, vector<128x128xf32> -> vector<128x128xf32>
    %46 = arith.addf %40, %45 : vector<128x128xf32>
    %c0_63 = arith.constant 0 : index
    %c2_64 = arith.constant 2 : index
    %c1_65 = arith.constant 1 : index
    %c0_66 = arith.constant 0 : index
    %47 = vector.load %arg8[%c0_63, %c2_64, %c1_65, %c0_66] : memref<2x18x24x128xf32, #tpu.memory_space<vmem>>, vector<1x8x16x128xf32>
    %48 = vector.shape_cast %47 : vector<1x8x16x128xf32> to vector<128x128xf32>
    %c7 = arith.constant 7 : index
    %c0_67 = arith.constant 0 : index
    %c0_68 = arith.constant 0 : index
    %49 = vector.load %arg1[%c7, %c0_67, %c0_68] : memref<9x128x128xf32, #tpu.memory_space<vmem>>, vector<1x128x128xf32>
    %50 = vector.shape_cast %49 : vector<1x128x128xf32> to vector<128x128xf32>
    %cst_69 = arith.constant dense<0.000000e+00> : vector<128x128xf32>
    %51 = tpu.matmul %48, %50, %cst_69 {dimension_numbers = #tpu.dot_dimension_numbers<[1], [0], [0], [1], [0, 0, 1, 1], [], []>} : vector<128x128xf32>, vector<128x128xf32>, vector<128x128xf32> -> vector<128x128xf32>
    %52 = arith.addf %46, %51 : vector<128x128xf32>
    %c0_70 = arith.constant 0 : index
    %c2_71 = arith.constant 2 : index
    %c2_72 = arith.constant 2 : index
    %c0_73 = arith.constant 0 : index
    %53 = vector.load %arg8[%c0_70, %c2_71, %c2_72, %c0_73] : memref<2x18x24x128xf32, #tpu.memory_space<vmem>>, vector<1x8x16x128xf32>
    %54 = vector.shape_cast %53 : vector<1x8x16x128xf32> to vector<128x128xf32>
    %c8 = arith.constant 8 : index
    %c0_74 = arith.constant 0 : index
    %c0_75 = arith.constant 0 : index
    %55 = vector.load %arg1[%c8, %c0_74, %c0_75] : memref<9x128x128xf32, #tpu.memory_space<vmem>>, vector<1x128x128xf32>
    %56 = vector.shape_cast %55 : vector<1x128x128xf32> to vector<128x128xf32>
    %cst_76 = arith.constant dense<0.000000e+00> : vector<128x128xf32>
    %57 = tpu.matmul %54, %56, %cst_76 {dimension_numbers = #tpu.dot_dimension_numbers<[1], [0], [0], [1], [0, 0, 1, 1], [], []>} : vector<128x128xf32>, vector<128x128xf32>, vector<128x128xf32> -> vector<128x128xf32>
    %58 = arith.addf %52, %57 : vector<128x128xf32>
    %c0_77 = arith.constant 0 : index
    %c0_78 = arith.constant 0 : index
    %59 = vector.load %arg7[%c0_77, %c0_78] : memref<512x128xf32, #tpu.memory_space<vmem>>, vector<128x128xf32>
    tpu.vector_store %arg7[%c0_77, %c0_78], %58 {strides = array<i32>} : memref<512x128xf32, #tpu.memory_space<vmem>>, vector<128x128xf32>,
    %cst_79 = arith.constant dense<0.000000e+00> : vector<128xf32>
    %60 = vector.multi_reduction <add>, %58, %cst_79 [0] : vector<128x128xf32> to vector<128xf32>
    %61 = vector.shape_cast %60 : vector<128xf32> to vector<1x128xf32>
    %62 = arith.addf %4, %61 : vector<1x128xf32>
    %63 = arith.mulf %58, %58 : vector<128x128xf32>
    %cst_80 = arith.constant dense<0.000000e+00> : vector<128xf32>
    %64 = vector.multi_reduction <add>, %63, %cst_80 [0] : vector<128x128xf32> to vector<128xf32>
    %65 = vector.shape_cast %64 : vector<128xf32> to vector<1x128xf32>
    %66 = arith.addf %5, %65 : vector<1x128xf32>
    %c0_81 = arith.constant 0 : index
    %c8_82 = arith.constant 8 : index
    %c0_83 = arith.constant 0 : index
    %c0_84 = arith.constant 0 : index
    %67 = vector.load %arg8[%c0_81, %c8_82, %c0_83, %c0_84] : memref<2x18x24x128xf32, #tpu.memory_space<vmem>>, vector<1x8x16x128xf32>
    %68 = vector.shape_cast %67 : vector<1x8x16x128xf32> to vector<128x128xf32>
    %c0_85 = arith.constant 0 : index
    %c0_86 = arith.constant 0 : index
    %c0_87 = arith.constant 0 : index
    %69 = vector.load %arg1[%c0_85, %c0_86, %c0_87] : memref<9x128x128xf32, #tpu.memory_space<vmem>>, vector<1x128x128xf32>
    %70 = vector.shape_cast %69 : vector<1x128x128xf32> to vector<128x128xf32>
    %cst_88 = arith.constant dense<0.000000e+00> : vector<128x128xf32>
    %71 = tpu.matmul %68, %70, %cst_88 {dimension_numbers = #tpu.dot_dimension_numbers<[1], [0], [0], [1], [0, 0, 1, 1], [], []>} : vector<128x128xf32>, vector<128x128xf32>, vector<128x128xf32> -> vector<128x128xf32>
    %c0_89 = arith.constant 0 : index
    %c8_90 = arith.constant 8 : index
    %c1_91 = arith.constant 1 : index
    %c0_92 = arith.constant 0 : index
    %72 = vector.load %arg8[%c0_89, %c8_90, %c1_91, %c0_92] : memref<2x18x24x128xf32, #tpu.memory_space<vmem>>, vector<1x8x16x128xf32>
    %73 = vector.shape_cast %72 : vector<1x8x16x128xf32> to vector<128x128xf32>
    %c1_93 = arith.constant 1 : index
    %c0_94 = arith.constant 0 : index
    %c0_95 = arith.constant 0 : index
    %74 = vector.load %arg1[%c1_93, %c0_94, %c0_95] : memref<9x128x128xf32, #tpu.memory_space<vmem>>, vector<1x128x128xf32>
    %75 = vector.shape_cast %74 : vector<1x128x128xf32> to vector<128x128xf32>
    %cst_96 = arith.constant dense<0.000000e+00> : vector<128x128xf32>
    %76 = tpu.matmul %73, %75, %cst_96 {dimension_numbers = #tpu.dot_dimension_numbers<[1], [0], [0], [1], [0, 0, 1, 1], [], []>} : vector<128x128xf32>, vector<128x128xf32>, vector<128x128xf32> -> vector<128x128xf32>
    %77 = arith.addf %71, %76 : vector<128x128xf32>
    %c0_97 = arith.constant 0 : index
    %c8_98 = arith.constant 8 : index
    %c2_99 = arith.constant 2 : index
    %c0_100 = arith.constant 0 : index
    %78 = vector.load %arg8[%c0_97, %c8_98, %c2_99, %c0_100] : memref<2x18x24x128xf32, #tpu.memory_space<vmem>>, vector<1x8x16x128xf32>
    %79 = vector.shape_cast %78 : vector<1x8x16x128xf32> to vector<128x128xf32>
    %c2_101 = arith.constant 2 : index
    %c0_102 = arith.constant 0 : index
    %c0_103 = arith.constant 0 : index
    %80 = vector.load %arg1[%c2_101, %c0_102, %c0_103] : memref<9x128x128xf32, #tpu.memory_space<vmem>>, vector<1x128x128xf32>
    %81 = vector.shape_cast %80 : vector<1x128x128xf32> to vector<128x128xf32>
    %cst_104 = arith.constant dense<0.000000e+00> : vector<128x128xf32>
    %82 = tpu.matmul %79, %81, %cst_104 {dimension_numbers = #tpu.dot_dimension_numbers<[1], [0], [0], [1], [0, 0, 1, 1], [], []>} : vector<128x128xf32>, vector<128x128xf32>, vector<128x128xf32> -> vector<128x128xf32>
    %83 = arith.addf %77, %82 : vector<128x128xf32>
    %c0_105 = arith.constant 0 : index
    %c9 = arith.constant 9 : index
    %c0_106 = arith.constant 0 : index
    %c0_107 = arith.constant 0 : index
    %84 = vector.load %arg8[%c0_105, %c9, %c0_106, %c0_107] : memref<2x18x24x128xf32, #tpu.memory_space<vmem>>, vector<1x8x16x128xf32>
    %85 = vector.shape_cast %84 : vector<1x8x16x128xf32> to vector<128x128xf32>
    %c3_108 = arith.constant 3 : index
    %c0_109 = arith.constant 0 : index
    %c0_110 = arith.constant 0 : index
    %86 = vector.load %arg1[%c3_108, %c0_109, %c0_110] : memref<9x128x128xf32, #tpu.memory_space<vmem>>, vector<1x128x128xf32>
    %87 = vector.shape_cast %86 : vector<1x128x128xf32> to vector<128x128xf32>
    %cst_111 = arith.constant dense<0.000000e+00> : vector<128x128xf32>
    %88 = tpu.matmul %85, %87, %cst_111 {dimension_numbers = #tpu.dot_dimension_numbers<[1], [0], [0], [1], [0, 0, 1, 1], [], []>} : vector<128x128xf32>, vector<128x128xf32>, vector<128x128xf32> -> vector<128x128xf32>
    %89 = arith.addf %83, %88 : vector<128x128xf32>
    %c0_112 = arith.constant 0 : index
    %c9_113 = arith.constant 9 : index
    %c1_114 = arith.constant 1 : index
    %c0_115 = arith.constant 0 : index
    %90 = vector.load %arg8[%c0_112, %c9_113, %c1_114, %c0_115] : memref<2x18x24x128xf32, #tpu.memory_space<vmem>>, vector<1x8x16x128xf32>
    %91 = vector.shape_cast %90 : vector<1x8x16x128xf32> to vector<128x128xf32>
    %c4_116 = arith.constant 4 : index
    %c0_117 = arith.constant 0 : index
    %c0_118 = arith.constant 0 : index
    %92 = vector.load %arg1[%c4_116, %c0_117, %c0_118] : memref<9x128x128xf32, #tpu.memory_space<vmem>>, vector<1x128x128xf32>
    %93 = vector.shape_cast %92 : vector<1x128x128xf32> to vector<128x128xf32>
    %cst_119 = arith.constant dense<0.000000e+00> : vector<128x128xf32>
    %94 = tpu.matmul %91, %93, %cst_119 {dimension_numbers = #tpu.dot_dimension_numbers<[1], [0], [0], [1], [0, 0, 1, 1], [], []>} : vector<128x128xf32>, vector<128x128xf32>, vector<128x128xf32> -> vector<128x128xf32>
    %95 = arith.addf %89, %94 : vector<128x128xf32>
    %c0_120 = arith.constant 0 : index
    %c9_121 = arith.constant 9 : index
    %c2_122 = arith.constant 2 : index
    %c0_123 = arith.constant 0 : index
    %96 = vector.load %arg8[%c0_120, %c9_121, %c2_122, %c0_123] : memref<2x18x24x128xf32, #tpu.memory_space<vmem>>, vector<1x8x16x128xf32>
    %97 = vector.shape_cast %96 : vector<1x8x16x128xf32> to vector<128x128xf32>
    %c5_124 = arith.constant 5 : index
    %c0_125 = arith.constant 0 : index
    %c0_126 = arith.constant 0 : index
    %98 = vector.load %arg1[%c5_124, %c0_125, %c0_126] : memref<9x128x128xf32, #tpu.memory_space<vmem>>, vector<1x128x128xf32>
    %99 = vector.shape_cast %98 : vector<1x128x128xf32> to vector<128x128xf32>
    %cst_127 = arith.constant dense<0.000000e+00> : vector<128x128xf32>
    %100 = tpu.matmul %97, %99, %cst_127 {dimension_numbers = #tpu.dot_dimension_numbers<[1], [0], [0], [1], [0, 0, 1, 1], [], []>} : vector<128x128xf32>, vector<128x128xf32>, vector<128x128xf32> -> vector<128x128xf32>
    %101 = arith.addf %95, %100 : vector<128x128xf32>
    %c0_128 = arith.constant 0 : index
    %c10 = arith.constant 10 : index
    %c0_129 = arith.constant 0 : index
    %c0_130 = arith.constant 0 : index
    %102 = vector.load %arg8[%c0_128, %c10, %c0_129, %c0_130] : memref<2x18x24x128xf32, #tpu.memory_space<vmem>>, vector<1x8x16x128xf32>
    %103 = vector.shape_cast %102 : vector<1x8x16x128xf32> to vector<128x128xf32>
    %c6_131 = arith.constant 6 : index
    %c0_132 = arith.constant 0 : index
    %c0_133 = arith.constant 0 : index
    %104 = vector.load %arg1[%c6_131, %c0_132, %c0_133] : memref<9x128x128xf32, #tpu.memory_space<vmem>>, vector<1x128x128xf32>
    %105 = vector.shape_cast %104 : vector<1x128x128xf32> to vector<128x128xf32>
    %cst_134 = arith.constant dense<0.000000e+00> : vector<128x128xf32>
    %106 = tpu.matmul %103, %105, %cst_134 {dimension_numbers = #tpu.dot_dimension_numbers<[1], [0], [0], [1], [0, 0, 1, 1], [], []>} : vector<128x128xf32>, vector<128x128xf32>, vector<128x128xf32> -> vector<128x128xf32>
    %107 = arith.addf %101, %106 : vector<128x128xf32>
    %c0_135 = arith.constant 0 : index
    %c10_136 = arith.constant 10 : index
    %c1_137 = arith.constant 1 : index
    %c0_138 = arith.constant 0 : index
    %108 = vector.load %arg8[%c0_135, %c10_136, %c1_137, %c0_138] : memref<2x18x24x128xf32, #tpu.memory_space<vmem>>, vector<1x8x16x128xf32>
    %109 = vector.shape_cast %108 : vector<1x8x16x128xf32> to vector<128x128xf32>
    %c7_139 = arith.constant 7 : index
    %c0_140 = arith.constant 0 : index
    %c0_141 = arith.constant 0 : index
    %110 = vector.load %arg1[%c7_139, %c0_140, %c0_141] : memref<9x128x128xf32, #tpu.memory_space<vmem>>, vector<1x128x128xf32>
    %111 = vector.shape_cast %110 : vector<1x128x128xf32> to vector<128x128xf32>
    %cst_142 = arith.constant dense<0.000000e+00> : vector<128x128xf32>
    %112 = tpu.matmul %109, %111, %cst_142 {dimension_numbers = #tpu.dot_dimension_numbers<[1], [0], [0], [1], [0, 0, 1, 1], [], []>} : vector<128x128xf32>, vector<128x128xf32>, vector<128x128xf32> -> vector<128x128xf32>
    %113 = arith.addf %107, %112 : vector<128x128xf32>
    %c0_143 = arith.constant 0 : index
    %c10_144 = arith.constant 10 : index
    %c2_145 = arith.constant 2 : index
    %c0_146 = arith.constant 0 : index
    %114 = vector.load %arg8[%c0_143, %c10_144, %c2_145, %c0_146] : memref<2x18x24x128xf32, #tpu.memory_space<vmem>>, vector<1x8x16x128xf32>
    %115 = vector.shape_cast %114 : vector<1x8x16x128xf32> to vector<128x128xf32>
    %c8_147 = arith.constant 8 : index
    %c0_148 = arith.constant 0 : index
    %c0_149 = arith.constant 0 : index
    %116 = vector.load %arg1[%c8_147, %c0_148, %c0_149] : memref<9x128x128xf32, #tpu.memory_space<vmem>>, vector<1x128x128xf32>
    %117 = vector.shape_cast %116 : vector<1x128x128xf32> to vector<128x128xf32>
    %cst_150 = arith.constant dense<0.000000e+00> : vector<128x128xf32>
    %118 = tpu.matmul %115, %117, %cst_150 {dimension_numbers = #tpu.dot_dimension_numbers<[1], [0], [0], [1], [0, 0, 1, 1], [], []>} : vector<128x128xf32>, vector<128x128xf32>, vector<128x128xf32> -> vector<128x128xf32>
    %119 = arith.addf %113, %118 : vector<128x128xf32>
    %c128 = arith.constant 128 : index
    %c0_151 = arith.constant 0 : index
    %120 = vector.load %arg7[%c128, %c0_151] : memref<512x128xf32, #tpu.memory_space<vmem>>, vector<128x128xf32>
    tpu.vector_store %arg7[%c128, %c0_151], %119 {strides = array<i32>} : memref<512x128xf32, #tpu.memory_space<vmem>>, vector<128x128xf32>,
    %cst_152 = arith.constant dense<0.000000e+00> : vector<128xf32>
    %121 = vector.multi_reduction <add>, %119, %cst_152 [0] : vector<128x128xf32> to vector<128xf32>
    %122 = vector.shape_cast %121 : vector<128xf32> to vector<1x128xf32>
    %123 = arith.addf %62, %122 : vector<1x128xf32>
    %124 = arith.mulf %119, %119 : vector<128x128xf32>
    %cst_153 = arith.constant dense<0.000000e+00> : vector<128xf32>
    %125 = vector.multi_reduction <add>, %124, %cst_153 [0] : vector<128x128xf32> to vector<128xf32>
    %126 = vector.shape_cast %125 : vector<128xf32> to vector<1x128xf32>
    %127 = arith.addf %66, %126 : vector<1x128xf32>
    %c1_154 = arith.constant 1 : index
    %c0_155 = arith.constant 0 : index
    %c0_156 = arith.constant 0 : index
    %c0_157 = arith.constant 0 : index
    %128 = vector.load %arg8[%c1_154, %c0_155, %c0_156, %c0_157] : memref<2x18x24x128xf32, #tpu.memory_space<vmem>>, vector<1x8x16x128xf32>
    %129 = vector.shape_cast %128 : vector<1x8x16x128xf32> to vector<128x128xf32>
    %c0_158 = arith.constant 0 : index
    %c0_159 = arith.constant 0 : index
    %c0_160 = arith.constant 0 : index
    %130 = vector.load %arg1[%c0_158, %c0_159, %c0_160] : memref<9x128x128xf32, #tpu.memory_space<vmem>>, vector<1x128x128xf32>
    %131 = vector.shape_cast %130 : vector<1x128x128xf32> to vector<128x128xf32>
    %cst_161 = arith.constant dense<0.000000e+00> : vector<128x128xf32>
    %132 = tpu.matmul %129, %131, %cst_161 {dimension_numbers = #tpu.dot_dimension_numbers<[1], [0], [0], [1], [0, 0, 1, 1], [], []>} : vector<128x128xf32>, vector<128x128xf32>, vector<128x128xf32> -> vector<128x128xf32>
    %c1_162 = arith.constant 1 : index
    %c0_163 = arith.constant 0 : index
    %c1_164 = arith.constant 1 : index
    %c0_165 = arith.constant 0 : index
    %133 = vector.load %arg8[%c1_162, %c0_163, %c1_164, %c0_165] : memref<2x18x24x128xf32, #tpu.memory_space<vmem>>, vector<1x8x16x128xf32>
    %134 = vector.shape_cast %133 : vector<1x8x16x128xf32> to vector<128x128xf32>
    %c1_166 = arith.constant 1 : index
    %c0_167 = arith.constant 0 : index
    %c0_168 = arith.constant 0 : index
    %135 = vector.load %arg1[%c1_166, %c0_167, %c0_168] : memref<9x128x128xf32, #tpu.memory_space<vmem>>, vector<1x128x128xf32>
    %136 = vector.shape_cast %135 : vector<1x128x128xf32> to vector<128x128xf32>
    %cst_169 = arith.constant dense<0.000000e+00> : vector<128x128xf32>
    %137 = tpu.matmul %134, %136, %cst_169 {dimension_numbers = #tpu.dot_dimension_numbers<[1], [0], [0], [1], [0, 0, 1, 1], [], []>} : vector<128x128xf32>, vector<128x128xf32>, vector<128x128xf32> -> vector<128x128xf32>
    %138 = arith.addf %132, %137 : vector<128x128xf32>
    %c1_170 = arith.constant 1 : index
    %c0_171 = arith.constant 0 : index
    %c2_172 = arith.constant 2 : index
    %c0_173 = arith.constant 0 : index
    %139 = vector.load %arg8[%c1_170, %c0_171, %c2_172, %c0_173] : memref<2x18x24x128xf32, #tpu.memory_space<vmem>>, vector<1x8x16x128xf32>
    %140 = vector.shape_cast %139 : vector<1x8x16x128xf32> to vector<128x128xf32>
    %c2_174 = arith.constant 2 : index
    %c0_175 = arith.constant 0 : index
    %c0_176 = arith.constant 0 : index
    %141 = vector.load %arg1[%c2_174, %c0_175, %c0_176] : memref<9x128x128xf32, #tpu.memory_space<vmem>>, vector<1x128x128xf32>
    %142 = vector.shape_cast %141 : vector<1x128x128xf32> to vector<128x128xf32>
    %cst_177 = arith.constant dense<0.000000e+00> : vector<128x128xf32>
    %143 = tpu.matmul %140, %142, %cst_177 {dimension_numbers = #tpu.dot_dimension_numbers<[1], [0], [0], [1], [0, 0, 1, 1], [], []>} : vector<128x128xf32>, vector<128x128xf32>, vector<128x128xf32> -> vector<128x128xf32>
    %144 = arith.addf %138, %143 : vector<128x128xf32>
    %c1_178 = arith.constant 1 : index
    %c1_179 = arith.constant 1 : index
    %c0_180 = arith.constant 0 : index
    %c0_181 = arith.constant 0 : index
    %145 = vector.load %arg8[%c1_178, %c1_179, %c0_180, %c0_181] : memref<2x18x24x128xf32, #tpu.memory_space<vmem>>, vector<1x8x16x128xf32>
    %146 = vector.shape_cast %145 : vector<1x8x16x128xf32> to vector<128x128xf32>
    %c3_182 = arith.constant 3 : index
    %c0_183 = arith.constant 0 : index
    %c0_184 = arith.constant 0 : index
    %147 = vector.load %arg1[%c3_182, %c0_183, %c0_184] : memref<9x128x128xf32, #tpu.memory_space<vmem>>, vector<1x128x128xf32>
    %148 = vector.shape_cast %147 : vector<1x128x128xf32> to vector<128x128xf32>
    %cst_185 = arith.constant dense<0.000000e+00> : vector<128x128xf32>
    %149 = tpu.matmul %146, %148, %cst_185 {dimension_numbers = #tpu.dot_dimension_numbers<[1], [0], [0], [1], [0, 0, 1, 1], [], []>} : vector<128x128xf32>, vector<128x128xf32>, vector<128x128xf32> -> vector<128x128xf32>
    %150 = arith.addf %144, %149 : vector<128x128xf32>
    %c1_186 = arith.constant 1 : index
    %c1_187 = arith.constant 1 : index
    %c1_188 = arith.constant 1 : index
    %c0_189 = arith.constant 0 : index
    %151 = vector.load %arg8[%c1_186, %c1_187, %c1_188, %c0_189] : memref<2x18x24x128xf32, #tpu.memory_space<vmem>>, vector<1x8x16x128xf32>
    %152 = vector.shape_cast %151 : vector<1x8x16x128xf32> to vector<128x128xf32>
    %c4_190 = arith.constant 4 : index
    %c0_191 = arith.constant 0 : index
    %c0_192 = arith.constant 0 : index
    %153 = vector.load %arg1[%c4_190, %c0_191, %c0_192] : memref<9x128x128xf32, #tpu.memory_space<vmem>>, vector<1x128x128xf32>
    %154 = vector.shape_cast %153 : vector<1x128x128xf32> to vector<128x128xf32>
    %cst_193 = arith.constant dense<0.000000e+00> : vector<128x128xf32>
    %155 = tpu.matmul %152, %154, %cst_193 {dimension_numbers = #tpu.dot_dimension_numbers<[1], [0], [0], [1], [0, 0, 1, 1], [], []>} : vector<128x128xf32>, vector<128x128xf32>, vector<128x128xf32> -> vector<128x128xf32>
    %156 = arith.addf %150, %155 : vector<128x128xf32>
    %c1_194 = arith.constant 1 : index
    %c1_195 = arith.constant 1 : index
    %c2_196 = arith.constant 2 : index
    %c0_197 = arith.constant 0 : index
    %157 = vector.load %arg8[%c1_194, %c1_195, %c2_196, %c0_197] : memref<2x18x24x128xf32, #tpu.memory_space<vmem>>, vector<1x8x16x128xf32>
    %158 = vector.shape_cast %157 : vector<1x8x16x128xf32> to vector<128x128xf32>
    %c5_198 = arith.constant 5 : index
    %c0_199 = arith.constant 0 : index
    %c0_200 = arith.constant 0 : index
    %159 = vector.load %arg1[%c5_198, %c0_199, %c0_200] : memref<9x128x128xf32, #tpu.memory_space<vmem>>, vector<1x128x128xf32>
    %160 = vector.shape_cast %159 : vector<1x128x128xf32> to vector<128x128xf32>
    %cst_201 = arith.constant dense<0.000000e+00> : vector<128x128xf32>
    %161 = tpu.matmul %158, %160, %cst_201 {dimension_numbers = #tpu.dot_dimension_numbers<[1], [0], [0], [1], [0, 0, 1, 1], [], []>} : vector<128x128xf32>, vector<128x128xf32>, vector<128x128xf32> -> vector<128x128xf32>
    %162 = arith.addf %156, %161 : vector<128x128xf32>
    %c1_202 = arith.constant 1 : index
    %c2_203 = arith.constant 2 : index
    %c0_204 = arith.constant 0 : index
    %c0_205 = arith.constant 0 : index
    %163 = vector.load %arg8[%c1_202, %c2_203, %c0_204, %c0_205] : memref<2x18x24x128xf32, #tpu.memory_space<vmem>>, vector<1x8x16x128xf32>
    %164 = vector.shape_cast %163 : vector<1x8x16x128xf32> to vector<128x128xf32>
    %c6_206 = arith.constant 6 : index
    %c0_207 = arith.constant 0 : index
    %c0_208 = arith.constant 0 : index
    %165 = vector.load %arg1[%c6_206, %c0_207, %c0_208] : memref<9x128x128xf32, #tpu.memory_space<vmem>>, vector<1x128x128xf32>
    %166 = vector.shape_cast %165 : vector<1x128x128xf32> to vector<128x128xf32>
    %cst_209 = arith.constant dense<0.000000e+00> : vector<128x128xf32>
    %167 = tpu.matmul %164, %166, %cst_209 {dimension_numbers = #tpu.dot_dimension_numbers<[1], [0], [0], [1], [0, 0, 1, 1], [], []>} : vector<128x128xf32>, vector<128x128xf32>, vector<128x128xf32> -> vector<128x128xf32>
    %168 = arith.addf %162, %167 : vector<128x128xf32>
    %c1_210 = arith.constant 1 : index
    %c2_211 = arith.constant 2 : index
    %c1_212 = arith.constant 1 : index
    %c0_213 = arith.constant 0 : index
    %169 = vector.load %arg8[%c1_210, %c2_211, %c1_212, %c0_213] : memref<2x18x24x128xf32, #tpu.memory_space<vmem>>, vector<1x8x16x128xf32>
    %170 = vector.shape_cast %169 : vector<1x8x16x128xf32> to vector<128x128xf32>
    %c7_214 = arith.constant 7 : index
    %c0_215 = arith.constant 0 : index
    %c0_216 = arith.constant 0 : index
    %171 = vector.load %arg1[%c7_214, %c0_215, %c0_216] : memref<9x128x128xf32, #tpu.memory_space<vmem>>, vector<1x128x128xf32>
    %172 = vector.shape_cast %171 : vector<1x128x128xf32> to vector<128x128xf32>
    %cst_217 = arith.constant dense<0.000000e+00> : vector<128x128xf32>
    %173 = tpu.matmul %170, %172, %cst_217 {dimension_numbers = #tpu.dot_dimension_numbers<[1], [0], [0], [1], [0, 0, 1, 1], [], []>} : vector<128x128xf32>, vector<128x128xf32>, vector<128x128xf32> -> vector<128x128xf32>
    %174 = arith.addf %168, %173 : vector<128x128xf32>
    %c1_218 = arith.constant 1 : index
    %c2_219 = arith.constant 2 : index
    %c2_220 = arith.constant 2 : index
    %c0_221 = arith.constant 0 : index
    %175 = vector.load %arg8[%c1_218, %c2_219, %c2_220, %c0_221] : memref<2x18x24x128xf32, #tpu.memory_space<vmem>>, vector<1x8x16x128xf32>
    %176 = vector.shape_cast %175 : vector<1x8x16x128xf32> to vector<128x128xf32>
    %c8_222 = arith.constant 8 : index
    %c0_223 = arith.constant 0 : index
    %c0_224 = arith.constant 0 : index
    %177 = vector.load %arg1[%c8_222, %c0_223, %c0_224] : memref<9x128x128xf32, #tpu.memory_space<vmem>>, vector<1x128x128xf32>
    %178 = vector.shape_cast %177 : vector<1x128x128xf32> to vector<128x128xf32>
    %cst_225 = arith.constant dense<0.000000e+00> : vector<128x128xf32>
    %179 = tpu.matmul %176, %178, %cst_225 {dimension_numbers = #tpu.dot_dimension_numbers<[1], [0], [0], [1], [0, 0, 1, 1], [], []>} : vector<128x128xf32>, vector<128x128xf32>, vector<128x128xf32> -> vector<128x128xf32>
    %180 = arith.addf %174, %179 : vector<128x128xf32>
    %c256 = arith.constant 256 : index
    %c0_226 = arith.constant 0 : index
    %181 = vector.load %arg7[%c256, %c0_226] : memref<512x128xf32, #tpu.memory_space<vmem>>, vector<128x128xf32>
    tpu.vector_store %arg7[%c256, %c0_226], %180 {strides = array<i32>} : memref<512x128xf32, #tpu.memory_space<vmem>>, vector<128x128xf32>,
    %cst_227 = arith.constant dense<0.000000e+00> : vector<128xf32>
    %182 = vector.multi_reduction <add>, %180, %cst_227 [0] : vector<128x128xf32> to vector<128xf32>
    %183 = vector.shape_cast %182 : vector<128xf32> to vector<1x128xf32>
    %184 = arith.addf %123, %183 : vector<1x128xf32>
    %185 = arith.mulf %180, %180 : vector<128x128xf32>
    %cst_228 = arith.constant dense<0.000000e+00> : vector<128xf32>
    %186 = vector.multi_reduction <add>, %185, %cst_228 [0] : vector<128x128xf32> to vector<128xf32>
    %187 = vector.shape_cast %186 : vector<128xf32> to vector<1x128xf32>
    %188 = arith.addf %127, %187 : vector<1x128xf32>
    %c1_229 = arith.constant 1 : index
    %c8_230 = arith.constant 8 : index
    %c0_231 = arith.constant 0 : index
    %c0_232 = arith.constant 0 : index
    %189 = vector.load %arg8[%c1_229, %c8_230, %c0_231, %c0_232] : memref<2x18x24x128xf32, #tpu.memory_space<vmem>>, vector<1x8x16x128xf32>
    %190 = vector.shape_cast %189 : vector<1x8x16x128xf32> to vector<128x128xf32>
    %c0_233 = arith.constant 0 : index
    %c0_234 = arith.constant 0 : index
    %c0_235 = arith.constant 0 : index
    %191 = vector.load %arg1[%c0_233, %c0_234, %c0_235] : memref<9x128x128xf32, #tpu.memory_space<vmem>>, vector<1x128x128xf32>
    %192 = vector.shape_cast %191 : vector<1x128x128xf32> to vector<128x128xf32>
    %cst_236 = arith.constant dense<0.000000e+00> : vector<128x128xf32>
    %193 = tpu.matmul %190, %192, %cst_236 {dimension_numbers = #tpu.dot_dimension_numbers<[1], [0], [0], [1], [0, 0, 1, 1], [], []>} : vector<128x128xf32>, vector<128x128xf32>, vector<128x128xf32> -> vector<128x128xf32>
    %c1_237 = arith.constant 1 : index
    %c8_238 = arith.constant 8 : index
    %c1_239 = arith.constant 1 : index
    %c0_240 = arith.constant 0 : index
    %194 = vector.load %arg8[%c1_237, %c8_238, %c1_239, %c0_240] : memref<2x18x24x128xf32, #tpu.memory_space<vmem>>, vector<1x8x16x128xf32>
    %195 = vector.shape_cast %194 : vector<1x8x16x128xf32> to vector<128x128xf32>
    %c1_241 = arith.constant 1 : index
    %c0_242 = arith.constant 0 : index
    %c0_243 = arith.constant 0 : index
    %196 = vector.load %arg1[%c1_241, %c0_242, %c0_243] : memref<9x128x128xf32, #tpu.memory_space<vmem>>, vector<1x128x128xf32>
    %197 = vector.shape_cast %196 : vector<1x128x128xf32> to vector<128x128xf32>
    %cst_244 = arith.constant dense<0.000000e+00> : vector<128x128xf32>
    %198 = tpu.matmul %195, %197, %cst_244 {dimension_numbers = #tpu.dot_dimension_numbers<[1], [0], [0], [1], [0, 0, 1, 1], [], []>} : vector<128x128xf32>, vector<128x128xf32>, vector<128x128xf32> -> vector<128x128xf32>
    %199 = arith.addf %193, %198 : vector<128x128xf32>
    %c1_245 = arith.constant 1 : index
    %c8_246 = arith.constant 8 : index
    %c2_247 = arith.constant 2 : index
    %c0_248 = arith.constant 0 : index
    %200 = vector.load %arg8[%c1_245, %c8_246, %c2_247, %c0_248] : memref<2x18x24x128xf32, #tpu.memory_space<vmem>>, vector<1x8x16x128xf32>
    %201 = vector.shape_cast %200 : vector<1x8x16x128xf32> to vector<128x128xf32>
    %c2_249 = arith.constant 2 : index
    %c0_250 = arith.constant 0 : index
    %c0_251 = arith.constant 0 : index
    %202 = vector.load %arg1[%c2_249, %c0_250, %c0_251] : memref<9x128x128xf32, #tpu.memory_space<vmem>>, vector<1x128x128xf32>
    %203 = vector.shape_cast %202 : vector<1x128x128xf32> to vector<128x128xf32>
    %cst_252 = arith.constant dense<0.000000e+00> : vector<128x128xf32>
    %204 = tpu.matmul %201, %203, %cst_252 {dimension_numbers = #tpu.dot_dimension_numbers<[1], [0], [0], [1], [0, 0, 1, 1], [], []>} : vector<128x128xf32>, vector<128x128xf32>, vector<128x128xf32> -> vector<128x128xf32>
    %205 = arith.addf %199, %204 : vector<128x128xf32>
    %c1_253 = arith.constant 1 : index
    %c9_254 = arith.constant 9 : index
    %c0_255 = arith.constant 0 : index
    %c0_256 = arith.constant 0 : index
    %206 = vector.load %arg8[%c1_253, %c9_254, %c0_255, %c0_256] : memref<2x18x24x128xf32, #tpu.memory_space<vmem>>, vector<1x8x16x128xf32>
    %207 = vector.shape_cast %206 : vector<1x8x16x128xf32> to vector<128x128xf32>
    %c3_257 = arith.constant 3 : index
    %c0_258 = arith.constant 0 : index
    %c0_259 = arith.constant 0 : index
    %208 = vector.load %arg1[%c3_257, %c0_258, %c0_259] : memref<9x128x128xf32, #tpu.memory_space<vmem>>, vector<1x128x128xf32>
    %209 = vector.shape_cast %208 : vector<1x128x128xf32> to vector<128x128xf32>
    %cst_260 = arith.constant dense<0.000000e+00> : vector<128x128xf32>
    %210 = tpu.matmul %207, %209, %cst_260 {dimension_numbers = #tpu.dot_dimension_numbers<[1], [0], [0], [1], [0, 0, 1, 1], [], []>} : vector<128x128xf32>, vector<128x128xf32>, vector<128x128xf32> -> vector<128x128xf32>
    %211 = arith.addf %205, %210 : vector<128x128xf32>
    %c1_261 = arith.constant 1 : index
    %c9_262 = arith.constant 9 : index
    %c1_263 = arith.constant 1 : index
    %c0_264 = arith.constant 0 : index
    %212 = vector.load %arg8[%c1_261, %c9_262, %c1_263, %c0_264] : memref<2x18x24x128xf32, #tpu.memory_space<vmem>>, vector<1x8x16x128xf32>
    %213 = vector.shape_cast %212 : vector<1x8x16x128xf32> to vector<128x128xf32>
    %c4_265 = arith.constant 4 : index
    %c0_266 = arith.constant 0 : index
    %c0_267 = arith.constant 0 : index
    %214 = vector.load %arg1[%c4_265, %c0_266, %c0_267] : memref<9x128x128xf32, #tpu.memory_space<vmem>>, vector<1x128x128xf32>
    %215 = vector.shape_cast %214 : vector<1x128x128xf32> to vector<128x128xf32>
    %cst_268 = arith.constant dense<0.000000e+00> : vector<128x128xf32>
    %216 = tpu.matmul %213, %215, %cst_268 {dimension_numbers = #tpu.dot_dimension_numbers<[1], [0], [0], [1], [0, 0, 1, 1], [], []>} : vector<128x128xf32>, vector<128x128xf32>, vector<128x128xf32> -> vector<128x128xf32>
    %217 = arith.addf %211, %216 : vector<128x128xf32>
    %c1_269 = arith.constant 1 : index
    %c9_270 = arith.constant 9 : index
    %c2_271 = arith.constant 2 : index
    %c0_272 = arith.constant 0 : index
    %218 = vector.load %arg8[%c1_269, %c9_270, %c2_271, %c0_272] : memref<2x18x24x128xf32, #tpu.memory_space<vmem>>, vector<1x8x16x128xf32>
    %219 = vector.shape_cast %218 : vector<1x8x16x128xf32> to vector<128x128xf32>
    %c5_273 = arith.constant 5 : index
    %c0_274 = arith.constant 0 : index
    %c0_275 = arith.constant 0 : index
    %220 = vector.load %arg1[%c5_273, %c0_274, %c0_275] : memref<9x128x128xf32, #tpu.memory_space<vmem>>, vector<1x128x128xf32>
    %221 = vector.shape_cast %220 : vector<1x128x128xf32> to vector<128x128xf32>
    %cst_276 = arith.constant dense<0.000000e+00> : vector<128x128xf32>
    %222 = tpu.matmul %219, %221, %cst_276 {dimension_numbers = #tpu.dot_dimension_numbers<[1], [0], [0], [1], [0, 0, 1, 1], [], []>} : vector<128x128xf32>, vector<128x128xf32>, vector<128x128xf32> -> vector<128x128xf32>
    %223 = arith.addf %217, %222 : vector<128x128xf32>
    %c1_277 = arith.constant 1 : index
    %c10_278 = arith.constant 10 : index
    %c0_279 = arith.constant 0 : index
    %c0_280 = arith.constant 0 : index
    %224 = vector.load %arg8[%c1_277, %c10_278, %c0_279, %c0_280] : memref<2x18x24x128xf32, #tpu.memory_space<vmem>>, vector<1x8x16x128xf32>
    %225 = vector.shape_cast %224 : vector<1x8x16x128xf32> to vector<128x128xf32>
    %c6_281 = arith.constant 6 : index
    %c0_282 = arith.constant 0 : index
    %c0_283 = arith.constant 0 : index
    %226 = vector.load %arg1[%c6_281, %c0_282, %c0_283] : memref<9x128x128xf32, #tpu.memory_space<vmem>>, vector<1x128x128xf32>
    %227 = vector.shape_cast %226 : vector<1x128x128xf32> to vector<128x128xf32>
    %cst_284 = arith.constant dense<0.000000e+00> : vector<128x128xf32>
    %228 = tpu.matmul %225, %227, %cst_284 {dimension_numbers = #tpu.dot_dimension_numbers<[1], [0], [0], [1], [0, 0, 1, 1], [], []>} : vector<128x128xf32>, vector<128x128xf32>, vector<128x128xf32> -> vector<128x128xf32>
    %229 = arith.addf %223, %228 : vector<128x128xf32>
    %c1_285 = arith.constant 1 : index
    %c10_286 = arith.constant 10 : index
    %c1_287 = arith.constant 1 : index
    %c0_288 = arith.constant 0 : index
    %230 = vector.load %arg8[%c1_285, %c10_286, %c1_287, %c0_288] : memref<2x18x24x128xf32, #tpu.memory_space<vmem>>, vector<1x8x16x128xf32>
    %231 = vector.shape_cast %230 : vector<1x8x16x128xf32> to vector<128x128xf32>
    %c7_289 = arith.constant 7 : index
    %c0_290 = arith.constant 0 : index
    %c0_291 = arith.constant 0 : index
    %232 = vector.load %arg1[%c7_289, %c0_290, %c0_291] : memref<9x128x128xf32, #tpu.memory_space<vmem>>, vector<1x128x128xf32>
    %233 = vector.shape_cast %232 : vector<1x128x128xf32> to vector<128x128xf32>
    %cst_292 = arith.constant dense<0.000000e+00> : vector<128x128xf32>
    %234 = tpu.matmul %231, %233, %cst_292 {dimension_numbers = #tpu.dot_dimension_numbers<[1], [0], [0], [1], [0, 0, 1, 1], [], []>} : vector<128x128xf32>, vector<128x128xf32>, vector<128x128xf32> -> vector<128x128xf32>
    %235 = arith.addf %229, %234 : vector<128x128xf32>
    %c1_293 = arith.constant 1 : index
    %c10_294 = arith.constant 10 : index
    %c2_295 = arith.constant 2 : index
    %c0_296 = arith.constant 0 : index
    %236 = vector.load %arg8[%c1_293, %c10_294, %c2_295, %c0_296] : memref<2x18x24x128xf32, #tpu.memory_space<vmem>>, vector<1x8x16x128xf32>
    %237 = vector.shape_cast %236 : vector<1x8x16x128xf32> to vector<128x128xf32>
    %c8_297 = arith.constant 8 : index
    %c0_298 = arith.constant 0 : index
    %c0_299 = arith.constant 0 : index
    %238 = vector.load %arg1[%c8_297, %c0_298, %c0_299] : memref<9x128x128xf32, #tpu.memory_space<vmem>>, vector<1x128x128xf32>
    %239 = vector.shape_cast %238 : vector<1x128x128xf32> to vector<128x128xf32>
    %cst_300 = arith.constant dense<0.000000e+00> : vector<128x128xf32>
    %240 = tpu.matmul %237, %239, %cst_300 {dimension_numbers = #tpu.dot_dimension_numbers<[1], [0], [0], [1], [0, 0, 1, 1], [], []>} : vector<128x128xf32>, vector<128x128xf32>, vector<128x128xf32> -> vector<128x128xf32>
    %241 = arith.addf %235, %240 : vector<128x128xf32>
    %c384 = arith.constant 384 : index
    %c0_301 = arith.constant 0 : index
    %242 = vector.load %arg7[%c384, %c0_301] : memref<512x128xf32, #tpu.memory_space<vmem>>, vector<128x128xf32>
    tpu.vector_store %arg7[%c384, %c0_301], %241 {strides = array<i32>} : memref<512x128xf32, #tpu.memory_space<vmem>>, vector<128x128xf32>,
    %cst_302 = arith.constant dense<0.000000e+00> : vector<128xf32>
    %243 = vector.multi_reduction <add>, %241, %cst_302 [0] : vector<128x128xf32> to vector<128xf32>
    %244 = vector.shape_cast %243 : vector<128xf32> to vector<1x128xf32>
    %245 = arith.addf %184, %244 : vector<1x128xf32>
    %246 = arith.mulf %241, %241 : vector<128x128xf32>
    %cst_303 = arith.constant dense<0.000000e+00> : vector<128xf32>
    %247 = vector.multi_reduction <add>, %246, %cst_303 [0] : vector<128x128xf32> to vector<128xf32>
    %248 = vector.shape_cast %247 : vector<128xf32> to vector<1x128xf32>
    %249 = arith.addf %188, %248 : vector<1x128xf32>
    %c0_304 = arith.constant 0 : index
    %c0_305 = arith.constant 0 : index
    %250 = vector.load %arg2[%c0_304, %c0_305] : memref<1x128xf32, #tpu.memory_space<vmem>>, vector<1x128xf32>
    %c0_306 = arith.constant 0 : index
    %c0_307 = arith.constant 0 : index
    %251 = vector.load %arg3[%c0_306, %c0_307] : memref<1x128xf32, #tpu.memory_space<vmem>>, vector<1x128xf32>
    %cst_308 = arith.constant 0.001953125 : f32
    %252 = vector.broadcast %cst_308 : f32 to vector<1x128xf32>
    %253 = arith.mulf %245, %252 : vector<1x128xf32>
    %cst_309 = arith.constant 0.001953125 : f32
    %254 = vector.broadcast %cst_309 : f32 to vector<1x128xf32>
    %255 = arith.mulf %249, %254 : vector<1x128xf32>
    %256 = arith.mulf %253, %253 : vector<1x128xf32>
    %257 = arith.subf %255, %256 : vector<1x128xf32>
    %cst_310 = arith.constant 0.000000e+00 : f32
    %258 = vector.broadcast %cst_310 : f32 to vector<1x128xf32>
    %259 = arith.maximumf %257, %258 : vector<1x128xf32>
    %cst_311 = arith.constant 9.99999974E-6 : f32
    %260 = vector.broadcast %cst_311 : f32 to vector<1x128xf32>
    %261 = arith.addf %259, %260 : vector<1x128xf32>
    %262 = math.rsqrt %261 : vector<1x128xf32>
    %263 = arith.mulf %262, %250 : vector<1x128xf32>
    %264 = arith.mulf %253, %263 : vector<1x128xf32>
    %265 = arith.subf %251, %264 : vector<1x128xf32>
    %c0_312 = arith.constant 0 : index
    %c0_313 = arith.constant 0 : index
    %266 = vector.load %arg7[%c0_312, %c0_313] : memref<512x128xf32, #tpu.memory_space<vmem>>, vector<128x128xf32>
    %267 = vector.broadcast %263 : vector<1x128xf32> to vector<128x128xf32>
    %268 = arith.mulf %266, %267 : vector<128x128xf32>
    %269 = vector.broadcast %265 : vector<1x128xf32> to vector<128x128xf32>
    %270 = arith.addf %268, %269 : vector<128x128xf32>
    %cst_314 = arith.constant 0.000000e+00 : f32
    %271 = vector.broadcast %cst_314 : f32 to vector<128x128xf32>
    %272 = arith.maximumf %270, %271 : vector<128x128xf32>
    %273 = vector.shape_cast %272 : vector<128x128xf32> to vector<1x8x16x128xf32>
    %c0_315 = arith.constant 0 : index
    %c1_316 = arith.constant 1 : index
    %c1_317 = arith.constant 1 : index
    %c0_318 = arith.constant 0 : index
    %274 = vector.load %arg8[%c0_315, %c1_316, %c1_317, %c0_318] : memref<2x18x24x128xf32, #tpu.memory_space<vmem>>, vector<1x8x16x128xf32>
    tpu.vector_store %arg8[%c0_315, %c1_316, %c1_317, %c0_318], %273 {strides = array<i32>} : memref<2x18x24x128xf32, #tpu.memory_space<vmem>>, vector<1x8x16x128xf32>,
    %c128_319 = arith.constant 128 : index
    %c0_320 = arith.constant 0 : index
    %275 = vector.load %arg7[%c128_319, %c0_320] : memref<512x128xf32, #tpu.memory_space<vmem>>, vector<128x128xf32>
    %276 = vector.broadcast %263 : vector<1x128xf32> to vector<128x128xf32>
    %277 = arith.mulf %275, %276 : vector<128x128xf32>
    %278 = vector.broadcast %265 : vector<1x128xf32> to vector<128x128xf32>
    %279 = arith.addf %277, %278 : vector<128x128xf32>
    %cst_321 = arith.constant 0.000000e+00 : f32
    %280 = vector.broadcast %cst_321 : f32 to vector<128x128xf32>
    %281 = arith.maximumf %279, %280 : vector<128x128xf32>
    %282 = vector.shape_cast %281 : vector<128x128xf32> to vector<1x8x16x128xf32>
    %c0_322 = arith.constant 0 : index
    %c9_323 = arith.constant 9 : index
    %c1_324 = arith.constant 1 : index
    %c0_325 = arith.constant 0 : index
    %283 = vector.load %arg8[%c0_322, %c9_323, %c1_324, %c0_325] : memref<2x18x24x128xf32, #tpu.memory_space<vmem>>, vector<1x8x16x128xf32>
    tpu.vector_store %arg8[%c0_322, %c9_323, %c1_324, %c0_325], %282 {strides = array<i32>} : memref<2x18x24x128xf32, #tpu.memory_space<vmem>>, vector<1x8x16x128xf32>,
    %c256_326 = arith.constant 256 : index
    %c0_327 = arith.constant 0 : index
    %284 = vector.load %arg7[%c256_326, %c0_327] : memref<512x128xf32, #tpu.memory_space<vmem>>, vector<128x128xf32>
    %285 = vector.broadcast %263 : vector<1x128xf32> to vector<128x128xf32>
    %286 = arith.mulf %284, %285 : vector<128x128xf32>
    %287 = vector.broadcast %265 : vector<1x128xf32> to vector<128x128xf32>
    %288 = arith.addf %286, %287 : vector<128x128xf32>
    %cst_328 = arith.constant 0.000000e+00 : f32
    %289 = vector.broadcast %cst_328 : f32 to vector<128x128xf32>
    %290 = arith.maximumf %288, %289 : vector<128x128xf32>
    %291 = vector.shape_cast %290 : vector<128x128xf32> to vector<1x8x16x128xf32>
    %c1_329 = arith.constant 1 : index
    %c1_330 = arith.constant 1 : index
    %c1_331 = arith.constant 1 : index
    %c0_332 = arith.constant 0 : index
    %292 = vector.load %arg8[%c1_329, %c1_330, %c1_331, %c0_332] : memref<2x18x24x128xf32, #tpu.memory_space<vmem>>, vector<1x8x16x128xf32>
    tpu.vector_store %arg8[%c1_329, %c1_330, %c1_331, %c0_332], %291 {strides = array<i32>} : memref<2x18x24x128xf32, #tpu.memory_space<vmem>>, vector<1x8x16x128xf32>,
    %c384_333 = arith.constant 384 : index
    %c0_334 = arith.constant 0 : index
    %293 = vector.load %arg7[%c384_333, %c0_334] : memref<512x128xf32, #tpu.memory_space<vmem>>, vector<128x128xf32>
    %294 = vector.broadcast %263 : vector<1x128xf32> to vector<128x128xf32>
    %295 = arith.mulf %293, %294 : vector<128x128xf32>
    %296 = vector.broadcast %265 : vector<1x128xf32> to vector<128x128xf32>
    %297 = arith.addf %295, %296 : vector<128x128xf32>
    %cst_335 = arith.constant 0.000000e+00 : f32
    %298 = vector.broadcast %cst_335 : f32 to vector<128x128xf32>
    %299 = arith.maximumf %297, %298 : vector<128x128xf32>
    %300 = vector.shape_cast %299 : vector<128x128xf32> to vector<1x8x16x128xf32>
    %c1_336 = arith.constant 1 : index
    %c9_337 = arith.constant 9 : index
    %c1_338 = arith.constant 1 : index
    %c0_339 = arith.constant 0 : index
    %301 = vector.load %arg8[%c1_336, %c9_337, %c1_338, %c0_339] : memref<2x18x24x128xf32, #tpu.memory_space<vmem>>, vector<1x8x16x128xf32>
    tpu.vector_store %arg8[%c1_336, %c9_337, %c1_338, %c0_339], %300 {strides = array<i32>} : memref<2x18x24x128xf32, #tpu.memory_space<vmem>>, vector<1x8x16x128xf32>,
    %cst_340 = arith.constant 0.000000e+00 : f32
    %302 = vector.broadcast %cst_340 : f32 to vector<1x128xf32>
    %cst_341 = arith.constant 0.000000e+00 : f32
    %303 = vector.broadcast %cst_341 : f32 to vector<1x128xf32>
    %c0_342 = arith.constant 0 : index
    %c0_343 = arith.constant 0 : index
    %c0_344 = arith.constant 0 : index
    %c0_345 = arith.constant 0 : index
    %304 = vector.load %arg8[%c0_342, %c0_343, %c0_344, %c0_345] : memref<2x18x24x128xf32, #tpu.memory_space<vmem>>, vector<1x8x16x128xf32>
    %305 = vector.shape_cast %304 : vector<1x8x16x128xf32> to vector<128x128xf32>
    %c0_346 = arith.constant 0 : index
    %c0_347 = arith.constant 0 : index
    %c0_348 = arith.constant 0 : index
    %306 = vector.load %arg4[%c0_346, %c0_347, %c0_348] : memref<9x128x128xf32, #tpu.memory_space<vmem>>, vector<1x128x128xf32>
    %307 = vector.shape_cast %306 : vector<1x128x128xf32> to vector<128x128xf32>
    %cst_349 = arith.constant dense<0.000000e+00> : vector<128x128xf32>
    %308 = tpu.matmul %305, %307, %cst_349 {dimension_numbers = #tpu.dot_dimension_numbers<[1], [0], [0], [1], [0, 0, 1, 1], [], []>} : vector<128x128xf32>, vector<128x128xf32>, vector<128x128xf32> -> vector<128x128xf32>
    %c0_350 = arith.constant 0 : index
    %c0_351 = arith.constant 0 : index
    %c1_352 = arith.constant 1 : index
    %c0_353 = arith.constant 0 : index
    %309 = vector.load %arg8[%c0_350, %c0_351, %c1_352, %c0_353] : memref<2x18x24x128xf32, #tpu.memory_space<vmem>>, vector<1x8x16x128xf32>
    %310 = vector.shape_cast %309 : vector<1x8x16x128xf32> to vector<128x128xf32>
    %c1_354 = arith.constant 1 : index
    %c0_355 = arith.constant 0 : index
    %c0_356 = arith.constant 0 : index
    %311 = vector.load %arg4[%c1_354, %c0_355, %c0_356] : memref<9x128x128xf32, #tpu.memory_space<vmem>>, vector<1x128x128xf32>
    %312 = vector.shape_cast %311 : vector<1x128x128xf32> to vector<128x128xf32>
    %cst_357 = arith.constant dense<0.000000e+00> : vector<128x128xf32>
    %313 = tpu.matmul %310, %312, %cst_357 {dimension_numbers = #tpu.dot_dimension_numbers<[1], [0], [0], [1], [0, 0, 1, 1], [], []>} : vector<128x128xf32>, vector<128x128xf32>, vector<128x128xf32> -> vector<128x128xf32>
    %314 = arith.addf %308, %313 : vector<128x128xf32>
    %c0_358 = arith.constant 0 : index
    %c0_359 = arith.constant 0 : index
    %c2_360 = arith.constant 2 : index
    %c0_361 = arith.constant 0 : index
    %315 = vector.load %arg8[%c0_358, %c0_359, %c2_360, %c0_361] : memref<2x18x24x128xf32, #tpu.memory_space<vmem>>, vector<1x8x16x128xf32>
    %316 = vector.shape_cast %315 : vector<1x8x16x128xf32> to vector<128x128xf32>
    %c2_362 = arith.constant 2 : index
    %c0_363 = arith.constant 0 : index
    %c0_364 = arith.constant 0 : index
    %317 = vector.load %arg4[%c2_362, %c0_363, %c0_364] : memref<9x128x128xf32, #tpu.memory_space<vmem>>, vector<1x128x128xf32>
    %318 = vector.shape_cast %317 : vector<1x128x128xf32> to vector<128x128xf32>
    %cst_365 = arith.constant dense<0.000000e+00> : vector<128x128xf32>
    %319 = tpu.matmul %316, %318, %cst_365 {dimension_numbers = #tpu.dot_dimension_numbers<[1], [0], [0], [1], [0, 0, 1, 1], [], []>} : vector<128x128xf32>, vector<128x128xf32>, vector<128x128xf32> -> vector<128x128xf32>
    %320 = arith.addf %314, %319 : vector<128x128xf32>
    %c0_366 = arith.constant 0 : index
    %c1_367 = arith.constant 1 : index
    %c0_368 = arith.constant 0 : index
    %c0_369 = arith.constant 0 : index
    %321 = vector.load %arg8[%c0_366, %c1_367, %c0_368, %c0_369] : memref<2x18x24x128xf32, #tpu.memory_space<vmem>>, vector<1x8x16x128xf32>
    %322 = vector.shape_cast %321 : vector<1x8x16x128xf32> to vector<128x128xf32>
    %c3_370 = arith.constant 3 : index
    %c0_371 = arith.constant 0 : index
    %c0_372 = arith.constant 0 : index
    %323 = vector.load %arg4[%c3_370, %c0_371, %c0_372] : memref<9x128x128xf32, #tpu.memory_space<vmem>>, vector<1x128x128xf32>
    %324 = vector.shape_cast %323 : vector<1x128x128xf32> to vector<128x128xf32>
    %cst_373 = arith.constant dense<0.000000e+00> : vector<128x128xf32>
    %325 = tpu.matmul %322, %324, %cst_373 {dimension_numbers = #tpu.dot_dimension_numbers<[1], [0], [0], [1], [0, 0, 1, 1], [], []>} : vector<128x128xf32>, vector<128x128xf32>, vector<128x128xf32> -> vector<128x128xf32>
    %326 = arith.addf %320, %325 : vector<128x128xf32>
    %c0_374 = arith.constant 0 : index
    %c1_375 = arith.constant 1 : index
    %c1_376 = arith.constant 1 : index
    %c0_377 = arith.constant 0 : index
    %327 = vector.load %arg8[%c0_374, %c1_375, %c1_376, %c0_377] : memref<2x18x24x128xf32, #tpu.memory_space<vmem>>, vector<1x8x16x128xf32>
    %328 = vector.shape_cast %327 : vector<1x8x16x128xf32> to vector<128x128xf32>
    %c4_378 = arith.constant 4 : index
    %c0_379 = arith.constant 0 : index
    %c0_380 = arith.constant 0 : index
    %329 = vector.load %arg4[%c4_378, %c0_379, %c0_380] : memref<9x128x128xf32, #tpu.memory_space<vmem>>, vector<1x128x128xf32>
    %330 = vector.shape_cast %329 : vector<1x128x128xf32> to vector<128x128xf32>
    %cst_381 = arith.constant dense<0.000000e+00> : vector<128x128xf32>
    %331 = tpu.matmul %328, %330, %cst_381 {dimension_numbers = #tpu.dot_dimension_numbers<[1], [0], [0], [1], [0, 0, 1, 1], [], []>} : vector<128x128xf32>, vector<128x128xf32>, vector<128x128xf32> -> vector<128x128xf32>
    %332 = arith.addf %326, %331 : vector<128x128xf32>
    %c0_382 = arith.constant 0 : index
    %c1_383 = arith.constant 1 : index
    %c2_384 = arith.constant 2 : index
    %c0_385 = arith.constant 0 : index
    %333 = vector.load %arg8[%c0_382, %c1_383, %c2_384, %c0_385] : memref<2x18x24x128xf32, #tpu.memory_space<vmem>>, vector<1x8x16x128xf32>
    %334 = vector.shape_cast %333 : vector<1x8x16x128xf32> to vector<128x128xf32>
    %c5_386 = arith.constant 5 : index
    %c0_387 = arith.constant 0 : index
    %c0_388 = arith.constant 0 : index
    %335 = vector.load %arg4[%c5_386, %c0_387, %c0_388] : memref<9x128x128xf32, #tpu.memory_space<vmem>>, vector<1x128x128xf32>
    %336 = vector.shape_cast %335 : vector<1x128x128xf32> to vector<128x128xf32>
    %cst_389 = arith.constant dense<0.000000e+00> : vector<128x128xf32>
    %337 = tpu.matmul %334, %336, %cst_389 {dimension_numbers = #tpu.dot_dimension_numbers<[1], [0], [0], [1], [0, 0, 1, 1], [], []>} : vector<128x128xf32>, vector<128x128xf32>, vector<128x128xf32> -> vector<128x128xf32>
    %338 = arith.addf %332, %337 : vector<128x128xf32>
    %c0_390 = arith.constant 0 : index
    %c2_391 = arith.constant 2 : index
    %c0_392 = arith.constant 0 : index
    %c0_393 = arith.constant 0 : index
    %339 = vector.load %arg8[%c0_390, %c2_391, %c0_392, %c0_393] : memref<2x18x24x128xf32, #tpu.memory_space<vmem>>, vector<1x8x16x128xf32>
    %340 = vector.shape_cast %339 : vector<1x8x16x128xf32> to vector<128x128xf32>
    %c6_394 = arith.constant 6 : index
    %c0_395 = arith.constant 0 : index
    %c0_396 = arith.constant 0 : index
    %341 = vector.load %arg4[%c6_394, %c0_395, %c0_396] : memref<9x128x128xf32, #tpu.memory_space<vmem>>, vector<1x128x128xf32>
    %342 = vector.shape_cast %341 : vector<1x128x128xf32> to vector<128x128xf32>
    %cst_397 = arith.constant dense<0.000000e+00> : vector<128x128xf32>
    %343 = tpu.matmul %340, %342, %cst_397 {dimension_numbers = #tpu.dot_dimension_numbers<[1], [0], [0], [1], [0, 0, 1, 1], [], []>} : vector<128x128xf32>, vector<128x128xf32>, vector<128x128xf32> -> vector<128x128xf32>
    %344 = arith.addf %338, %343 : vector<128x128xf32>
    %c0_398 = arith.constant 0 : index
    %c2_399 = arith.constant 2 : index
    %c1_400 = arith.constant 1 : index
    %c0_401 = arith.constant 0 : index
    %345 = vector.load %arg8[%c0_398, %c2_399, %c1_400, %c0_401] : memref<2x18x24x128xf32, #tpu.memory_space<vmem>>, vector<1x8x16x128xf32>
    %346 = vector.shape_cast %345 : vector<1x8x16x128xf32> to vector<128x128xf32>
    %c7_402 = arith.constant 7 : index
    %c0_403 = arith.constant 0 : index
    %c0_404 = arith.constant 0 : index
    %347 = vector.load %arg4[%c7_402, %c0_403, %c0_404] : memref<9x128x128xf32, #tpu.memory_space<vmem>>, vector<1x128x128xf32>
    %348 = vector.shape_cast %347 : vector<1x128x128xf32> to vector<128x128xf32>
    %cst_405 = arith.constant dense<0.000000e+00> : vector<128x128xf32>
    %349 = tpu.matmul %346, %348, %cst_405 {dimension_numbers = #tpu.dot_dimension_numbers<[1], [0], [0], [1], [0, 0, 1, 1], [], []>} : vector<128x128xf32>, vector<128x128xf32>, vector<128x128xf32> -> vector<128x128xf32>
    %350 = arith.addf %344, %349 : vector<128x128xf32>
    %c0_406 = arith.constant 0 : index
    %c2_407 = arith.constant 2 : index
    %c2_408 = arith.constant 2 : index
    %c0_409 = arith.constant 0 : index
    %351 = vector.load %arg8[%c0_406, %c2_407, %c2_408, %c0_409] : memref<2x18x24x128xf32, #tpu.memory_space<vmem>>, vector<1x8x16x128xf32>
    %352 = vector.shape_cast %351 : vector<1x8x16x128xf32> to vector<128x128xf32>
    %c8_410 = arith.constant 8 : index
    %c0_411 = arith.constant 0 : index
    %c0_412 = arith.constant 0 : index
    %353 = vector.load %arg4[%c8_410, %c0_411, %c0_412] : memref<9x128x128xf32, #tpu.memory_space<vmem>>, vector<1x128x128xf32>
    %354 = vector.shape_cast %353 : vector<1x128x128xf32> to vector<128x128xf32>
    %cst_413 = arith.constant dense<0.000000e+00> : vector<128x128xf32>
    %355 = tpu.matmul %352, %354, %cst_413 {dimension_numbers = #tpu.dot_dimension_numbers<[1], [0], [0], [1], [0, 0, 1, 1], [], []>} : vector<128x128xf32>, vector<128x128xf32>, vector<128x128xf32> -> vector<128x128xf32>
    %356 = arith.addf %350, %355 : vector<128x128xf32>
    %c0_414 = arith.constant 0 : index
    %c0_415 = arith.constant 0 : index
    %357 = vector.load %arg7[%c0_414, %c0_415] : memref<512x128xf32, #tpu.memory_space<vmem>>, vector<128x128xf32>
    tpu.vector_store %arg7[%c0_414, %c0_415], %356 {strides = array<i32>} : memref<512x128xf32, #tpu.memory_space<vmem>>, vector<128x128xf32>,
    %cst_416 = arith.constant dense<0.000000e+00> : vector<128xf32>
    %358 = vector.multi_reduction <add>, %356, %cst_416 [0] : vector<128x128xf32> to vector<128xf32>
    %359 = vector.shape_cast %358 : vector<128xf32> to vector<1x128xf32>
    %360 = arith.addf %302, %359 : vector<1x128xf32>
    %361 = arith.mulf %356, %356 : vector<128x128xf32>
    %cst_417 = arith.constant dense<0.000000e+00> : vector<128xf32>
    %362 = vector.multi_reduction <add>, %361, %cst_417 [0] : vector<128x128xf32> to vector<128xf32>
    %363 = vector.shape_cast %362 : vector<128xf32> to vector<1x128xf32>
    %364 = arith.addf %303, %363 : vector<1x128xf32>
    %c0_418 = arith.constant 0 : index
    %c8_419 = arith.constant 8 : index
    %c0_420 = arith.constant 0 : index
    %c0_421 = arith.constant 0 : index
    %365 = vector.load %arg8[%c0_418, %c8_419, %c0_420, %c0_421] : memref<2x18x24x128xf32, #tpu.memory_space<vmem>>, vector<1x8x16x128xf32>
    %366 = vector.shape_cast %365 : vector<1x8x16x128xf32> to vector<128x128xf32>
    %c0_422 = arith.constant 0 : index
    %c0_423 = arith.constant 0 : index
    %c0_424 = arith.constant 0 : index
    %367 = vector.load %arg4[%c0_422, %c0_423, %c0_424] : memref<9x128x128xf32, #tpu.memory_space<vmem>>, vector<1x128x128xf32>
    %368 = vector.shape_cast %367 : vector<1x128x128xf32> to vector<128x128xf32>
    %cst_425 = arith.constant dense<0.000000e+00> : vector<128x128xf32>
    %369 = tpu.matmul %366, %368, %cst_425 {dimension_numbers = #tpu.dot_dimension_numbers<[1], [0], [0], [1], [0, 0, 1, 1], [], []>} : vector<128x128xf32>, vector<128x128xf32>, vector<128x128xf32> -> vector<128x128xf32>
    %c0_426 = arith.constant 0 : index
    %c8_427 = arith.constant 8 : index
    %c1_428 = arith.constant 1 : index
    %c0_429 = arith.constant 0 : index
    %370 = vector.load %arg8[%c0_426, %c8_427, %c1_428, %c0_429] : memref<2x18x24x128xf32, #tpu.memory_space<vmem>>, vector<1x8x16x128xf32>
    %371 = vector.shape_cast %370 : vector<1x8x16x128xf32> to vector<128x128xf32>
    %c1_430 = arith.constant 1 : index
    %c0_431 = arith.constant 0 : index
    %c0_432 = arith.constant 0 : index
    %372 = vector.load %arg4[%c1_430, %c0_431, %c0_432] : memref<9x128x128xf32, #tpu.memory_space<vmem>>, vector<1x128x128xf32>
    %373 = vector.shape_cast %372 : vector<1x128x128xf32> to vector<128x128xf32>
    %cst_433 = arith.constant dense<0.000000e+00> : vector<128x128xf32>
    %374 = tpu.matmul %371, %373, %cst_433 {dimension_numbers = #tpu.dot_dimension_numbers<[1], [0], [0], [1], [0, 0, 1, 1], [], []>} : vector<128x128xf32>, vector<128x128xf32>, vector<128x128xf32> -> vector<128x128xf32>
    %375 = arith.addf %369, %374 : vector<128x128xf32>
    %c0_434 = arith.constant 0 : index
    %c8_435 = arith.constant 8 : index
    %c2_436 = arith.constant 2 : index
    %c0_437 = arith.constant 0 : index
    %376 = vector.load %arg8[%c0_434, %c8_435, %c2_436, %c0_437] : memref<2x18x24x128xf32, #tpu.memory_space<vmem>>, vector<1x8x16x128xf32>
    %377 = vector.shape_cast %376 : vector<1x8x16x128xf32> to vector<128x128xf32>
    %c2_438 = arith.constant 2 : index
    %c0_439 = arith.constant 0 : index
    %c0_440 = arith.constant 0 : index
    %378 = vector.load %arg4[%c2_438, %c0_439, %c0_440] : memref<9x128x128xf32, #tpu.memory_space<vmem>>, vector<1x128x128xf32>
    %379 = vector.shape_cast %378 : vector<1x128x128xf32> to vector<128x128xf32>
    %cst_441 = arith.constant dense<0.000000e+00> : vector<128x128xf32>
    %380 = tpu.matmul %377, %379, %cst_441 {dimension_numbers = #tpu.dot_dimension_numbers<[1], [0], [0], [1], [0, 0, 1, 1], [], []>} : vector<128x128xf32>, vector<128x128xf32>, vector<128x128xf32> -> vector<128x128xf32>
    %381 = arith.addf %375, %380 : vector<128x128xf32>
    %c0_442 = arith.constant 0 : index
    %c9_443 = arith.constant 9 : index
    %c0_444 = arith.constant 0 : index
    %c0_445 = arith.constant 0 : index
    %382 = vector.load %arg8[%c0_442, %c9_443, %c0_444, %c0_445] : memref<2x18x24x128xf32, #tpu.memory_space<vmem>>, vector<1x8x16x128xf32>
    %383 = vector.shape_cast %382 : vector<1x8x16x128xf32> to vector<128x128xf32>
    %c3_446 = arith.constant 3 : index
    %c0_447 = arith.constant 0 : index
    %c0_448 = arith.constant 0 : index
    %384 = vector.load %arg4[%c3_446, %c0_447, %c0_448] : memref<9x128x128xf32, #tpu.memory_space<vmem>>, vector<1x128x128xf32>
    %385 = vector.shape_cast %384 : vector<1x128x128xf32> to vector<128x128xf32>
    %cst_449 = arith.constant dense<0.000000e+00> : vector<128x128xf32>
    %386 = tpu.matmul %383, %385, %cst_449 {dimension_numbers = #tpu.dot_dimension_numbers<[1], [0], [0], [1], [0, 0, 1, 1], [], []>} : vector<128x128xf32>, vector<128x128xf32>, vector<128x128xf32> -> vector<128x128xf32>
    %387 = arith.addf %381, %386 : vector<128x128xf32>
    %c0_450 = arith.constant 0 : index
    %c9_451 = arith.constant 9 : index
    %c1_452 = arith.constant 1 : index
    %c0_453 = arith.constant 0 : index
    %388 = vector.load %arg8[%c0_450, %c9_451, %c1_452, %c0_453] : memref<2x18x24x128xf32, #tpu.memory_space<vmem>>, vector<1x8x16x128xf32>
    %389 = vector.shape_cast %388 : vector<1x8x16x128xf32> to vector<128x128xf32>
    %c4_454 = arith.constant 4 : index
    %c0_455 = arith.constant 0 : index
    %c0_456 = arith.constant 0 : index
    %390 = vector.load %arg4[%c4_454, %c0_455, %c0_456] : memref<9x128x128xf32, #tpu.memory_space<vmem>>, vector<1x128x128xf32>
    %391 = vector.shape_cast %390 : vector<1x128x128xf32> to vector<128x128xf32>
    %cst_457 = arith.constant dense<0.000000e+00> : vector<128x128xf32>
    %392 = tpu.matmul %389, %391, %cst_457 {dimension_numbers = #tpu.dot_dimension_numbers<[1], [0], [0], [1], [0, 0, 1, 1], [], []>} : vector<128x128xf32>, vector<128x128xf32>, vector<128x128xf32> -> vector<128x128xf32>
    %393 = arith.addf %387, %392 : vector<128x128xf32>
    %c0_458 = arith.constant 0 : index
    %c9_459 = arith.constant 9 : index
    %c2_460 = arith.constant 2 : index
    %c0_461 = arith.constant 0 : index
    %394 = vector.load %arg8[%c0_458, %c9_459, %c2_460, %c0_461] : memref<2x18x24x128xf32, #tpu.memory_space<vmem>>, vector<1x8x16x128xf32>
    %395 = vector.shape_cast %394 : vector<1x8x16x128xf32> to vector<128x128xf32>
    %c5_462 = arith.constant 5 : index
    %c0_463 = arith.constant 0 : index
    %c0_464 = arith.constant 0 : index
    %396 = vector.load %arg4[%c5_462, %c0_463, %c0_464] : memref<9x128x128xf32, #tpu.memory_space<vmem>>, vector<1x128x128xf32>
    %397 = vector.shape_cast %396 : vector<1x128x128xf32> to vector<128x128xf32>
    %cst_465 = arith.constant dense<0.000000e+00> : vector<128x128xf32>
    %398 = tpu.matmul %395, %397, %cst_465 {dimension_numbers = #tpu.dot_dimension_numbers<[1], [0], [0], [1], [0, 0, 1, 1], [], []>} : vector<128x128xf32>, vector<128x128xf32>, vector<128x128xf32> -> vector<128x128xf32>
    %399 = arith.addf %393, %398 : vector<128x128xf32>
    %c0_466 = arith.constant 0 : index
    %c10_467 = arith.constant 10 : index
    %c0_468 = arith.constant 0 : index
    %c0_469 = arith.constant 0 : index
    %400 = vector.load %arg8[%c0_466, %c10_467, %c0_468, %c0_469] : memref<2x18x24x128xf32, #tpu.memory_space<vmem>>, vector<1x8x16x128xf32>
    %401 = vector.shape_cast %400 : vector<1x8x16x128xf32> to vector<128x128xf32>
    %c6_470 = arith.constant 6 : index
    %c0_471 = arith.constant 0 : index
    %c0_472 = arith.constant 0 : index
    %402 = vector.load %arg4[%c6_470, %c0_471, %c0_472] : memref<9x128x128xf32, #tpu.memory_space<vmem>>, vector<1x128x128xf32>
    %403 = vector.shape_cast %402 : vector<1x128x128xf32> to vector<128x128xf32>
    %cst_473 = arith.constant dense<0.000000e+00> : vector<128x128xf32>
    %404 = tpu.matmul %401, %403, %cst_473 {dimension_numbers = #tpu.dot_dimension_numbers<[1], [0], [0], [1], [0, 0, 1, 1], [], []>} : vector<128x128xf32>, vector<128x128xf32>, vector<128x128xf32> -> vector<128x128xf32>
    %405 = arith.addf %399, %404 : vector<128x128xf32>
    %c0_474 = arith.constant 0 : index
    %c10_475 = arith.constant 10 : index
    %c1_476 = arith.constant 1 : index
    %c0_477 = arith.constant 0 : index
    %406 = vector.load %arg8[%c0_474, %c10_475, %c1_476, %c0_477] : memref<2x18x24x128xf32, #tpu.memory_space<vmem>>, vector<1x8x16x128xf32>
    %407 = vector.shape_cast %406 : vector<1x8x16x128xf32> to vector<128x128xf32>
    %c7_478 = arith.constant 7 : index
    %c0_479 = arith.constant 0 : index
    %c0_480 = arith.constant 0 : index
    %408 = vector.load %arg4[%c7_478, %c0_479, %c0_480] : memref<9x128x128xf32, #tpu.memory_space<vmem>>, vector<1x128x128xf32>
    %409 = vector.shape_cast %408 : vector<1x128x128xf32> to vector<128x128xf32>
    %cst_481 = arith.constant dense<0.000000e+00> : vector<128x128xf32>
    %410 = tpu.matmul %407, %409, %cst_481 {dimension_numbers = #tpu.dot_dimension_numbers<[1], [0], [0], [1], [0, 0, 1, 1], [], []>} : vector<128x128xf32>, vector<128x128xf32>, vector<128x128xf32> -> vector<128x128xf32>
    %411 = arith.addf %405, %410 : vector<128x128xf32>
    %c0_482 = arith.constant 0 : index
    %c10_483 = arith.constant 10 : index
    %c2_484 = arith.constant 2 : index
    %c0_485 = arith.constant 0 : index
    %412 = vector.load %arg8[%c0_482, %c10_483, %c2_484, %c0_485] : memref<2x18x24x128xf32, #tpu.memory_space<vmem>>, vector<1x8x16x128xf32>
    %413 = vector.shape_cast %412 : vector<1x8x16x128xf32> to vector<128x128xf32>
    %c8_486 = arith.constant 8 : index
    %c0_487 = arith.constant 0 : index
    %c0_488 = arith.constant 0 : index
    %414 = vector.load %arg4[%c8_486, %c0_487, %c0_488] : memref<9x128x128xf32, #tpu.memory_space<vmem>>, vector<1x128x128xf32>
    %415 = vector.shape_cast %414 : vector<1x128x128xf32> to vector<128x128xf32>
    %cst_489 = arith.constant dense<0.000000e+00> : vector<128x128xf32>
    %416 = tpu.matmul %413, %415, %cst_489 {dimension_numbers = #tpu.dot_dimension_numbers<[1], [0], [0], [1], [0, 0, 1, 1], [], []>} : vector<128x128xf32>, vector<128x128xf32>, vector<128x128xf32> -> vector<128x128xf32>
    %417 = arith.addf %411, %416 : vector<128x128xf32>
    %c128_490 = arith.constant 128 : index
    %c0_491 = arith.constant 0 : index
    %418 = vector.load %arg7[%c128_490, %c0_491] : memref<512x128xf32, #tpu.memory_space<vmem>>, vector<128x128xf32>
    tpu.vector_store %arg7[%c128_490, %c0_491], %417 {strides = array<i32>} : memref<512x128xf32, #tpu.memory_space<vmem>>, vector<128x128xf32>,
    %cst_492 = arith.constant dense<0.000000e+00> : vector<128xf32>
    %419 = vector.multi_reduction <add>, %417, %cst_492 [0] : vector<128x128xf32> to vector<128xf32>
    %420 = vector.shape_cast %419 : vector<128xf32> to vector<1x128xf32>
    %421 = arith.addf %360, %420 : vector<1x128xf32>
    %422 = arith.mulf %417, %417 : vector<128x128xf32>
    %cst_493 = arith.constant dense<0.000000e+00> : vector<128xf32>
    %423 = vector.multi_reduction <add>, %422, %cst_493 [0] : vector<128x128xf32> to vector<128xf32>
    %424 = vector.shape_cast %423 : vector<128xf32> to vector<1x128xf32>
    %425 = arith.addf %364, %424 : vector<1x128xf32>
    %c1_494 = arith.constant 1 : index
    %c0_495 = arith.constant 0 : index
    %c0_496 = arith.constant 0 : index
    %c0_497 = arith.constant 0 : index
    %426 = vector.load %arg8[%c1_494, %c0_495, %c0_496, %c0_497] : memref<2x18x24x128xf32, #tpu.memory_space<vmem>>, vector<1x8x16x128xf32>
    %427 = vector.shape_cast %426 : vector<1x8x16x128xf32> to vector<128x128xf32>
    %c0_498 = arith.constant 0 : index
    %c0_499 = arith.constant 0 : index
    %c0_500 = arith.constant 0 : index
    %428 = vector.load %arg4[%c0_498, %c0_499, %c0_500] : memref<9x128x128xf32, #tpu.memory_space<vmem>>, vector<1x128x128xf32>
    %429 = vector.shape_cast %428 : vector<1x128x128xf32> to vector<128x128xf32>
    %cst_501 = arith.constant dense<0.000000e+00> : vector<128x128xf32>
    %430 = tpu.matmul %427, %429, %cst_501 {dimension_numbers = #tpu.dot_dimension_numbers<[1], [0], [0], [1], [0, 0, 1, 1], [], []>} : vector<128x128xf32>, vector<128x128xf32>, vector<128x128xf32> -> vector<128x128xf32>
    %c1_502 = arith.constant 1 : index
    %c0_503 = arith.constant 0 : index
    %c1_504 = arith.constant 1 : index
    %c0_505 = arith.constant 0 : index
    %431 = vector.load %arg8[%c1_502, %c0_503, %c1_504, %c0_505] : memref<2x18x24x128xf32, #tpu.memory_space<vmem>>, vector<1x8x16x128xf32>
    %432 = vector.shape_cast %431 : vector<1x8x16x128xf32> to vector<128x128xf32>
    %c1_506 = arith.constant 1 : index
    %c0_507 = arith.constant 0 : index
    %c0_508 = arith.constant 0 : index
    %433 = vector.load %arg4[%c1_506, %c0_507, %c0_508] : memref<9x128x128xf32, #tpu.memory_space<vmem>>, vector<1x128x128xf32>
    %434 = vector.shape_cast %433 : vector<1x128x128xf32> to vector<128x128xf32>
    %cst_509 = arith.constant dense<0.000000e+00> : vector<128x128xf32>
    %435 = tpu.matmul %432, %434, %cst_509 {dimension_numbers = #tpu.dot_dimension_numbers<[1], [0], [0], [1], [0, 0, 1, 1], [], []>} : vector<128x128xf32>, vector<128x128xf32>, vector<128x128xf32> -> vector<128x128xf32>
    %436 = arith.addf %430, %435 : vector<128x128xf32>
    %c1_510 = arith.constant 1 : index
    %c0_511 = arith.constant 0 : index
    %c2_512 = arith.constant 2 : index
    %c0_513 = arith.constant 0 : index
    %437 = vector.load %arg8[%c1_510, %c0_511, %c2_512, %c0_513] : memref<2x18x24x128xf32, #tpu.memory_space<vmem>>, vector<1x8x16x128xf32>
    %438 = vector.shape_cast %437 : vector<1x8x16x128xf32> to vector<128x128xf32>
    %c2_514 = arith.constant 2 : index
    %c0_515 = arith.constant 0 : index
    %c0_516 = arith.constant 0 : index
    %439 = vector.load %arg4[%c2_514, %c0_515, %c0_516] : memref<9x128x128xf32, #tpu.memory_space<vmem>>, vector<1x128x128xf32>
    %440 = vector.shape_cast %439 : vector<1x128x128xf32> to vector<128x128xf32>
    %cst_517 = arith.constant dense<0.000000e+00> : vector<128x128xf32>
    %441 = tpu.matmul %438, %440, %cst_517 {dimension_numbers = #tpu.dot_dimension_numbers<[1], [0], [0], [1], [0, 0, 1, 1], [], []>} : vector<128x128xf32>, vector<128x128xf32>, vector<128x128xf32> -> vector<128x128xf32>
    %442 = arith.addf %436, %441 : vector<128x128xf32>
    %c1_518 = arith.constant 1 : index
    %c1_519 = arith.constant 1 : index
    %c0_520 = arith.constant 0 : index
    %c0_521 = arith.constant 0 : index
    %443 = vector.load %arg8[%c1_518, %c1_519, %c0_520, %c0_521] : memref<2x18x24x128xf32, #tpu.memory_space<vmem>>, vector<1x8x16x128xf32>
    %444 = vector.shape_cast %443 : vector<1x8x16x128xf32> to vector<128x128xf32>
    %c3_522 = arith.constant 3 : index
    %c0_523 = arith.constant 0 : index
    %c0_524 = arith.constant 0 : index
    %445 = vector.load %arg4[%c3_522, %c0_523, %c0_524] : memref<9x128x128xf32, #tpu.memory_space<vmem>>, vector<1x128x128xf32>
    %446 = vector.shape_cast %445 : vector<1x128x128xf32> to vector<128x128xf32>
    %cst_525 = arith.constant dense<0.000000e+00> : vector<128x128xf32>
    %447 = tpu.matmul %444, %446, %cst_525 {dimension_numbers = #tpu.dot_dimension_numbers<[1], [0], [0], [1], [0, 0, 1, 1], [], []>} : vector<128x128xf32>, vector<128x128xf32>, vector<128x128xf32> -> vector<128x128xf32>
    %448 = arith.addf %442, %447 : vector<128x128xf32>
    %c1_526 = arith.constant 1 : index
    %c1_527 = arith.constant 1 : index
    %c1_528 = arith.constant 1 : index
    %c0_529 = arith.constant 0 : index
    %449 = vector.load %arg8[%c1_526, %c1_527, %c1_528, %c0_529] : memref<2x18x24x128xf32, #tpu.memory_space<vmem>>, vector<1x8x16x128xf32>
    %450 = vector.shape_cast %449 : vector<1x8x16x128xf32> to vector<128x128xf32>
    %c4_530 = arith.constant 4 : index
    %c0_531 = arith.constant 0 : index
    %c0_532 = arith.constant 0 : index
    %451 = vector.load %arg4[%c4_530, %c0_531, %c0_532] : memref<9x128x128xf32, #tpu.memory_space<vmem>>, vector<1x128x128xf32>
    %452 = vector.shape_cast %451 : vector<1x128x128xf32> to vector<128x128xf32>
    %cst_533 = arith.constant dense<0.000000e+00> : vector<128x128xf32>
    %453 = tpu.matmul %450, %452, %cst_533 {dimension_numbers = #tpu.dot_dimension_numbers<[1], [0], [0], [1], [0, 0, 1, 1], [], []>} : vector<128x128xf32>, vector<128x128xf32>, vector<128x128xf32> -> vector<128x128xf32>
    %454 = arith.addf %448, %453 : vector<128x128xf32>
    %c1_534 = arith.constant 1 : index
    %c1_535 = arith.constant 1 : index
    %c2_536 = arith.constant 2 : index
    %c0_537 = arith.constant 0 : index
    %455 = vector.load %arg8[%c1_534, %c1_535, %c2_536, %c0_537] : memref<2x18x24x128xf32, #tpu.memory_space<vmem>>, vector<1x8x16x128xf32>
    %456 = vector.shape_cast %455 : vector<1x8x16x128xf32> to vector<128x128xf32>
    %c5_538 = arith.constant 5 : index
    %c0_539 = arith.constant 0 : index
    %c0_540 = arith.constant 0 : index
    %457 = vector.load %arg4[%c5_538, %c0_539, %c0_540] : memref<9x128x128xf32, #tpu.memory_space<vmem>>, vector<1x128x128xf32>
    %458 = vector.shape_cast %457 : vector<1x128x128xf32> to vector<128x128xf32>
    %cst_541 = arith.constant dense<0.000000e+00> : vector<128x128xf32>
    %459 = tpu.matmul %456, %458, %cst_541 {dimension_numbers = #tpu.dot_dimension_numbers<[1], [0], [0], [1], [0, 0, 1, 1], [], []>} : vector<128x128xf32>, vector<128x128xf32>, vector<128x128xf32> -> vector<128x128xf32>
    %460 = arith.addf %454, %459 : vector<128x128xf32>
    %c1_542 = arith.constant 1 : index
    %c2_543 = arith.constant 2 : index
    %c0_544 = arith.constant 0 : index
    %c0_545 = arith.constant 0 : index
    %461 = vector.load %arg8[%c1_542, %c2_543, %c0_544, %c0_545] : memref<2x18x24x128xf32, #tpu.memory_space<vmem>>, vector<1x8x16x128xf32>
    %462 = vector.shape_cast %461 : vector<1x8x16x128xf32> to vector<128x128xf32>
    %c6_546 = arith.constant 6 : index
    %c0_547 = arith.constant 0 : index
    %c0_548 = arith.constant 0 : index
    %463 = vector.load %arg4[%c6_546, %c0_547, %c0_548] : memref<9x128x128xf32, #tpu.memory_space<vmem>>, vector<1x128x128xf32>
    %464 = vector.shape_cast %463 : vector<1x128x128xf32> to vector<128x128xf32>
    %cst_549 = arith.constant dense<0.000000e+00> : vector<128x128xf32>
    %465 = tpu.matmul %462, %464, %cst_549 {dimension_numbers = #tpu.dot_dimension_numbers<[1], [0], [0], [1], [0, 0, 1, 1], [], []>} : vector<128x128xf32>, vector<128x128xf32>, vector<128x128xf32> -> vector<128x128xf32>
    %466 = arith.addf %460, %465 : vector<128x128xf32>
    %c1_550 = arith.constant 1 : index
    %c2_551 = arith.constant 2 : index
    %c1_552 = arith.constant 1 : index
    %c0_553 = arith.constant 0 : index
    %467 = vector.load %arg8[%c1_550, %c2_551, %c1_552, %c0_553] : memref<2x18x24x128xf32, #tpu.memory_space<vmem>>, vector<1x8x16x128xf32>
    %468 = vector.shape_cast %467 : vector<1x8x16x128xf32> to vector<128x128xf32>
    %c7_554 = arith.constant 7 : index
    %c0_555 = arith.constant 0 : index
    %c0_556 = arith.constant 0 : index
    %469 = vector.load %arg4[%c7_554, %c0_555, %c0_556] : memref<9x128x128xf32, #tpu.memory_space<vmem>>, vector<1x128x128xf32>
    %470 = vector.shape_cast %469 : vector<1x128x128xf32> to vector<128x128xf32>
    %cst_557 = arith.constant dense<0.000000e+00> : vector<128x128xf32>
    %471 = tpu.matmul %468, %470, %cst_557 {dimension_numbers = #tpu.dot_dimension_numbers<[1], [0], [0], [1], [0, 0, 1, 1], [], []>} : vector<128x128xf32>, vector<128x128xf32>, vector<128x128xf32> -> vector<128x128xf32>
    %472 = arith.addf %466, %471 : vector<128x128xf32>
    %c1_558 = arith.constant 1 : index
    %c2_559 = arith.constant 2 : index
    %c2_560 = arith.constant 2 : index
    %c0_561 = arith.constant 0 : index
    %473 = vector.load %arg8[%c1_558, %c2_559, %c2_560, %c0_561] : memref<2x18x24x128xf32, #tpu.memory_space<vmem>>, vector<1x8x16x128xf32>
    %474 = vector.shape_cast %473 : vector<1x8x16x128xf32> to vector<128x128xf32>
    %c8_562 = arith.constant 8 : index
    %c0_563 = arith.constant 0 : index
    %c0_564 = arith.constant 0 : index
    %475 = vector.load %arg4[%c8_562, %c0_563, %c0_564] : memref<9x128x128xf32, #tpu.memory_space<vmem>>, vector<1x128x128xf32>
    %476 = vector.shape_cast %475 : vector<1x128x128xf32> to vector<128x128xf32>
    %cst_565 = arith.constant dense<0.000000e+00> : vector<128x128xf32>
    %477 = tpu.matmul %474, %476, %cst_565 {dimension_numbers = #tpu.dot_dimension_numbers<[1], [0], [0], [1], [0, 0, 1, 1], [], []>} : vector<128x128xf32>, vector<128x128xf32>, vector<128x128xf32> -> vector<128x128xf32>
    %478 = arith.addf %472, %477 : vector<128x128xf32>
    %c256_566 = arith.constant 256 : index
    %c0_567 = arith.constant 0 : index
    %479 = vector.load %arg7[%c256_566, %c0_567] : memref<512x128xf32, #tpu.memory_space<vmem>>, vector<128x128xf32>
    tpu.vector_store %arg7[%c256_566, %c0_567], %478 {strides = array<i32>} : memref<512x128xf32, #tpu.memory_space<vmem>>, vector<128x128xf32>,
    %cst_568 = arith.constant dense<0.000000e+00> : vector<128xf32>
    %480 = vector.multi_reduction <add>, %478, %cst_568 [0] : vector<128x128xf32> to vector<128xf32>
    %481 = vector.shape_cast %480 : vector<128xf32> to vector<1x128xf32>
    %482 = arith.addf %421, %481 : vector<1x128xf32>
    %483 = arith.mulf %478, %478 : vector<128x128xf32>
    %cst_569 = arith.constant dense<0.000000e+00> : vector<128xf32>
    %484 = vector.multi_reduction <add>, %483, %cst_569 [0] : vector<128x128xf32> to vector<128xf32>
    %485 = vector.shape_cast %484 : vector<128xf32> to vector<1x128xf32>
    %486 = arith.addf %425, %485 : vector<1x128xf32>
    %c1_570 = arith.constant 1 : index
    %c8_571 = arith.constant 8 : index
    %c0_572 = arith.constant 0 : index
    %c0_573 = arith.constant 0 : index
    %487 = vector.load %arg8[%c1_570, %c8_571, %c0_572, %c0_573] : memref<2x18x24x128xf32, #tpu.memory_space<vmem>>, vector<1x8x16x128xf32>
    %488 = vector.shape_cast %487 : vector<1x8x16x128xf32> to vector<128x128xf32>
    %c0_574 = arith.constant 0 : index
    %c0_575 = arith.constant 0 : index
    %c0_576 = arith.constant 0 : index
    %489 = vector.load %arg4[%c0_574, %c0_575, %c0_576] : memref<9x128x128xf32, #tpu.memory_space<vmem>>, vector<1x128x128xf32>
    %490 = vector.shape_cast %489 : vector<1x128x128xf32> to vector<128x128xf32>
    %cst_577 = arith.constant dense<0.000000e+00> : vector<128x128xf32>
    %491 = tpu.matmul %488, %490, %cst_577 {dimension_numbers = #tpu.dot_dimension_numbers<[1], [0], [0], [1], [0, 0, 1, 1], [], []>} : vector<128x128xf32>, vector<128x128xf32>, vector<128x128xf32> -> vector<128x128xf32>
    %c1_578 = arith.constant 1 : index
    %c8_579 = arith.constant 8 : index
    %c1_580 = arith.constant 1 : index
    %c0_581 = arith.constant 0 : index
    %492 = vector.load %arg8[%c1_578, %c8_579, %c1_580, %c0_581] : memref<2x18x24x128xf32, #tpu.memory_space<vmem>>, vector<1x8x16x128xf32>
    %493 = vector.shape_cast %492 : vector<1x8x16x128xf32> to vector<128x128xf32>
    %c1_582 = arith.constant 1 : index
    %c0_583 = arith.constant 0 : index
    %c0_584 = arith.constant 0 : index
    %494 = vector.load %arg4[%c1_582, %c0_583, %c0_584] : memref<9x128x128xf32, #tpu.memory_space<vmem>>, vector<1x128x128xf32>
    %495 = vector.shape_cast %494 : vector<1x128x128xf32> to vector<128x128xf32>
    %cst_585 = arith.constant dense<0.000000e+00> : vector<128x128xf32>
    %496 = tpu.matmul %493, %495, %cst_585 {dimension_numbers = #tpu.dot_dimension_numbers<[1], [0], [0], [1], [0, 0, 1, 1], [], []>} : vector<128x128xf32>, vector<128x128xf32>, vector<128x128xf32> -> vector<128x128xf32>
    %497 = arith.addf %491, %496 : vector<128x128xf32>
    %c1_586 = arith.constant 1 : index
    %c8_587 = arith.constant 8 : index
    %c2_588 = arith.constant 2 : index
    %c0_589 = arith.constant 0 : index
    %498 = vector.load %arg8[%c1_586, %c8_587, %c2_588, %c0_589] : memref<2x18x24x128xf32, #tpu.memory_space<vmem>>, vector<1x8x16x128xf32>
    %499 = vector.shape_cast %498 : vector<1x8x16x128xf32> to vector<128x128xf32>
    %c2_590 = arith.constant 2 : index
    %c0_591 = arith.constant 0 : index
    %c0_592 = arith.constant 0 : index
    %500 = vector.load %arg4[%c2_590, %c0_591, %c0_592] : memref<9x128x128xf32, #tpu.memory_space<vmem>>, vector<1x128x128xf32>
    %501 = vector.shape_cast %500 : vector<1x128x128xf32> to vector<128x128xf32>
    %cst_593 = arith.constant dense<0.000000e+00> : vector<128x128xf32>
    %502 = tpu.matmul %499, %501, %cst_593 {dimension_numbers = #tpu.dot_dimension_numbers<[1], [0], [0], [1], [0, 0, 1, 1], [], []>} : vector<128x128xf32>, vector<128x128xf32>, vector<128x128xf32> -> vector<128x128xf32>
    %503 = arith.addf %497, %502 : vector<128x128xf32>
    %c1_594 = arith.constant 1 : index
    %c9_595 = arith.constant 9 : index
    %c0_596 = arith.constant 0 : index
    %c0_597 = arith.constant 0 : index
    %504 = vector.load %arg8[%c1_594, %c9_595, %c0_596, %c0_597] : memref<2x18x24x128xf32, #tpu.memory_space<vmem>>, vector<1x8x16x128xf32>
    %505 = vector.shape_cast %504 : vector<1x8x16x128xf32> to vector<128x128xf32>
    %c3_598 = arith.constant 3 : index
    %c0_599 = arith.constant 0 : index
    %c0_600 = arith.constant 0 : index
    %506 = vector.load %arg4[%c3_598, %c0_599, %c0_600] : memref<9x128x128xf32, #tpu.memory_space<vmem>>, vector<1x128x128xf32>
    %507 = vector.shape_cast %506 : vector<1x128x128xf32> to vector<128x128xf32>
    %cst_601 = arith.constant dense<0.000000e+00> : vector<128x128xf32>
    %508 = tpu.matmul %505, %507, %cst_601 {dimension_numbers = #tpu.dot_dimension_numbers<[1], [0], [0], [1], [0, 0, 1, 1], [], []>} : vector<128x128xf32>, vector<128x128xf32>, vector<128x128xf32> -> vector<128x128xf32>
    %509 = arith.addf %503, %508 : vector<128x128xf32>
    %c1_602 = arith.constant 1 : index
    %c9_603 = arith.constant 9 : index
    %c1_604 = arith.constant 1 : index
    %c0_605 = arith.constant 0 : index
    %510 = vector.load %arg8[%c1_602, %c9_603, %c1_604, %c0_605] : memref<2x18x24x128xf32, #tpu.memory_space<vmem>>, vector<1x8x16x128xf32>
    %511 = vector.shape_cast %510 : vector<1x8x16x128xf32> to vector<128x128xf32>
    %c4_606 = arith.constant 4 : index
    %c0_607 = arith.constant 0 : index
    %c0_608 = arith.constant 0 : index
    %512 = vector.load %arg4[%c4_606, %c0_607, %c0_608] : memref<9x128x128xf32, #tpu.memory_space<vmem>>, vector<1x128x128xf32>
    %513 = vector.shape_cast %512 : vector<1x128x128xf32> to vector<128x128xf32>
    %cst_609 = arith.constant dense<0.000000e+00> : vector<128x128xf32>
    %514 = tpu.matmul %511, %513, %cst_609 {dimension_numbers = #tpu.dot_dimension_numbers<[1], [0], [0], [1], [0, 0, 1, 1], [], []>} : vector<128x128xf32>, vector<128x128xf32>, vector<128x128xf32> -> vector<128x128xf32>
    %515 = arith.addf %509, %514 : vector<128x128xf32>
    %c1_610 = arith.constant 1 : index
    %c9_611 = arith.constant 9 : index
    %c2_612 = arith.constant 2 : index
    %c0_613 = arith.constant 0 : index
    %516 = vector.load %arg8[%c1_610, %c9_611, %c2_612, %c0_613] : memref<2x18x24x128xf32, #tpu.memory_space<vmem>>, vector<1x8x16x128xf32>
    %517 = vector.shape_cast %516 : vector<1x8x16x128xf32> to vector<128x128xf32>
    %c5_614 = arith.constant 5 : index
    %c0_615 = arith.constant 0 : index
    %c0_616 = arith.constant 0 : index
    %518 = vector.load %arg4[%c5_614, %c0_615, %c0_616] : memref<9x128x128xf32, #tpu.memory_space<vmem>>, vector<1x128x128xf32>
    %519 = vector.shape_cast %518 : vector<1x128x128xf32> to vector<128x128xf32>
    %cst_617 = arith.constant dense<0.000000e+00> : vector<128x128xf32>
    %520 = tpu.matmul %517, %519, %cst_617 {dimension_numbers = #tpu.dot_dimension_numbers<[1], [0], [0], [1], [0, 0, 1, 1], [], []>} : vector<128x128xf32>, vector<128x128xf32>, vector<128x128xf32> -> vector<128x128xf32>
    %521 = arith.addf %515, %520 : vector<128x128xf32>
    %c1_618 = arith.constant 1 : index
    %c10_619 = arith.constant 10 : index
    %c0_620 = arith.constant 0 : index
    %c0_621 = arith.constant 0 : index
    %522 = vector.load %arg8[%c1_618, %c10_619, %c0_620, %c0_621] : memref<2x18x24x128xf32, #tpu.memory_space<vmem>>, vector<1x8x16x128xf32>
    %523 = vector.shape_cast %522 : vector<1x8x16x128xf32> to vector<128x128xf32>
    %c6_622 = arith.constant 6 : index
    %c0_623 = arith.constant 0 : index
    %c0_624 = arith.constant 0 : index
    %524 = vector.load %arg4[%c6_622, %c0_623, %c0_624] : memref<9x128x128xf32, #tpu.memory_space<vmem>>, vector<1x128x128xf32>
    %525 = vector.shape_cast %524 : vector<1x128x128xf32> to vector<128x128xf32>
    %cst_625 = arith.constant dense<0.000000e+00> : vector<128x128xf32>
    %526 = tpu.matmul %523, %525, %cst_625 {dimension_numbers = #tpu.dot_dimension_numbers<[1], [0], [0], [1], [0, 0, 1, 1], [], []>} : vector<128x128xf32>, vector<128x128xf32>, vector<128x128xf32> -> vector<128x128xf32>
    %527 = arith.addf %521, %526 : vector<128x128xf32>
    %c1_626 = arith.constant 1 : index
    %c10_627 = arith.constant 10 : index
    %c1_628 = arith.constant 1 : index
    %c0_629 = arith.constant 0 : index
    %528 = vector.load %arg8[%c1_626, %c10_627, %c1_628, %c0_629] : memref<2x18x24x128xf32, #tpu.memory_space<vmem>>, vector<1x8x16x128xf32>
    %529 = vector.shape_cast %528 : vector<1x8x16x128xf32> to vector<128x128xf32>
    %c7_630 = arith.constant 7 : index
    %c0_631 = arith.constant 0 : index
    %c0_632 = arith.constant 0 : index
    %530 = vector.load %arg4[%c7_630, %c0_631, %c0_632] : memref<9x128x128xf32, #tpu.memory_space<vmem>>, vector<1x128x128xf32>
    %531 = vector.shape_cast %530 : vector<1x128x128xf32> to vector<128x128xf32>
    %cst_633 = arith.constant dense<0.000000e+00> : vector<128x128xf32>
    %532 = tpu.matmul %529, %531, %cst_633 {dimension_numbers = #tpu.dot_dimension_numbers<[1], [0], [0], [1], [0, 0, 1, 1], [], []>} : vector<128x128xf32>, vector<128x128xf32>, vector<128x128xf32> -> vector<128x128xf32>
    %533 = arith.addf %527, %532 : vector<128x128xf32>
    %c1_634 = arith.constant 1 : index
    %c10_635 = arith.constant 10 : index
    %c2_636 = arith.constant 2 : index
    %c0_637 = arith.constant 0 : index
    %534 = vector.load %arg8[%c1_634, %c10_635, %c2_636, %c0_637] : memref<2x18x24x128xf32, #tpu.memory_space<vmem>>, vector<1x8x16x128xf32>
    %535 = vector.shape_cast %534 : vector<1x8x16x128xf32> to vector<128x128xf32>
    %c8_638 = arith.constant 8 : index
    %c0_639 = arith.constant 0 : index
    %c0_640 = arith.constant 0 : index
    %536 = vector.load %arg4[%c8_638, %c0_639, %c0_640] : memref<9x128x128xf32, #tpu.memory_space<vmem>>, vector<1x128x128xf32>
    %537 = vector.shape_cast %536 : vector<1x128x128xf32> to vector<128x128xf32>
    %cst_641 = arith.constant dense<0.000000e+00> : vector<128x128xf32>
    %538 = tpu.matmul %535, %537, %cst_641 {dimension_numbers = #tpu.dot_dimension_numbers<[1], [0], [0], [1], [0, 0, 1, 1], [], []>} : vector<128x128xf32>, vector<128x128xf32>, vector<128x128xf32> -> vector<128x128xf32>
    %539 = arith.addf %533, %538 : vector<128x128xf32>
    %c384_642 = arith.constant 384 : index
    %c0_643 = arith.constant 0 : index
    %540 = vector.load %arg7[%c384_642, %c0_643] : memref<512x128xf32, #tpu.memory_space<vmem>>, vector<128x128xf32>
    tpu.vector_store %arg7[%c384_642, %c0_643], %539 {strides = array<i32>} : memref<512x128xf32, #tpu.memory_space<vmem>>, vector<128x128xf32>,
    %cst_644 = arith.constant dense<0.000000e+00> : vector<128xf32>
    %541 = vector.multi_reduction <add>, %539, %cst_644 [0] : vector<128x128xf32> to vector<128xf32>
    %542 = vector.shape_cast %541 : vector<128xf32> to vector<1x128xf32>
    %543 = arith.addf %482, %542 : vector<1x128xf32>
    %544 = arith.mulf %539, %539 : vector<128x128xf32>
    %cst_645 = arith.constant dense<0.000000e+00> : vector<128xf32>
    %545 = vector.multi_reduction <add>, %544, %cst_645 [0] : vector<128x128xf32> to vector<128xf32>
    %546 = vector.shape_cast %545 : vector<128xf32> to vector<1x128xf32>
    %547 = arith.addf %486, %546 : vector<1x128xf32>
    %c0_646 = arith.constant 0 : index
    %c0_647 = arith.constant 0 : index
    %548 = vector.load %arg5[%c0_646, %c0_647] : memref<1x128xf32, #tpu.memory_space<vmem>>, vector<1x128xf32>
    %c0_648 = arith.constant 0 : index
    %c0_649 = arith.constant 0 : index
    %549 = vector.load %arg6[%c0_648, %c0_649] : memref<1x128xf32, #tpu.memory_space<vmem>>, vector<1x128xf32>
    %cst_650 = arith.constant 0.001953125 : f32
    %550 = vector.broadcast %cst_650 : f32 to vector<1x128xf32>
    %551 = arith.mulf %543, %550 : vector<1x128xf32>
    %cst_651 = arith.constant 0.001953125 : f32
    %552 = vector.broadcast %cst_651 : f32 to vector<1x128xf32>
    %553 = arith.mulf %547, %552 : vector<1x128xf32>
    %554 = arith.mulf %551, %551 : vector<1x128xf32>
    %555 = arith.subf %553, %554 : vector<1x128xf32>
    %cst_652 = arith.constant 0.000000e+00 : f32
    %556 = vector.broadcast %cst_652 : f32 to vector<1x128xf32>
    %557 = arith.maximumf %555, %556 : vector<1x128xf32>
    %cst_653 = arith.constant 9.99999974E-6 : f32
    %558 = vector.broadcast %cst_653 : f32 to vector<1x128xf32>
    %559 = arith.addf %557, %558 : vector<1x128xf32>
    %560 = math.rsqrt %559 : vector<1x128xf32>
    %561 = arith.mulf %560, %548 : vector<1x128xf32>
    %562 = arith.mulf %551, %561 : vector<1x128xf32>
    %563 = arith.subf %549, %562 : vector<1x128xf32>
    %c0_654 = arith.constant 0 : index
    %c0_655 = arith.constant 0 : index
    %564 = vector.load %arg7[%c0_654, %c0_655] : memref<512x128xf32, #tpu.memory_space<vmem>>, vector<128x128xf32>
    %565 = vector.broadcast %561 : vector<1x128xf32> to vector<128x128xf32>
    %566 = arith.mulf %564, %565 : vector<128x128xf32>
    %567 = vector.broadcast %563 : vector<1x128xf32> to vector<128x128xf32>
    %568 = arith.addf %566, %567 : vector<128x128xf32>
    %cst_656 = arith.constant 0.000000e+00 : f32
    %569 = vector.broadcast %cst_656 : f32 to vector<128x128xf32>
    %570 = arith.maximumf %568, %569 : vector<128x128xf32>
    %c0_657 = arith.constant 0 : index
    %c0_658 = arith.constant 0 : index
    %571 = vector.load %arg7[%c0_657, %c0_658] : memref<512x128xf32, #tpu.memory_space<vmem>>, vector<128x128xf32>
    tpu.vector_store %arg7[%c0_657, %c0_658], %570 {strides = array<i32>} : memref<512x128xf32, #tpu.memory_space<vmem>>, vector<128x128xf32>,
    %c128_659 = arith.constant 128 : index
    %c0_660 = arith.constant 0 : index
    %572 = vector.load %arg7[%c128_659, %c0_660] : memref<512x128xf32, #tpu.memory_space<vmem>>, vector<128x128xf32>
    %573 = vector.broadcast %561 : vector<1x128xf32> to vector<128x128xf32>
    %574 = arith.mulf %572, %573 : vector<128x128xf32>
    %575 = vector.broadcast %563 : vector<1x128xf32> to vector<128x128xf32>
    %576 = arith.addf %574, %575 : vector<128x128xf32>
    %cst_661 = arith.constant 0.000000e+00 : f32
    %577 = vector.broadcast %cst_661 : f32 to vector<128x128xf32>
    %578 = arith.maximumf %576, %577 : vector<128x128xf32>
    %c128_662 = arith.constant 128 : index
    %c0_663 = arith.constant 0 : index
    %579 = vector.load %arg7[%c128_662, %c0_663] : memref<512x128xf32, #tpu.memory_space<vmem>>, vector<128x128xf32>
    tpu.vector_store %arg7[%c128_662, %c0_663], %578 {strides = array<i32>} : memref<512x128xf32, #tpu.memory_space<vmem>>, vector<128x128xf32>,
    %c256_664 = arith.constant 256 : index
    %c0_665 = arith.constant 0 : index
    %580 = vector.load %arg7[%c256_664, %c0_665] : memref<512x128xf32, #tpu.memory_space<vmem>>, vector<128x128xf32>
    %581 = vector.broadcast %561 : vector<1x128xf32> to vector<128x128xf32>
    %582 = arith.mulf %580, %581 : vector<128x128xf32>
    %583 = vector.broadcast %563 : vector<1x128xf32> to vector<128x128xf32>
    %584 = arith.addf %582, %583 : vector<128x128xf32>
    %cst_666 = arith.constant 0.000000e+00 : f32
    %585 = vector.broadcast %cst_666 : f32 to vector<128x128xf32>
    %586 = arith.maximumf %584, %585 : vector<128x128xf32>
    %c256_667 = arith.constant 256 : index
    %c0_668 = arith.constant 0 : index
    %587 = vector.load %arg7[%c256_667, %c0_668] : memref<512x128xf32, #tpu.memory_space<vmem>>, vector<128x128xf32>
    tpu.vector_store %arg7[%c256_667, %c0_668], %586 {strides = array<i32>} : memref<512x128xf32, #tpu.memory_space<vmem>>, vector<128x128xf32>,
    %c384_669 = arith.constant 384 : index
    %c0_670 = arith.constant 0 : index
    %588 = vector.load %arg7[%c384_669, %c0_670] : memref<512x128xf32, #tpu.memory_space<vmem>>, vector<128x128xf32>
    %589 = vector.broadcast %561 : vector<1x128xf32> to vector<128x128xf32>
    %590 = arith.mulf %588, %589 : vector<128x128xf32>
    %591 = vector.broadcast %563 : vector<1x128xf32> to vector<128x128xf32>
    %592 = arith.addf %590, %591 : vector<128x128xf32>
    %cst_671 = arith.constant 0.000000e+00 : f32
    %593 = vector.broadcast %cst_671 : f32 to vector<128x128xf32>
    %594 = arith.maximumf %592, %593 : vector<128x128xf32>
    %c384_672 = arith.constant 384 : index
    %c0_673 = arith.constant 0 : index
    %595 = vector.load %arg7[%c384_672, %c0_673] : memref<512x128xf32, #tpu.memory_space<vmem>>, vector<128x128xf32>
    tpu.vector_store %arg7[%c384_672, %c0_673], %594 {strides = array<i32>} : memref<512x128xf32, #tpu.memory_space<vmem>>, vector<128x128xf32>,
    return
  }
}

</mosaic_0001>

<bundles_post_ra>
// kernel: vgg_block_forward.1
= control target key start
LH: loop header
LB: loop body
LE: loop exit
PB: predicated region body
PF: predicated region fallthrough
CT: control target
= control target key end

     0   :  { %v25924_v3 = vmov 0.0   ;;  %vm199_vm0 = vcmask 31744   ;;  %s31000_s1 = inlined_call_operand.vmem [shape: f32[9,128,128], index: 1, kind: input, shape index: {}]   ;;  %s31001_s0 = inlined_call_operand.vmem [shape: f32[2,16,16,4], index: 0, kind: input, shape index: {}]   ;;  %s31002_s4 = inlined_call_operand.vmem [shape: f32[9,128,128], index: 4, kind: input, shape index: {}]   ;;  %s31003_s2 = inlined_call_operand.vmem [shape: f32[1,128], index: 2, kind: input, shape index: {}]   ;;  %s31004_s3 = inlined_call_operand.vmem [shape: f32[1,128], index: 3, kind: input, shape index: {}]   ;;  %s31005_s5 = inlined_call_operand.vmem [shape: f32[1,128], index: 5, kind: input, shape index: {}]   ;;  %s31006_s6 = inlined_call_operand.vmem [shape: f32[1,128], index: 6, kind: input, shape index: {}]   ;;  %s31007_s7 = inlined_call_operand.vmem [shape: f32[512,128], index: 7, kind: output, shape index: {}]  }
   0x1   :  { %v25968_v0 = vld [vmem:[%s31000_s1 + $0x80] sm:$0xff]  ;;  %v25973_v1 = vld [vmem:[%s31000_s1 + $0x88] sm:$0xff]  ;;  %v25978_v2 = vld [vmem:[%s31000_s1 + $0x90] sm:$0xff]  ;;  %26 = vst [vmem:[#allocation2] sm:$0xff] %v25924_v3 }
   0x2   :  { %27 = vst [vmem:[#allocation2 + $0x8] sm:$0xff] %v25924_v3  ;;  %28 = vst [vmem:[#allocation2 + $0x10] sm:$0xff] %v25924_v3  ;;  %v22586_v4 = vpack.c.bf16 %v25973_v1, %v25968_v0  ;;  %v15229_v5 = vld [vmem:[%s31000_s1 + $0x98] sm:$0xff]  ;;  %v15230_v7 = vld [vmem:[%s31000_s1 + $0xa0] sm:$0xff] }
   0x3   :  { %29 = vst [vmem:[#allocation2 + $0x18] sm:$0xff] %v25924_v3  ;;  %30 = vst [vmem:[#allocation2 + $0x20] sm:$0xff] %v25924_v3  ;;  %v22590_v6 = vpack.c.bf16 %v15229_v5, %v25978_v2  ;;  %v15231_v8 = vld [vmem:[%s31000_s1 + $0xa8] sm:$0xff]  ;;  %v15232_v10 = vld [vmem:[%s31000_s1 + $0xb0] sm:$0xff] }
   0x4   :  { %31 = vst [vmem:[#allocation2 + $0x28] sm:$0xff] %v25924_v3  ;;  %32 = vst [vmem:[#allocation2 + $0x30] sm:$0xff] %v25924_v3  ;;  %22587 = vmatprep.subr.bf16.mxu0 %v22586_v4  ;;  %22875 = vmatprep.subr.bf16.mxu1 %v22586_v4  ;;  %v22594_v9 = vpack.c.bf16 %v15231_v8, %v15230_v7  ;;  %v148_v11 = vld [vmem:[%s31001_s0 + $0x70] sm:$0xff]  ;;  %v15233_v12 = vld [vmem:[%s31000_s1 + $0xb8] sm:$0xff] }
   0x5   :  { %33 = vst [vmem:[#allocation2 + $0x38] sm:$0xff] %v25924_v3  ;;  %34 = vst [vmem:[#allocation2 + $0x40] sm:$0xff] %v25924_v3  ;;  %22589 = vmatpush3.bf16.msra.mxu0 %v22586_v4  ;;  %22877 = vmatpush3.bf16.msra.mxu1 %v22586_v4  ;;  %v149_v13 = vld [vmem:[%s31001_s0 + $0x78] sm:$0xff]  ;;  %v134_v14 = vld [vmem:[%s31001_s0] sm:$0xff]  ;;  %v22598_v18 = vpack.c.bf16 %v15233_v12, %v15232_v10 }
   0x6   :  { %35 = vst [vmem:[#allocation2 + $0x48] sm:$0xff] %v25924_v3  ;;  %36 = vst [vmem:[#allocation2 + $0x50] sm:$0xff] %v25924_v3  ;;  %22591 = vmatprep.subr.bf16.mxu0 %v22590_v6  ;;  %22879 = vmatprep.subr.bf16.mxu1 %v22590_v6  ;;  %v150_v16 = vld [vmem:[%s31001_s0 + $0x80] sm:$0xff]  ;;  %v135_v17 = vld [vmem:[%s31001_s0 + $0x8] sm:$0xff] }
   0x7   :  { %37 = vst [vmem:[#allocation2 + $0x58] sm:$0xff] %v25924_v3  ;;  %38 = vst [vmem:[#allocation2 + $0x60] sm:$0xff] %v25924_v3  ;;  %v151_v19 = vld [vmem:[%s31001_s0 + $0x88] sm:$0xff]  ;;  %v136_v20 = vld [vmem:[%s31001_s0 + $0x10] sm:$0xff] }
   0x8   :  { %39 = vst [vmem:[#allocation2 + $0x68] sm:$0xff] %v25924_v3  ;;  %40 = vst [vmem:[#allocation2 + $0x70] sm:$0xff] %v25924_v3  ;;  %v152_v21 = vld [vmem:[%s31001_s0 + $0x90] sm:$0xff]  ;;  %v15234_v22 = vld [vmem:[%s31000_s1 + $0xc0] sm:$0xff] }
   0x9   :  { %41 = vst [vmem:[#allocation2 + $0x78] sm:$0xff] %v25924_v3  ;;  %42 = vst [vmem:[#allocation2 + $0x80] sm:$0xff] %v25924_v3  ;;  %v296_v15 = vld [vmem:[#allocation2 + $0x1] sm:$0xff]  ;;  %22593 = vmatpush3.bf16.msra.mxu0 %v22590_v6  ;;  %22881 = vmatpush3.bf16.msra.mxu1 %v22590_v6  ;;  %v137_v24 = vld [vmem:[%s31001_s0 + $0x18] sm:$0xff] }
   0xa   :  { %43 = vst [vmem:[#allocation2 + $0x88] sm:$0xff] %v25924_v3  ;;  %44 = vst [vmem:[#allocation2 + $0x90] sm:$0xff] %v25924_v3  ;;  %22595 = vmatprep.subr.bf16.mxu0 %v22594_v9  ;;  %22883 = vmatprep.subr.bf16.mxu1 %v22594_v9  ;;  %v15235_v23 = vld [vmem:[%s31000_s1 + $0xc8] sm:$0xff]  ;;  %v153_v25 = vld [vmem:[%s31001_s0 + $0x98] sm:$0xff] }
   0xb   :  { %45 = vst [vmem:[#allocation2 + $0x98] sm:$0xff] %v25924_v3  ;;  %46 = vst [vmem:[#allocation2 + $0xa0] sm:$0xff] %v25924_v3  ;;  %18586 = vmatprep.mubr.f32.mxu0 %v296_v15  ;;  %v138_v26 = vld [vmem:[%s31001_s0 + $0x20] sm:$0xff]  ;;  %v139_v28 = vld [vmem:[%s31001_s0 + $0x28] sm:$0xff]  ;;  %v22602_v29 = vpack.c.bf16 %v15235_v23, %v15234_v22 }
   0xc   :  { %47 = vst [vmem:[#allocation2 + $0xa8] sm:$0xff] %v25924_v3  ;;  %48 = vst [vmem:[#allocation2 + $0xb0] sm:$0xff] %v25924_v3  ;;  %v154_v27 = vld [vmem:[%s31001_s0 + $0xa0] sm:$0xff]  ;;  %v155_v31 = vld [vmem:[%s31001_s0 + $0xa8] sm:$0xff] }
   0xd   :  { %49 = vst [vmem:[#allocation2 + $0xb8] sm:$0xff] %v25924_v3  ;;  %50 = vst [vmem:[#allocation2 + $0xc0] sm:$0xff] %v25924_v3  ;;  %22597 = vmatpush3.bf16.msra.mxu0 %v22594_v9  ;;  %22885 = vmatpush3.bf16.msra.mxu1 %v22594_v9  ;;  %v140_v32 = vld [vmem:[%s31001_s0 + $0x30] sm:$0xff]  ;;  %v15237_v34 = vld [vmem:[%s31000_s1 + $0xd8] sm:$0xff] }
   0xe   :  { %51 = vst [vmem:[#allocation2 + $0xc8] sm:$0xff] %v25924_v3  ;;  %52 = vst [vmem:[#allocation2 + $0xd0] sm:$0xff] %v25924_v3  ;;  %22599 = vmatprep.subr.bf16.mxu0 %v22598_v18  ;;  %22887 = vmatprep.subr.bf16.mxu1 %v22598_v18  ;;  %v15236_v33 = vld [vmem:[%s31000_s1 + $0xd0] sm:$0xff]  ;;  %v141_v36 = vld [vmem:[%s31001_s0 + $0x38] sm:$0xff] }
   0xf   :  { %53 = vst [vmem:[#allocation2 + $0xd8] sm:$0xff] %v25924_v3  ;;  %54 = vst [vmem:[#allocation2 + $0xe0] sm:$0xff] %v25924_v3  ;;  %v156_v35 = vld [vmem:[%s31001_s0 + $0xb0] sm:$0xff]  ;;  %v157_v37 = vld [vmem:[%s31001_s0 + $0xb8] sm:$0xff]  ;;  %v22606_v38 = vpack.c.bf16 %v15237_v34, %v15236_v33 }
  0x10   :  { %55 = vst [vmem:[#allocation2 + $0xe8] sm:$0xff] %v25924_v3  ;;  %56 = vst [vmem:[#allocation2 + $0xf0] sm:$0xff] %v25924_v3  ;;  %v15238_v39 = vld [vmem:[%s31000_s1 + $0xe0] sm:$0xff]  ;;  %v15239_v40 = vld [vmem:[%s31000_s1 + $0xe8] sm:$0xff] }
  0x11   :  { %57 = vst [vmem:[#allocation2 + $0xf8] sm:$0xff] %v25924_v3  ;;  %58 = vst [vmem:[#allocation2 + $0x100] sm:$0xff] %v25924_v3  ;;  %22601 = vmatpush3.bf16.msra.mxu0 %v22598_v18  ;;  %22889 = vmatpush3.bf16.msra.mxu1 %v22598_v18  ;;  %v142_v41 = vld [vmem:[%s31001_s0 + $0x40] sm:$0xff]  ;;  %v143_v43 = vld [vmem:[%s31001_s0 + $0x48] sm:$0xff]  ;;  %v22610_v44 = vpack.c.bf16 %v15239_v40, %v15238_v39 }
  0x12   :  { %59 = vst [vmem:[#allocation2 + $0x108] sm:$0xff] %v25924_v3  ;;  %60 = vst [vmem:[#allocation2 + $0x110] sm:$0xff] %v25924_v3  ;;  %22603 = vmatprep.subr.bf16.mxu0 %v22602_v29  ;;  %22891 = vmatprep.subr.bf16.mxu1 %v22602_v29  ;;  %v158_v42 = vld [vmem:[%s31001_s0 + $0xc0] sm:$0xff]  ;;  %v15240_v45 = vld [vmem:[%s31000_s1 + $0xf0] sm:$0xff] }
  0x13   :  { %61 = vst [vmem:[#allocation2 + $0x118] sm:$0xff] %v25924_v3  ;;  %62 = vst [vmem:[#allocation2 + $0x120] sm:$0xff] %v25924_v3  ;;  %v15241_v46 = vld [vmem:[%s31000_s1 + $0xf8] sm:$0xff]  ;;  %v159_v47 = vld [vmem:[%s31001_s0 + $0xc8] sm:$0xff] }
  0x14   :  { %63 = vst [vmem:[#allocation2 + $0x128] sm:$0xff] %v25924_v3  ;;  %64 = vst [vmem:[#allocation2 + $0x130] sm:$0xff] %v25924_v3  ;;  %v144_v48 = vld [vmem:[%s31001_s0 + $0x50] sm:$0xff]  ;;  %v145_v50 = vld [vmem:[%s31001_s0 + $0x58] sm:$0xff]  ;;  %v22614_v51 = vpack.c.bf16 %v15241_v46, %v15240_v45 }
  0x15   :  { %65 = vst [vmem:[#allocation2 + $0x138] sm:$0xff] %v25924_v3  ;;  %66 = vst [vmem:[#allocation2 + $0x140] sm:$0xff] %v25924_v3  ;;  %22605 = vmatpush3.bf16.msra.mxu0 %v22602_v29  ;;  %22893 = vmatpush3.bf16.msra.mxu1 %v22602_v29  ;;  %v160_v49 = vld [vmem:[%s31001_s0 + $0xd0] sm:$0xff]  ;;  %v161_v52 = vld [vmem:[%s31001_s0 + $0xd8] sm:$0xff] }
  0x16   :  { %67 = vst [vmem:[#allocation2 + $0x148] sm:$0xff] %v25924_v3  ;;  %68 = vst [vmem:[#allocation2 + $0x150] sm:$0xff] %v25924_v3  ;;  %22607 = vmatprep.subr.bf16.mxu0 %v22606_v38  ;;  %22895 = vmatprep.subr.bf16.mxu1 %v22606_v38  ;;  %v146_v53 = vld [vmem:[%s31001_s0 + $0x60] sm:$0xff]  ;;  %v281_v56 = vld [vmem:[%s31000_s1 + $0x8] sm:$0xff] }
  0x17   :  { %69 = vst [vmem:[#allocation2 + $0x158] sm:$0xff] %v25924_v3  ;;  %70 = vst [vmem:[#allocation2 + $0x160] sm:$0xff] %v25924_v3  ;;  %v162_v54 = vld [vmem:[%s31001_s0 + $0xe0] sm:$0xff]  ;;  %v147_v57 = vld [vmem:[%s31001_s0 + $0x68] sm:$0xff] }
  0x18   :  { %71 = vst [vmem:[#allocation2 + $0x168] sm:$0xff] %v25924_v3  ;;  %72 = vst [vmem:[#allocation2 + $0x170] sm:$0xff] %v25924_v3  ;;  %v280_v55 = vld [vmem:[%s31000_s1] sm:$0xff]  ;;  %v163_v58 = vld [vmem:[%s31001_s0 + $0xe8] sm:$0xff] }
  0x19   :  { %73 = vst [vmem:[#allocation2 + $0x178] sm:$0xff] %v25924_v3  ;;  %74 = vst [vmem:[#allocation2 + $0x180] sm:$0xff] %v25924_v3  ;;  %22609 = vmatpush3.bf16.msra.mxu0 %v22606_v38  ;;  %22897 = vmatpush3.bf16.msra.mxu1 %v22606_v38  ;;  %v22618_v59 = vpack.c.bf16 %v281_v56, %v280_v55  ;;  %v282_v60 = vld [vmem:[%s31000_s1 + $0x10] sm:$0xff]  ;;  %v283_v61 = vld [vmem:[%s31000_s1 + $0x18] sm:$0xff] }
  0x1a   :  { %75 = vst [vmem:[#allocation2 + $0x188] sm:$0xff] %v25924_v3  ;;  %76 = vst [vmem:[#allocation2 + $0x190] sm:$0xff] %v25924_v3  ;;  %22611 = vmatprep.subr.bf16.mxu0 %v22610_v44  ;;  %22899 = vmatprep.subr.bf16.mxu1 %v22610_v44  ;;  %v297_v62 = vld [vmem:[#allocation2 + $0x9] sm:$0xff]  ;;  %v22622_v2 = vpack.c.bf16 %v283_v61, %v282_v60  ;;  %v284_v4 = vld [vmem:[%s31000_s1 + $0x20] sm:$0xff] }
  0x1b   :  { %77 = vst [vmem:[#allocation2 + $0x198] sm:$0xff] %v25924_v3  ;;  %78 = vst [vmem:[#allocation2 + $0x1a0] sm:$0xff] %v25924_v3  ;;  %v285_v5 = vld [vmem:[%s31000_s1 + $0x28] sm:$0xff]  ;;  %v287_v12 = vld [vmem:[%s31000_s1 + $0x38] sm:$0xff] }
  0x1c   :  { %79 = vst [vmem:[#allocation2 + $0x1a8] sm:$0xff] %v25924_v3  ;;  %80 = vst [vmem:[#allocation2 + $0x1b0] sm:$0xff] %v25924_v3  ;;  %v22626_v10 = vpack.c.bf16 %v285_v5, %v284_v4  ;;  %v288_v18 = vld [vmem:[%s31000_s1 + $0x40] sm:$0xff]  ;;  %v293_v33 = vld [vmem:[%s31000_s1 + $0x68] sm:$0xff] }
  0x1d   :  { %81 = vst [vmem:[#allocation2 + $0x1b8] sm:$0xff] %v25924_v3  ;;  %82 = vst [vmem:[#allocation2 + $0x1c0] sm:$0xff] %v25924_v3  ;;  %22613 = vmatpush3.bf16.msra.mxu0 %v22610_v44  ;;  %22901 = vmatpush3.bf16.msra.mxu1 %v22610_v44  ;;  %v294_v39 = vld [vmem:[%s31000_s1 + $0x70] sm:$0xff]  ;;  %v295_v40 = vld [vmem:[%s31000_s1 + $0x78] sm:$0xff] }
  0x1e   :  { %83 = vst [vmem:[#allocation2 + $0x1c8] sm:$0xff] %v25924_v3  ;;  %84 = vst [vmem:[#allocation2 + $0x1d0] sm:$0xff] %v25924_v3  ;;  %22615 = vmatprep.subr.bf16.mxu0 %v22614_v51  ;;  %22903 = vmatprep.subr.bf16.mxu1 %v22614_v51  ;;  %v22646_v45 = vpack.c.bf16 %v295_v40, %v294_v39  ;;  %v15242_v46 = vld [vmem:[%s31000_s1 + $0x100] sm:$0xff]  ;;  %v164_v60 = vld [vmem:[%s31001_s0 + $0xf0] sm:$0xff] }
  0x1f   :  { %85 = vst [vmem:[#allocation2 + $0x1d8] sm:$0xff] %v25924_v3  ;;  %86 = vst [vmem:[#allocation2 + $0x1e0] sm:$0xff] %v25924_v3  ;;  %v15249_v4 = vld [vmem:[%s31000_s1 + $0x138] sm:$0xff]  ;;  %v15259_v39 = vld [vmem:[%s31000_s1 + $0x188] sm:$0xff] }
  0x20   :  { %87 = vst [vmem:[#allocation2 + $0x1e8] sm:$0xff] %v25924_v3  ;;  %88 = vst [vmem:[#allocation2 + $0x1f0] sm:$0xff] %v25924_v3 }
  0x21   :  { %89 = vst [vmem:[#allocation2 + $0x1f8] sm:$0xff] %v25924_v3  ;;  %90 = vst [vmem:[#allocation2 + $0x200] sm:$0xff] %v25924_v3  ;;  %22617 = vmatpush3.bf16.msra.mxu0 %v22614_v51  ;;  %22905 = vmatpush3.bf16.msra.mxu1 %v22614_v51 }
  0x22   :  { %91 = vst [vmem:[#allocation2 + $0x208] sm:$0xff] %v25924_v3  ;;  %92 = vst [vmem:[#allocation2 + $0x210] sm:$0xff] %v25924_v3  ;;  %22619 = vmatprep.subr.bf16.mxu0 %v22618_v59  ;;  %22907 = vmatprep.subr.bf16.mxu1 %v22618_v59 }
  0x23   :  { %93 = vst [vmem:[#allocation2 + $0x218] sm:$0xff] %v25924_v3  ;;  %94 = vst [vmem:[#allocation2 + $0x220] sm:$0xff] %v25924_v3 }
  0x24   :  { %95 = vst [vmem:[#allocation2 + $0x228] sm:$0xff] %v25924_v3  ;;  %96 = vst [vmem:[#allocation2 + $0x230] sm:$0xff] %v25924_v3  ;;  %18587 = vmatmul.mubr.f32.vlgmr.msra.gmra.mrb[0].mxu0 %v297_v62 }
  0x25   :  { %97 = vst [vmem:[#allocation2 + $0x238] sm:$0xff] %v25924_v3  ;;  %98 = vst [vmem:[#allocation2 + $0x240] sm:$0xff] %v25924_v3  ;;  %22621 = vmatpush3.bf16.msra.mxu0 %v22618_v59 }
  0x26   :  { %99 = vst [vmem:[#allocation2 + $0x248] sm:$0xff] %v25924_v3  ;;  %100 = vst [vmem:[#allocation2 + $0x250] sm:$0xff] %v25924_v3  ;;  %22623 = vmatprep.subr.bf16.mxu0 %v22622_v2 }
  0x27   :  { %101 = vst [vmem:[#allocation2 + $0x258] sm:$0xff] %v25924_v3  ;;  %102 = vst [vmem:[#allocation2 + $0x260] sm:$0xff] %v25924_v3 }
  0x28   :  { %103 = vst [vmem:[#allocation2 + $0x268] sm:$0xff] %v25924_v3  ;;  %104 = vst [vmem:[#allocation2 + $0x270] sm:$0xff] %v25924_v3 }
  0x29   :  { %105 = vst [vmem:[#allocation2 + $0x278] sm:$0xff] %v25924_v3  ;;  %106 = vst [vmem:[#allocation2 + $0x280] sm:$0xff] %v25924_v3  ;;  %22625 = vmatpush3.bf16.msra.mxu0 %v22622_v2 }
  0x2a   :  { %107 = vst [vmem:[#allocation2 + $0x288] sm:$0xff] %v25924_v3  ;;  %108 = vst [vmem:[#allocation2 + $0x290] sm:$0xff] %v25924_v3  ;;  %22627 = vmatprep.subr.bf16.mxu0 %v22626_v10 }
  0x2b   :  { %109 = vst [vmem:[#allocation2 + $0x298] sm:$0xff] %v25924_v3  ;;  %110 = vst [vmem:[#allocation2 + $0x2a0] sm:$0xff] %v25924_v3 }
  0x2c   :  { %111 = vst [vmem:[#allocation2 + $0x2a8] sm:$0xff] %v25924_v3  ;;  %112 = vst [vmem:[#allocation2 + $0x2b0] sm:$0xff] %v25924_v3 }
  0x2d   :  { %113 = vst [vmem:[#allocation2 + $0x2b8] sm:$0xff] %v25924_v3  ;;  %114 = vst [vmem:[#allocation2 + $0x2c0] sm:$0xff] %v25924_v3  ;;  %22629 = vmatpush3.bf16.msra.mxu0 %v22626_v10 }
  0x2e   :  { %115 = vst [vmem:[#allocation2 + $0x2c8] sm:$0xff] %v25924_v3  ;;  %116 = vst [vmem:[#allocation2 + $0x2d0] sm:$0xff] %v25924_v3 }
  0x2f   :  { %117 = vst [vmem:[#allocation2 + $0x2d8] sm:$0xff] %v25924_v3  ;;  %118 = vst [vmem:[#allocation2 + $0x2e0] sm:$0xff] %v25924_v3 }
  0x30   :  { %119 = vst [vmem:[#allocation2 + $0x2e8] sm:$0xff] %v25924_v3  ;;  %120 = vst [vmem:[#allocation2 + $0x2f0] sm:$0xff] %v25924_v3 }
  0x31   :  { %121 = vst [vmem:[#allocation2 + $0x2f8] sm:$0xff] %v25924_v3  ;;  %122 = vst [vmem:[#allocation2 + $0x300] sm:$0xff] %v25924_v3 }
  0x32   :  { %123 = vst [vmem:[#allocation2 + $0x308] sm:$0xff] %v25924_v3  ;;  %124 = vst [vmem:[#allocation2 + $0x310] sm:$0xff] %v25924_v3 }
  0x33   :  { %125 = vst [vmem:[#allocation2 + $0x318] sm:$0xff] %v25924_v3  ;;  %126 = vst [vmem:[#allocation2 + $0x320] sm:$0xff] %v25924_v3 }
  0x34   :  { %127 = vst [vmem:[#allocation2 + $0x328] sm:$0xff] %v25924_v3  ;;  %128 = vst [vmem:[#allocation2 + $0x330] sm:$0xff] %v25924_v3 }
  0x35   :  { %129 = vst [vmem:[#allocation2 + $0x338] sm:$0xff] %v25924_v3  ;;  %130 = vst [vmem:[#allocation2 + $0x340] sm:$0xff] %v25924_v3 }
  0x36   :  { %131 = vst [vmem:[#allocation2 + $0x348] sm:$0xff] %v25924_v3  ;;  %132 = vst [vmem:[#allocation2 + $0x350] sm:$0xff] %v25924_v3 }
  0x37   :  { %133 = vst [vmem:[#allocation2 + $0x358] sm:$0xff] %v25924_v3  ;;  %214 = vst.msk [vmem:[#allocation2 + $0xc1] sm:$0xff] %vm199_vm0, %v148_v11  ;;  %v286_v11 = vld [vmem:[%s31000_s1 + $0x30] sm:$0xff] }
  0x38   :  { %215 = vst.msk [vmem:[#allocation2 + $0xc9] sm:$0xff] %vm199_vm0, %v149_v13  ;;  %200 = vst.msk [vmem:[#allocation2 + $0x19] sm:$0xff] %vm199_vm0, %v134_v14 }
  0x39   :  { %216 = vst.msk [vmem:[#allocation2 + $0xd9] sm:$0xff] %vm199_vm0, %v150_v16  ;;  %201 = vst.msk [vmem:[#allocation2 + $0x21] sm:$0xff] %vm199_vm0, %v135_v17  ;;  %v22630_v17 = vpack.c.bf16 %v287_v12, %v286_v11  ;;  %v15251_v11 = vld [vmem:[%s31000_s1 + $0x148] sm:$0xff] }
  0x3a   :  { %217 = vst.msk [vmem:[#allocation2 + $0xe1] sm:$0xff] %vm199_vm0, %v151_v19  ;;  %202 = vst.msk [vmem:[#allocation2 + $0x31] sm:$0xff] %vm199_vm0, %v136_v20  ;;  %v289_v19 = vld [vmem:[%s31000_s1 + $0x48] sm:$0xff] }
  0x3b   :  { %218 = vst.msk [vmem:[#allocation2 + $0xf1] sm:$0xff] %vm199_vm0, %v152_v21  ;;  %203 = vst.msk [vmem:[#allocation2 + $0x39] sm:$0xff] %vm199_vm0, %v137_v24  ;;  %22631 = vmatprep.subr.bf16.mxu0 %v22630_v17  ;;  %v22634_v24 = vpack.c.bf16 %v289_v19, %v288_v18  ;;  %v15253_v18 = vld [vmem:[%s31000_s1 + $0x158] sm:$0xff] }
  0x3c   :  { %219 = vst.msk [vmem:[#allocation2 + $0xf9] sm:$0xff] %vm199_vm0, %v153_v25  ;;  %204 = vst.msk [vmem:[#allocation2 + $0x49] sm:$0xff] %vm199_vm0, %v138_v26  ;;  %v290_v25 = vld [vmem:[%s31000_s1 + $0x50] sm:$0xff]  ;;  %v291_v26 = vld [vmem:[%s31000_s1 + $0x58] sm:$0xff]  ;;  %22633 = vmatpush3.bf16.msra.mxu0 %v22630_v17 }
  0x3d   :  { %220 = vst.msk [vmem:[#allocation2 + $0x109] sm:$0xff] %vm199_vm0, %v154_v27  ;;  %205 = vst.msk [vmem:[#allocation2 + $0x51] sm:$0xff] %vm199_vm0, %v139_v28  ;;  %22635 = vmatprep.subr.bf16.mxu0 %v22634_v24 }
  0x3e   :  { %v2087_v30 = vld [vmem:[#allocation2 + $0xc1] sm:$0xff]  ;;  %221 = vst.msk [vmem:[#allocation2 + $0x111] sm:$0xff] %vm199_vm0, %v155_v31  ;;  %206 = vst.msk [vmem:[#allocation2 + $0x61] sm:$0xff] %vm199_vm0, %v140_v32  ;;  %v22638_v31 = vpack.c.bf16 %v291_v26, %v290_v25 }
  0x3f   :  { %19090 = vmatprep.mubr.f32.mxu1 %v2087_v30  ;;  %222 = vst.msk [vmem:[#allocation2 + $0x121] sm:$0xff] %vm199_vm0, %v156_v35  ;;  %207 = vst.msk [vmem:[#allocation2 + $0x69] sm:$0xff] %vm199_vm0, %v141_v36  ;;  %v2088_v63 = vld [vmem:[#allocation2 + $0xc9] sm:$0xff]  ;;  %v298_v0 = vld [vmem:[#allocation2 + $0x19] sm:$0xff] }
  0x40   :  { %223 = vst.msk [vmem:[#allocation2 + $0x129] sm:$0xff] %vm199_vm0, %v157_v37  ;;  %208 = vst.msk [vmem:[#allocation2 + $0x79] sm:$0xff] %vm199_vm0, %v142_v41  ;;  %v2089_v1 = vld [vmem:[#allocation2 + $0xd9] sm:$0xff]  ;;  %19091 = vmatmul.mubr.f32.vlgmr.msra.gmra.mrb[0].mxu1 %v2088_v63  ;;  %v299_v6 = vld [vmem:[#allocation2 + $0x21] sm:$0xff]  ;;  %18589 = vmatprep.mubr.f32.mxu0 %v298_v0 }
  0x41   :  { %224 = vst.msk [vmem:[#allocation2 + $0x139] sm:$0xff] %vm199_vm0, %v158_v42  ;;  %209 = vst.msk [vmem:[#allocation2 + $0x81] sm:$0xff] %vm199_vm0, %v143_v43  ;;  %22909 = vmatpush3.bf16.msra.mxu1 %v22618_v59  ;;  %v2090_v7 = vld [vmem:[#allocation2 + $0xe1] sm:$0xff]  ;;  %19093 = vmatprep.mubr.f32.mxu1 %v2089_v1  ;;  %v300_v8 = vld [vmem:[#allocation2 + $0x31] sm:$0xff] }
  0x42   :  { %225 = vst.msk [vmem:[#allocation2 + $0x141] sm:$0xff] %vm199_vm0, %v159_v47  ;;  %210 = vst.msk [vmem:[#allocation2 + $0x91] sm:$0xff] %vm199_vm0, %v144_v48  ;;  %22911 = vmatprep.subr.bf16.mxu1 %v22622_v2  ;;  %v2091_v9 = vld [vmem:[#allocation2 + $0xf1] sm:$0xff]  ;;  %18590 = vmatmul.mubr.f32.gmra.mrb[2].mxu0 %v299_v6  ;;  %v301_v13 = vld [vmem:[#allocation2 + $0x39] sm:$0xff] }
  0x43   :  { %226 = vst.msk [vmem:[#allocation2 + $0x151] sm:$0xff] %vm199_vm0, %v160_v49  ;;  %211 = vst.msk [vmem:[#allocation2 + $0x99] sm:$0xff] %vm199_vm0, %v145_v50  ;;  %v2092_v14 = vld [vmem:[#allocation2 + $0xf9] sm:$0xff]  ;;  %18592 = vmatprep.mubr.f32.mxu0 %v300_v8  ;;  %v302_v15 = vld [vmem:[#allocation2 + $0x49] sm:$0xff]  ;;  %22637 = vmatpush3.bf16.msra.mxu0 %v22634_v24 }
  0x44   :  { %227 = vst.msk [vmem:[#allocation2 + $0x159] sm:$0xff] %vm199_vm0, %v161_v52  ;;  %212 = vst.msk [vmem:[#allocation2 + $0xa9] sm:$0xff] %vm199_vm0, %v146_v53  ;;  %19094 = vmatmul.mubr.f32.gmra.mrb[2].mxu1 %v2090_v7  ;;  %v2093_v16 = vld [vmem:[#allocation2 + $0x109] sm:$0xff]  ;;  %v303_v20 = vld [vmem:[#allocation2 + $0x51] sm:$0xff]  ;;  %22639 = vmatprep.subr.bf16.mxu0 %v22638_v31 }
  0x45   :  { %228 = vst.msk [vmem:[#allocation2 + $0x169] sm:$0xff] %vm199_vm0, %v162_v54  ;;  %213 = vst.msk [vmem:[#allocation2 + $0xb1] sm:$0xff] %vm199_vm0, %v147_v57  ;;  %22913 = vmatpush3.bf16.msra.mxu1 %v22622_v2  ;;  %19096 = vmatprep.mubr.f32.mxu1 %v2091_v9  ;;  %v2094_v21 = vld [vmem:[#allocation2 + $0x111] sm:$0xff]  ;;  %v304_v22 = vld [vmem:[#allocation2 + $0x61] sm:$0xff] }
  0x46   :  { %229 = vst.msk [vmem:[#allocation2 + $0x171] sm:$0xff] %vm199_vm0, %v163_v58  ;;  %22915 = vmatprep.subr.bf16.mxu1 %v22626_v10  ;;  %18593 = vmatmul.mubr.f32.gmra.mrb[4].mxu0 %v301_v13  ;;  %v2095_v23 = vld [vmem:[#allocation2 + $0x121] sm:$0xff]  ;;  %v305_v27 = vld [vmem:[#allocation2 + $0x69] sm:$0xff]  ;;  %v15245_v53 = vld [vmem:[%s31000_s1 + $0x118] sm:$0xff] }
  0x47   :  { %18595 = vmatprep.mubr.f32.mxu0 %v302_v15  ;;  %v2096_v28 = vld [vmem:[#allocation2 + $0x129] sm:$0xff]  ;;  %v306_v29 = vld [vmem:[#allocation2 + $0x79] sm:$0xff]  ;;  %22641 = vmatpush3.bf16.msra.mxu0 %v22638_v31  ;;  %230 = vst.msk [vmem:[#allocation2 + $0x181] sm:$0xff] %vm199_vm0, %v164_v60 }
  0x48   :  { %19097 = vmatmul.mubr.f32.gmra.mrb[4].mxu1 %v2092_v14  ;;  %v2097_v30 = vld [vmem:[#allocation2 + $0x139] sm:$0xff]  ;;  %v307_v34 = vld [vmem:[#allocation2 + $0x81] sm:$0xff]  ;;  %v15244_v52 = vld [vmem:[%s31000_s1 + $0x110] sm:$0xff] }
  0x49   :  { %22917 = vmatpush3.bf16.msra.mxu1 %v22626_v10  ;;  %19099 = vmatprep.mubr.f32.mxu1 %v2093_v16  ;;  %v292_v32 = vld [vmem:[%s31000_s1 + $0x60] sm:$0xff]  ;;  %v308_v36 = vld [vmem:[#allocation2 + $0x91] sm:$0xff]  ;;  %v15243_v47 = vld [vmem:[%s31000_s1 + $0x108] sm:$0xff]  ;;  %v22654_v57 = vpack.c.bf16 %v15245_v53, %v15244_v52 }
  0x4a   :  { %22919 = vmatprep.subr.bf16.mxu1 %v22630_v17  ;;  %18596 = vmatmul.mubr.f32.gmra.mrb[6].mxu0 %v303_v20  ;;  %v2098_v35 = vld [vmem:[#allocation2 + $0x141] sm:$0xff]  ;;  %v2099_v37 = vld [vmem:[#allocation2 + $0x151] sm:$0xff]  ;;  %v22642_v38 = vpack.c.bf16 %v293_v33, %v292_v32  ;;  %v309_v41 = vld [vmem:[#allocation2 + $0x99] sm:$0xff]  ;;  %v22650_v51 = vpack.c.bf16 %v15243_v47, %v15242_v46 }
  0x4b   :  { %18598 = vmatprep.mubr.f32.mxu0 %v304_v22  ;;  %v2100_v42 = vld [vmem:[#allocation2 + $0x159] sm:$0xff]  ;;  %v310_v43 = vld [vmem:[#allocation2 + $0xa9] sm:$0xff] }
  0x4c   :  { %19100 = vmatmul.mubr.f32.gmra.mrb[6].mxu1 %v2094_v21  ;;  %22643 = vmatprep.subr.bf16.mxu0 %v22642_v38  ;;  %v2101_v44 = vld [vmem:[#allocation2 + $0x169] sm:$0xff]  ;;  %v311_v48 = vld [vmem:[#allocation2 + $0xb1] sm:$0xff]  ;;  %v26304_v50 = vld [vmem:[#allocation2 + $0xc0] sm:$0xff] }
  0x4d   :  { %22921 = vmatpush3.bf16.msra.mxu1 %v22630_v17  ;;  %19102 = vmatprep.mubr.f32.mxu1 %v2095_v23  ;;  %v2102_v49 = vld [vmem:[#allocation2 + $0x171] sm:$0xff]  ;;  %v26312_v54 = vld [vmem:[#allocation2 + $0xc8] sm:$0xff]  ;;  %v15246_v58 = vld [vmem:[%s31000_s1 + $0x120] sm:$0xff] }
  0x4e   :  { %22923 = vmatprep.subr.bf16.mxu1 %v22634_v24  ;;  %18599 = vmatmul.mubr.f32.gmra.mrb[8].mxu0 %v305_v27  ;;  %v26316_v55 = vld [vmem:[#allocation2 + $0x18] sm:$0xff]  ;;  %v15247_v59 = vld [vmem:[%s31000_s1 + $0x128] sm:$0xff]  ;;  %v26331_v61 = vld [vmem:[#allocation2 + $0x20] sm:$0xff] }
  0x4f   :  { %18601 = vmatprep.mubr.f32.mxu0 %v306_v29  ;;  %22645 = vmatpush3.bf16.msra.mxu0 %v22642_v38  ;;  %v26318_v56 = vld [vmem:[#allocation2 + $0xd8] sm:$0xff]  ;;  %v26333_v62 = vld [vmem:[#allocation2 + $0xe0] sm:$0xff]  ;;  %v26342_v63 = vld [vmem:[#allocation2 + $0x30] sm:$0xff]  ;;  %v22658_v1 = vpack.c.bf16 %v15247_v59, %v15246_v58 }
  0x50   :  { %19103 = vmatmul.mubr.f32.gmra.mrb[8].mxu1 %v2096_v28  ;;  %22647 = vmatprep.subr.bf16.mxu0 %v22646_v45  ;;  %v26344_v0 = vld [vmem:[#allocation2 + $0xf0] sm:$0xff]  ;;  %v26354_v5 = vld [vmem:[#allocation2 + $0x38] sm:$0xff]  ;;  %v26360_v7 = vld [vmem:[#allocation2 + $0x48] sm:$0xff] }
  0x51   :  { %22925 = vmatpush3.bf16.msra.mxu1 %v22634_v24  ;;  %19105 = vmatprep.mubr.f32.mxu1 %v2097_v30  ;;  %v15248_v2 = vld [vmem:[%s31000_s1 + $0x130] sm:$0xff]  ;;  %v26356_v6 = vld [vmem:[#allocation2 + $0xf8] sm:$0xff]  ;;  %v26362_v8 = vld [vmem:[#allocation2 + $0x108] sm:$0xff] }
  0x52   :  { %22927 = vmatprep.subr.bf16.mxu1 %v22638_v31  ;;  %18602 = vmatmul.mubr.f32.gmra.mrb[10].mxu0 %v307_v34  ;;  %v22662_v9 = vpack.c.bf16 %v15249_v4, %v15248_v2  ;;  %v15250_v10 = vld [vmem:[%s31000_s1 + $0x140] sm:$0xff]  ;;  %v26372_v12 = vld [vmem:[#allocation2 + $0x50] sm:$0xff]  ;;  %v26390_v19 = vld [vmem:[#allocation2 + $0x68] sm:$0xff] }
  0x53   :  { %18604 = vmatprep.mubr.f32.mxu0 %v308_v36  ;;  %22649 = vmatpush3.bf16.msra.mxu0 %v22646_v45  ;;  %v26374_v13 = vld [vmem:[#allocation2 + $0x110] sm:$0xff]  ;;  %v26378_v14 = vld [vmem:[#allocation2 + $0x60] sm:$0xff]  ;;  %v22666_v16 = vpack.c.bf16 %v15251_v11, %v15250_v10  ;;  %v26392_v20 = vld [vmem:[#allocation2 + $0x128] sm:$0xff] }
  0x54   :  { %19106 = vmatmul.mubr.f32.gmra.mrb[10].mxu1 %v2098_v35  ;;  %22651 = vmatprep.subr.bf16.mxu0 %v22650_v51  ;;  %v26380_v15 = vld [vmem:[#allocation2 + $0x120] sm:$0xff]  ;;  %v15252_v17 = vld [vmem:[%s31000_s1 + $0x150] sm:$0xff]  ;;  %v26396_v21 = vld [vmem:[#allocation2 + $0x78] sm:$0xff] }
  0x55   :  { %22929 = vmatpush3.bf16.msra.mxu1 %v22638_v31  ;;  %19108 = vmatprep.mubr.f32.mxu1 %v2099_v37  ;;  %v26398_v22 = vld [vmem:[#allocation2 + $0x138] sm:$0xff]  ;;  %v22670_v23 = vpack.c.bf16 %v15253_v18, %v15252_v17  ;;  %v15254_v24 = vld [vmem:[%s31000_s1 + $0x160] sm:$0xff]  ;;  %v15255_v25 = vld [vmem:[%s31000_s1 + $0x168] sm:$0xff] }
  0x56   :  { %22931 = vmatprep.subr.bf16.mxu1 %v22642_v38  ;;  %18605 = vmatmul.mubr.f32.gmra.mrb[12].mxu0 %v309_v41  ;;  %v26408_v26 = vld [vmem:[#allocation2 + $0x80] sm:$0xff]  ;;  %v26414_v28 = vld [vmem:[#allocation2 + $0x90] sm:$0xff]  ;;  %v22674_v30 = vpack.c.bf16 %v15255_v25, %v15254_v24  ;;  %v15257_v32 = vld [vmem:[%s31000_s1 + $0x178] sm:$0xff] }
  0x57   :  { %18607 = vmatprep.mubr.f32.mxu0 %v310_v43  ;;  %v26410_v27 = vld [vmem:[#allocation2 + $0x140] sm:$0xff]  ;;  %v26416_v29 = vld [vmem:[#allocation2 + $0x150] sm:$0xff]  ;;  %v26426_v33 = vld [vmem:[#allocation2 + $0x98] sm:$0xff] }
  0x58   :  { %19109 = vmatmul.mubr.f32.gmra.mrb[12].mxu1 %v2100_v42  ;;  %v15256_v31 = vld [vmem:[%s31000_s1 + $0x170] sm:$0xff]  ;;  %v26428_v34 = vld [vmem:[#allocation2 + $0x158] sm:$0xff]  ;;  %v26432_v35 = vld [vmem:[#allocation2 + $0xa8] sm:$0xff] }
  0x59   :  { %22933 = vmatpush3.bf16.msra.mxu1 %v22642_v38  ;;  %19111 = vmatprep.mubr.f32.mxu1 %v2101_v44  ;;  %v26434_v36 = vld [vmem:[#allocation2 + $0x168] sm:$0xff]  ;;  %v22678_v37 = vpack.c.bf16 %v15257_v32, %v15256_v31  ;;  %v15258_v38 = vld [vmem:[%s31000_s1 + $0x180] sm:$0xff]  ;;  %v26444_v40 = vld [vmem:[#allocation2 + $0xb0] sm:$0xff] }
  0x5a   :  { %22935 = vmatprep.subr.bf16.mxu1 %v22646_v45  ;;  %18608 = vmatmul.mubr.f32.gmra.mrb[14].mxu0 %v311_v48  ;;  %v26446_v41 = vld [vmem:[#allocation2 + $0x170] sm:$0xff]  ;;  %v619_v42 = vld [vmem:[#allocation2 + $0x2] sm:$0xff]  ;;  %v22682_v44 = vpack.c.bf16 %v15259_v39, %v15258_v38  ;;  %v15261_v46 = vld [vmem:[%s31000_s1 + $0x198] sm:$0xff] }
  0x5b   :  { %18642 = vmatprep.mubr.f32.mxu0 %v25924_v3  ;;  %v2409_v43 = vld [vmem:[#allocation2 + $0xc2] sm:$0xff]  ;;  %v620_v47 = vld [vmem:[#allocation2 + $0xa] sm:$0xff]  ;;  %v26474_v60 = vld [vmem:[#allocation2 + $0x32] sm:$0xff] }
  0x5c   :  { %19112 = vmatmul.mubr.f32.gmra.mrb[14].mxu1 %v2102_v49  ;;  %v2410_v48 = vld [vmem:[#allocation2 + $0xca] sm:$0xff]  ;;  %v26458_v49 = vld [vmem:[#allocation2 + $0x1a] sm:$0xff]  ;;  %v26468_v58 = vld [vmem:[#allocation2 + $0x22] sm:$0xff] }
  0x5d   :  { %22937 = vmatpush3.bf16.msra.mxu1 %v22646_v45  ;;  %19146 = vmatprep.mubr.f32.mxu1 %v26304_v50  ;;  %v15260_v45 = vld [vmem:[%s31000_s1 + $0x190] sm:$0xff]  ;;  %v15262_v53 = vld [vmem:[%s31000_s1 + $0x1a0] sm:$0xff]  ;;  %v15265_v4 = vld [vmem:[%s31000_s1 + $0x1b8] sm:$0xff] }
  0x5e   :  { %22939 = vmatprep.subr.bf16.mxu1 %v22650_v51  ;;  %18643 = vmatmul.mubr.f32.vlgmr.msra.gmra.mrb[0].mxu0 %v25924_v3  ;;  %v165_v3 = vld [vmem:[%s31001_s0 + $0xf8] sm:$0xff]  ;;  %v22686_v52 = vpack.c.bf16 %v15261_v46, %v15260_v45  ;;  %v26470_v59 = vld [vmem:[#allocation2 + $0xe2] sm:$0xff]  ;;  %v15264_v2 = vld [vmem:[%s31000_s1 + $0x1b0] sm:$0xff] }
  0x5f   :  { %22653 = vmatpush3.bf16.msra.mxu0 %v22650_v51  ;;  %18645 = vmatprep.mubr.f32.mxu0 %v26316_v55  ;;  %231 = vst.msk [vmem:[#allocation2 + $0x189] sm:$0xff] %vm199_vm0, %v165_v3  ;;  %v26476_v3 = vld [vmem:[#allocation2 + $0xf2] sm:$0xff]  ;;  %v26488_v10 = vld [vmem:[#allocation2 + $0xfa] sm:$0xff]  ;;  %v26492_v11 = vld [vmem:[#allocation2 + $0x4a] sm:$0xff]  ;;  %v22694_v17 = vpack.c.bf16 %v15265_v4, %v15264_v2 }
  0x60   :  { %19147 = vmatmul.mubr.f32.vlgmr.msra.gmra.mrb[0].mxu1 %v26312_v54  ;;  %22655 = vmatprep.subr.bf16.mxu0 %v22654_v57  ;;  %v15266_v18 = vld [vmem:[%s31000_s1 + $0x1c0] sm:$0xff]  ;;  %v26504_v24 = vld [vmem:[#allocation2 + $0x52] sm:$0xff]  ;;  %v26522_v39 = vld [vmem:[#allocation2 + $0x6a] sm:$0xff] }
  0x61   :  { %22941 = vmatpush3.bf16.msra.mxu1 %v22650_v51  ;;  %19149 = vmatprep.mubr.f32.mxu1 %v26318_v56  ;;  %v26460_v51 = vld [vmem:[#allocation2 + $0xda] sm:$0xff]  ;;  %v26506_v25 = vld [vmem:[#allocation2 + $0x112] sm:$0xff]  ;;  %v26512_v31 = vld [vmem:[#allocation2 + $0x122] sm:$0xff] }
  0x62   :  { %22943 = vmatprep.subr.bf16.mxu1 %v22654_v57  ;;  %18646 = vmatmul.mubr.f32.gmra.mrb[2].mxu0 %v26331_v61  ;;  %v15269_v38 = vld [vmem:[%s31000_s1 + $0x1d8] sm:$0xff]  ;;  %v15270_v46 = vld [vmem:[%s31000_s1 + $0x1e0] sm:$0xff]  ;;  %v15272_v2 = vld [vmem:[%s31000_s1 + $0x1f0] sm:$0xff] }
  0x63   :  { %22657 = vmatpush3.bf16.msra.mxu0 %v22654_v57  ;;  %18648 = vmatprep.mubr.f32.mxu0 %v26342_v63  ;;  %v15273_v4 = vld [vmem:[%s31000_s1 + $0x1f8] sm:$0xff] }
  0x64   :  { %19150 = vmatmul.mubr.f32.gmra.mrb[2].mxu1 %v26333_v62  ;;  %22659 = vmatprep.subr.bf16.mxu0 %v22658_v1 }
  0x65   :  { %22945 = vmatpush3.bf16.msra.mxu1 %v22654_v57  ;;  %19152 = vmatprep.mubr.f32.mxu1 %v26344_v0  ;;  %v15263_v57 = vld [vmem:[%s31000_s1 + $0x1a8] sm:$0xff] }
  0x66   :  { %22947 = vmatprep.subr.bf16.mxu1 %v22658_v1  ;;  %18649 = vmatmul.mubr.f32.gmra.mrb[4].mxu0 %v26354_v5 }
  0x67   :  { %22661 = vmatpush3.bf16.msra.mxu0 %v22658_v1  ;;  %18651 = vmatprep.mubr.f32.mxu0 %v26360_v7 }
  0x68   :  { %19153 = vmatmul.mubr.f32.gmra.mrb[4].mxu1 %v26356_v6  ;;  %22663 = vmatprep.subr.bf16.mxu0 %v22662_v9 }
  0x69   :  { %22949 = vmatpush3.bf16.msra.mxu1 %v22658_v1  ;;  %19155 = vmatprep.mubr.f32.mxu1 %v26362_v8  ;;  %v22690_v1 = vpack.c.bf16 %v15263_v57, %v15262_v53  ;;  %v26546_v53 = vld [vmem:[#allocation2 + $0x92] sm:$0xff] }
  0x6a   :  { %22951 = vmatprep.subr.bf16.mxu1 %v22662_v9  ;;  %18652 = vmatmul.mubr.f32.gmra.mrb[6].mxu0 %v26372_v12  ;;  %v26548_v57 = vld [vmem:[#allocation2 + $0x152] sm:$0xff] }
  0x6b   :  { %22665 = vmatpush3.bf16.msra.mxu0 %v22662_v9  ;;  %18654 = vmatprep.mubr.f32.mxu0 %v26378_v14 }
  0x6c   :  { %19156 = vmatmul.mubr.f32.gmra.mrb[6].mxu1 %v26374_v13  ;;  %22667 = vmatprep.subr.bf16.mxu0 %v22666_v16 }
  0x6d   :  { %22953 = vmatpush3.bf16.msra.mxu1 %v22662_v9  ;;  %19158 = vmatprep.mubr.f32.mxu1 %v26380_v15  ;;  %v26486_v9 = vld [vmem:[#allocation2 + $0x3a] sm:$0xff] }
  0x6e   :  { %22955 = vmatprep.subr.bf16.mxu1 %v22666_v16  ;;  %18655 = vmatmul.mubr.f32.gmra.mrb[8].mxu0 %v26390_v19 }
  0x6f   :  { %22669 = vmatpush3.bf16.msra.mxu0 %v22666_v16  ;;  %18657 = vmatprep.mubr.f32.mxu0 %v26396_v21 }
  0x70   :  { %19159 = vmatmul.mubr.f32.gmra.mrb[8].mxu1 %v26392_v20  ;;  %22671 = vmatprep.subr.bf16.mxu0 %v22670_v23 }
  0x71   :  { %22957 = vmatpush3.bf16.msra.mxu1 %v22666_v16  ;;  %19161 = vmatprep.mubr.f32.mxu1 %v26398_v22  ;;  %v26494_v16 = vld [vmem:[#allocation2 + $0x10a] sm:$0xff] }
  0x72   :  { %22959 = vmatprep.subr.bf16.mxu1 %v22670_v23  ;;  %18658 = vmatmul.mubr.f32.gmra.mrb[10].mxu0 %v26408_v26 }
  0x73   :  { %22673 = vmatpush3.bf16.msra.mxu0 %v22670_v23  ;;  %18660 = vmatprep.mubr.f32.mxu0 %v26414_v28 }
  0x74   :  { %19162 = vmatmul.mubr.f32.gmra.mrb[10].mxu1 %v26410_v27  ;;  %22675 = vmatprep.subr.bf16.mxu0 %v22674_v30 }
  0x75   :  { %22961 = vmatpush3.bf16.msra.mxu1 %v22670_v23  ;;  %19164 = vmatprep.mubr.f32.mxu1 %v26416_v29  ;;  %v15267_v23 = vld [vmem:[%s31000_s1 + $0x1c8] sm:$0xff] }
  0x76   :  { %22963 = vmatprep.subr.bf16.mxu1 %v22674_v30  ;;  %18661 = vmatmul.mubr.f32.gmra.mrb[12].mxu0 %v26426_v33  ;;  %v22698_v32 = vpack.c.bf16 %v15267_v23, %v15266_v18  ;;  %v26560_v18 = vld [vmem:[#allocation2 + $0x15a] sm:$0xff]  ;;  %v26564_v23 = vld [vmem:[#allocation2 + $0xaa] sm:$0xff] }
  0x77   :  { %22677 = vmatpush3.bf16.msra.mxu0 %v22674_v30  ;;  %18663 = vmatprep.mubr.f32.mxu0 %v26432_v35 }
  0x78   :  { %19165 = vmatmul.mubr.f32.gmra.mrb[12].mxu1 %v26428_v34  ;;  %22679 = vmatprep.subr.bf16.mxu0 %v22678_v37 }
  0x79   :  { %22965 = vmatpush3.bf16.msra.mxu1 %v22674_v30  ;;  %19167 = vmatprep.mubr.f32.mxu1 %v26434_v36  ;;  %v26510_v30 = vld [vmem:[#allocation2 + $0x62] sm:$0xff] }
  0x7a   :  { %22967 = vmatprep.subr.bf16.mxu1 %v22678_v37  ;;  %18664 = vmatmul.mubr.f32.gmra.mrb[14].mxu0 %v26444_v40 }
  0x7b   :  { %22681 = vmatpush3.bf16.msra.mxu0 %v22678_v37  ;;  %18698 = vmatprep.mubr.f32.mxu0 %v619_v42  ;;  %v26524_v42 = vld [vmem:[#allocation2 + $0x12a] sm:$0xff] }
  0x7c   :  { %19168 = vmatmul.mubr.f32.gmra.mrb[14].mxu1 %v26446_v41  ;;  %22683 = vmatprep.subr.bf16.mxu0 %v22682_v44 }
  0x7d   :  { %22969 = vmatpush3.bf16.msra.mxu1 %v22678_v37  ;;  %19202 = vmatprep.mubr.f32.mxu1 %v2409_v43  ;;  %v15268_v37 = vld [vmem:[%s31000_s1 + $0x1d0] sm:$0xff]  ;;  %v26528_v43 = vld [vmem:[#allocation2 + $0x7a] sm:$0xff] }
  0x7e   :  { %22971 = vmatprep.subr.bf16.mxu1 %v22682_v44  ;;  %18699 = vmatmul.mubr.f32.vlgmr.msra.gmra.mrb[0].mxu0 %v620_v47  ;;  %v22702_v45 = vpack.c.bf16 %v15269_v38, %v15268_v37  ;;  %v15271_v47 = vld [vmem:[%s31000_s1 + $0x1e8] sm:$0xff]  ;;  %v22710_v37 = vpack.c.bf16 %v15273_v4, %v15272_v2  ;;  %v15274_v38 = vld [vmem:[%s31000_s1 + $0x200] sm:$0xff]  ;;  %v15276_v4 = vld [vmem:[%s31000_s1 + $0x210] sm:$0xff] }
  0x7f   :  { %22685 = vmatpush3.bf16.msra.mxu0 %v22682_v44  ;;  %18701 = vmatprep.mubr.f32.mxu0 %v26458_v49 }
  0x80   :  { %19203 = vmatmul.mubr.f32.vlgmr.msra.gmra.mrb[0].mxu1 %v2410_v48  ;;  %22687 = vmatprep.subr.bf16.mxu0 %v22686_v52  ;;  %v26540_v48 = vld [vmem:[#allocation2 + $0x82] sm:$0xff] }
  0x81   :  { %22973 = vmatpush3.bf16.msra.mxu1 %v22682_v44  ;;  %19205 = vmatprep.mubr.f32.mxu1 %v26460_v51  ;;  %v26530_v44 = vld [vmem:[#allocation2 + $0x13a] sm:$0xff] }
  0x82   :  { %22975 = vmatprep.subr.bf16.mxu1 %v22686_v52  ;;  %18702 = vmatmul.mubr.f32.gmra.mrb[2].mxu0 %v26468_v58 }
  0x83   :  { %22689 = vmatpush3.bf16.msra.mxu0 %v22686_v52  ;;  %18704 = vmatprep.mubr.f32.mxu0 %v26474_v60 }
  0x84   :  { %19206 = vmatmul.mubr.f32.gmra.mrb[2].mxu1 %v26470_v59  ;;  %22691 = vmatprep.subr.bf16.mxu0 %v22690_v1 }
  0x85   :  { %22977 = vmatpush3.bf16.msra.mxu1 %v22686_v52  ;;  %19208 = vmatprep.mubr.f32.mxu1 %v26476_v3  ;;  %v26542_v52 = vld [vmem:[#allocation2 + $0x142] sm:$0xff] }
  0x86   :  { %22979 = vmatprep.subr.bf16.mxu1 %v22690_v1  ;;  %18705 = vmatmul.mubr.f32.gmra.mrb[4].mxu0 %v26486_v9 }
  0x87   :  { %22693 = vmatpush3.bf16.msra.mxu0 %v22690_v1  ;;  %18707 = vmatprep.mubr.f32.mxu0 %v26492_v11 }
  0x88   :  { %19209 = vmatmul.mubr.f32.gmra.mrb[4].mxu1 %v26488_v10  ;;  %22695 = vmatprep.subr.bf16.mxu0 %v22694_v17 }
  0x89   :  { %22981 = vmatpush3.bf16.msra.mxu1 %v22690_v1  ;;  %19211 = vmatprep.mubr.f32.mxu1 %v26494_v16  ;;  %v22706_v1 = vpack.c.bf16 %v15271_v47, %v15270_v46  ;;  %v26576_v46 = vld [vmem:[#allocation2 + $0xb2] sm:$0xff] }
  0x8a   :  { %22983 = vmatprep.subr.bf16.mxu1 %v22694_v17  ;;  %18708 = vmatmul.mubr.f32.gmra.mrb[6].mxu0 %v26504_v24  ;;  %v26578_v47 = vld [vmem:[#allocation2 + $0x172] sm:$0xff] }
  0x8b   :  { %22697 = vmatpush3.bf16.msra.mxu0 %v22694_v17  ;;  %18710 = vmatprep.mubr.f32.mxu0 %v26510_v30  ;;  %31093 = vst [vmem:[#allocation3_spill] sm:$0xff] %v26578_v47 }
  0x8c   :  { %19212 = vmatmul.mubr.f32.gmra.mrb[6].mxu1 %v26506_v25  ;;  %22699 = vmatprep.subr.bf16.mxu0 %v22698_v32 }
  0x8d   :  { %22985 = vmatpush3.bf16.msra.mxu1 %v22694_v17  ;;  %19214 = vmatprep.mubr.f32.mxu1 %v26512_v31  ;;  %v26558_v17 = vld [vmem:[#allocation2 + $0x9a] sm:$0xff] }
  0x8e   :  { %22987 = vmatprep.subr.bf16.mxu1 %v22698_v32  ;;  %18711 = vmatmul.mubr.f32.gmra.mrb[8].mxu0 %v26522_v39 }
  0x8f   :  { %22701 = vmatpush3.bf16.msra.mxu0 %v22698_v32  ;;  %18713 = vmatprep.mubr.f32.mxu0 %v26528_v43 }
  0x90   :  { %19215 = vmatmul.mubr.f32.gmra.mrb[8].mxu1 %v26524_v42  ;;  %22703 = vmatprep.subr.bf16.mxu0 %v22702_v45 }
  0x91   :  { %22989 = vmatpush3.bf16.msra.mxu1 %v22698_v32  ;;  %19217 = vmatprep.mubr.f32.mxu1 %v26530_v44  ;;  %v26566_v32 = vld [vmem:[#allocation2 + $0x16a] sm:$0xff] }
  0x92   :  { %22991 = vmatprep.subr.bf16.mxu1 %v22702_v45  ;;  %18714 = vmatmul.mubr.f32.gmra.mrb[10].mxu0 %v26540_v48 }
  0x93   :  { %22705 = vmatpush3.bf16.msra.mxu0 %v22702_v45  ;;  %18716 = vmatprep.mubr.f32.mxu0 %v26546_v53 }
  0x94   :  { %19218 = vmatmul.mubr.f32.gmra.mrb[10].mxu1 %v26542_v52  ;;  %22707 = vmatprep.subr.bf16.mxu0 %v22706_v1 }
  0x95   :  { %22993 = vmatpush3.bf16.msra.mxu1 %v22702_v45  ;;  %19220 = vmatprep.mubr.f32.mxu1 %v26548_v57  ;;  %v15275_v45 = vld [vmem:[%s31000_s1 + $0x208] sm:$0xff] }
  0x96   :  { %22995 = vmatprep.subr.bf16.mxu1 %v22706_v1  ;;  %18717 = vmatmul.mubr.f32.gmra.mrb[12].mxu0 %v26558_v17  ;;  %v22714_v2 = vpack.c.bf16 %v15275_v45, %v15274_v38  ;;  %v15278_v45 = vld [vmem:[%s31000_s1 + $0x220] sm:$0xff] }
  0x97   :  { %22709 = vmatpush3.bf16.msra.mxu0 %v22706_v1  ;;  %18719 = vmatprep.mubr.f32.mxu0 %v26564_v23 }
  0x98   :  { %19221 = vmatmul.mubr.f32.gmra.mrb[12].mxu1 %v26560_v18  ;;  %22711 = vmatprep.subr.bf16.mxu0 %v22710_v37 }
  0x99   :  { %22997 = vmatpush3.bf16.msra.mxu1 %v22706_v1  ;;  %19223 = vmatprep.mubr.f32.mxu1 %v26566_v32  ;;  %v15277_v1 = vld [vmem:[%s31000_s1 + $0x218] sm:$0xff] }
  0x9a   :  { %22999 = vmatprep.subr.bf16.mxu1 %v22710_v37  ;;  %18720 = vmatmul.mubr.f32.gmra.mrb[14].mxu0 %v26576_v46  ;;  %v22718_v38 = vpack.c.bf16 %v15277_v1, %v15276_v4  ;;  %v26686_v4 = vld [vmem:[#allocation2 + $0xf9] sm:$0xff]  ;;  %v26690_v1 = vld [vmem:[#allocation2 + $0x49] sm:$0xff] }
  0x9b   :  { %22713 = vmatpush3.bf16.msra.mxu0 %v22710_v37  ;;  %18754 = vmatprep.mubr.f32.mxu0 %v26316_v55 }
  0x9c   :  { %19224 = vmatmul.mubr.f32.gmra.mrb[14].mxu1 %v26578_v47  ;;  %22715 = vmatprep.subr.bf16.mxu0 %v22714_v2  ;;  %v15279_v47 = vld [vmem:[%s31000_s1 + $0x228] sm:$0xff] }
  0x9d   :  { %23001 = vmatpush3.bf16.msra.mxu1 %v22710_v37  ;;  %19258 = vmatprep.mubr.f32.mxu1 %v26318_v56  ;;  %v22722_v55 = vpack.c.bf16 %v15279_v47, %v15278_v45  ;;  %v15280_v56 = vld [vmem:[%s31000_s1 + $0x230] sm:$0xff]  ;;  %v15294_v37 = vld [vmem:[%s31000_s1 + $0x2a0] sm:$0xff]  ;;  %v15295_v47 = vld [vmem:[%s31000_s1 + $0x2a8] sm:$0xff] }
  0x9e   :  { %23003 = vmatprep.subr.bf16.mxu1 %v22714_v2  ;;  %18755 = vmatmul.mubr.f32.vlgmr.msra.gmra.mrb[0].mxu0 %v26331_v61  ;;  %v15281_v61 = vld [vmem:[%s31000_s1 + $0x238] sm:$0xff]  ;;  %v22754_v45 = vpack.c.bf16 %v15295_v47, %v15294_v37  ;;  %v26764_v37 = vld [vmem:[#allocation2 + $0x169] sm:$0xff] }
  0x9f   :  { %22717 = vmatpush3.bf16.msra.mxu0 %v22714_v2  ;;  %18757 = vmatprep.mubr.f32.mxu0 %v26342_v63  ;;  %v15282_v63 = vld [vmem:[%s31000_s1 + $0x240] sm:$0xff] }
  0xa0   :  { %19259 = vmatmul.mubr.f32.vlgmr.msra.gmra.mrb[0].mxu1 %v26333_v62  ;;  %22719 = vmatprep.subr.bf16.mxu0 %v22718_v38  ;;  %v22726_v62 = vpack.c.bf16 %v15281_v61, %v15280_v56  ;;  %v15297_v56 = vld [vmem:[%s31000_s1 + $0x2b8] sm:$0xff] }
  0xa1   :  { %23005 = vmatpush3.bf16.msra.mxu1 %v22714_v2  ;;  %19261 = vmatprep.mubr.f32.mxu1 %v26344_v0  ;;  %v15283_v0 = vld [vmem:[%s31000_s1 + $0x248] sm:$0xff]  ;;  %v26684_v2 = vld [vmem:[#allocation2 + $0x39] sm:$0xff]  ;;  %v26702_v61 = vld [vmem:[#allocation2 + $0x51] sm:$0xff] }
  0xa2   :  { %23007 = vmatprep.subr.bf16.mxu1 %v22718_v38  ;;  %18758 = vmatmul.mubr.f32.gmra.mrb[2].mxu0 %v26354_v5  ;;  %v22730_v5 = vpack.c.bf16 %v15283_v0, %v15282_v63  ;;  %v26708_v63 = vld [vmem:[#allocation2 + $0x61] sm:$0xff] }
  0xa3   :  { %22721 = vmatpush3.bf16.msra.mxu0 %v22718_v38  ;;  %18760 = vmatprep.mubr.f32.mxu0 %v26360_v7  ;;  %v15285_v7 = vld [vmem:[%s31000_s1 + $0x258] sm:$0xff]  ;;  %v26710_v0 = vld [vmem:[#allocation2 + $0x121] sm:$0xff] }
  0xa4   :  { %19262 = vmatmul.mubr.f32.gmra.mrb[2].mxu1 %v26356_v6  ;;  %22723 = vmatprep.subr.bf16.mxu0 %v22722_v55  ;;  %v15284_v6 = vld [vmem:[%s31000_s1 + $0x250] sm:$0xff] }
  0xa5   :  { %23009 = vmatpush3.bf16.msra.mxu1 %v22718_v38  ;;  %19264 = vmatprep.mubr.f32.mxu1 %v26362_v8  ;;  %v22734_v8 = vpack.c.bf16 %v15285_v7, %v15284_v6  ;;  %v26692_v38 = vld [vmem:[#allocation2 + $0x109] sm:$0xff]  ;;  %v15298_v6 = vld [vmem:[%s31000_s1 + $0x2c0] sm:$0xff] }
  0xa6   :  { %23011 = vmatprep.subr.bf16.mxu1 %v22722_v55  ;;  %18761 = vmatmul.mubr.f32.gmra.mrb[4].mxu0 %v26372_v12  ;;  %v15286_v12 = vld [vmem:[%s31000_s1 + $0x260] sm:$0xff]  ;;  %v15299_v7 = vld [vmem:[%s31000_s1 + $0x2c8] sm:$0xff] }
  0xa7   :  { %22725 = vmatpush3.bf16.msra.mxu0 %v22722_v55  ;;  %18763 = vmatprep.mubr.f32.mxu0 %v26378_v14 }
  0xa8   :  { %19265 = vmatmul.mubr.f32.gmra.mrb[4].mxu1 %v26374_v13  ;;  %22727 = vmatprep.subr.bf16.mxu0 %v22726_v62  ;;  %v15287_v13 = vld [vmem:[%s31000_s1 + $0x268] sm:$0xff] }
  0xa9   :  { %23013 = vmatpush3.bf16.msra.mxu1 %v22722_v55  ;;  %19267 = vmatprep.mubr.f32.mxu1 %v26380_v15  ;;  %v22738_v14 = vpack.c.bf16 %v15287_v13, %v15286_v12  ;;  %v15288_v15 = vld [vmem:[%s31000_s1 + $0x270] sm:$0xff]  ;;  %v26726_v13 = vld [vmem:[#allocation2 + $0x79] sm:$0xff] }
  0xaa   :  { %23015 = vmatprep.subr.bf16.mxu1 %v22726_v62  ;;  %18764 = vmatmul.mubr.f32.gmra.mrb[6].mxu0 %v26390_v19  ;;  %v15289_v19 = vld [vmem:[%s31000_s1 + $0x278] sm:$0xff]  ;;  %v15296_v55 = vld [vmem:[%s31000_s1 + $0x2b0] sm:$0xff] }
  0xab   :  { %22729 = vmatpush3.bf16.msra.mxu0 %v22726_v62  ;;  %18766 = vmatprep.mubr.f32.mxu0 %v26396_v21  ;;  %v22742_v21 = vpack.c.bf16 %v15289_v19, %v15288_v15  ;;  %v26722_v12 = vld [vmem:[#allocation2 + $0x129] sm:$0xff]  ;;  %v22762_v15 = vpack.c.bf16 %v15299_v7, %v15298_v6  ;;  %v26783_v7 = vld [vmem:[#allocation2 + $0xc1] sm:$0xff] }
  0xac   :  { %19268 = vmatmul.mubr.f32.gmra.mrb[6].mxu1 %v26392_v20  ;;  %22731 = vmatprep.subr.bf16.mxu0 %v22730_v5  ;;  %v26652_v20 = vld [vmem:[#allocation2 + $0x180] sm:$0xff]  ;;  %v15300_v19 = vld [vmem:[%s31000_s1 + $0x2d0] sm:$0xff] }
  0xad   :  { %23017 = vmatpush3.bf16.msra.mxu1 %v22726_v62  ;;  %19270 = vmatprep.mubr.f32.mxu1 %v26398_v22  ;;  %v15290_v22 = vld [vmem:[%s31000_s1 + $0x280] sm:$0xff]  ;;  %v26704_v62 = vld [vmem:[#allocation2 + $0x111] sm:$0xff] }
  0xae   :  { %23019 = vmatprep.subr.bf16.mxu1 %v22730_v5  ;;  %18767 = vmatmul.mubr.f32.gmra.mrb[8].mxu0 %v26408_v26  ;;  %v15291_v26 = vld [vmem:[%s31000_s1 + $0x288] sm:$0xff]  ;;  %v180_v6 = vld [vmem:[%s31001_s0 + $0x170] sm:$0xff] }
  0xaf   :  { %22733 = vmatpush3.bf16.msra.mxu0 %v22730_v5  ;;  %18769 = vmatprep.mubr.f32.mxu0 %v26414_v28  ;;  %v1007_v28 = vld [vmem:[#allocation2 + $0x19] sm:$0xff]  ;;  %246 = vst.msk [vmem:[#allocation2 + $0x271] sm:$0xff] %vm199_vm0, %v180_v6 }
  0xb0   :  { %19271 = vmatmul.mubr.f32.gmra.mrb[8].mxu1 %v26410_v27  ;;  %22735 = vmatprep.subr.bf16.mxu0 %v22734_v8  ;;  %v26662_v27 = vld [vmem:[#allocation2 + $0x188] sm:$0xff] }
  0xb1   :  { %23021 = vmatpush3.bf16.msra.mxu1 %v22730_v5  ;;  %19273 = vmatprep.mubr.f32.mxu1 %v26416_v29  ;;  %v2796_v29 = vld [vmem:[#allocation2 + $0xd9] sm:$0xff]  ;;  %v22758_v5 = vpack.c.bf16 %v15297_v56, %v15296_v55  ;;  %v26774_v56 = vld [vmem:[#allocation2 + $0xb1] sm:$0xff] }
  0xb2   :  { %23023 = vmatprep.subr.bf16.mxu1 %v22734_v8  ;;  %18770 = vmatmul.mubr.f32.gmra.mrb[10].mxu0 %v26426_v33  ;;  %v22746_v33 = vpack.c.bf16 %v15291_v26, %v15290_v22  ;;  %v26738_v22 = vld [vmem:[#allocation2 + $0x81] sm:$0xff]  ;;  %v15305_v55 = vld [vmem:[%s31000_s1 + $0x2f8] sm:$0xff] }
  0xb3   :  { %22737 = vmatpush3.bf16.msra.mxu0 %v22734_v8  ;;  %18772 = vmatprep.mubr.f32.mxu0 %v26432_v35  ;;  %v15293_v35 = vld [vmem:[%s31000_s1 + $0x298] sm:$0xff]  ;;  %v26740_v26 = vld [vmem:[#allocation2 + $0x141] sm:$0xff] }
  0xb4   :  { %19274 = vmatmul.mubr.f32.gmra.mrb[10].mxu1 %v26428_v34  ;;  %22739 = vmatprep.subr.bf16.mxu0 %v22738_v14  ;;  %v15292_v34 = vld [vmem:[%s31000_s1 + $0x290] sm:$0xff] }
  0xb5   :  { %23025 = vmatpush3.bf16.msra.mxu1 %v22734_v8  ;;  %19276 = vmatprep.mubr.f32.mxu1 %v26434_v36  ;;  %v2797_v36 = vld [vmem:[#allocation2 + $0xe1] sm:$0xff]  ;;  %v26720_v8 = vld [vmem:[#allocation2 + $0x69] sm:$0xff] }
  0xb6   :  { %23027 = vmatprep.subr.bf16.mxu1 %v22738_v14  ;;  %18773 = vmatmul.mubr.f32.gmra.mrb[12].mxu0 %v26444_v40  ;;  %v26674_v40 = vld [vmem:[#allocation2 + $0x31] sm:$0xff] }
  0xb7   :  { %22741 = vmatpush3.bf16.msra.mxu0 %v22738_v14  ;;  %18775 = vmatprep.mubr.f32.mxu0 %v26304_v50  ;;  %v1008_v50 = vld [vmem:[#allocation2 + $0x21] sm:$0xff] }
  0xb8   :  { %19277 = vmatmul.mubr.f32.gmra.mrb[12].mxu1 %v26446_v41  ;;  %22743 = vmatprep.subr.bf16.mxu0 %v22742_v21  ;;  %v22750_v41 = vpack.c.bf16 %v15293_v35, %v15292_v34  ;;  %v15302_v34 = vld [vmem:[%s31000_s1 + $0x2e0] sm:$0xff]  ;;  %v15303_v35 = vld [vmem:[%s31000_s1 + $0x2e8] sm:$0xff] }
  0xb9   :  { %23029 = vmatpush3.bf16.msra.mxu1 %v22738_v14  ;;  %19279 = vmatprep.mubr.f32.mxu1 %v26652_v20  ;;  %v26728_v14 = vld [vmem:[#allocation2 + $0x139] sm:$0xff]  ;;  %v22770_v47 = vpack.c.bf16 %v15303_v35, %v15302_v34  ;;  %v15307_v34 = vld [vmem:[%s31000_s1 + $0x308] sm:$0xff] }
  0xba   :  { %23031 = vmatprep.subr.bf16.mxu1 %v22742_v21  ;;  %18776 = vmatmul.mubr.f32.gmra.mrb[14].mxu0 %v26312_v54  ;;  %v26676_v54 = vld [vmem:[#allocation2 + $0xf1] sm:$0xff]  ;;  %v26800_v35 = vld [vmem:[#allocation2 + $0xc9] sm:$0xff] }
  0xbb   :  { %22745 = vmatpush3.bf16.msra.mxu0 %v22742_v21  ;;  %18810 = vmatprep.mubr.f32.mxu0 %v1007_v28  ;;  %v26744_v28 = vld [vmem:[#allocation2 + $0x91] sm:$0xff] }
  0xbc   :  { %19280 = vmatmul.mubr.f32.gmra.mrb[14].mxu1 %v26662_v27  ;;  %22747 = vmatprep.subr.bf16.mxu0 %v22746_v33 }
  0xbd   :  { %23033 = vmatpush3.bf16.msra.mxu1 %v22742_v21  ;;  %19314 = vmatprep.mubr.f32.mxu1 %v2796_v29  ;;  %v15301_v21 = vld [vmem:[%s31000_s1 + $0x2d8] sm:$0xff] }
  0xbe   :  { %23035 = vmatprep.subr.bf16.mxu1 %v22746_v33  ;;  %18811 = vmatmul.mubr.f32.vlgmr.msra.gmra.mrb[0].mxu0 %v1008_v50  ;;  %v26746_v29 = vld [vmem:[#allocation2 + $0x151] sm:$0xff]  ;;  %v26756_v50 = vld [vmem:[#allocation2 + $0x99] sm:$0xff] }
  0xbf   :  { %22749 = vmatpush3.bf16.msra.mxu0 %v22746_v33  ;;  %18813 = vmatprep.mubr.f32.mxu0 %v26674_v40 }
  0xc0   :  { %19315 = vmatmul.mubr.f32.vlgmr.msra.gmra.mrb[0].mxu1 %v2797_v36  ;;  %22751 = vmatprep.subr.bf16.mxu0 %v22750_v41  ;;  %v26758_v36 = vld [vmem:[#allocation2 + $0x159] sm:$0xff] }
  0xc1   :  { %23037 = vmatpush3.bf16.msra.mxu1 %v22746_v33  ;;  %19317 = vmatprep.mubr.f32.mxu1 %v26676_v54  ;;  %v22766_v33 = vpack.c.bf16 %v15301_v21, %v15300_v19  ;;  %v181_v21 = vld [vmem:[%s31001_s0 + $0x178] sm:$0xff] }
  0xc2   :  { %23039 = vmatprep.subr.bf16.mxu1 %v22750_v41  ;;  %18814 = vmatmul.mubr.f32.gmra.mrb[2].mxu0 %v26684_v2  ;;  %247 = vst.msk [vmem:[#allocation2 + $0x279] sm:$0xff] %vm199_vm0, %v181_v21  ;;  %v167_v21 = vld [vmem:[%s31001_s0 + $0x108] sm:$0xff] }
  0xc3   :  { %22753 = vmatpush3.bf16.msra.mxu0 %v22750_v41  ;;  %18816 = vmatprep.mubr.f32.mxu0 %v26690_v1  ;;  %233 = vst.msk [vmem:[#allocation2 + $0x1d1] sm:$0xff] %vm199_vm0, %v167_v21  ;;  %v184_v21 = vld [vmem:[%s31001_s0 + $0x190] sm:$0xff] }
  0xc4   :  { %19318 = vmatmul.mubr.f32.gmra.mrb[2].mxu1 %v26686_v4  ;;  %22755 = vmatprep.subr.bf16.mxu0 %v22754_v45  ;;  %250 = vst.msk [vmem:[#allocation2 + $0x2a1] sm:$0xff] %vm199_vm0, %v184_v21  ;;  %v189_v21 = vld [vmem:[%s31001_s0 + $0x1b8] sm:$0xff] }
  0xc5   :  { %23041 = vmatpush3.bf16.msra.mxu1 %v22750_v41  ;;  %19320 = vmatprep.mubr.f32.mxu1 %v26692_v38  ;;  %v26762_v41 = vld [vmem:[#allocation2 + $0xa9] sm:$0xff]  ;;  %255 = vst.msk [vmem:[#allocation2 + $0x2d9] sm:$0xff] %vm199_vm0, %v189_v21  ;;  %v1397_v21 = vld [vmem:[#allocation2 + $0x38] sm:$0xff] }
  0xc6   :  { %23043 = vmatprep.subr.bf16.mxu1 %v22754_v45  ;;  %18817 = vmatmul.mubr.f32.gmra.mrb[4].mxu0 %v26702_v61 }
  0xc7   :  { %22757 = vmatpush3.bf16.msra.mxu0 %v22754_v45  ;;  %18819 = vmatprep.mubr.f32.mxu0 %v26708_v63 }
  0xc8   :  { %19321 = vmatmul.mubr.f32.gmra.mrb[4].mxu1 %v26704_v62  ;;  %22759 = vmatprep.subr.bf16.mxu0 %v22758_v5 }
  0xc9   :  { %23045 = vmatpush3.bf16.msra.mxu1 %v22754_v45  ;;  %19323 = vmatprep.mubr.f32.mxu1 %v26710_v0  ;;  %v15304_v45 = vld [vmem:[%s31000_s1 + $0x2f0] sm:$0xff] }
  0xca   :  { %23047 = vmatprep.subr.bf16.mxu1 %v22758_v5  ;;  %18820 = vmatmul.mubr.f32.gmra.mrb[6].mxu0 %v26720_v8  ;;  %v22774_v19 = vpack.c.bf16 %v15305_v55, %v15304_v45  ;;  %v26802_v45 = vld [vmem:[#allocation2 + $0x189] sm:$0xff]  ;;  %v166_v55 = vld [vmem:[%s31001_s0 + $0x100] sm:$0xff] }
  0xcb   :  { %22761 = vmatpush3.bf16.msra.mxu0 %v22758_v5  ;;  %18822 = vmatprep.mubr.f32.mxu0 %v26726_v13  ;;  %232 = vst.msk [vmem:[#allocation2 + $0x1c9] sm:$0xff] %vm199_vm0, %v166_v55  ;;  %v168_v55 = vld [vmem:[%s31001_s0 + $0x110] sm:$0xff] }
  0xcc   :  { %19324 = vmatmul.mubr.f32.gmra.mrb[6].mxu1 %v26722_v12  ;;  %22763 = vmatprep.subr.bf16.mxu0 %v22762_v15  ;;  %234 = vst.msk [vmem:[#allocation2 + $0x1e1] sm:$0xff] %vm199_vm0, %v168_v55 }
  0xcd   :  { %23049 = vmatpush3.bf16.msra.mxu1 %v22758_v5  ;;  %19326 = vmatprep.mubr.f32.mxu1 %v26728_v14  ;;  %v26776_v5 = vld [vmem:[#allocation2 + $0x171] sm:$0xff] }
  0xce   :  { %23051 = vmatprep.subr.bf16.mxu1 %v22762_v15  ;;  %18823 = vmatmul.mubr.f32.gmra.mrb[8].mxu0 %v26738_v22 }
  0xcf   :  { %22765 = vmatpush3.bf16.msra.mxu0 %v22762_v15  ;;  %18825 = vmatprep.mubr.f32.mxu0 %v26744_v28 }
  0xd0   :  { %19327 = vmatmul.mubr.f32.gmra.mrb[8].mxu1 %v26740_v26  ;;  %22767 = vmatprep.subr.bf16.mxu0 %v22766_v33 }
  0xd1   :  { %23053 = vmatpush3.bf16.msra.mxu1 %v22762_v15  ;;  %19329 = vmatprep.mubr.f32.mxu1 %v26746_v29  ;;  %v26785_v15 = vld [vmem:[#allocation2 + $0x181] sm:$0xff] }
  0xd2   :  { %23055 = vmatprep.subr.bf16.mxu1 %v22766_v33  ;;  %18826 = vmatmul.mubr.f32.gmra.mrb[10].mxu0 %v26756_v50  ;;  %31094 = vst [vmem:[#allocation4_spill] sm:$0xff] %v26785_v15 }
  0xd3   :  { %22769 = vmatpush3.bf16.msra.mxu0 %v22766_v33  ;;  %18828 = vmatprep.mubr.f32.mxu0 %v26762_v41 }
  0xd4   :  { %19330 = vmatmul.mubr.f32.gmra.mrb[10].mxu1 %v26758_v36  ;;  %22771 = vmatprep.subr.bf16.mxu0 %v22770_v47 }
  0xd5   :  { %23057 = vmatpush3.bf16.msra.mxu1 %v22766_v33  ;;  %19332 = vmatprep.mubr.f32.mxu1 %v26764_v37  ;;  %v15306_v33 = vld [vmem:[%s31000_s1 + $0x300] sm:$0xff] }
  0xd6   :  { %23059 = vmatprep.subr.bf16.mxu1 %v22770_v47  ;;  %18829 = vmatmul.mubr.f32.gmra.mrb[12].mxu0 %v26774_v56  ;;  %v22778_v6 = vpack.c.bf16 %v15307_v34, %v15306_v33  ;;  %v15309_v33 = vld [vmem:[%s31000_s1 + $0x318] sm:$0xff]  ;;  %v183_v34 = vld [vmem:[%s31001_s0 + $0x188] sm:$0xff] }
  0xd7   :  { %22773 = vmatpush3.bf16.msra.mxu0 %v22770_v47  ;;  %18831 = vmatprep.mubr.f32.mxu0 %v26783_v7  ;;  %249 = vst.msk [vmem:[#allocation2 + $0x291] sm:$0xff] %vm199_vm0, %v183_v34  ;;  %v187_v34 = vld [vmem:[%s31001_s0 + $0x1a8] sm:$0xff] }
  0xd8   :  { %19333 = vmatmul.mubr.f32.gmra.mrb[12].mxu1 %v26776_v5  ;;  %22775 = vmatprep.subr.bf16.mxu0 %v22774_v19  ;;  %253 = vst.msk [vmem:[#allocation2 + $0x2c1] sm:$0xff] %vm199_vm0, %v187_v34  ;;  %v31095_v34 = vld [vmem:[#allocation3_spill] sm:$0xff] }
  0xd9   :  { %23061 = vmatpush3.bf16.msra.mxu1 %v22770_v47  ;;  %19335 = vmatprep.mubr.f32.mxu1 %v26785_v15  ;;  %v182_v47 = vld [vmem:[%s31001_s0 + $0x180] sm:$0xff]  ;;  %v15308_v15 = vld [vmem:[%s31000_s1 + $0x310] sm:$0xff] }
  0xda   :  { %23063 = vmatprep.subr.bf16.mxu1 %v22774_v19  ;;  %18832 = vmatmul.mubr.f32.gmra.mrb[14].mxu0 %v26800_v35  ;;  %248 = vst.msk [vmem:[#allocation2 + $0x289] sm:$0xff] %vm199_vm0, %v182_v47  ;;  %v22782_v47 = vpack.c.bf16 %v15309_v33, %v15308_v15  ;;  %v185_v15 = vld [vmem:[%s31001_s0 + $0x198] sm:$0xff] }
  0xdb   :  { %22777 = vmatpush3.bf16.msra.mxu0 %v22774_v19  ;;  %18866 = vmatprep.mubr.f32.mxu0 %v26458_v49  ;;  %v15310_v49 = vld [vmem:[%s31000_s1 + $0x320] sm:$0xff]  ;;  %251 = vst.msk [vmem:[#allocation2 + $0x2a9] sm:$0xff] %vm199_vm0, %v185_v15  ;;  %v192_v15 = vld [vmem:[%s31001_s0 + $0x1d0] sm:$0xff] }
  0xdc   :  { %19336 = vmatmul.mubr.f32.gmra.mrb[14].mxu1 %v26802_v45  ;;  %22779 = vmatprep.subr.bf16.mxu0 %v22778_v6  ;;  %258 = vst.msk [vmem:[#allocation2 + $0x301] sm:$0xff] %vm199_vm0, %v192_v15  ;;  %v3187_v15 = vld [vmem:[#allocation2 + $0x120] sm:$0xff] }
  0xdd   :  { %23065 = vmatpush3.bf16.msra.mxu1 %v22774_v19  ;;  %19370 = vmatprep.mubr.f32.mxu1 %v26460_v51  ;;  %v169_v19 = vld [vmem:[%s31001_s0 + $0x118] sm:$0xff]  ;;  %v15311_v51 = vld [vmem:[%s31000_s1 + $0x328] sm:$0xff] }
  0xde   :  { %23067 = vmatprep.subr.bf16.mxu1 %v22778_v6  ;;  %18867 = vmatmul.mubr.f32.vlgmr.msra.gmra.mrb[0].mxu0 %v26468_v58  ;;  %235 = vst.msk [vmem:[#allocation2 + $0x1e9] sm:$0xff] %vm199_vm0, %v169_v19  ;;  %v170_v58 = vld [vmem:[%s31001_s0 + $0x120] sm:$0xff]  ;;  %v22786_v33 = vpack.c.bf16 %v15311_v51, %v15310_v49  ;;  %v175_v49 = vld [vmem:[%s31001_s0 + $0x148] sm:$0xff] }
  0xdf   :  { %22781 = vmatpush3.bf16.msra.mxu0 %v22778_v6  ;;  %18869 = vmatprep.mubr.f32.mxu0 %v26474_v60  ;;  %236 = vst.msk [vmem:[#allocation2 + $0x1f9] sm:$0xff] %vm199_vm0, %v170_v58  ;;  %v171_v60 = vld [vmem:[%s31001_s0 + $0x128] sm:$0xff]  ;;  %v190_v19 = vld [vmem:[%s31001_s0 + $0x1c0] sm:$0xff]  ;;  %241 = vst.msk [vmem:[#allocation2 + $0x231] sm:$0xff] %vm199_vm0, %v175_v49 }
  0xe0   :  { %19371 = vmatmul.mubr.f32.vlgmr.msra.gmra.mrb[0].mxu1 %v26470_v59  ;;  %v186_v59 = vld [vmem:[%s31001_s0 + $0x1a0] sm:$0xff]  ;;  %22783 = vmatprep.subr.bf16.mxu0 %v22782_v47  ;;  %237 = vst.msk [vmem:[#allocation2 + $0x201] sm:$0xff] %vm199_vm0, %v171_v60  ;;  %256 = vst.msk [vmem:[#allocation2 + $0x2e9] sm:$0xff] %vm199_vm0, %v190_v19  ;;  %v191_v51 = vld [vmem:[%s31001_s0 + $0x1c8] sm:$0xff] }
  0xe1   :  { %23069 = vmatpush3.bf16.msra.mxu1 %v22778_v6  ;;  %19373 = vmatprep.mubr.f32.mxu1 %v26476_v3  ;;  %252 = vst.msk [vmem:[#allocation2 + $0x2b9] sm:$0xff] %vm199_vm0, %v186_v59  ;;  %v15312_v3 = vld [vmem:[%s31000_s1 + $0x330] sm:$0xff]  ;;  %v15313_v6 = vld [vmem:[%s31000_s1 + $0x338] sm:$0xff]  ;;  %257 = vst.msk [vmem:[#allocation2 + $0x2f1] sm:$0xff] %vm199_vm0, %v191_v51 }
  0xe2   :  { %23071 = vmatprep.subr.bf16.mxu1 %v22782_v47  ;;  %18870 = vmatmul.mubr.f32.gmra.mrb[2].mxu0 %v26486_v9  ;;  %v172_v9 = vld [vmem:[%s31001_s0 + $0x130] sm:$0xff]  ;;  %v22790_v55 = vpack.c.bf16 %v15313_v6, %v15312_v3  ;;  %v177_v58 = vld [vmem:[%s31001_s0 + $0x158] sm:$0xff]  ;;  %v195_v3 = vld [vmem:[%s31001_s0 + $0x1e8] sm:$0xff] }
  0xe3   :  { %22785 = vmatpush3.bf16.msra.mxu0 %v22782_v47  ;;  %18872 = vmatprep.mubr.f32.mxu0 %v26492_v11  ;;  %238 = vst.msk [vmem:[#allocation2 + $0x211] sm:$0xff] %vm199_vm0, %v172_v9  ;;  %v173_v11 = vld [vmem:[%s31001_s0 + $0x138] sm:$0xff]  ;;  %243 = vst.msk [vmem:[#allocation2 + $0x249] sm:$0xff] %vm199_vm0, %v177_v58  ;;  %v15322_v9 = vld [vmem:[%s31000_s1 + $0x380] sm:$0xff] }
  0xe4   :  { %19374 = vmatmul.mubr.f32.gmra.mrb[2].mxu1 %v26488_v10  ;;  %v188_v10 = vld [vmem:[%s31001_s0 + $0x1b0] sm:$0xff]  ;;  %22787 = vmatprep.subr.bf16.mxu0 %v22786_v33  ;;  %239 = vst.msk [vmem:[#allocation2 + $0x219] sm:$0xff] %vm199_vm0, %v173_v11  ;;  %v193_v59 = vld [vmem:[%s31001_s0 + $0x1d8] sm:$0xff]  ;;  %261 = vst.msk [vmem:[#allocation2 + $0x321] sm:$0xff] %vm199_vm0, %v195_v3 }
  0xe5   :  { %23073 = vmatpush3.bf16.msra.mxu1 %v22782_v47  ;;  %19376 = vmatprep.mubr.f32.mxu1 %v26494_v16  ;;  %254 = vst.msk [vmem:[#allocation2 + $0x2d1] sm:$0xff] %vm199_vm0, %v188_v10  ;;  %v15314_v16 = vld [vmem:[%s31000_s1 + $0x340] sm:$0xff]  ;;  %v15315_v47 = vld [vmem:[%s31000_s1 + $0x348] sm:$0xff]  ;;  %259 = vst.msk [vmem:[#allocation2 + $0x309] sm:$0xff] %vm199_vm0, %v193_v59 }
  0xe6   :  { %23075 = vmatprep.subr.bf16.mxu1 %v22786_v33  ;;  %18873 = vmatmul.mubr.f32.gmra.mrb[4].mxu0 %v26504_v24  ;;  %v174_v24 = vld [vmem:[%s31001_s0 + $0x140] sm:$0xff]  ;;  %v15321_v60 = vld [vmem:[%s31000_s1 + $0x378] sm:$0xff]  ;;  %v27002_v10 = vld [vmem:[#allocation2 + $0x18a] sm:$0xff] }
  0xe7   :  { %22789 = vmatpush3.bf16.msra.mxu0 %v22786_v33  ;;  %18875 = vmatprep.mubr.f32.mxu0 %v26510_v30  ;;  %240 = vst.msk [vmem:[#allocation2 + $0x229] sm:$0xff] %vm199_vm0, %v174_v24  ;;  %v15316_v30 = vld [vmem:[%s31000_s1 + $0x350] sm:$0xff]  ;;  %v3184_v24 = vld [vmem:[#allocation2 + $0xf8] sm:$0xff]  ;;  %v3185_v19 = vld [vmem:[#allocation2 + $0x108] sm:$0xff] }
  0xe8   :  { %19377 = vmatmul.mubr.f32.gmra.mrb[4].mxu1 %v26506_v25  ;;  %22791 = vmatprep.subr.bf16.mxu0 %v22790_v55  ;;  %v22794_v25 = vpack.c.bf16 %v15315_v47, %v15314_v16  ;;  %v15324_v16 = vld [vmem:[%s31000_s1 + $0x390] sm:$0xff]  ;;  %v15325_v47 = vld [vmem:[%s31000_s1 + $0x398] sm:$0xff]  ;;  %v1401_v59 = vld [vmem:[#allocation2 + $0x68] sm:$0xff] }
  0xe9   :  { %23077 = vmatpush3.bf16.msra.mxu1 %v22786_v33  ;;  %19379 = vmatprep.mubr.f32.mxu1 %v26512_v31  ;;  %v15317_v31 = vld [vmem:[%s31000_s1 + $0x358] sm:$0xff]  ;;  %v22814_v49 = vpack.c.bf16 %v15325_v47, %v15324_v16  ;;  %v1399_v51 = vld [vmem:[#allocation2 + $0x50] sm:$0xff]  ;;  %v1403_v3 = vld [vmem:[#allocation2 + $0x80] sm:$0xff] }
  0xea   :  { %23079 = vmatprep.subr.bf16.mxu1 %v22790_v55  ;;  %18876 = vmatmul.mubr.f32.gmra.mrb[6].mxu0 %v26522_v39  ;;  %v176_v39 = vld [vmem:[%s31001_s0 + $0x150] sm:$0xff]  ;;  %v3192_v16 = vld [vmem:[#allocation2 + $0x158] sm:$0xff]  ;;  %v1406_v47 = vld [vmem:[#allocation2 + $0xa8] sm:$0xff] }
  0xeb   :  { %22793 = vmatpush3.bf16.msra.mxu0 %v22790_v55  ;;  %18878 = vmatprep.mubr.f32.mxu0 %v26528_v43  ;;  %242 = vst.msk [vmem:[#allocation2 + $0x241] sm:$0xff] %vm199_vm0, %v176_v39  ;;  %v15318_v43 = vld [vmem:[%s31000_s1 + $0x360] sm:$0xff]  ;;  %v3186_v39 = vld [vmem:[#allocation2 + $0x110] sm:$0xff] }
  0xec   :  { %19380 = vmatmul.mubr.f32.gmra.mrb[6].mxu1 %v26524_v42  ;;  %22795 = vmatprep.subr.bf16.mxu0 %v22794_v25  ;;  %v22798_v42 = vpack.c.bf16 %v15317_v31, %v15316_v30  ;;  %v15326_v30 = vld [vmem:[%s31000_s1 + $0x3a0] sm:$0xff]  ;;  %v15327_v31 = vld [vmem:[%s31000_s1 + $0x3a8] sm:$0xff] }
  0xed   :  { %23081 = vmatpush3.bf16.msra.mxu1 %v22790_v55  ;;  %19382 = vmatprep.mubr.f32.mxu1 %v26530_v44  ;;  %v15319_v44 = vld [vmem:[%s31000_s1 + $0x368] sm:$0xff]  ;;  %v3183_v55 = vld [vmem:[#allocation2 + $0xf0] sm:$0xff]  ;;  %v22818_v58 = vpack.c.bf16 %v15327_v31, %v15326_v30  ;;  %v1408_v31 = vld [vmem:[#allocation2 + $0xc0] sm:$0xff] }
  0xee   :  { %23083 = vmatprep.subr.bf16.mxu1 %v22794_v25  ;;  %18879 = vmatmul.mubr.f32.gmra.mrb[8].mxu0 %v26540_v48  ;;  %v178_v48 = vld [vmem:[%s31001_s0 + $0x160] sm:$0xff]  ;;  %v22802_v33 = vpack.c.bf16 %v15319_v44, %v15318_v43  ;;  %v15328_v43 = vld [vmem:[%s31000_s1 + $0x3b0] sm:$0xff]  ;;  %v15329_v44 = vld [vmem:[%s31000_s1 + $0x3b8] sm:$0xff] }
  0xef   :  { %22797 = vmatpush3.bf16.msra.mxu0 %v22794_v25  ;;  %18881 = vmatprep.mubr.f32.mxu0 %v26546_v53  ;;  %244 = vst.msk [vmem:[#allocation2 + $0x259] sm:$0xff] %vm199_vm0, %v178_v48  ;;  %v179_v53 = vld [vmem:[%s31001_s0 + $0x168] sm:$0xff]  ;;  %v3194_v30 = vld [vmem:[#allocation2 + $0x170] sm:$0xff] }
  0xf0   :  { %19383 = vmatmul.mubr.f32.gmra.mrb[8].mxu1 %v26542_v52  ;;  %v194_v52 = vld [vmem:[%s31001_s0 + $0x1e0] sm:$0xff]  ;;  %22799 = vmatprep.subr.bf16.mxu0 %v22798_v42  ;;  %245 = vst.msk [vmem:[#allocation2 + $0x261] sm:$0xff] %vm199_vm0, %v179_v53  ;;  %v3188_v48 = vld [vmem:[#allocation2 + $0x128] sm:$0xff]  ;;  %v22822_v53 = vpack.c.bf16 %v15329_v44, %v15328_v43 }
  0xf1   :  { %23085 = vmatpush3.bf16.msra.mxu1 %v22794_v25  ;;  %19385 = vmatprep.mubr.f32.mxu1 %v26548_v57  ;;  %260 = vst.msk [vmem:[#allocation2 + $0x319] sm:$0xff] %vm199_vm0, %v194_v52  ;;  %v15320_v57 = vld [vmem:[%s31000_s1 + $0x370] sm:$0xff]  ;;  %v1398_v25 = vld [vmem:[#allocation2 + $0x48] sm:$0xff]  ;;  %v1402_v52 = vld [vmem:[#allocation2 + $0x78] sm:$0xff] }
  0xf2   :  { %23087 = vmatprep.subr.bf16.mxu1 %v22798_v42  ;;  %18882 = vmatmul.mubr.f32.gmra.mrb[10].mxu0 %v26558_v17  ;;  %v26988_v17 = vld [vmem:[#allocation2 + $0xc2] sm:$0xff]  ;;  %v22806_v6 = vpack.c.bf16 %v15321_v60, %v15320_v57 }
  0xf3   :  { %22801 = vmatpush3.bf16.msra.mxu0 %v22798_v42  ;;  %18884 = vmatprep.mubr.f32.mxu0 %v26564_v23  ;;  %v15323_v23 = vld [vmem:[%s31000_s1 + $0x388] sm:$0xff]  ;;  %v15330_v57 = vld [vmem:[%s31000_s1 + $0x3c0] sm:$0xff] }
  0xf4   :  { %19386 = vmatmul.mubr.f32.gmra.mrb[10].mxu1 %v26560_v18  ;;  %22803 = vmatprep.subr.bf16.mxu0 %v22802_v33  ;;  %v26990_v18 = vld [vmem:[#allocation2 + $0x182] sm:$0xff]  ;;  %v22810_v11 = vpack.c.bf16 %v15323_v23, %v15322_v9  ;;  %v3191_v9 = vld [vmem:[#allocation2 + $0x150] sm:$0xff] }
  0xf5   :  { %23089 = vmatpush3.bf16.msra.mxu1 %v22798_v42  ;;  %19388 = vmatprep.mubr.f32.mxu1 %v26566_v32  ;;  %v27000_v32 = vld [vmem:[#allocation2 + $0xca] sm:$0xff]  ;;  %v1400_v42 = vld [vmem:[#allocation2 + $0x60] sm:$0xff] }
  0xf6   :  { %23091 = vmatprep.subr.bf16.mxu1 %v22802_v33  ;;  %18885 = vmatmul.mubr.f32.gmra.mrb[12].mxu0 %v26576_v46  ;;  %v1396_v46 = vld [vmem:[#allocation2 + $0x30] sm:$0xff]  ;;  %v15331_v60 = vld [vmem:[%s31000_s1 + $0x3c8] sm:$0xff]  ;;  %v15338_v44 = vld [vmem:[%s31000_s1 + $0x400] sm:$0xff] }
  0xf7   :  { %22805 = vmatpush3.bf16.msra.mxu0 %v22802_v33  ;;  %18887 = vmatprep.mubr.f32.mxu0 %v26988_v17  ;;  %v22826_v23 = vpack.c.bf16 %v15331_v60, %v15330_v57  ;;  %v15342_v57 = vld [vmem:[%s31000_s1 + $0x420] sm:$0xff]  ;;  %v15343_v60 = vld [vmem:[%s31000_s1 + $0x428] sm:$0xff] }
  0xf8   :  { %19389 = vmatmul.mubr.f32.gmra.mrb[12].mxu1 %v31095_v34  ;;  %22807 = vmatprep.subr.bf16.mxu0 %v22806_v6  ;;  %v1404_v34 = vld [vmem:[#allocation2 + $0x90] sm:$0xff] }
  0xf9   :  { %23093 = vmatpush3.bf16.msra.mxu1 %v22802_v33  ;;  %19391 = vmatprep.mubr.f32.mxu1 %v26990_v18  ;;  %v3189_v33 = vld [vmem:[#allocation2 + $0x138] sm:$0xff] }
  0xfa   :  { %23095 = vmatprep.subr.bf16.mxu1 %v22806_v6  ;;  %18888 = vmatmul.mubr.f32.gmra.mrb[14].mxu0 %v27000_v32 }
  0xfb   :  { %22809 = vmatpush3.bf16.msra.mxu0 %v22806_v6  ;;  %18922 = vmatprep.mubr.f32.mxu0 %v1396_v46  ;;  %v15332_v46 = vld [vmem:[%s31000_s1 + $0x3d0] sm:$0xff] }
  0xfc   :  { %19392 = vmatmul.mubr.f32.gmra.mrb[14].mxu1 %v27002_v10  ;;  %22811 = vmatprep.subr.bf16.mxu0 %v22810_v11 }
  0xfd   :  { %23097 = vmatpush3.bf16.msra.mxu1 %v22806_v6  ;;  %19426 = vmatprep.mubr.f32.mxu1 %v3183_v55  ;;  %v3190_v6 = vld [vmem:[#allocation2 + $0x140] sm:$0xff]  ;;  %v15333_v55 = vld [vmem:[%s31000_s1 + $0x3d8] sm:$0xff] }
  0xfe   :  { %23099 = vmatprep.subr.bf16.mxu1 %v22810_v11  ;;  %18923 = vmatmul.mubr.f32.vlgmr.msra.gmra.mrb[0].mxu0 %v1397_v21  ;;  %v3193_v21 = vld [vmem:[#allocation2 + $0x168] sm:$0xff] }
  0xff   :  { %22813 = vmatpush3.bf16.msra.mxu0 %v22810_v11  ;;  %18925 = vmatprep.mubr.f32.mxu0 %v1398_v25  ;;  %v15334_v25 = vld [vmem:[%s31000_s1 + $0x3e0] sm:$0xff] }
 0x100   :  { %19427 = vmatmul.mubr.f32.vlgmr.msra.gmra.mrb[0].mxu1 %v3184_v24  ;;  %22815 = vmatprep.subr.bf16.mxu0 %v22814_v49  ;;  %v22830_v24 = vpack.c.bf16 %v15333_v55, %v15332_v46  ;;  %v15486_v55 = vld [vmem:[%s31000_s1 + $0xa0] sm:$0xff] }
 0x101   :  { %23101 = vmatpush3.bf16.msra.mxu1 %v22810_v11  ;;  %19429 = vmatprep.mubr.f32.mxu1 %v3185_v19  ;;  %v1405_v11 = vld [vmem:[#allocation2 + $0x98] sm:$0xff]  ;;  %v15335_v19 = vld [vmem:[%s31000_s1 + $0x3e8] sm:$0xff] }
 0x102   :  { %23103 = vmatprep.subr.bf16.mxu1 %v22814_v49  ;;  %18926 = vmatmul.mubr.f32.gmra.mrb[2].mxu0 %v1399_v51  ;;  %v22834_v51 = vpack.c.bf16 %v15335_v19, %v15334_v25  ;;  %v15488_v19 = vld [vmem:[%s31000_s1 + $0xb0] sm:$0xff] }
 0x103   :  { %22817 = vmatpush3.bf16.msra.mxu0 %v22814_v49  ;;  %18928 = vmatprep.mubr.f32.mxu0 %v1400_v42  ;;  %v15337_v42 = vld [vmem:[%s31000_s1 + $0x3f8] sm:$0xff] }
 0x104   :  { %19430 = vmatmul.mubr.f32.gmra.mrb[2].mxu1 %v3186_v39  ;;  %22819 = vmatprep.subr.bf16.mxu0 %v22818_v58  ;;  %v15336_v39 = vld [vmem:[%s31000_s1 + $0x3f0] sm:$0xff] }
 0x105   :  { %23105 = vmatpush3.bf16.msra.mxu1 %v22814_v49  ;;  %19432 = vmatprep.mubr.f32.mxu1 %v3187_v15  ;;  %v1407_v49 = vld [vmem:[#allocation2 + $0xb0] sm:$0xff]  ;;  %v1409_v15 = vld [vmem:[#allocation2 + $0xc8] sm:$0xff]  ;;  %v22838_v43 = vpack.c.bf16 %v15337_v42, %v15336_v39  ;;  %v3575_v39 = vld [vmem:[#allocation2 + $0x13a] sm:$0xff] }
 0x106   :  { %23107 = vmatprep.subr.bf16.mxu1 %v22818_v58  ;;  %18929 = vmatmul.mubr.f32.gmra.mrb[4].mxu0 %v1401_v59  ;;  %v15339_v59 = vld [vmem:[%s31000_s1 + $0x408] sm:$0xff] }
 0x107   :  { %22821 = vmatpush3.bf16.msra.mxu0 %v22818_v58  ;;  %18931 = vmatprep.mubr.f32.mxu0 %v1402_v52  ;;  %v22842_v52 = vpack.c.bf16 %v15339_v59, %v15338_v44  ;;  %v3576_v44 = vld [vmem:[#allocation2 + $0x142] sm:$0xff]  ;;  %v1792_v59 = vld [vmem:[#allocation2 + $0x92] sm:$0xff] }
 0x108   :  { %19433 = vmatmul.mubr.f32.gmra.mrb[4].mxu1 %v3188_v48  ;;  %22823 = vmatprep.subr.bf16.mxu0 %v22822_v53  ;;  %v1411_v48 = vld [vmem:[#allocation2 + $0xe0] sm:$0xff] }
 0x109   :  { %23109 = vmatpush3.bf16.msra.mxu1 %v22818_v58  ;;  %19435 = vmatprep.mubr.f32.mxu1 %v3189_v33  ;;  %v1410_v58 = vld [vmem:[#allocation2 + $0xd8] sm:$0xff] }
 0x10a   :  { %23111 = vmatprep.subr.bf16.mxu1 %v22822_v53  ;;  %18932 = vmatmul.mubr.f32.gmra.mrb[6].mxu0 %v1403_v3  ;;  %v15341_v33 = vld [vmem:[%s31000_s1 + $0x418] sm:$0xff] }
 0x10b   :  { %22825 = vmatpush3.bf16.msra.mxu0 %v22822_v53  ;;  %18934 = vmatprep.mubr.f32.mxu0 %v1404_v34  ;;  %v15485_v3 = vld [vmem:[%s31000_s1 + $0x98] sm:$0xff] }
 0x10c   :  { %19436 = vmatmul.mubr.f32.gmra.mrb[6].mxu1 %v3190_v6  ;;  %22827 = vmatprep.subr.bf16.mxu0 %v22826_v23  ;;  %v1785_v6 = vld [vmem:[#allocation2 + $0x3a] sm:$0xff] }
 0x10d   :  { %23113 = vmatpush3.bf16.msra.mxu1 %v22822_v53  ;;  %19438 = vmatprep.mubr.f32.mxu1 %v3191_v9  ;;  %v3570_v34 = vld [vmem:[#allocation2 + $0xfa] sm:$0xff]  ;;  %v1786_v9 = vld [vmem:[#allocation2 + $0x4a] sm:$0xff] }
 0x10e   :  { %23115 = vmatprep.subr.bf16.mxu1 %v22826_v23  ;;  %18935 = vmatmul.mubr.f32.gmra.mrb[8].mxu0 %v1405_v11  ;;  %v15487_v11 = vld [vmem:[%s31000_s1 + $0xa8] sm:$0xff] }
 0x10f   :  { %22829 = vmatpush3.bf16.msra.mxu0 %v22826_v23  ;;  %18937 = vmatprep.mubr.f32.mxu0 %v1406_v47  ;;  %v3572_v47 = vld [vmem:[#allocation2 + $0x112] sm:$0xff]  ;;  %v23170_v25 = vpack.c.bf16 %v15487_v11, %v15486_v55  ;;  %v3876_v55 = vld [vmem:[#allocation2 + $0x1e9] sm:$0xff] }
 0x110   :  { %19439 = vmatmul.mubr.f32.gmra.mrb[8].mxu1 %v3192_v16  ;;  %22831 = vmatprep.subr.bf16.mxu0 %v22830_v24  ;;  %v1787_v16 = vld [vmem:[#allocation2 + $0x52] sm:$0xff]  ;;  %v5660_v11 = vld [vmem:[#allocation2 + $0x2a9] sm:$0xff] }
 0x111   :  { %23117 = vmatpush3.bf16.msra.mxu1 %v22826_v23  ;;  %19441 = vmatprep.mubr.f32.mxu1 %v3193_v21  ;;  %v3571_v23 = vld [vmem:[#allocation2 + $0x10a] sm:$0xff]  ;;  %v1788_v21 = vld [vmem:[#allocation2 + $0x62] sm:$0xff] }
 0x112   :  { %23119 = vmatprep.subr.bf16.mxu1 %v22830_v24  ;;  %18938 = vmatmul.mubr.f32.gmra.mrb[10].mxu0 %v1407_v49  ;;  %v15489_v49 = vld [vmem:[%s31000_s1 + $0xb8] sm:$0xff] }
 0x113   :  { %22833 = vmatpush3.bf16.msra.mxu0 %v22830_v24  ;;  %18940 = vmatprep.mubr.f32.mxu0 %v1408_v31  ;;  %v3574_v31 = vld [vmem:[#allocation2 + $0x12a] sm:$0xff]  ;;  %v23174_v42 = vpack.c.bf16 %v15489_v49, %v15488_v19  ;;  %v3878_v19 = vld [vmem:[#allocation2 + $0x201] sm:$0xff] }
 0x114   :  { %19442 = vmatmul.mubr.f32.gmra.mrb[10].mxu1 %v3194_v30  ;;  %22835 = vmatprep.subr.bf16.mxu0 %v22834_v51  ;;  %v1789_v30 = vld [vmem:[#allocation2 + $0x6a] sm:$0xff]  ;;  %v5662_v49 = vld [vmem:[#allocation2 + $0x2c1] sm:$0xff] }
 0x115   :  { %23121 = vmatpush3.bf16.msra.mxu1 %v22830_v24  ;;  %19444 = vmatprep.mubr.f32.mxu1 %v26652_v20  ;;  %v27058_v20 = vld [vmem:[#allocation2] sm:$0xff] }
 0x116   :  { %23123 = vmatprep.subr.bf16.mxu1 %v22834_v51  ;;  %18941 = vmatmul.mubr.f32.gmra.mrb[12].mxu0 %v1409_v15  ;;  %v3573_v24 = vld [vmem:[#allocation2 + $0x122] sm:$0xff] }
 0x117   :  { %22837 = vmatpush3.bf16.msra.mxu0 %v22834_v51  ;;  %18943 = vmatprep.mubr.f32.mxu0 %v1410_v58  ;;  %v15490_v15 = vld [vmem:[%s31000_s1 + $0xc0] sm:$0xff]  ;;  %v15491_v58 = vld [vmem:[%s31000_s1 + $0xc8] sm:$0xff] }
 0x118   :  { %19445 = vmatmul.mubr.f32.gmra.mrb[12].mxu1 %v26662_v27  ;;  %22839 = vmatprep.subr.bf16.mxu0 %v22838_v43  ;;  %v15340_v27 = vld [vmem:[%s31000_s1 + $0x410] sm:$0xff] }
 0x119   :  { %23125 = vmatpush3.bf16.msra.mxu1 %v22834_v51  ;;  %19447 = vmatprep.mubr.f32.mxu1 %v27058_v20  ;;  %v22846_v53 = vpack.c.bf16 %v15341_v33, %v15340_v27  ;;  %v1790_v51 = vld [vmem:[#allocation2 + $0x7a] sm:$0xff]  ;;  %v15492_v27 = vld [vmem:[%s31000_s1 + $0xd0] sm:$0xff] }
 0x11a   :  { %23127 = vmatprep.subr.bf16.mxu1 %v22838_v43  ;;  %18944 = vmatmul.mubr.f32.gmra.mrb[14].mxu0 %v1411_v48  ;;  %v3577_v48 = vld [vmem:[#allocation2 + $0x152] sm:$0xff] }
 0x11b   :  { %22841 = vmatpush3.bf16.msra.mxu0 %v22838_v43  ;;  %18978 = vmatprep.mubr.f32.mxu0 %v26674_v40  ;;  %v22850_v40 = vpack.c.bf16 %v15343_v60, %v15342_v57  ;;  %v15493_v33 = vld [vmem:[%s31000_s1 + $0xd8] sm:$0xff]  ;;  %v1794_v60 = vld [vmem:[#allocation2 + $0xaa] sm:$0xff] }
 0x11c   :  { %19448 = vmatmul.mubr.f32.gmra.mrb[14].mxu1 %v27058_v20  ;;  %22843 = vmatprep.subr.bf16.mxu0 %v22842_v52  ;;  %v3578_v57 = vld [vmem:[#allocation2 + $0x15a] sm:$0xff] }
 0x11d   :  { %23129 = vmatpush3.bf16.msra.mxu1 %v22838_v43  ;;  %19482 = vmatprep.mubr.f32.mxu1 %v26676_v54  ;;  %v15344_v54 = vld [vmem:[%s31000_s1 + $0x430] sm:$0xff]  ;;  %v1791_v43 = vld [vmem:[#allocation2 + $0x82] sm:$0xff] }
 0x11e   :  { %23131 = vmatprep.subr.bf16.mxu1 %v22842_v52  ;;  %18979 = vmatmul.mubr.f32.vlgmr.msra.gmra.mrb[0].mxu0 %v26684_v2  ;;  %v15345_v2 = vld [vmem:[%s31000_s1 + $0x438] sm:$0xff] }
 0x11f   :  { %22845 = vmatpush3.bf16.msra.mxu0 %v22842_v52  ;;  %18981 = vmatprep.mubr.f32.mxu0 %v26690_v1  ;;  %v15346_v1 = vld [vmem:[%s31000_s1 + $0x440] sm:$0xff] }
 0x120   :  { %19483 = vmatmul.mubr.f32.vlgmr.msra.gmra.mrb[0].mxu1 %v26686_v4  ;;  %22847 = vmatprep.subr.bf16.mxu0 %v22846_v53  ;;  %v22854_v4 = vpack.c.bf16 %v15345_v2, %v15344_v54  ;;  %v23182_v54 = vpack.c.bf16 %v15493_v33, %v15492_v27  ;;  %v15494_v2 = vld [vmem:[%s31000_s1 + $0xe0] sm:$0xff]  ;;  %v3882_v27 = vld [vmem:[#allocation2 + $0x231] sm:$0xff] }
 0x121   :  { %23133 = vmatpush3.bf16.msra.mxu1 %v22842_v52  ;;  %19485 = vmatprep.mubr.f32.mxu1 %v26692_v38  ;;  %v15347_v38 = vld [vmem:[%s31000_s1 + $0x448] sm:$0xff]  ;;  %v23178_v52 = vpack.c.bf16 %v15491_v58, %v15490_v15  ;;  %v3880_v15 = vld [vmem:[#allocation2 + $0x219] sm:$0xff]  ;;  %v5666_v33 = vld [vmem:[#allocation2 + $0x2f1] sm:$0xff] }
 0x122   :  { %23135 = vmatprep.subr.bf16.mxu1 %v22846_v53  ;;  %18982 = vmatmul.mubr.f32.gmra.mrb[2].mxu0 %v26702_v61  ;;  %v22858_v61 = vpack.c.bf16 %v15347_v38, %v15346_v1  ;;  %v1795_v1 = vld [vmem:[#allocation2 + $0xb2] sm:$0xff] }
 0x123   :  { %22849 = vmatpush3.bf16.msra.mxu0 %v22846_v53  ;;  %18984 = vmatprep.mubr.f32.mxu0 %v26708_v63  ;;  %v15349_v63 = vld [vmem:[%s31000_s1 + $0x458] sm:$0xff] }
 0x124   :  { %19486 = vmatmul.mubr.f32.gmra.mrb[2].mxu1 %v26704_v62  ;;  %22851 = vmatprep.subr.bf16.mxu0 %v22850_v40  ;;  %v15348_v62 = vld [vmem:[%s31000_s1 + $0x450] sm:$0xff]  ;;  %v5664_v58 = vld [vmem:[#allocation2 + $0x2d9] sm:$0xff] }
 0x125   :  { %23137 = vmatpush3.bf16.msra.mxu1 %v22846_v53  ;;  %19488 = vmatprep.mubr.f32.mxu1 %v26710_v0  ;;  %v22862_v0 = vpack.c.bf16 %v15349_v63, %v15348_v62  ;;  %v1793_v53 = vld [vmem:[#allocation2 + $0x9a] sm:$0xff]  ;;  %v3580_v38 = vld [vmem:[#allocation2 + $0x172] sm:$0xff] }
 0x126   :  { %23139 = vmatprep.subr.bf16.mxu1 %v22850_v40  ;;  %18985 = vmatmul.mubr.f32.gmra.mrb[4].mxu0 %v26720_v8  ;;  %v15350_v8 = vld [vmem:[%s31000_s1 + $0x460] sm:$0xff]  ;;  %v197_v63 = vld [vmem:[%s31001_s0 + $0x1f8] sm:$0xff] }
 0x127   :  { %22853 = vmatpush3.bf16.msra.mxu0 %v22850_v40  ;;  %18987 = vmatprep.mubr.f32.mxu0 %v26726_v13  ;;  %263 = vst.msk [vmem:[#allocation2 + $0x339] sm:$0xff] %vm199_vm0, %v197_v63  ;;  %v15499_v63 = vld [vmem:[%s31000_s1 + $0x108] sm:$0xff] }
 0x128   :  { %19489 = vmatmul.mubr.f32.gmra.mrb[4].mxu1 %v26722_v12  ;;  %22855 = vmatprep.subr.bf16.mxu0 %v22854_v4  ;;  %v15351_v12 = vld [vmem:[%s31000_s1 + $0x468] sm:$0xff] }
 0x129   :  { %23141 = vmatpush3.bf16.msra.mxu1 %v22850_v40  ;;  %19491 = vmatprep.mubr.f32.mxu1 %v26728_v14  ;;  %v22866_v13 = vpack.c.bf16 %v15351_v12, %v15350_v8  ;;  %v15352_v14 = vld [vmem:[%s31000_s1 + $0x470] sm:$0xff]  ;;  %v15497_v8 = vld [vmem:[%s31000_s1 + $0xf8] sm:$0xff] }
 0x12a   :  { %23143 = vmatprep.subr.bf16.mxu1 %v22854_v4  ;;  %18988 = vmatmul.mubr.f32.gmra.mrb[6].mxu0 %v26738_v22  ;;  %v15353_v22 = vld [vmem:[%s31000_s1 + $0x478] sm:$0xff]  ;;  %v3579_v40 = vld [vmem:[#allocation2 + $0x16a] sm:$0xff] }
 0x12b   :  { %22857 = vmatpush3.bf16.msra.mxu0 %v22854_v4  ;;  %18990 = vmatprep.mubr.f32.mxu0 %v26744_v28  ;;  %v1604_v28 = vld [vmem:[#allocation2 + $0xd9] sm:$0xff] }
 0x12c   :  { %19492 = vmatmul.mubr.f32.gmra.mrb[6].mxu1 %v26740_v26  ;;  %22859 = vmatprep.subr.bf16.mxu0 %v22858_v61  ;;  %v31096_v26 = vld [vmem:[#allocation4_spill] sm:$0xff]  ;;  %v1798_v12 = vld [vmem:[#allocation2 + $0xda] sm:$0xff] }
 0x12d   :  { %23145 = vmatpush3.bf16.msra.mxu1 %v22854_v4  ;;  %19494 = vmatprep.mubr.f32.mxu1 %v26746_v29  ;;  %v3390_v29 = vld [vmem:[#allocation2 + $0x199] sm:$0xff]  ;;  %v15495_v4 = vld [vmem:[%s31000_s1 + $0xe8] sm:$0xff] }
 0x12e   :  { %23147 = vmatprep.subr.bf16.mxu1 %v22858_v61  ;;  %18991 = vmatmul.mubr.f32.gmra.mrb[8].mxu0 %v26756_v50  ;;  %v22870_v50 = vpack.c.bf16 %v15353_v22, %v15352_v14  ;;  %v23186_v62 = vpack.c.bf16 %v15495_v4, %v15494_v2  ;;  %v3855_v22 = vld [vmem:[%s31000_s1] sm:$0xff]  ;;  %v3884_v2 = vld [vmem:[#allocation2 + $0x249] sm:$0xff] }
 0x12f   :  { %22861 = vmatpush3.bf16.msra.mxu0 %v22858_v61  ;;  %18993 = vmatprep.mubr.f32.mxu0 %v26762_v41  ;;  %v15483_v41 = vld [vmem:[%s31000_s1 + $0x88] sm:$0xff] }
 0x130   :  { %19495 = vmatmul.mubr.f32.gmra.mrb[8].mxu1 %v26758_v36  ;;  %22863 = vmatprep.subr.bf16.mxu0 %v22862_v0  ;;  %v15482_v36 = vld [vmem:[%s31000_s1 + $0x80] sm:$0xff]  ;;  %v5668_v4 = vld [vmem:[#allocation2 + $0x309] sm:$0xff] }
 0x131   :  { %23149 = vmatpush3.bf16.msra.mxu1 %v22858_v61  ;;  %19497 = vmatprep.mubr.f32.mxu1 %v26764_v37  ;;  %v1605_v37 = vld [vmem:[#allocation2 + $0xe1] sm:$0xff]  ;;  %v196_v61 = vld [vmem:[%s31001_s0 + $0x1f0] sm:$0xff] }
 0x132   :  { %23151 = vmatprep.subr.bf16.mxu1 %v22862_v0  ;;  %18994 = vmatmul.mubr.f32.gmra.mrb[10].mxu0 %v26774_v56  ;;  %v3391_v56 = vld [vmem:[#allocation2 + $0x1a1] sm:$0xff]  ;;  %262 = vst.msk [vmem:[#allocation2 + $0x331] sm:$0xff] %vm199_vm0, %v196_v61 }
 0x133   :  { %22865 = vmatpush3.bf16.msra.mxu0 %v22862_v0  ;;  %18996 = vmatprep.mubr.f32.mxu0 %v26783_v7  ;;  %v3569_v7 = vld [vmem:[#allocation2 + $0xf2] sm:$0xff] }
 0x134   :  { %19498 = vmatmul.mubr.f32.gmra.mrb[10].mxu1 %v26776_v5  ;;  %22867 = vmatprep.subr.bf16.mxu0 %v22866_v13  ;;  %v1784_v5 = vld [vmem:[#allocation2 + $0x32] sm:$0xff] }
 0x135   :  { %23153 = vmatpush3.bf16.msra.mxu1 %v22862_v0  ;;  %19500 = vmatprep.mubr.f32.mxu1 %v31096_v26  ;;  %v15496_v0 = vld [vmem:[%s31000_s1 + $0xf0] sm:$0xff]  ;;  %v3856_v26 = vld [vmem:[%s31000_s1 + $0x8] sm:$0xff] }
 0x136   :  { %23155 = vmatprep.subr.bf16.mxu1 %v22866_v13  ;;  %18997 = vmatmul.mubr.f32.gmra.mrb[12].mxu0 %v26800_v35  ;;  %v23162_v35 = vpack.c.bf16 %v15483_v41, %v15482_v36  ;;  %v23190_v14 = vpack.c.bf16 %v15497_v8, %v15496_v0  ;;  %v3872_v36 = vld [vmem:[#allocation2 + $0x1b9] sm:$0xff]  ;;  %v3886_v0 = vld [vmem:[#allocation2 + $0x261] sm:$0xff] }
 0x137   :  { %22869 = vmatpush3.bf16.msra.mxu0 %v22866_v13  ;;  %18999 = vmatprep.mubr.f32.mxu0 %v1604_v28  ;;  %v3871_v28 = vld [vmem:[#allocation2 + $0x1b1] sm:$0xff]  ;;  %v5656_v41 = vld [vmem:[#allocation2 + $0x279] sm:$0xff]  ;;  %v5670_v8 = vld [vmem:[#allocation2 + $0x321] sm:$0xff] }
 0x138   :  { %19501 = vmatmul.mubr.f32.gmra.mrb[12].mxu1 %v26802_v45  ;;  %22871 = vmatprep.subr.bf16.mxu0 %v22870_v50  ;;  %v15484_v45 = vld [vmem:[%s31000_s1 + $0x90] sm:$0xff] }
 0x139   :  { %23157 = vmatpush3.bf16.msra.mxu1 %v22866_v13  ;;  %19503 = vmatprep.mubr.f32.mxu1 %v3390_v29  ;;  %v23166_v46 = vpack.c.bf16 %v15485_v3, %v15484_v45  ;;  %v3583_v13 = vld [vmem:[#allocation2 + $0x19a] sm:$0xff]  ;;  %v23194_v29 = vpack.c.bf16 %v3856_v26, %v3855_v22  ;;  %v3874_v45 = vld [vmem:[#allocation2 + $0x1d1] sm:$0xff] }
 0x13a   :  { %23159 = vmatprep.subr.bf16.mxu1 %v22870_v50  ;;  %19000 = vmatmul.mubr.f32.gmra.mrb[14].mxu0 %v1605_v37  ;;  %v3873_v37 = vld [vmem:[#allocation2 + $0x1c9] sm:$0xff]  ;;  %v5658_v3 = vld [vmem:[#allocation2 + $0x291] sm:$0xff] }
 0x13b   :  { %22873 = vmatpush3.bf16.msra.mxu0 %v22870_v50  ;;  %19034 = vmatprep.mubr.f32.mxu0 %v1784_v5  ;;  %v15501_v22 = vld [vmem:[%s31000_s1 + $0x118] sm:$0xff] }
 0x13c   :  { %19504 = vmatmul.mubr.f32.gmra.mrb[14].mxu1 %v3391_v56  ;;  %23163 = vmatprep.subr.bf16.mxu0 %v23162_v35  ;;  %v5657_v56 = vld [vmem:[#allocation2 + $0x289] sm:$0xff]  ;;  %v27254_v26 = vld [vmem:[#allocation2 + $0x278] sm:$0xff] }
 0x13d   :  { %23161 = vmatpush3.bf16.msra.mxu1 %v22870_v50  ;;  %19538 = vmatprep.mubr.f32.mxu1 %v3569_v7  ;;  %v3858_v50 = vld [vmem:[%s31000_s1 + $0x18] sm:$0xff]  ;;  %v3859_v7 = vld [vmem:[%s31000_s1 + $0x20] sm:$0xff] }
 0x13e   :  { %23451 = vmatprep.subr.bf16.mxu1 %v23162_v35  ;;  %19035 = vmatmul.mubr.f32.vlgmr.msra.gmra.mrb[0].mxu0 %v1785_v6  ;;  %v3875_v6 = vld [vmem:[#allocation2 + $0x1e1] sm:$0xff] }
 0x13f   :  { %23165 = vmatpush3.bf16.msra.mxu0 %v23162_v35  ;;  %19037 = vmatprep.mubr.f32.mxu0 %v1786_v9 }
 0x140   :  { %19539 = vmatmul.mubr.f32.vlgmr.msra.gmra.mrb[0].mxu1 %v3570_v34  ;;  %23167 = vmatprep.subr.bf16.mxu0 %v23166_v46  ;;  %v5659_v34 = vld [vmem:[#allocation2 + $0x2a1] sm:$0xff] }
 0x141   :  { %23453 = vmatpush3.bf16.msra.mxu1 %v23162_v35  ;;  %19541 = vmatprep.mubr.f32.mxu1 %v3571_v23  ;;  %v3860_v35 = vld [vmem:[%s31000_s1 + $0x28] sm:$0xff]  ;;  %v3861_v23 = vld [vmem:[%s31000_s1 + $0x30] sm:$0xff] }
 0x142   :  { %23455 = vmatprep.subr.bf16.mxu1 %v23166_v46  ;;  %19038 = vmatmul.mubr.f32.gmra.mrb[2].mxu0 %v1787_v16  ;;  %v23202_v9 = vpack.c.bf16 %v3860_v35, %v3859_v7  ;;  %v3877_v16 = vld [vmem:[#allocation2 + $0x1f9] sm:$0xff]  ;;  %v27290_v7 = vld [vmem:[#allocation2 + $0x2a8] sm:$0xff] }
 0x143   :  { %23169 = vmatpush3.bf16.msra.mxu0 %v23166_v46  ;;  %19040 = vmatprep.mubr.f32.mxu0 %v1788_v21  ;;  %v27294_v35 = vld [vmem:[#allocation2 + $0x1f8] sm:$0xff] }
 0x144   :  { %19542 = vmatmul.mubr.f32.gmra.mrb[2].mxu1 %v3572_v47  ;;  %23171 = vmatprep.subr.bf16.mxu0 %v23170_v25  ;;  %v5661_v47 = vld [vmem:[#allocation2 + $0x2b9] sm:$0xff] }
 0x145   :  { %23457 = vmatpush3.bf16.msra.mxu1 %v23166_v46  ;;  %19544 = vmatprep.mubr.f32.mxu1 %v3573_v24  ;;  %v3862_v46 = vld [vmem:[%s31000_s1 + $0x38] sm:$0xff]  ;;  %v3863_v24 = vld [vmem:[%s31000_s1 + $0x40] sm:$0xff] }
 0x146   :  { %23459 = vmatprep.subr.bf16.mxu1 %v23170_v25  ;;  %19041 = vmatmul.mubr.f32.gmra.mrb[4].mxu0 %v1789_v30  ;;  %v23206_v21 = vpack.c.bf16 %v3862_v46, %v3861_v23  ;;  %v3879_v30 = vld [vmem:[#allocation2 + $0x211] sm:$0xff]  ;;  %v27308_v23 = vld [vmem:[#allocation2 + $0x2c0] sm:$0xff] }
 0x147   :  { %23173 = vmatpush3.bf16.msra.mxu0 %v23170_v25  ;;  %19043 = vmatprep.mubr.f32.mxu0 %v1790_v51  ;;  %v27312_v46 = vld [vmem:[#allocation2 + $0x210] sm:$0xff] }
 0x148   :  { %19545 = vmatmul.mubr.f32.gmra.mrb[4].mxu1 %v3574_v31  ;;  %23175 = vmatprep.subr.bf16.mxu0 %v23174_v42  ;;  %v5663_v31 = vld [vmem:[#allocation2 + $0x2d1] sm:$0xff] }
 0x149   :  { %23461 = vmatpush3.bf16.msra.mxu1 %v23170_v25  ;;  %19547 = vmatprep.mubr.f32.mxu1 %v3575_v39  ;;  %v3864_v25 = vld [vmem:[%s31000_s1 + $0x48] sm:$0xff]  ;;  %v3865_v39 = vld [vmem:[%s31000_s1 + $0x50] sm:$0xff] }
 0x14a   :  { %23463 = vmatprep.subr.bf16.mxu1 %v23174_v42  ;;  %19044 = vmatmul.mubr.f32.gmra.mrb[6].mxu0 %v1791_v43  ;;  %v23210_v51 = vpack.c.bf16 %v3864_v25, %v3863_v24  ;;  %v3881_v43 = vld [vmem:[#allocation2 + $0x229] sm:$0xff]  ;;  %v27326_v24 = vld [vmem:[#allocation2 + $0x2d8] sm:$0xff] }
 0x14b   :  { %23177 = vmatpush3.bf16.msra.mxu0 %v23174_v42  ;;  %19046 = vmatprep.mubr.f32.mxu0 %v1792_v59  ;;  %v27330_v25 = vld [vmem:[#allocation2 + $0x228] sm:$0xff] }
 0x14c   :  { %19548 = vmatmul.mubr.f32.gmra.mrb[6].mxu1 %v3576_v44  ;;  %23179 = vmatprep.subr.bf16.mxu0 %v23178_v52  ;;  %v5665_v44 = vld [vmem:[#allocation2 + $0x2e9] sm:$0xff] }
 0x14d   :  { %23465 = vmatpush3.bf16.msra.mxu1 %v23174_v42  ;;  %19550 = vmatprep.mubr.f32.mxu1 %v3577_v48  ;;  %v3866_v42 = vld [vmem:[%s31000_s1 + $0x58] sm:$0xff]  ;;  %v3867_v48 = vld [vmem:[%s31000_s1 + $0x60] sm:$0xff] }
 0x14e   :  { %23467 = vmatprep.subr.bf16.mxu1 %v23178_v52  ;;  %19047 = vmatmul.mubr.f32.gmra.mrb[8].mxu0 %v1793_v53  ;;  %v23214_v59 = vpack.c.bf16 %v3866_v42, %v3865_v39  ;;  %v3883_v53 = vld [vmem:[#allocation2 + $0x241] sm:$0xff]  ;;  %v27344_v39 = vld [vmem:[#allocation2 + $0x2f0] sm:$0xff] }
 0x14f   :  { %23181 = vmatpush3.bf16.msra.mxu0 %v23178_v52  ;;  %19049 = vmatprep.mubr.f32.mxu0 %v1794_v60  ;;  %v27348_v42 = vld [vmem:[#allocation2 + $0x240] sm:$0xff] }
 0x150   :  { %19551 = vmatmul.mubr.f32.gmra.mrb[8].mxu1 %v3578_v57  ;;  %23183 = vmatprep.subr.bf16.mxu0 %v23182_v54  ;;  %v5667_v57 = vld [vmem:[#allocation2 + $0x301] sm:$0xff] }
 0x151   :  { %23469 = vmatpush3.bf16.msra.mxu1 %v23178_v52  ;;  %19553 = vmatprep.mubr.f32.mxu1 %v3579_v40  ;;  %v3868_v52 = vld [vmem:[%s31000_s1 + $0x68] sm:$0xff]  ;;  %v3869_v40 = vld [vmem:[%s31000_s1 + $0x70] sm:$0xff] }
 0x152   :  { %23471 = vmatprep.subr.bf16.mxu1 %v23182_v54  ;;  %19050 = vmatmul.mubr.f32.gmra.mrb[10].mxu0 %v1795_v1  ;;  %v23218_v60 = vpack.c.bf16 %v3868_v52, %v3867_v48  ;;  %v3885_v1 = vld [vmem:[#allocation2 + $0x259] sm:$0xff]  ;;  %v27362_v48 = vld [vmem:[#allocation2 + $0x308] sm:$0xff] }
 0x153   :  { %23185 = vmatpush3.bf16.msra.mxu0 %v23182_v54  ;;  %19052 = vmatprep.mubr.f32.mxu0 %v26988_v17  ;;  %v1799_v17 = vld [vmem:[#allocation2 + $0xe2] sm:$0xff]  ;;  %v27366_v52 = vld [vmem:[#allocation2 + $0x258] sm:$0xff] }
 0x154   :  { %19554 = vmatmul.mubr.f32.gmra.mrb[10].mxu1 %v3580_v38  ;;  %23187 = vmatprep.subr.bf16.mxu0 %v23186_v62  ;;  %v5669_v38 = vld [vmem:[#allocation2 + $0x319] sm:$0xff] }
 0x155   :  { %23473 = vmatpush3.bf16.msra.mxu1 %v23182_v54  ;;  %19556 = vmatprep.mubr.f32.mxu1 %v26990_v18  ;;  %v3584_v18 = vld [vmem:[#allocation2 + $0x1a2] sm:$0xff]  ;;  %v3870_v54 = vld [vmem:[%s31000_s1 + $0x78] sm:$0xff] }
 0x156   :  { %23475 = vmatprep.subr.bf16.mxu1 %v23186_v62  ;;  %19053 = vmatmul.mubr.f32.gmra.mrb[12].mxu0 %v27000_v32  ;;  %v5655_v32 = vld [vmem:[#allocation2 + $0x271] sm:$0xff]  ;;  %v23222_v61 = vpack.c.bf16 %v3870_v54, %v3869_v40  ;;  %v27380_v40 = vld [vmem:[#allocation2 + $0x320] sm:$0xff] }
 0x157   :  { %23189 = vmatpush3.bf16.msra.mxu0 %v23186_v62  ;;  %19055 = vmatprep.mubr.f32.mxu0 %v1798_v12  ;;  %v27246_v12 = vld [vmem:[#allocation2 + $0x270] sm:$0xff] }
 0x158   :  { %19557 = vmatmul.mubr.f32.gmra.mrb[12].mxu1 %v27002_v10  ;;  %23191 = vmatprep.subr.bf16.mxu0 %v23190_v14  ;;  %v3857_v10 = vld [vmem:[%s31000_s1 + $0x10] sm:$0xff] }
 0x159   :  { %23477 = vmatpush3.bf16.msra.mxu1 %v23186_v62  ;;  %19559 = vmatprep.mubr.f32.mxu1 %v3583_v13  ;;  %v23198_v5 = vpack.c.bf16 %v3858_v50, %v3857_v10  ;;  %v15498_v62 = vld [vmem:[%s31000_s1 + $0x100] sm:$0xff]  ;;  %v27270_v10 = vld [vmem:[#allocation2 + $0x1d0] sm:$0xff] }
 0x15a   :  { %23479 = vmatprep.subr.bf16.mxu1 %v23190_v14  ;;  %19056 = vmatmul.mubr.f32.gmra.mrb[14].mxu0 %v1799_v17  ;;  %v23226_v13 = vpack.c.bf16 %v15499_v63, %v15498_v62  ;;  %v27258_v17 = vld [vmem:[#allocation2 + $0x1c8] sm:$0xff]  ;;  %v27272_v50 = vld [vmem:[#allocation2 + $0x290] sm:$0xff]  ;;  %v5978_v62 = vld [vmem:[#allocation2 + $0x27a] sm:$0xff] }
 0x15b   :  { %23193 = vmatpush3.bf16.msra.mxu0 %v23190_v14  ;;  %19594 = vmatprep.mubr.f32.mxu0 %v3871_v28  ;;  %v4193_v54 = vld [vmem:[#allocation2 + $0x1b2] sm:$0xff]  ;;  %v27392_v63 = vld [vmem:[#allocation2 + $0x1ca] sm:$0xff] }
 0x15c   :  { %19560 = vmatmul.mubr.f32.gmra.mrb[14].mxu1 %v3584_v18  ;;  %23195 = vmatprep.subr.bf16.mxu0 %v23194_v29  ;;  %v27260_v18 = vld [vmem:[#allocation2 + $0x288] sm:$0xff] }
 0x15d   :  { %23481 = vmatpush3.bf16.msra.mxu1 %v23190_v14  ;;  %20098 = vmatprep.mubr.f32.mxu1 %v5655_v32  ;;  %v15500_v14 = vld [vmem:[%s31000_s1 + $0x110] sm:$0xff]  ;;  %v15502_v32 = vld [vmem:[%s31000_s1 + $0x120] sm:$0xff] }
 0x15e   :  { %23483 = vmatprep.subr.bf16.mxu1 %v23194_v29  ;;  %19595 = vmatmul.mubr.f32.vlgmr.msra.gmra.mrb[16].mxu0 %v3872_v36  ;;  %v23230_v28 = vpack.c.bf16 %v15501_v22, %v15500_v14  ;;  %v27278_v36 = vld [vmem:[#allocation2 + $0x2a0] sm:$0xff]  ;;  %v15519_v14 = vld [vmem:[%s31000_s1 + $0x1a8] sm:$0xff]  ;;  %v27402_v22 = vld [vmem:[#allocation2 + $0x1d2] sm:$0xff] }
 0x15f   :  { %23197 = vmatpush3.bf16.msra.mxu0 %v23194_v29  ;;  %19597 = vmatprep.mubr.f32.mxu0 %v3873_v37  ;;  %v15504_v37 = vld [vmem:[%s31000_s1 + $0x130] sm:$0xff] }
 0x160   :  { %20099 = vmatmul.mubr.f32.vlgmr.msra.gmra.mrb[16].mxu1 %v5656_v41  ;;  %23199 = vmatprep.subr.bf16.mxu0 %v23198_v5 }
 0x161   :  { %23485 = vmatpush3.bf16.msra.mxu1 %v23194_v29  ;;  %20101 = vmatprep.mubr.f32.mxu1 %v5657_v56  ;;  %v15503_v29 = vld [vmem:[%s31000_s1 + $0x128] sm:$0xff]  ;;  %v15505_v56 = vld [vmem:[%s31000_s1 + $0x138] sm:$0xff] }
 0x162   :  { %23487 = vmatprep.subr.bf16.mxu1 %v23198_v5  ;;  %19598 = vmatmul.mubr.f32.gmra.mrb[18].mxu0 %v3874_v45  ;;  %v23234_v41 = vpack.c.bf16 %v15503_v29, %v15502_v32  ;;  %v27296_v45 = vld [vmem:[#allocation2 + $0x2b8] sm:$0xff]  ;;  %v27408_v32 = vld [vmem:[#allocation2 + $0x1e2] sm:$0xff] }
 0x163   :  { %23201 = vmatpush3.bf16.msra.mxu0 %v23198_v5  ;;  %19600 = vmatprep.mubr.f32.mxu0 %v3875_v6  ;;  %v15506_v6 = vld [vmem:[%s31000_s1 + $0x140] sm:$0xff] }
 0x164   :  { %20102 = vmatmul.mubr.f32.gmra.mrb[18].mxu1 %v5658_v3  ;;  %23203 = vmatprep.subr.bf16.mxu0 %v23202_v9  ;;  %v23238_v3 = vpack.c.bf16 %v15505_v56, %v15504_v37  ;;  %v27410_v29 = vld [vmem:[#allocation2 + $0x2a2] sm:$0xff]  ;;  %v15520_v37 = vld [vmem:[%s31000_s1 + $0x1b0] sm:$0xff]  ;;  %v15521_v56 = vld [vmem:[%s31000_s1 + $0x1b8] sm:$0xff] }
 0x165   :  { %23489 = vmatpush3.bf16.msra.mxu1 %v23198_v5  ;;  %20104 = vmatprep.mubr.f32.mxu1 %v5659_v34  ;;  %v27288_v5 = vld [vmem:[#allocation2 + $0x1e8] sm:$0xff] }
 0x166   :  { %23491 = vmatprep.subr.bf16.mxu1 %v23202_v9  ;;  %19601 = vmatmul.mubr.f32.gmra.mrb[20].mxu0 %v3876_v55  ;;  %v15507_v34 = vld [vmem:[%s31000_s1 + $0x148] sm:$0xff]  ;;  %v27314_v55 = vld [vmem:[#allocation2 + $0x2d0] sm:$0xff] }
 0x167   :  { %23205 = vmatpush3.bf16.msra.mxu0 %v23202_v9  ;;  %19603 = vmatprep.mubr.f32.mxu0 %v3877_v16  ;;  %v15508_v16 = vld [vmem:[%s31000_s1 + $0x150] sm:$0xff] }
 0x168   :  { %20105 = vmatmul.mubr.f32.gmra.mrb[20].mxu1 %v5660_v11  ;;  %23207 = vmatprep.subr.bf16.mxu0 %v23206_v21  ;;  %v23242_v11 = vpack.c.bf16 %v15507_v34, %v15506_v6  ;;  %v27422_v6 = vld [vmem:[#allocation2 + $0x2aa] sm:$0xff]  ;;  %v27426_v34 = vld [vmem:[#allocation2 + $0x1fa] sm:$0xff] }
 0x169   :  { %23493 = vmatpush3.bf16.msra.mxu1 %v23202_v9  ;;  %20107 = vmatprep.mubr.f32.mxu1 %v5661_v47  ;;  %v27306_v9 = vld [vmem:[#allocation2 + $0x200] sm:$0xff]  ;;  %v15509_v47 = vld [vmem:[%s31000_s1 + $0x158] sm:$0xff] }
 0x16a   :  { %23495 = vmatprep.subr.bf16.mxu1 %v23206_v21  ;;  %19604 = vmatmul.mubr.f32.gmra.mrb[22].mxu0 %v3878_v19  ;;  %v27332_v19 = vld [vmem:[#allocation2 + $0x2e8] sm:$0xff] }
 0x16b   :  { %23209 = vmatpush3.bf16.msra.mxu0 %v23206_v21  ;;  %19606 = vmatprep.mubr.f32.mxu0 %v3879_v30  ;;  %v15510_v30 = vld [vmem:[%s31000_s1 + $0x160] sm:$0xff] }
 0x16c   :  { %20108 = vmatmul.mubr.f32.gmra.mrb[22].mxu1 %v5662_v49  ;;  %23211 = vmatprep.subr.bf16.mxu0 %v23210_v51  ;;  %v23246_v49 = vpack.c.bf16 %v15509_v47, %v15508_v16  ;;  %v23270_v16 = vpack.c.bf16 %v15521_v56, %v15520_v37  ;;  %v15522_v47 = vld [vmem:[%s31000_s1 + $0x1c0] sm:$0xff]  ;;  %v15528_v37 = vld [vmem:[%s31000_s1 + $0x1f0] sm:$0xff]  ;;  %v15529_v56 = vld [vmem:[%s31000_s1 + $0x1f8] sm:$0xff] }
 0x16d   :  { %23497 = vmatpush3.bf16.msra.mxu1 %v23206_v21  ;;  %20110 = vmatprep.mubr.f32.mxu1 %v5663_v31  ;;  %v27324_v21 = vld [vmem:[#allocation2 + $0x218] sm:$0xff]  ;;  %v15511_v31 = vld [vmem:[%s31000_s1 + $0x168] sm:$0xff] }
 0x16e   :  { %23499 = vmatprep.subr.bf16.mxu1 %v23210_v51  ;;  %19607 = vmatmul.mubr.f32.gmra.mrb[24].mxu0 %v3880_v15  ;;  %v27350_v15 = vld [vmem:[#allocation2 + $0x300] sm:$0xff] }
 0x16f   :  { %23213 = vmatpush3.bf16.msra.mxu0 %v23210_v51  ;;  %19609 = vmatprep.mubr.f32.mxu0 %v3881_v43  ;;  %v15512_v43 = vld [vmem:[%s31000_s1 + $0x170] sm:$0xff] }
 0x170   :  { %20111 = vmatmul.mubr.f32.gmra.mrb[24].mxu1 %v5664_v58  ;;  %23215 = vmatprep.subr.bf16.mxu0 %v23214_v59  ;;  %v23250_v58 = vpack.c.bf16 %v15511_v31, %v15510_v30  ;;  %v27438_v30 = vld [vmem:[#allocation2 + $0x202] sm:$0xff] }
 0x171   :  { %23501 = vmatpush3.bf16.msra.mxu1 %v23210_v51  ;;  %20113 = vmatprep.mubr.f32.mxu1 %v5665_v44  ;;  %v27342_v51 = vld [vmem:[#allocation2 + $0x230] sm:$0xff]  ;;  %v15513_v44 = vld [vmem:[%s31000_s1 + $0x178] sm:$0xff]  ;;  %v27440_v31 = vld [vmem:[#allocation2 + $0x2c2] sm:$0xff] }
 0x172   :  { %23503 = vmatprep.subr.bf16.mxu1 %v23214_v59  ;;  %19610 = vmatmul.mubr.f32.gmra.mrb[26].mxu0 %v3882_v27  ;;  %v27368_v27 = vld [vmem:[#allocation2 + $0x318] sm:$0xff] }
 0x173   :  { %23217 = vmatpush3.bf16.msra.mxu0 %v23214_v59  ;;  %19612 = vmatprep.mubr.f32.mxu0 %v3883_v53  ;;  %v15514_v53 = vld [vmem:[%s31000_s1 + $0x180] sm:$0xff] }
 0x174   :  { %20114 = vmatmul.mubr.f32.gmra.mrb[26].mxu1 %v5666_v33  ;;  %23219 = vmatprep.subr.bf16.mxu0 %v23218_v60  ;;  %v23254_v33 = vpack.c.bf16 %v15513_v44, %v15512_v43  ;;  %v27446_v43 = vld [vmem:[#allocation2 + $0x2d2] sm:$0xff] }
 0x175   :  { %23505 = vmatpush3.bf16.msra.mxu1 %v23214_v59  ;;  %20116 = vmatprep.mubr.f32.mxu1 %v5667_v57  ;;  %v27360_v59 = vld [vmem:[#allocation2 + $0x248] sm:$0xff] }
 0x176   :  { %23507 = vmatprep.subr.bf16.mxu1 %v23218_v60  ;;  %19613 = vmatmul.mubr.f32.gmra.mrb[28].mxu0 %v3884_v2  ;;  %v15515_v57 = vld [vmem:[%s31000_s1 + $0x188] sm:$0xff]  ;;  %v5977_v2 = vld [vmem:[#allocation2 + $0x272] sm:$0xff] }
 0x177   :  { %23221 = vmatpush3.bf16.msra.mxu0 %v23218_v60  ;;  %19615 = vmatprep.mubr.f32.mxu0 %v3885_v1  ;;  %v15516_v1 = vld [vmem:[%s31000_s1 + $0x190] sm:$0xff] }
 0x178   :  { %20117 = vmatmul.mubr.f32.gmra.mrb[28].mxu1 %v5668_v4  ;;  %23223 = vmatprep.subr.bf16.mxu0 %v23222_v61  ;;  %v23258_v4 = vpack.c.bf16 %v15515_v57, %v15514_v53  ;;  %v15525_v53 = vld [vmem:[%s31000_s1 + $0x1d8] sm:$0xff] }
 0x179   :  { %23509 = vmatpush3.bf16.msra.mxu1 %v23218_v60  ;;  %20119 = vmatprep.mubr.f32.mxu1 %v5669_v38  ;;  %v27378_v60 = vld [vmem:[#allocation2 + $0x260] sm:$0xff]  ;;  %v15517_v38 = vld [vmem:[%s31000_s1 + $0x198] sm:$0xff] }
 0x17a   :  { %23511 = vmatprep.subr.bf16.mxu1 %v23222_v61  ;;  %19616 = vmatmul.mubr.f32.gmra.mrb[30].mxu0 %v3886_v0  ;;  %v27394_v0 = vld [vmem:[#allocation2 + $0x28a] sm:$0xff]  ;;  %v27456_v57 = vld [vmem:[#allocation2 + $0x21a] sm:$0xff] }
 0x17b   :  { %23225 = vmatpush3.bf16.msra.mxu0 %v23222_v61  ;;  %19650 = vmatprep.mubr.f32.mxu0 %v27058_v20 }
 0x17c   :  { %20120 = vmatmul.mubr.f32.gmra.mrb[30].mxu1 %v5670_v8  ;;  %23227 = vmatprep.subr.bf16.mxu0 %v23226_v13  ;;  %v23262_v8 = vpack.c.bf16 %v15517_v38, %v15516_v1  ;;  %v15526_v38 = vld [vmem:[%s31000_s1 + $0x1e0] sm:$0xff] }
 0x17d   :  { %23513 = vmatpush3.bf16.msra.mxu1 %v23222_v61  ;;  %20154 = vmatprep.mubr.f32.mxu1 %v27246_v12  ;;  %v4194_v61 = vld [vmem:[#allocation2 + $0x1ba] sm:$0xff] }
 0x17e   :  { %23515 = vmatprep.subr.bf16.mxu1 %v23226_v13  ;;  %19651 = vmatmul.mubr.f32.vlgmr.msra.gmra.mrb[16].mxu0 %v27058_v20  ;;  %v27276_v20 = vld [vmem:[#allocation2 + $0x1e0] sm:$0xff] }
 0x17f   :  { %23229 = vmatpush3.bf16.msra.mxu0 %v23226_v13  ;;  %19653 = vmatprep.mubr.f32.mxu0 %v27258_v17 }
 0x180   :  { %20155 = vmatmul.mubr.f32.vlgmr.msra.gmra.mrb[16].mxu1 %v27254_v26  ;;  %23231 = vmatprep.subr.bf16.mxu0 %v23230_v28 }
 0x181   :  { %23517 = vmatpush3.bf16.msra.mxu1 %v23226_v13  ;;  %20157 = vmatprep.mubr.f32.mxu1 %v27260_v18  ;;  %v15518_v13 = vld [vmem:[%s31000_s1 + $0x1a0] sm:$0xff] }
 0x182   :  { %23519 = vmatprep.subr.bf16.mxu1 %v23230_v28  ;;  %19654 = vmatmul.mubr.f32.gmra.mrb[18].mxu0 %v27270_v10 }
 0x183   :  { %23233 = vmatpush3.bf16.msra.mxu0 %v23230_v28  ;;  %19656 = vmatprep.mubr.f32.mxu0 %v27276_v20 }
 0x184   :  { %20158 = vmatmul.mubr.f32.gmra.mrb[18].mxu1 %v27272_v50  ;;  %23235 = vmatprep.subr.bf16.mxu0 %v23234_v41 }
 0x185   :  { %23521 = vmatpush3.bf16.msra.mxu1 %v23230_v28  ;;  %20160 = vmatprep.mubr.f32.mxu1 %v27278_v36  ;;  %v27404_v28 = vld [vmem:[#allocation2 + $0x292] sm:$0xff] }
 0x186   :  { %23523 = vmatprep.subr.bf16.mxu1 %v23234_v41  ;;  %19657 = vmatmul.mubr.f32.gmra.mrb[20].mxu0 %v27288_v5 }
 0x187   :  { %23237 = vmatpush3.bf16.msra.mxu0 %v23234_v41  ;;  %19659 = vmatprep.mubr.f32.mxu0 %v27294_v35 }
 0x188   :  { %20161 = vmatmul.mubr.f32.gmra.mrb[20].mxu1 %v27290_v7  ;;  %23239 = vmatprep.subr.bf16.mxu0 %v23238_v3 }
 0x189   :  { %23525 = vmatpush3.bf16.msra.mxu1 %v23234_v41  ;;  %20163 = vmatprep.mubr.f32.mxu1 %v27296_v45  ;;  %v23266_v41 = vpack.c.bf16 %v15519_v14, %v15518_v13  ;;  %v27480_v13 = vld [vmem:[#allocation2 + $0x242] sm:$0xff] }
 0x18a   :  { %23527 = vmatprep.subr.bf16.mxu1 %v23238_v3  ;;  %19660 = vmatmul.mubr.f32.gmra.mrb[22].mxu0 %v27306_v9  ;;  %v27482_v14 = vld [vmem:[#allocation2 + $0x302] sm:$0xff] }
 0x18b   :  { %23241 = vmatpush3.bf16.msra.mxu0 %v23238_v3  ;;  %19662 = vmatprep.mubr.f32.mxu0 %v27312_v46 }
 0x18c   :  { %20164 = vmatmul.mubr.f32.gmra.mrb[22].mxu1 %v27308_v23  ;;  %23243 = vmatprep.subr.bf16.mxu0 %v23242_v11 }
 0x18d   :  { %23529 = vmatpush3.bf16.msra.mxu1 %v23238_v3  ;;  %20166 = vmatprep.mubr.f32.mxu1 %v27314_v55  ;;  %v27420_v3 = vld [vmem:[#allocation2 + $0x1ea] sm:$0xff] }
 0x18e   :  { %23531 = vmatprep.subr.bf16.mxu1 %v23242_v11  ;;  %19663 = vmatmul.mubr.f32.gmra.mrb[24].mxu0 %v27324_v21 }
 0x18f   :  { %23245 = vmatpush3.bf16.msra.mxu0 %v23242_v11  ;;  %19665 = vmatprep.mubr.f32.mxu0 %v27330_v25 }
 0x190   :  { %20167 = vmatmul.mubr.f32.gmra.mrb[24].mxu1 %v27326_v24  ;;  %23247 = vmatprep.subr.bf16.mxu0 %v23246_v49 }
 0x191   :  { %23533 = vmatpush3.bf16.msra.mxu1 %v23242_v11  ;;  %20169 = vmatprep.mubr.f32.mxu1 %v27332_v19  ;;  %v27428_v11 = vld [vmem:[#allocation2 + $0x2ba] sm:$0xff] }
 0x192   :  { %23535 = vmatprep.subr.bf16.mxu1 %v23246_v49  ;;  %19666 = vmatmul.mubr.f32.gmra.mrb[26].mxu0 %v27342_v51 }
 0x193   :  { %23249 = vmatpush3.bf16.msra.mxu0 %v23246_v49  ;;  %19668 = vmatprep.mubr.f32.mxu0 %v27348_v42 }
 0x194   :  { %20170 = vmatmul.mubr.f32.gmra.mrb[26].mxu1 %v27344_v39  ;;  %23251 = vmatprep.subr.bf16.mxu0 %v23250_v58 }
 0x195   :  { %23537 = vmatpush3.bf16.msra.mxu1 %v23246_v49  ;;  %20172 = vmatprep.mubr.f32.mxu1 %v27350_v15  ;;  %v15523_v49 = vld [vmem:[%s31000_s1 + $0x1c8] sm:$0xff] }
 0x196   :  { %23539 = vmatprep.subr.bf16.mxu1 %v23250_v58  ;;  %19669 = vmatmul.mubr.f32.gmra.mrb[28].mxu0 %v27360_v59  ;;  %v23274_v44 = vpack.c.bf16 %v15523_v49, %v15522_v47  ;;  %v27494_v47 = vld [vmem:[#allocation2 + $0x30a] sm:$0xff]  ;;  %v27498_v49 = vld [vmem:[#allocation2 + $0x25a] sm:$0xff] }
 0x197   :  { %23253 = vmatpush3.bf16.msra.mxu0 %v23250_v58  ;;  %19671 = vmatprep.mubr.f32.mxu0 %v27366_v52 }
 0x198   :  { %20173 = vmatmul.mubr.f32.gmra.mrb[28].mxu1 %v27362_v48  ;;  %23255 = vmatprep.subr.bf16.mxu0 %v23254_v33 }
 0x199   :  { %23541 = vmatpush3.bf16.msra.mxu1 %v23250_v58  ;;  %20175 = vmatprep.mubr.f32.mxu1 %v27368_v27  ;;  %v27444_v58 = vld [vmem:[#allocation2 + $0x212] sm:$0xff] }
 0x19a   :  { %23543 = vmatprep.subr.bf16.mxu1 %v23254_v33  ;;  %19672 = vmatmul.mubr.f32.gmra.mrb[30].mxu0 %v27378_v60 }
 0x19b   :  { %23257 = vmatpush3.bf16.msra.mxu0 %v23254_v33  ;;  %19706 = vmatprep.mubr.f32.mxu0 %v4193_v54  ;;  %v27458_v54 = vld [vmem:[#allocation2 + $0x2da] sm:$0xff] }
 0x19c   :  { %20176 = vmatmul.mubr.f32.gmra.mrb[30].mxu1 %v27380_v40  ;;  %23259 = vmatprep.subr.bf16.mxu0 %v23258_v4 }
 0x19d   :  { %23545 = vmatpush3.bf16.msra.mxu1 %v23254_v33  ;;  %20210 = vmatprep.mubr.f32.mxu1 %v5977_v2  ;;  %v15524_v33 = vld [vmem:[%s31000_s1 + $0x1d0] sm:$0xff] }
 0x19e   :  { %23547 = vmatprep.subr.bf16.mxu1 %v23258_v4  ;;  %19707 = vmatmul.mubr.f32.vlgmr.msra.gmra.mrb[16].mxu0 %v4194_v61  ;;  %v27462_v2 = vld [vmem:[#allocation2 + $0x22a] sm:$0xff]  ;;  %v23278_v1 = vpack.c.bf16 %v15525_v53, %v15524_v33  ;;  %v23286_v33 = vpack.c.bf16 %v15529_v56, %v15528_v37  ;;  %v15530_v53 = vld [vmem:[%s31000_s1 + $0x200] sm:$0xff] }
 0x19f   :  { %23261 = vmatpush3.bf16.msra.mxu0 %v23258_v4  ;;  %19709 = vmatprep.mubr.f32.mxu0 %v27392_v63  ;;  %v15527_v61 = vld [vmem:[%s31000_s1 + $0x1e8] sm:$0xff]  ;;  %v15532_v56 = vld [vmem:[%s31000_s1 + $0x210] sm:$0xff] }
 0x1a0   :  { %20211 = vmatmul.mubr.f32.vlgmr.msra.gmra.mrb[16].mxu1 %v5978_v62  ;;  %23263 = vmatprep.subr.bf16.mxu0 %v23262_v8  ;;  %v27474_v62 = vld [vmem:[#allocation2 + $0x232] sm:$0xff] }
 0x1a1   :  { %23549 = vmatpush3.bf16.msra.mxu1 %v23258_v4  ;;  %20213 = vmatprep.mubr.f32.mxu1 %v27394_v0  ;;  %v27464_v4 = vld [vmem:[#allocation2 + $0x2ea] sm:$0xff] }
 0x1a2   :  { %23551 = vmatprep.subr.bf16.mxu1 %v23262_v8  ;;  %19710 = vmatmul.mubr.f32.gmra.mrb[18].mxu0 %v27402_v22 }
 0x1a3   :  { %23265 = vmatpush3.bf16.msra.mxu0 %v23262_v8  ;;  %19712 = vmatprep.mubr.f32.mxu0 %v27408_v32 }
 0x1a4   :  { %20214 = vmatmul.mubr.f32.gmra.mrb[18].mxu1 %v27404_v28  ;;  %23267 = vmatprep.subr.bf16.mxu0 %v23266_v41 }
 0x1a5   :  { %23553 = vmatpush3.bf16.msra.mxu1 %v23262_v8  ;;  %20216 = vmatprep.mubr.f32.mxu1 %v27410_v29  ;;  %v27476_v8 = vld [vmem:[#allocation2 + $0x2f2] sm:$0xff] }
 0x1a6   :  { %23555 = vmatprep.subr.bf16.mxu1 %v23266_v41  ;;  %19713 = vmatmul.mubr.f32.gmra.mrb[20].mxu0 %v27420_v3 }
 0x1a7   :  { %23269 = vmatpush3.bf16.msra.mxu0 %v23266_v41  ;;  %19715 = vmatprep.mubr.f32.mxu0 %v27426_v34 }
 0x1a8   :  { %20217 = vmatmul.mubr.f32.gmra.mrb[20].mxu1 %v27422_v6  ;;  %23271 = vmatprep.subr.bf16.mxu0 %v23270_v16 }
 0x1a9   :  { %23557 = vmatpush3.bf16.msra.mxu1 %v23266_v41  ;;  %20219 = vmatprep.mubr.f32.mxu1 %v27428_v11  ;;  %v23282_v41 = vpack.c.bf16 %v15527_v61, %v15526_v38  ;;  %v27510_v38 = vld [vmem:[#allocation2 + $0x262] sm:$0xff] }
 0x1aa   :  { %23559 = vmatprep.subr.bf16.mxu1 %v23270_v16  ;;  %19716 = vmatmul.mubr.f32.gmra.mrb[22].mxu0 %v27438_v30  ;;  %v27512_v61 = vld [vmem:[#allocation2 + $0x322] sm:$0xff] }
 0x1ab   :  { %23273 = vmatpush3.bf16.msra.mxu0 %v23270_v16  ;;  %19718 = vmatprep.mubr.f32.mxu0 %v27444_v58  ;;  %31097 = vst [vmem:[#allocation3_spill] sm:$0xff] %v27512_v61 }
 0x1ac   :  { %20220 = vmatmul.mubr.f32.gmra.mrb[22].mxu1 %v27440_v31  ;;  %23275 = vmatprep.subr.bf16.mxu0 %v23274_v44 }
 0x1ad   :  { %23561 = vmatpush3.bf16.msra.mxu1 %v23270_v16  ;;  %20222 = vmatprep.mubr.f32.mxu1 %v27446_v43  ;;  %v27492_v16 = vld [vmem:[#allocation2 + $0x24a] sm:$0xff] }
 0x1ae   :  { %23563 = vmatprep.subr.bf16.mxu1 %v23274_v44  ;;  %19719 = vmatmul.mubr.f32.gmra.mrb[24].mxu0 %v27456_v57 }
 0x1af   :  { %23277 = vmatpush3.bf16.msra.mxu0 %v23274_v44  ;;  %19721 = vmatprep.mubr.f32.mxu0 %v27462_v2 }
 0x1b0   :  { %20223 = vmatmul.mubr.f32.gmra.mrb[24].mxu1 %v27458_v54  ;;  %23279 = vmatprep.subr.bf16.mxu0 %v23278_v1 }
 0x1b1   :  { %23565 = vmatpush3.bf16.msra.mxu1 %v23274_v44  ;;  %20225 = vmatprep.mubr.f32.mxu1 %v27464_v4  ;;  %v27500_v44 = vld [vmem:[#allocation2 + $0x31a] sm:$0xff] }
 0x1b2   :  { %23567 = vmatprep.subr.bf16.mxu1 %v23278_v1  ;;  %19722 = vmatmul.mubr.f32.gmra.mrb[26].mxu0 %v27474_v62 }
 0x1b3   :  { %23281 = vmatpush3.bf16.msra.mxu0 %v23278_v1  ;;  %19724 = vmatprep.mubr.f32.mxu0 %v27480_v13 }
 0x1b4   :  { %20226 = vmatmul.mubr.f32.gmra.mrb[26].mxu1 %v27476_v8  ;;  %23283 = vmatprep.subr.bf16.mxu0 %v23282_v41 }
 0x1b5   :  { %23569 = vmatpush3.bf16.msra.mxu1 %v23278_v1  ;;  %20228 = vmatprep.mubr.f32.mxu1 %v27482_v14  ;;  %v15531_v1 = vld [vmem:[%s31000_s1 + $0x208] sm:$0xff] }
 0x1b6   :  { %23571 = vmatprep.subr.bf16.mxu1 %v23282_v41  ;;  %19725 = vmatmul.mubr.f32.gmra.mrb[28].mxu0 %v27492_v16  ;;  %v23290_v37 = vpack.c.bf16 %v15531_v1, %v15530_v53  ;;  %v15534_v1 = vld [vmem:[%s31000_s1 + $0x220] sm:$0xff] }
 0x1b7   :  { %23285 = vmatpush3.bf16.msra.mxu0 %v23282_v41  ;;  %19727 = vmatprep.mubr.f32.mxu0 %v27498_v49 }
 0x1b8   :  { %20229 = vmatmul.mubr.f32.gmra.mrb[28].mxu1 %v27494_v47  ;;  %23287 = vmatprep.subr.bf16.mxu0 %v23286_v33 }
 0x1b9   :  { %23573 = vmatpush3.bf16.msra.mxu1 %v23282_v41  ;;  %20231 = vmatprep.mubr.f32.mxu1 %v27500_v44  ;;  %v15533_v41 = vld [vmem:[%s31000_s1 + $0x218] sm:$0xff] }
 0x1ba   :  { %23575 = vmatprep.subr.bf16.mxu1 %v23286_v33  ;;  %19728 = vmatmul.mubr.f32.gmra.mrb[30].mxu0 %v27510_v38  ;;  %v23294_v53 = vpack.c.bf16 %v15533_v41, %v15532_v56  ;;  %v6367_v56 = vld [vmem:[#allocation2 + $0x2a9] sm:$0xff]  ;;  %v4584_v41 = vld [vmem:[#allocation2 + $0x1f9] sm:$0xff] }
 0x1bb   :  { %23289 = vmatpush3.bf16.msra.mxu0 %v23286_v33  ;;  %19762 = vmatprep.mubr.f32.mxu0 %v27258_v17 }
 0x1bc   :  { %20232 = vmatmul.mubr.f32.gmra.mrb[30].mxu1 %v27512_v61  ;;  %23291 = vmatprep.subr.bf16.mxu0 %v23290_v37  ;;  %v15535_v61 = vld [vmem:[%s31000_s1 + $0x228] sm:$0xff] }
 0x1bd   :  { %23577 = vmatpush3.bf16.msra.mxu1 %v23286_v33  ;;  %20266 = vmatprep.mubr.f32.mxu1 %v27260_v18  ;;  %v23298_v17 = vpack.c.bf16 %v15535_v61, %v15534_v1  ;;  %v15536_v18 = vld [vmem:[%s31000_s1 + $0x230] sm:$0xff]  ;;  %v15550_v33 = vld [vmem:[%s31000_s1 + $0x2a0] sm:$0xff]  ;;  %v15551_v61 = vld [vmem:[%s31000_s1 + $0x2a8] sm:$0xff] }
 0x1be   :  { %23579 = vmatprep.subr.bf16.mxu1 %v23290_v37  ;;  %19763 = vmatmul.mubr.f32.vlgmr.msra.gmra.mrb[16].mxu0 %v27270_v10  ;;  %v15537_v10 = vld [vmem:[%s31000_s1 + $0x238] sm:$0xff]  ;;  %v23330_v1 = vpack.c.bf16 %v15551_v61, %v15550_v33  ;;  %v4593_v33 = vld [vmem:[#allocation2 + $0x261] sm:$0xff] }
 0x1bf   :  { %23293 = vmatpush3.bf16.msra.mxu0 %v23290_v37  ;;  %19765 = vmatprep.mubr.f32.mxu0 %v27276_v20  ;;  %v15538_v20 = vld [vmem:[%s31000_s1 + $0x240] sm:$0xff] }
 0x1c0   :  { %20267 = vmatmul.mubr.f32.vlgmr.msra.gmra.mrb[16].mxu1 %v27272_v50  ;;  %23295 = vmatprep.subr.bf16.mxu0 %v23294_v53  ;;  %v23302_v50 = vpack.c.bf16 %v15537_v10, %v15536_v18  ;;  %v15553_v18 = vld [vmem:[%s31000_s1 + $0x2b8] sm:$0xff]  ;;  %v4585_v10 = vld [vmem:[#allocation2 + $0x201] sm:$0xff] }
 0x1c1   :  { %23581 = vmatpush3.bf16.msra.mxu1 %v23290_v37  ;;  %20269 = vmatprep.mubr.f32.mxu1 %v27278_v36  ;;  %v15539_v36 = vld [vmem:[%s31000_s1 + $0x248] sm:$0xff] }
 0x1c2   :  { %23583 = vmatprep.subr.bf16.mxu1 %v23294_v53  ;;  %19766 = vmatmul.mubr.f32.gmra.mrb[18].mxu0 %v27288_v5  ;;  %v23306_v5 = vpack.c.bf16 %v15539_v36, %v15538_v20  ;;  %v4583_v37 = vld [vmem:[#allocation2 + $0x1e9] sm:$0xff]  ;;  %v4586_v20 = vld [vmem:[#allocation2 + $0x211] sm:$0xff]  ;;  %v6377_v61 = vld [vmem:[#allocation2 + $0x321] sm:$0xff] }
 0x1c3   :  { %23297 = vmatpush3.bf16.msra.mxu0 %v23294_v53  ;;  %19768 = vmatprep.mubr.f32.mxu0 %v27294_v35  ;;  %v15541_v35 = vld [vmem:[%s31000_s1 + $0x258] sm:$0xff] }
 0x1c4   :  { %20270 = vmatmul.mubr.f32.gmra.mrb[18].mxu1 %v27290_v7  ;;  %23299 = vmatprep.subr.bf16.mxu0 %v23298_v17  ;;  %v15540_v7 = vld [vmem:[%s31000_s1 + $0x250] sm:$0xff] }
 0x1c5   :  { %23585 = vmatpush3.bf16.msra.mxu1 %v23294_v53  ;;  %20272 = vmatprep.mubr.f32.mxu1 %v27296_v45  ;;  %v23310_v45 = vpack.c.bf16 %v15541_v35, %v15540_v7  ;;  %v6368_v53 = vld [vmem:[#allocation2 + $0x2b9] sm:$0xff]  ;;  %v6370_v36 = vld [vmem:[#allocation2 + $0x2d1] sm:$0xff]  ;;  %v15555_v35 = vld [vmem:[%s31000_s1 + $0x2c8] sm:$0xff] }
 0x1c6   :  { %23587 = vmatprep.subr.bf16.mxu1 %v23298_v17  ;;  %19769 = vmatmul.mubr.f32.gmra.mrb[20].mxu0 %v27306_v9  ;;  %v15542_v9 = vld [vmem:[%s31000_s1 + $0x260] sm:$0xff] }
 0x1c7   :  { %23301 = vmatpush3.bf16.msra.mxu0 %v23298_v17  ;;  %19771 = vmatprep.mubr.f32.mxu0 %v27312_v46  ;;  %v15554_v7 = vld [vmem:[%s31000_s1 + $0x2c0] sm:$0xff] }
 0x1c8   :  { %20273 = vmatmul.mubr.f32.gmra.mrb[20].mxu1 %v27308_v23  ;;  %23303 = vmatprep.subr.bf16.mxu0 %v23302_v50  ;;  %v15543_v23 = vld [vmem:[%s31000_s1 + $0x268] sm:$0xff] }
 0x1c9   :  { %23589 = vmatpush3.bf16.msra.mxu1 %v23298_v17  ;;  %20275 = vmatprep.mubr.f32.mxu1 %v27314_v55  ;;  %v23314_v46 = vpack.c.bf16 %v15543_v23, %v15542_v9  ;;  %v15544_v55 = vld [vmem:[%s31000_s1 + $0x270] sm:$0xff]  ;;  %v6371_v9 = vld [vmem:[#allocation2 + $0x2d9] sm:$0xff] }
 0x1ca   :  { %23591 = vmatprep.subr.bf16.mxu1 %v23302_v50  ;;  %19772 = vmatmul.mubr.f32.gmra.mrb[22].mxu0 %v27324_v21  ;;  %v15545_v21 = vld [vmem:[%s31000_s1 + $0x278] sm:$0xff]  ;;  %v15552_v17 = vld [vmem:[%s31000_s1 + $0x2b0] sm:$0xff] }
 0x1cb   :  { %23305 = vmatpush3.bf16.msra.mxu0 %v23302_v50  ;;  %19774 = vmatprep.mubr.f32.mxu0 %v27330_v25  ;;  %v23318_v25 = vpack.c.bf16 %v15545_v21, %v15544_v55  ;;  %v4588_v23 = vld [vmem:[#allocation2 + $0x229] sm:$0xff]  ;;  %v23338_v55 = vpack.c.bf16 %v15555_v35, %v15554_v7 }
 0x1cc   :  { %20276 = vmatmul.mubr.f32.gmra.mrb[22].mxu1 %v27326_v24  ;;  %23307 = vmatprep.subr.bf16.mxu0 %v23306_v5  ;;  %v6185_v24 = vld [vmem:[#allocation2 + $0x330] sm:$0xff]  ;;  %v15567_v7 = vld [vmem:[%s31000_s1 + $0x328] sm:$0xff] }
 0x1cd   :  { %23593 = vmatpush3.bf16.msra.mxu1 %v23302_v50  ;;  %20278 = vmatprep.mubr.f32.mxu1 %v27332_v19  ;;  %v15546_v19 = vld [vmem:[%s31000_s1 + $0x280] sm:$0xff]  ;;  %v15556_v21 = vld [vmem:[%s31000_s1 + $0x2d0] sm:$0xff] }
 0x1ce   :  { %23595 = vmatprep.subr.bf16.mxu1 %v23306_v5  ;;  %19775 = vmatmul.mubr.f32.gmra.mrb[24].mxu0 %v27342_v51  ;;  %v15547_v51 = vld [vmem:[%s31000_s1 + $0x288] sm:$0xff] }
 0x1cf   :  { %23309 = vmatpush3.bf16.msra.mxu0 %v23306_v5  ;;  %19777 = vmatprep.mubr.f32.mxu0 %v27348_v42  ;;  %v4580_v42 = vld [vmem:[#allocation2 + $0x1c9] sm:$0xff]  ;;  %v6369_v50 = vld [vmem:[#allocation2 + $0x2c1] sm:$0xff] }
 0x1d0   :  { %20279 = vmatmul.mubr.f32.gmra.mrb[24].mxu1 %v27344_v39  ;;  %23311 = vmatprep.subr.bf16.mxu0 %v23310_v45  ;;  %v6186_v39 = vld [vmem:[#allocation2 + $0x338] sm:$0xff] }
 0x1d1   :  { %23597 = vmatpush3.bf16.msra.mxu1 %v23306_v5  ;;  %20281 = vmatprep.mubr.f32.mxu1 %v27350_v15  ;;  %v6364_v15 = vld [vmem:[#allocation2 + $0x289] sm:$0xff]  ;;  %v23334_v5 = vpack.c.bf16 %v15553_v18, %v15552_v17  ;;  %v4595_v17 = vld [vmem:[#allocation2 + $0x279] sm:$0xff] }
 0x1d2   :  { %23599 = vmatprep.subr.bf16.mxu1 %v23310_v45  ;;  %19778 = vmatmul.mubr.f32.gmra.mrb[26].mxu0 %v27360_v59  ;;  %v23322_v59 = vpack.c.bf16 %v15547_v51, %v15546_v19  ;;  %v6373_v19 = vld [vmem:[#allocation2 + $0x2f1] sm:$0xff]  ;;  %v4590_v51 = vld [vmem:[#allocation2 + $0x241] sm:$0xff]  ;;  %v6379_v18 = vld [vmem:[#allocation2 + $0x339] sm:$0xff] }
 0x1d3   :  { %23313 = vmatpush3.bf16.msra.mxu0 %v23310_v45  ;;  %19780 = vmatprep.mubr.f32.mxu0 %v27366_v52  ;;  %v15549_v52 = vld [vmem:[%s31000_s1 + $0x298] sm:$0xff] }
 0x1d4   :  { %20282 = vmatmul.mubr.f32.gmra.mrb[26].mxu1 %v27362_v48  ;;  %23315 = vmatprep.subr.bf16.mxu0 %v23314_v46  ;;  %v15548_v48 = vld [vmem:[%s31000_s1 + $0x290] sm:$0xff] }
 0x1d5   :  { %23601 = vmatpush3.bf16.msra.mxu1 %v23310_v45  ;;  %20284 = vmatprep.mubr.f32.mxu1 %v27368_v27  ;;  %v6365_v27 = vld [vmem:[#allocation2 + $0x291] sm:$0xff]  ;;  %v4587_v45 = vld [vmem:[#allocation2 + $0x219] sm:$0xff] }
 0x1d6   :  { %23603 = vmatprep.subr.bf16.mxu1 %v23314_v46  ;;  %19781 = vmatmul.mubr.f32.gmra.mrb[28].mxu0 %v27378_v60  ;;  %v4582_v60 = vld [vmem:[#allocation2 + $0x1e1] sm:$0xff] }
 0x1d7   :  { %23317 = vmatpush3.bf16.msra.mxu0 %v23314_v46  ;;  %19783 = vmatprep.mubr.f32.mxu0 %v27246_v12  ;;  %v4581_v12 = vld [vmem:[#allocation2 + $0x1d1] sm:$0xff] }
 0x1d8   :  { %20285 = vmatmul.mubr.f32.gmra.mrb[28].mxu1 %v27380_v40  ;;  %23319 = vmatprep.subr.bf16.mxu0 %v23318_v25  ;;  %v6366_v40 = vld [vmem:[#allocation2 + $0x2a1] sm:$0xff] }
 0x1d9   :  { %23605 = vmatpush3.bf16.msra.mxu1 %v23314_v46  ;;  %20287 = vmatprep.mubr.f32.mxu1 %v6185_v24  ;;  %v6372_v46 = vld [vmem:[#allocation2 + $0x2e9] sm:$0xff]  ;;  %v15557_v24 = vld [vmem:[%s31000_s1 + $0x2d8] sm:$0xff] }
 0x1da   :  { %23607 = vmatprep.subr.bf16.mxu1 %v23318_v25  ;;  %19784 = vmatmul.mubr.f32.gmra.mrb[30].mxu0 %v27254_v26  ;;  %v23326_v26 = vpack.c.bf16 %v15549_v52, %v15548_v48  ;;  %v4591_v48 = vld [vmem:[#allocation2 + $0x249] sm:$0xff] }
 0x1db   :  { %23321 = vmatpush3.bf16.msra.mxu0 %v23318_v25  ;;  %19818 = vmatprep.mubr.f32.mxu0 %v4580_v42  ;;  %v23342_v42 = vpack.c.bf16 %v15557_v24, %v15556_v21  ;;  %v6375_v52 = vld [vmem:[#allocation2 + $0x309] sm:$0xff]  ;;  %v31098_v24 = vld [vmem:[#allocation3_spill] sm:$0xff] }
 0x1dc   :  { %20288 = vmatmul.mubr.f32.gmra.mrb[30].mxu1 %v6186_v39  ;;  %23323 = vmatprep.subr.bf16.mxu0 %v23322_v59  ;;  %v6374_v39 = vld [vmem:[#allocation2 + $0x301] sm:$0xff] }
 0x1dd   :  { %23609 = vmatpush3.bf16.msra.mxu1 %v23318_v25  ;;  %20322 = vmatprep.mubr.f32.mxu1 %v6364_v15  ;;  %v4589_v25 = vld [vmem:[#allocation2 + $0x231] sm:$0xff]  ;;  %v15558_v15 = vld [vmem:[%s31000_s1 + $0x2e0] sm:$0xff] }
 0x1de   :  { %23611 = vmatprep.subr.bf16.mxu1 %v23322_v59  ;;  %19819 = vmatmul.mubr.f32.vlgmr.msra.gmra.mrb[16].mxu0 %v4581_v12  ;;  %v4592_v12 = vld [vmem:[#allocation2 + $0x259] sm:$0xff] }
 0x1df   :  { %23325 = vmatpush3.bf16.msra.mxu0 %v23322_v59  ;;  %19821 = vmatprep.mubr.f32.mxu0 %v4582_v60 }
 0x1e0   :  { %20323 = vmatmul.mubr.f32.vlgmr.msra.gmra.mrb[16].mxu1 %v6365_v27  ;;  %23327 = vmatprep.subr.bf16.mxu0 %v23326_v26  ;;  %v6376_v27 = vld [vmem:[#allocation2 + $0x319] sm:$0xff] }
 0x1e1   :  { %23613 = vmatpush3.bf16.msra.mxu1 %v23322_v59  ;;  %20325 = vmatprep.mubr.f32.mxu1 %v6366_v40  ;;  %v15559_v59 = vld [vmem:[%s31000_s1 + $0x2e8] sm:$0xff]  ;;  %v15560_v40 = vld [vmem:[%s31000_s1 + $0x2f0] sm:$0xff] }
 0x1e2   :  { %23615 = vmatprep.subr.bf16.mxu1 %v23326_v26  ;;  %19822 = vmatmul.mubr.f32.gmra.mrb[18].mxu0 %v4583_v37  ;;  %v23346_v60 = vpack.c.bf16 %v15559_v59, %v15558_v15  ;;  %v4594_v37 = vld [vmem:[#allocation2 + $0x271] sm:$0xff]  ;;  %v27748_v15 = vld [vmem:[#allocation2 + $0x27a] sm:$0xff] }
 0x1e3   :  { %23329 = vmatpush3.bf16.msra.mxu0 %v23326_v26  ;;  %19824 = vmatprep.mubr.f32.mxu0 %v4584_v41  ;;  %v27752_v59 = vld [vmem:[#allocation2 + $0x33a] sm:$0xff] }
 0x1e4   :  { %20326 = vmatmul.mubr.f32.gmra.mrb[18].mxu1 %v6367_v56  ;;  %23331 = vmatprep.subr.bf16.mxu0 %v23330_v1  ;;  %v6378_v56 = vld [vmem:[#allocation2 + $0x331] sm:$0xff] }
 0x1e5   :  { %23617 = vmatpush3.bf16.msra.mxu1 %v23326_v26  ;;  %20328 = vmatprep.mubr.f32.mxu1 %v6368_v53  ;;  %v15561_v26 = vld [vmem:[%s31000_s1 + $0x2f8] sm:$0xff]  ;;  %v15562_v53 = vld [vmem:[%s31000_s1 + $0x300] sm:$0xff] }
 0x1e6   :  { %23619 = vmatprep.subr.bf16.mxu1 %v23330_v1  ;;  %19825 = vmatmul.mubr.f32.gmra.mrb[20].mxu0 %v4585_v10  ;;  %v23350_v41 = vpack.c.bf16 %v15561_v26, %v15560_v40  ;;  %v15578_v40 = vld [vmem:[%s31000_s1 + $0x380] sm:$0xff]  ;;  %v15579_v26 = vld [vmem:[%s31000_s1 + $0x388] sm:$0xff] }
 0x1e7   :  { %23333 = vmatpush3.bf16.msra.mxu0 %v23330_v1  ;;  %19827 = vmatprep.mubr.f32.mxu0 %v4586_v20  ;;  %v15565_v20 = vld [vmem:[%s31000_s1 + $0x318] sm:$0xff] }
 0x1e8   :  { %20329 = vmatmul.mubr.f32.gmra.mrb[20].mxu1 %v6369_v50  ;;  %23335 = vmatprep.subr.bf16.mxu0 %v23334_v5  ;;  %v15564_v50 = vld [vmem:[%s31000_s1 + $0x310] sm:$0xff] }
 0x1e9   :  { %23621 = vmatpush3.bf16.msra.mxu1 %v23330_v1  ;;  %20331 = vmatprep.mubr.f32.mxu1 %v6370_v36  ;;  %v15563_v1 = vld [vmem:[%s31000_s1 + $0x308] sm:$0xff]  ;;  %v23358_v36 = vpack.c.bf16 %v15565_v20, %v15564_v50 }
 0x1ea   :  { %23623 = vmatprep.subr.bf16.mxu1 %v23334_v5  ;;  %19828 = vmatmul.mubr.f32.gmra.mrb[22].mxu0 %v4587_v45  ;;  %v23354_v10 = vpack.c.bf16 %v15563_v1, %v15562_v53  ;;  %v15576_v45 = vld [vmem:[%s31000_s1 + $0x370] sm:$0xff] }
 0x1eb   :  { %23337 = vmatpush3.bf16.msra.mxu0 %v23334_v5  ;;  %19830 = vmatprep.mubr.f32.mxu0 %v4588_v23 }
 0x1ec   :  { %20332 = vmatmul.mubr.f32.gmra.mrb[22].mxu1 %v6371_v9  ;;  %23339 = vmatprep.subr.bf16.mxu0 %v23338_v55 }
 0x1ed   :  { %23625 = vmatpush3.bf16.msra.mxu1 %v23334_v5  ;;  %20334 = vmatprep.mubr.f32.mxu1 %v6372_v46  ;;  %v15566_v5 = vld [vmem:[%s31000_s1 + $0x320] sm:$0xff] }
 0x1ee   :  { %23627 = vmatprep.subr.bf16.mxu1 %v23338_v55  ;;  %19831 = vmatmul.mubr.f32.gmra.mrb[24].mxu0 %v4589_v25  ;;  %v4787_v25 = vld [vmem:[#allocation2 + $0x272] sm:$0xff] }
 0x1ef   :  { %23341 = vmatpush3.bf16.msra.mxu0 %v23338_v55  ;;  %19833 = vmatprep.mubr.f32.mxu0 %v4590_v51 }
 0x1f0   :  { %20335 = vmatmul.mubr.f32.gmra.mrb[24].mxu1 %v6373_v19  ;;  %23343 = vmatprep.subr.bf16.mxu0 %v23342_v42  ;;  %v6571_v19 = vld [vmem:[#allocation2 + $0x332] sm:$0xff] }
 0x1f1   :  { %23629 = vmatpush3.bf16.msra.mxu1 %v23338_v55  ;;  %20337 = vmatprep.mubr.f32.mxu1 %v6374_v39 }
 0x1f2   :  { %23631 = vmatprep.subr.bf16.mxu1 %v23342_v42  ;;  %19834 = vmatmul.mubr.f32.gmra.mrb[26].mxu0 %v4591_v48 }
 0x1f3   :  { %23345 = vmatpush3.bf16.msra.mxu0 %v23342_v42  ;;  %19836 = vmatprep.mubr.f32.mxu0 %v4592_v12 }
 0x1f4   :  { %20338 = vmatmul.mubr.f32.gmra.mrb[26].mxu1 %v6375_v52  ;;  %23347 = vmatprep.subr.bf16.mxu0 %v23346_v60 }
 0x1f5   :  { %23633 = vmatpush3.bf16.msra.mxu1 %v23342_v42  ;;  %20340 = vmatprep.mubr.f32.mxu1 %v6376_v27 }
 0x1f6   :  { %23635 = vmatprep.subr.bf16.mxu1 %v23346_v60  ;;  %19837 = vmatmul.mubr.f32.gmra.mrb[28].mxu0 %v4593_v33 }
 0x1f7   :  { %23349 = vmatpush3.bf16.msra.mxu0 %v23346_v60  ;;  %19839 = vmatprep.mubr.f32.mxu0 %v4594_v37 }
 0x1f8   :  { %20341 = vmatmul.mubr.f32.gmra.mrb[28].mxu1 %v6377_v61  ;;  %23351 = vmatprep.subr.bf16.mxu0 %v23350_v41 }
 0x1f9   :  { %23637 = vmatpush3.bf16.msra.mxu1 %v23346_v60  ;;  %20343 = vmatprep.mubr.f32.mxu1 %v6378_v56 }
 0x1fa   :  { %23639 = vmatprep.subr.bf16.mxu1 %v23350_v41  ;;  %19840 = vmatmul.mubr.f32.gmra.mrb[30].mxu0 %v4595_v17 }
 0x1fb   :  { %23353 = vmatpush3.bf16.msra.mxu0 %v23350_v41  ;;  %19874 = vmatprep.mubr.f32.mxu0 %v27392_v63  ;;  %v23362_v63 = vpack.c.bf16 %v15567_v7, %v15566_v5  ;;  %v23386_v5 = vpack.c.bf16 %v15579_v26, %v15578_v40 }
 0x1fc   :  { %20344 = vmatmul.mubr.f32.gmra.mrb[30].mxu1 %v6379_v18  ;;  %23355 = vmatprep.subr.bf16.mxu0 %v23354_v10 }
 0x1fd   :  { %23641 = vmatpush3.bf16.msra.mxu1 %v23350_v41  ;;  %20378 = vmatprep.mubr.f32.mxu1 %v27394_v0  ;;  %v15568_v0 = vld [vmem:[%s31000_s1 + $0x330] sm:$0xff]  ;;  %v4967_v41 = vld [vmem:[#allocation2 + $0x1e0] sm:$0xff] }
 0x1fe   :  { %23643 = vmatprep.subr.bf16.mxu1 %v23354_v10  ;;  %19875 = vmatmul.mubr.f32.vlgmr.msra.gmra.mrb[16].mxu0 %v27402_v22  ;;  %v15569_v22 = vld [vmem:[%s31000_s1 + $0x338] sm:$0xff] }
 0x1ff   :  { %23357 = vmatpush3.bf16.msra.mxu0 %v23354_v10  ;;  %19877 = vmatprep.mubr.f32.mxu0 %v27408_v32  ;;  %v15570_v32 = vld [vmem:[%s31000_s1 + $0x340] sm:$0xff] }
 0x200   :  { %20379 = vmatmul.mubr.f32.vlgmr.msra.gmra.mrb[16].mxu1 %v27404_v28  ;;  %23359 = vmatprep.subr.bf16.mxu0 %v23358_v36  ;;  %v23366_v28 = vpack.c.bf16 %v15569_v22, %v15568_v0 }
 0x201   :  { %23645 = vmatpush3.bf16.msra.mxu1 %v23354_v10  ;;  %20381 = vmatprep.mubr.f32.mxu1 %v27410_v29  ;;  %v15571_v29 = vld [vmem:[%s31000_s1 + $0x348] sm:$0xff]  ;;  %v6751_v10 = vld [vmem:[#allocation2 + $0x2a0] sm:$0xff] }
 0x202   :  { %23647 = vmatprep.subr.bf16.mxu1 %v23358_v36  ;;  %19878 = vmatmul.mubr.f32.gmra.mrb[18].mxu0 %v27420_v3  ;;  %v23370_v3 = vpack.c.bf16 %v15571_v29, %v15570_v32  ;;  %v6752_v32 = vld [vmem:[#allocation2 + $0x2a8] sm:$0xff]  ;;  %v15580_v29 = vld [vmem:[%s31000_s1 + $0x390] sm:$0xff] }
 0x203   :  { %23361 = vmatpush3.bf16.msra.mxu0 %v23358_v36  ;;  %19880 = vmatprep.mubr.f32.mxu0 %v27426_v34  ;;  %v15573_v34 = vld [vmem:[%s31000_s1 + $0x358] sm:$0xff] }
 0x204   :  { %20382 = vmatmul.mubr.f32.gmra.mrb[18].mxu1 %v27422_v6  ;;  %23363 = vmatprep.subr.bf16.mxu0 %v23362_v63  ;;  %v15572_v6 = vld [vmem:[%s31000_s1 + $0x350] sm:$0xff] }
 0x205   :  { %23649 = vmatpush3.bf16.msra.mxu1 %v23358_v36  ;;  %20384 = vmatprep.mubr.f32.mxu1 %v27428_v11  ;;  %v23374_v11 = vpack.c.bf16 %v15573_v34, %v15572_v6  ;;  %v4968_v36 = vld [vmem:[#allocation2 + $0x1e8] sm:$0xff] }
 0x206   :  { %23651 = vmatprep.subr.bf16.mxu1 %v23362_v63  ;;  %19881 = vmatmul.mubr.f32.gmra.mrb[20].mxu0 %v27438_v30  ;;  %v15574_v30 = vld [vmem:[%s31000_s1 + $0x360] sm:$0xff] }
 0x207   :  { %23365 = vmatpush3.bf16.msra.mxu0 %v23362_v63  ;;  %19883 = vmatprep.mubr.f32.mxu0 %v27444_v58 }
 0x208   :  { %20385 = vmatmul.mubr.f32.gmra.mrb[20].mxu1 %v27440_v31  ;;  %23367 = vmatprep.subr.bf16.mxu0 %v23366_v28  ;;  %v15575_v31 = vld [vmem:[%s31000_s1 + $0x368] sm:$0xff] }
 0x209   :  { %23653 = vmatpush3.bf16.msra.mxu1 %v23362_v63  ;;  %20387 = vmatprep.mubr.f32.mxu1 %v27446_v43 }
 0x20a   :  { %23655 = vmatprep.subr.bf16.mxu1 %v23366_v28  ;;  %19884 = vmatmul.mubr.f32.gmra.mrb[22].mxu0 %v27456_v57  ;;  %v23378_v57 = vpack.c.bf16 %v15575_v31, %v15574_v30 }
 0x20b   :  { %23369 = vmatpush3.bf16.msra.mxu0 %v23366_v28  ;;  %19886 = vmatprep.mubr.f32.mxu0 %v27462_v2 }
 0x20c   :  { %20388 = vmatmul.mubr.f32.gmra.mrb[22].mxu1 %v27458_v54  ;;  %23371 = vmatprep.subr.bf16.mxu0 %v23370_v3 }
 0x20d   :  { %23657 = vmatpush3.bf16.msra.mxu1 %v23366_v28  ;;  %20390 = vmatprep.mubr.f32.mxu1 %v27464_v4 }
 0x20e   :  { %23659 = vmatprep.subr.bf16.mxu1 %v23370_v3  ;;  %19887 = vmatmul.mubr.f32.gmra.mrb[24].mxu0 %v27474_v62 }
 0x20f   :  { %23373 = vmatpush3.bf16.msra.mxu0 %v23370_v3  ;;  %19889 = vmatprep.mubr.f32.mxu0 %v27480_v13 }
 0x210   :  { %20391 = vmatmul.mubr.f32.gmra.mrb[24].mxu1 %v27476_v8  ;;  %23375 = vmatprep.subr.bf16.mxu0 %v23374_v11 }
 0x211   :  { %23661 = vmatpush3.bf16.msra.mxu1 %v23370_v3  ;;  %20393 = vmatprep.mubr.f32.mxu1 %v27482_v14  ;;  %v27702_v58 = vpop.f32.mrb[0].mxu0  ;;  %v15581_v3 = vld [vmem:[%s31000_s1 + $0x398] sm:$0xff] }
 0x212   :  { %23663 = vmatprep.subr.bf16.mxu1 %v23374_v11  ;;  %v2017_v54 = vmul.f32 %v27702_v58, %v27702_v58  ;;  %v27710_v4 = vpop.f32.mrb[1].mxu0  ;;  %19890 = vmatmul.mubr.f32.gmra.mrb[26].mxu0 %v27492_v16  ;;  %v15577_v16 = vld [vmem:[%s31000_s1 + $0x378] sm:$0xff] }
 0x213   :  { %v27704_v43 = vpop.f32.mrb[0].mxu1  ;;  %v1994_v8 = vadd.f32 %v27702_v58, %v27710_v4  ;;  %v2016_v13 = vmul.f32 %v27710_v4, %v27710_v4  ;;  %23377 = vmatpush3.bf16.msra.mxu0 %v23374_v11  ;;  %19892 = vmatprep.mubr.f32.mxu0 %v27498_v49  ;;  %v23382_v49 = vpack.c.bf16 %v15577_v16, %v15576_v45 }
 0x214   :  { %v3801_v2 = vmul.f32 %v27704_v43, %v27704_v43  ;;  %v27712_v62 = vpop.f32.mrb[1].mxu1  ;;  %20394 = vmatmul.mubr.f32.gmra.mrb[26].mxu1 %v27494_v47  ;;  %23379 = vmatprep.subr.bf16.mxu0 %v23378_v57 }
 0x215   :  { %v3778_v14 = vadd.f32 %v27704_v43, %v27712_v62  ;;  %v3800_v35 = vmul.f32 %v27712_v62, %v27712_v62  ;;  %23665 = vmatpush3.bf16.msra.mxu1 %v23374_v11  ;;  %v2032_v47 = vadd.f32 %v2017_v54, %v2016_v13  ;;  %v27731_v23 = vpop.f32.mrb[2].mxu0  ;;  %20396 = vmatprep.mubr.f32.mxu1 %v27500_v44  ;;  %v4969_v13 = vld [vmem:[#allocation2 + $0x1f8] sm:$0xff] }
 0x216   :  { %v27736_v55 = vpop.f32.mrb[3].mxu0  ;;  %19893 = vmatmul.mubr.f32.gmra.mrb[28].mxu0 %v27510_v38  ;;  %23667 = vmatprep.subr.bf16.mxu1 %v23378_v57  ;;  %v2019_v38 = vmul.f32 %v27731_v23, %v27731_v23 }
 0x217   :  { %v3816_v9 = vadd.f32 %v3801_v2, %v3800_v35  ;;  %v27733_v46 = vpop.f32.mrb[2].mxu1  ;;  %v1995_v51 = vadd.f32 %v1994_v8, %v27736_v55  ;;  %v2018_v39 = vmul.f32 %v27736_v55, %v27736_v55  ;;  %23381 = vmatpush3.bf16.msra.mxu0 %v23378_v57  ;;  %19895 = vmatprep.mubr.f32.mxu0 %v4787_v25  ;;  %v15583_v35 = vld [vmem:[%s31000_s1 + $0x3a8] sm:$0xff] }
 0x218   :  { %v27738_v21 = vpop.f32.mrb[3].mxu1  ;;  %20397 = vmatmul.mubr.f32.gmra.mrb[28].mxu1 %v31098_v24  ;;  %v3803_v33 = vmul.f32 %v27733_v46, %v27733_v46  ;;  %23383 = vmatprep.subr.bf16.mxu0 %v23382_v49 }
 0x219   :  { %v3779_v42 = vadd.f32 %v3778_v14, %v27738_v21  ;;  %v3802_v44 = vmul.f32 %v27738_v21, %v27738_v21  ;;  %23669 = vmatpush3.bf16.msra.mxu1 %v23378_v57  ;;  %v2033_v48 = vadd.f32 %v2032_v47, %v2018_v39  ;;  %v27754_v12 = vpop.f32.mrb[4].mxu0  ;;  %20399 = vmatprep.mubr.f32.mxu1 %v6571_v19  ;;  %v15582_v14 = vld [vmem:[%s31000_s1 + $0x3a0] sm:$0xff]  ;;  %v6753_v47 = vld [vmem:[#allocation2 + $0x2b8] sm:$0xff] }
 0x21a   :  { %v1996_v60 = vadd.f32 %v27731_v23, %v1995_v51  ;;  %v27767_v61 = vpop.f32.mrb[5].mxu0  ;;  %19896 = vmatmul.mubr.f32.gmra.mrb[30].mxu0 %v27748_v15  ;;  %23671 = vmatprep.subr.bf16.mxu1 %v23382_v49  ;;  %v2021_v7 = vmul.f32 %v27754_v12, %v27754_v12  ;;  %v4970_v39 = vld [vmem:[#allocation2 + $0x200] sm:$0xff] }
 0x21b   :  { %v3817_v52 = vadd.f32 %v3816_v9, %v3802_v44  ;;  %v27756_v27 = vpop.f32.mrb[4].mxu1  ;;  %v3780_v56 = vadd.f32 %v27733_v46, %v3779_v42  ;;  %v2020_v1 = vmul.f32 %v27767_v61, %v27767_v61  ;;  %v2034_v17 = vadd.f32 %v2033_v48, %v2019_v38  ;;  %23385 = vmatpush3.bf16.msra.mxu0 %v23382_v49 }
 0x21c   :  { %v27769_v37 = vpop.f32.mrb[5].mxu1  ;;  %v1997_v53 = vadd.f32 %v1996_v60, %v27767_v61  ;;  %20400 = vmatmul.mubr.f32.gmra.mrb[30].mxu1 %v27752_v59  ;;  %19930 = vmatprep.mubr.f32.mxu0 %v4967_v41  ;;  %v3805_v6 = vmul.f32 %v27756_v27, %v27756_v27  ;;  %v23390_v9 = vpack.c.bf16 %v15581_v3, %v15580_v29  ;;  %v15584_v41 = vld [vmem:[%s31000_s1 + $0x3b0] sm:$0xff] }
 0x21d   :  { %v3804_v18 = vmul.f32 %v27769_v37, %v27769_v37  ;;  %v3781_v50 = vadd.f32 %v3780_v56, %v27769_v37  ;;  %v3818_v20 = vadd.f32 %v3817_v52, %v3803_v33  ;;  %v2035_v63 = vadd.f32 %v2034_v17, %v2020_v1  ;;  %23673 = vmatpush3.bf16.msra.mxu1 %v23382_v49  ;;  %v27782_v0 = vpop.f32.mrb[6].mxu0  ;;  %v6754_v52 = vld [vmem:[#allocation2 + $0x2c0] sm:$0xff] }
 0x21e   :  { %v1998_v28 = vadd.f32 %v27754_v12, %v1997_v53  ;;  %20434 = vmatprep.mubr.f32.mxu1 %v6751_v10  ;;  %v27795_v11 = vpop.f32.mrb[7].mxu0  ;;  %19931 = vmatmul.mubr.f32.vlgmr.msra.gmra.mrb[16].mxu0 %v4968_v36  ;;  %v2023_v24 = vmul.f32 %v27782_v0, %v27782_v0  ;;  %v23394_v60 = vpack.c.bf16 %v15583_v35, %v15582_v14  ;;  %v15585_v53 = vld [vmem:[%s31000_s1 + $0x3b8] sm:$0xff]  ;;  %v4971_v10 = vld [vmem:[#allocation2 + $0x210] sm:$0xff]  ;;  %v4973_v35 = vld [vmem:[#allocation2 + $0x228] sm:$0xff] }
 0x21f   :  { %v27784_v22 = vpop.f32.mrb[6].mxu1  ;;  %v3819_v34 = vadd.f32 %v3818_v20, %v3804_v18  ;;  %v3782_v31 = vadd.f32 %v27756_v27, %v3781_v50  ;;  %v2022_v54 = vmul.f32 %v27795_v11, %v27795_v11  ;;  %v2036_v2 = vadd.f32 %v2035_v63, %v2021_v7  ;;  %23387 = vmatprep.subr.bf16.mxu0 %v23386_v5  ;;  %v6755_v50 = vld [vmem:[#allocation2 + $0x2d0] sm:$0xff] }
 0x220   :  { %v27797_v30 = vpop.f32.mrb[7].mxu1  ;;  %v1999_v57 = vadd.f32 %v1998_v28, %v27795_v11  ;;  %20435 = vmatmul.mubr.f32.vlgmr.msra.gmra.mrb[16].mxu1 %v6752_v32  ;;  %23675 = vmatprep.subr.bf16.mxu1 %v23386_v5  ;;  %v3807_v42 = vmul.f32 %v27784_v22, %v27784_v22  ;;  %v4972_v28 = vld [vmem:[#allocation2 + $0x218] sm:$0xff] }
 0x221   :  { %v3806_v8 = vmul.f32 %v27797_v30, %v27797_v30  ;;  %v3783_v45 = vadd.f32 %v3782_v31, %v27797_v30  ;;  %v3820_v16 = vadd.f32 %v3819_v34, %v3805_v6  ;;  %v2037_v25 = vadd.f32 %v2036_v2, %v2022_v54  ;;  %23389 = vmatpush3.bf16.msra.mxu0 %v23386_v5  ;;  %v27814_v19 = vpop.f32.mrb[8].mxu0  ;;  %v6756_v34 = vld [vmem:[#allocation2 + $0x2d8] sm:$0xff] }
 0x222   :  { %v2000_v51 = vadd.f32 %v27782_v0, %v1999_v57  ;;  %23677 = vmatpush3.bf16.msra.mxu1 %v23386_v5  ;;  %19933 = vmatprep.mubr.f32.mxu0 %v4969_v13  ;;  %v27821_v38 = vpop.f32.mrb[9].mxu0  ;;  %v2025_v1 = vmul.f32 %v27814_v19, %v27814_v19  ;;  %v23398_v31 = vpack.c.bf16 %v15585_v53, %v15584_v41 }
 0x223   :  { %v27816_v49 = vpop.f32.mrb[8].mxu1  ;;  %v3821_v44 = vadd.f32 %v3820_v16, %v3806_v8  ;;  %20437 = vmatprep.mubr.f32.mxu1 %v6753_v47  ;;  %v2024_v26 = vmul.f32 %v27821_v38, %v27821_v38  ;;  %v2038_v33 = vadd.f32 %v2037_v25, %v2023_v24  ;;  %v3784_v56 = vadd.f32 %v27784_v22, %v3783_v45  ;;  %v6757_v45 = vld [vmem:[#allocation2 + $0x2e8] sm:$0xff] }
 0x224   :  { %v27823_v48 = vpop.f32.mrb[9].mxu1  ;;  %v2001_v40 = vadd.f32 %v2000_v51, %v27821_v38  ;;  %19934 = vmatmul.mubr.f32.gmra.mrb[18].mxu0 %v4970_v39  ;;  %23391 = vmatprep.subr.bf16.mxu0 %v23390_v9  ;;  %v3809_v32 = vmul.f32 %v27816_v49, %v27816_v49  ;;  %v4974_v51 = vld [vmem:[#allocation2 + $0x230] sm:$0xff] }
 0x225   :  { %v3808_v17 = vmul.f32 %v27823_v48, %v27823_v48  ;;  %v3822_v18 = vadd.f32 %v3821_v44, %v3807_v42  ;;  %v2039_v20 = vadd.f32 %v2038_v33, %v2024_v26  ;;  %v3785_v36 = vadd.f32 %v3784_v56, %v27823_v48  ;;  %20438 = vmatmul.mubr.f32.gmra.mrb[18].mxu1 %v6754_v52  ;;  %v27840_v5 = vpop.f32.mrb[10].mxu0  ;;  %v6758_v26 = vld [vmem:[#allocation2 + $0x2f0] sm:$0xff]  ;;  %v15586_v33 = vld [vmem:[%s31000_s1 + $0x3c0] sm:$0xff]  ;;  %v15587_v56 = vld [vmem:[%s31000_s1 + $0x3c8] sm:$0xff] }
 0x226   :  { %23679 = vmatprep.subr.bf16.mxu1 %v23390_v9  ;;  %v2002_v63 = vadd.f32 %v27814_v19, %v2001_v40  ;;  %23393 = vmatpush3.bf16.msra.mxu0 %v23390_v9  ;;  %v27847_v3 = vpop.f32.mrb[11].mxu0  ;;  %v2027_v16 = vmul.f32 %v27840_v5, %v27840_v5 }
 0x227   :  { %v27842_v7 = vpop.f32.mrb[10].mxu1  ;;  %v3823_v29 = vadd.f32 %v3822_v18, %v3808_v17  ;;  %23681 = vmatpush3.bf16.msra.mxu1 %v23390_v9  ;;  %19936 = vmatprep.mubr.f32.mxu0 %v4971_v10  ;;  %v2026_v54 = vmul.f32 %v27847_v3, %v27847_v3  ;;  %v2040_v2 = vadd.f32 %v2039_v20, %v2025_v1  ;;  %v4975_v10 = vld [vmem:[#allocation2 + $0x240] sm:$0xff] }
 0x228   :  { %v27849_v6 = vpop.f32.mrb[11].mxu1  ;;  %20440 = vmatprep.mubr.f32.mxu1 %v6755_v50  ;;  %v2003_v57 = vadd.f32 %v2002_v63, %v27847_v3  ;;  %v3786_v8 = vadd.f32 %v27816_v49, %v3785_v36  ;;  %19937 = vmatmul.mubr.f32.gmra.mrb[20].mxu0 %v4972_v28  ;;  %v3811_v39 = vmul.f32 %v27842_v7, %v27842_v7  ;;  %v6759_v63 = vld [vmem:[#allocation2 + $0x300] sm:$0xff] }
 0x229   :  { %v3810_v13 = vmul.f32 %v27849_v6, %v27849_v6  ;;  %v3824_v14 = vadd.f32 %v3823_v29, %v3809_v32  ;;  %23395 = vmatprep.subr.bf16.mxu0 %v23394_v60  ;;  %v2041_v47 = vadd.f32 %v2040_v2, %v2026_v54  ;;  %20441 = vmatmul.mubr.f32.gmra.mrb[20].mxu1 %v6756_v34  ;;  %v27859_v9 = vpop.f32.mrb[12].mxu0 }
 0x22a   :  { %23683 = vmatprep.subr.bf16.mxu1 %v23394_v60  ;;  %v2004_v25 = vadd.f32 %v27840_v5, %v2003_v57  ;;  %v3787_v42 = vadd.f32 %v3786_v8, %v27849_v6  ;;  %23397 = vmatpush3.bf16.msra.mxu0 %v23394_v60  ;;  %v27867_v52 = vpop.f32.mrb[13].mxu0  ;;  %v2029_v50 = vmul.f32 %v27859_v9, %v27859_v9  ;;  %v4976_v8 = vld [vmem:[#allocation2 + $0x248] sm:$0xff] }
 0x22b   :  { %v27861_v24 = vpop.f32.mrb[12].mxu1  ;;  %v3825_v44 = vadd.f32 %v3824_v14, %v3810_v13  ;;  %23685 = vmatpush3.bf16.msra.mxu1 %v23394_v60  ;;  %19939 = vmatprep.mubr.f32.mxu0 %v4973_v35  ;;  %v2028_v60 = vmul.f32 %v27867_v52, %v27867_v52  ;;  %v2042_v53 = vadd.f32 %v2041_v47, %v2027_v16  ;;  %v15588_v13 = vld [vmem:[%s31000_s1 + $0x3d0] sm:$0xff]  ;;  %v15589_v14 = vld [vmem:[%s31000_s1 + $0x3d8] sm:$0xff]  ;;  %v6760_v16 = vld [vmem:[#allocation2 + $0x308] sm:$0xff] }
 0x22c   :  { %v27869_v40 = vpop.f32.mrb[13].mxu1  ;;  %20443 = vmatprep.mubr.f32.mxu1 %v6757_v45  ;;  %v2005_v41 = vadd.f32 %v2004_v25, %v27867_v52  ;;  %v3788_v1 = vadd.f32 %v27842_v7, %v3787_v42  ;;  %19940 = vmatmul.mubr.f32.gmra.mrb[22].mxu0 %v4974_v51  ;;  %v23402_v32 = vpack.c.bf16 %v15587_v56, %v15586_v33 }
 0x22d   :  { %v3812_v17 = vmul.f32 %v27869_v40, %v27869_v40  ;;  %v3826_v18 = vadd.f32 %v3825_v44, %v3811_v39  ;;  %23399 = vmatprep.subr.bf16.mxu0 %v23398_v31  ;;  %20444 = vmatmul.mubr.f32.gmra.mrb[22].mxu1 %v6758_v26  ;;  %v27885_v20 = vpop.f32.mrb[14].mxu0  ;;  %v2043_v29 = vadd.f32 %v2042_v53, %v2028_v60  ;;  %v6761_v26 = vld [vmem:[#allocation2 + $0x318] sm:$0xff]  ;;  %v4978_v53 = vld [vmem:[#allocation2 + $0x260] sm:$0xff] }
 0x22e   :  { %v2006_v28 = vadd.f32 %v27859_v9, %v2005_v41  ;;  %v3789_v34 = vadd.f32 %v3788_v1, %v27869_v40  ;;  %23687 = vmatprep.subr.bf16.mxu1 %v23398_v31  ;;  %23401 = vmatpush3.bf16.msra.mxu0 %v23398_v31  ;;  %v27891_v54 = vpop.f32.mrb[15].mxu0  ;;  %v3813_v35 = vmul.f32 %v27861_v24, %v27861_v24  ;;  %v15590_v1 = vld [vmem:[%s31000_s1 + $0x3e0] sm:$0xff] }
 0x22f   :  { %v27887_v36 = vpop.f32.mrb[14].mxu1  ;;  %v3827_v57 = vadd.f32 %v3826_v18, %v3812_v17  ;;  %23689 = vmatpush3.bf16.msra.mxu1 %v23398_v31  ;;  %19942 = vmatprep.mubr.f32.mxu0 %v4975_v10  ;;  %v2030_v47 = vmul.f32 %v27891_v54, %v27891_v54  ;;  %v2044_v25 = vadd.f32 %v2043_v29, %v2029_v50  ;;  %v4977_v31 = vld [vmem:[#allocation2 + $0x258] sm:$0xff]  ;;  %v15591_v17 = vld [vmem:[%s31000_s1 + $0x3e8] sm:$0xff] }
 0x230   :  { %v27893_v2 = vpop.f32.mrb[15].mxu1  ;;  %v2007_v45 = vadd.f32 %v2006_v28, %v27891_v54  ;;  %20446 = vmatprep.mubr.f32.mxu1 %v6759_v63  ;;  %v3790_v51 = vadd.f32 %v27861_v24, %v3789_v34  ;;  %19943 = vmatmul.mubr.f32.gmra.mrb[24].mxu0 %v4976_v8  ;;  %v23406_v33 = vpack.c.bf16 %v15589_v14, %v15588_v13  ;;  %v6762_v63 = vld [vmem:[#allocation2 + $0x320] sm:$0xff]  ;;  %v4979_v8 = vld [vmem:[#allocation2 + $0x270] sm:$0xff] }
 0x231   :  { %v3814_v39 = vmul.f32 %v27893_v2, %v27893_v2  ;;  %v3828_v44 = vadd.f32 %v3827_v57, %v3813_v35  ;;  %23403 = vmatprep.subr.bf16.mxu0 %v23402_v32  ;;  %v2031_v56 = vmul.f32 %v27885_v20, %v27885_v20  ;;  %v2045_v41 = vadd.f32 %v2044_v25, %v2030_v47  ;;  %v6763_v13 = vld [vmem:[#allocation2 + $0x330] sm:$0xff]  ;;  %v15593_v47 = vld [vmem:[%s31000_s1 + $0x3f8] sm:$0xff] }
 0x232   :  { %v2008_v42 = vadd.f32 %v27885_v20, %v2007_v45  ;;  %v3791_v60 = vadd.f32 %v3790_v51, %v27893_v2  ;;  %20447 = vmatmul.mubr.f32.gmra.mrb[24].mxu1 %v6760_v16  ;;  %23691 = vmatprep.subr.bf16.mxu1 %v23402_v32  ;;  %v3815_v18 = vmul.f32 %v27887_v36, %v27887_v36  ;;  %v4980_v16 = vld [vmem:[#allocation2 + $0x278] sm:$0xff] }
 0x233   :  { %v3829_v50 = vadd.f32 %v3828_v44, %v3814_v39  ;;  %23405 = vmatpush3.bf16.msra.mxu0 %v23402_v32  ;;  %23693 = vmatpush3.bf16.msra.mxu1 %v23402_v32  ;;  %v2046_v28 = vadd.f32 %v2045_v41, %v2031_v56  ;;  %v23410_v14 = vpack.c.bf16 %v15591_v17, %v15590_v1  ;;  %v15592_v32 = vld [vmem:[%s31000_s1 + $0x3f0] sm:$0xff]  ;;  %v6764_v39 = vld [vmem:[#allocation2 + $0x338] sm:$0xff]  ;;  %v4981_v56 = vld [vmem:[#allocation2 + $0x288] sm:$0xff] }
 0x234   :  { %v2009_v10 = vrot.slane %v2008_v42, 4  ;;  %v3792_v29 = vadd.f32 %v27887_v36, %v3791_v60  ;;  %19945 = vmatprep.mubr.f32.mxu0 %v4977_v31  ;;  %20449 = vmatprep.mubr.f32.mxu1 %v6761_v26  ;;  %v23414_v41 = vpack.c.bf16 %v15593_v47, %v15592_v32  ;;  %v4982_v1 = vld [vmem:[#allocation2 + $0x290] sm:$0xff]  ;;  %v15595_v17 = vld [vmem:[%s31000_s1 + $0x408] sm:$0xff] }
 0x235   :  { %v3830_v57 = vadd.f32 %v3829_v50, %v3815_v18  ;;  %19946 = vmatmul.mubr.f32.gmra.mrb[26].mxu0 %v4978_v53  ;;  %23407 = vmatprep.subr.bf16.mxu0 %v23406_v33  ;;  %v2047_v35 = vrot.slane %v2046_v28, 4  ;;  %v5161_v47 = vld [vmem:[#allocation2 + $0x1e9] sm:$0xff] }
 0x236   :  { %v2010_v34 = vadd.f32 %v2009_v10, %v2008_v42  ;;  %v3793_v45 = vrot.slane %v3792_v29, 4  ;;  %20450 = vmatmul.mubr.f32.gmra.mrb[26].mxu1 %v6762_v63  ;;  %23695 = vmatprep.subr.bf16.mxu1 %v23406_v33 }
 0x237   :  { %v3831_v51 = vrot.slane %v3830_v57, 4  ;;  %23409 = vmatpush3.bf16.msra.mxu0 %v23406_v33  ;;  %23697 = vmatpush3.bf16.msra.mxu1 %v23406_v33  ;;  %v2048_v42 = vadd.f32 %v2047_v35, %v2046_v28  ;;  %v15594_v33 = vld [vmem:[%s31000_s1 + $0x400] sm:$0xff] }
 0x238   :  { %v2011_v25 = vrot.slane %v2010_v34, 2  ;;  %v3794_v44 = vadd.f32 %v3793_v45, %v3792_v29  ;;  %19948 = vmatprep.mubr.f32.mxu0 %v4979_v8  ;;  %20452 = vmatprep.mubr.f32.mxu1 %v6763_v13  ;;  %v25920_v28 = vld [vmem:[#allocation2] sm:$0xff]  ;;  %v23418_v8 = vpack.c.bf16 %v15595_v17, %v15594_v33  ;;  %v5164_v17 = vld [vmem:[#allocation2 + $0x211] sm:$0xff] }
 0x239   :  { %v3832_v26 = vadd.f32 %v3831_v51, %v3830_v57  ;;  %19949 = vmatmul.mubr.f32.gmra.mrb[28].mxu0 %v4980_v16  ;;  %23411 = vmatprep.subr.bf16.mxu0 %v23410_v14  ;;  %v2049_v60 = vrot.slane %v2048_v42, 2  ;;  %v6944_v57 = vld [vmem:[#allocation2 + $0x2a1] sm:$0xff]  ;;  %v15597_v16 = vld [vmem:[%s31000_s1 + $0x418] sm:$0xff] }
 0x23a   :  { %v2012_v31 = vadd.f32 %v2011_v25, %v2010_v34  ;;  %v3795_v53 = vrot.slane %v3794_v44, 2  ;;  %20453 = vmatmul.mubr.f32.gmra.mrb[28].mxu1 %v6764_v39  ;;  %23699 = vmatprep.subr.bf16.mxu1 %v23410_v14  ;;  %v5160_v34 = vld [vmem:[#allocation2 + $0x1e1] sm:$0xff]  ;;  %v6945_v25 = vld [vmem:[#allocation2 + $0x2a9] sm:$0xff] }
 0x23b   :  { %v3833_v10 = vrot.slane %v3832_v26, 2  ;;  %23413 = vmatpush3.bf16.msra.mxu0 %v23410_v14  ;;  %23701 = vmatpush3.bf16.msra.mxu1 %v23410_v14  ;;  %v2050_v50 = vadd.f32 %v2049_v60, %v2048_v42  ;;  %v15596_v14 = vld [vmem:[%s31000_s1 + $0x410] sm:$0xff]  ;;  %v15599_v60 = vld [vmem:[%s31000_s1 + $0x428] sm:$0xff] }
 0x23c   :  { %v2013_v18 = vrot.slane %v2012_v31, 1  ;;  %v3796_v63 = vadd.f32 %v3795_v53, %v3794_v44  ;;  %19951 = vmatprep.mubr.f32.mxu0 %v4981_v56  ;;  %20455 = vmatprep.mubr.f32.mxu1 %v25920_v28  ;;  %v5162_v44 = vld [vmem:[#allocation2 + $0x1f9] sm:$0xff]  ;;  %v6947_v33 = vld [vmem:[#allocation2 + $0x2c1] sm:$0xff] }
 0x23d   :  { %v3834_v29 = vadd.f32 %v3833_v10, %v3832_v26  ;;  %19952 = vmatmul.mubr.f32.gmra.mrb[30].mxu0 %v4982_v1  ;;  %23415 = vmatprep.subr.bf16.mxu0 %v23414_v41  ;;  %v2051_v35 = vrot.slane %v2050_v50, 1  ;;  %v23422_v26 = vpack.c.bf16 %v15597_v16, %v15596_v14  ;;  %v5163_v1 = vld [vmem:[#allocation2 + $0x201] sm:$0xff]  ;;  %v6951_v14 = vld [vmem:[#allocation2 + $0x2f1] sm:$0xff] }
 0x23e   :  { %v2014_v13 = vadd.f32 %v2013_v18, %v2012_v31  ;;  %v3797_v45 = vrot.slane %v3796_v63, 1  ;;  %20456 = vmatmul.mubr.f32.gmra.mrb[30].mxu1 %v25920_v28  ;;  %23703 = vmatprep.subr.bf16.mxu1 %v23414_v41  ;;  %v6946_v31 = vld [vmem:[#allocation2 + $0x2b9] sm:$0xff]  ;;  %v6948_v18 = vld [vmem:[#allocation2 + $0x2d1] sm:$0xff]  ;;  %v5168_v16 = vld [vmem:[#allocation2 + $0x241] sm:$0xff] }
 0x23f   :  { %v3835_v32 = vrot.slane %v3834_v29, 1  ;;  %23417 = vmatpush3.bf16.msra.mxu0 %v23414_v41  ;;  %23705 = vmatpush3.bf16.msra.mxu1 %v23414_v41  ;;  %v2052_v51 = vadd.f32 %v2051_v35, %v2050_v50  ;;  %v15598_v41 = vld [vmem:[%s31000_s1 + $0x420] sm:$0xff]  ;;  %v15600_v50 = vld [vmem:[%s31000_s1 + $0x430] sm:$0xff]  ;;  %v15603_v35 = vld [vmem:[%s31000_s1 + $0x448] sm:$0xff] }
 0x240   :  { %v3798_v39 = vadd.f32 %v3797_v45, %v3796_v63  ;;  %19986 = vmatprep.mubr.f32.mxu0 %v5160_v34  ;;  %20490 = vmatprep.mubr.f32.mxu1 %v6944_v57  ;;  %v23426_v10 = vpack.c.bf16 %v15599_v60, %v15598_v41  ;;  %v15601_v63 = vld [vmem:[%s31000_s1 + $0x438] sm:$0xff]  ;;  %v5166_v34 = vld [vmem:[#allocation2 + $0x229] sm:$0xff]  ;;  %v15606_v41 = vld [vmem:[%s31000_s1 + $0x460] sm:$0xff] }
 0x241   :  { %v3836_v42 = vadd.f32 %v3835_v32, %v3834_v29  ;;  %23419 = vmatprep.subr.bf16.mxu0 %v23418_v8  ;;  %23707 = vmatprep.subr.bf16.mxu1 %v23418_v8  ;;  %v5165_v28 = vld [vmem:[#allocation2 + $0x219] sm:$0xff]  ;;  %v6950_v57 = vld [vmem:[#allocation2 + $0x2e9] sm:$0xff]  ;;  %v5167_v45 = vld [vmem:[#allocation2 + $0x231] sm:$0xff] }
 0x242   :  { %v27940_v56 = vadd.f32 %v3798_v39, %v2014_v13  ;;  %19987 = vmatmul.mubr.f32.vlgmr.msra.gmra.mrb[16].mxu0 %v5161_v47  ;;  %20491 = vmatmul.mubr.f32.vlgmr.msra.gmra.mrb[16].mxu1 %v6945_v25  ;;  %v6949_v29 = vld [vmem:[#allocation2 + $0x2d9] sm:$0xff]  ;;  %v6952_v32 = vld [vmem:[#allocation2 + $0x301] sm:$0xff]  ;;  %v15604_v25 = vld [vmem:[%s31000_s1 + $0x450] sm:$0xff] }
 0x243   :  { %v27948_v53 = vadd.f32 %v3836_v42, %v2052_v51  ;;  %23421 = vmatpush3.bf16.msra.mxu0 %v23418_v8  ;;  %23709 = vmatpush3.bf16.msra.mxu1 %v23418_v8  ;;  %v23430_v8 = vpack.c.bf16 %v15601_v63, %v15600_v50  ;;  %v15602_v13 = vld [vmem:[%s31000_s1 + $0x440] sm:$0xff]  ;;  %v15605_v51 = vld [vmem:[%s31000_s1 + $0x458] sm:$0xff]  ;;  %v5169_v39 = vld [vmem:[#allocation2 + $0x249] sm:$0xff] }
 0x244   :  { %19989 = vmatprep.mubr.f32.mxu0 %v5162_v44  ;;  %20493 = vmatprep.mubr.f32.mxu1 %v6946_v31  ;;  %v23434_v47 = vpack.c.bf16 %v15603_v35, %v15602_v13  ;;  %v6953_v42 = vld [vmem:[#allocation2 + $0x309] sm:$0xff]  ;;  %v5170_v44 = vld [vmem:[#allocation2 + $0x259] sm:$0xff]  ;;  %v5175_v13 = vld [vmem:[#allocation2 + $0x291] sm:$0xff] }
 0x245   :  { %23423 = vmatprep.subr.bf16.mxu0 %v23422_v26  ;;  %23711 = vmatprep.subr.bf16.mxu1 %v23422_v26  ;;  %v6954_v31 = vld [vmem:[#allocation2 + $0x319] sm:$0xff]  ;;  %v15607_v60 = vld [vmem:[%s31000_s1 + $0x468] sm:$0xff]  ;;  %v15608_v50 = vld [vmem:[%s31000_s1 + $0x470] sm:$0xff] }
 0x246   :  { %19990 = vmatmul.mubr.f32.gmra.mrb[18].mxu0 %v5163_v1  ;;  %20494 = vmatmul.mubr.f32.gmra.mrb[18].mxu1 %v6947_v33  ;;  %v5171_v1 = vld [vmem:[#allocation2 + $0x261] sm:$0xff]  ;;  %v15609_v63 = vld [vmem:[%s31000_s1 + $0x478] sm:$0xff] }
 0x247   :  { %23425 = vmatpush3.bf16.msra.mxu0 %v23422_v26  ;;  %23713 = vmatpush3.bf16.msra.mxu1 %v23422_v26  ;;  %v23438_v26 = vpack.c.bf16 %v15605_v51, %v15604_v25  ;;  %v6955_v33 = vld [vmem:[#allocation2 + $0x321] sm:$0xff]  ;;  %v6959_v35 = vld [vmem:[#allocation2 + $0x351] sm:$0xff] }
 0x248   :  { %19992 = vmatprep.mubr.f32.mxu0 %v5164_v17  ;;  %20496 = vmatprep.mubr.f32.mxu1 %v6948_v18  ;;  %v5172_v17 = vld [vmem:[#allocation2 + $0x271] sm:$0xff]  ;;  %v7139_v25 = vld [vmem:[#allocation2 + $0x2ba] sm:$0xff]  ;;  %v5356_v51 = vld [vmem:[#allocation2 + $0x202] sm:$0xff] }
 0x249   :  { %23427 = vmatprep.subr.bf16.mxu0 %v23426_v10  ;;  %23715 = vmatprep.subr.bf16.mxu1 %v23426_v10  ;;  %v6956_v18 = vld [vmem:[#allocation2 + $0x331] sm:$0xff] }
 0x24a   :  { %19993 = vmatmul.mubr.f32.gmra.mrb[20].mxu0 %v5165_v28  ;;  %20497 = vmatmul.mubr.f32.gmra.mrb[20].mxu1 %v6949_v29  ;;  %v5173_v28 = vld [vmem:[#allocation2 + $0x279] sm:$0xff] }
 0x24b   :  { %23429 = vmatpush3.bf16.msra.mxu0 %v23426_v10  ;;  %23717 = vmatpush3.bf16.msra.mxu1 %v23426_v10  ;;  %v23442_v10 = vpack.c.bf16 %v15607_v60, %v15606_v41  ;;  %v6957_v29 = vld [vmem:[#allocation2 + $0x339] sm:$0xff]  ;;  %v5359_v41 = vld [vmem:[#allocation2 + $0x22a] sm:$0xff] }
 0x24c   :  { %19995 = vmatprep.mubr.f32.mxu0 %v5166_v34  ;;  %20499 = vmatprep.mubr.f32.mxu1 %v6950_v57  ;;  %v5174_v34 = vld [vmem:[#allocation2 + $0x289] sm:$0xff] }
 0x24d   :  { %23431 = vmatprep.subr.bf16.mxu0 %v23430_v8  ;;  %23719 = vmatprep.subr.bf16.mxu1 %v23430_v8  ;;  %v6958_v57 = vld [vmem:[#allocation2 + $0x349] sm:$0xff] }
 0x24e   :  { %19996 = vmatmul.mubr.f32.gmra.mrb[22].mxu0 %v5167_v45  ;;  %20500 = vmatmul.mubr.f32.gmra.mrb[22].mxu1 %v6951_v14  ;;  %v5353_v45 = vld [vmem:[#allocation2 + $0x1e2] sm:$0xff]  ;;  %v7143_v60 = vld [vmem:[#allocation2 + $0x2ea] sm:$0xff] }
 0x24f   :  { %23433 = vmatpush3.bf16.msra.mxu0 %v23430_v8  ;;  %23721 = vmatpush3.bf16.msra.mxu1 %v23430_v8  ;;  %v23446_v8 = vpack.c.bf16 %v15609_v63, %v15608_v50  ;;  %v7137_v14 = vld [vmem:[#allocation2 + $0x2a2] sm:$0xff]  ;;  %v7146_v50 = vld [vmem:[#allocation2 + $0x30a] sm:$0xff]  ;;  %v5363_v63 = vld [vmem:[#allocation2 + $0x25a] sm:$0xff] }
 0x250   :  { %19998 = vmatprep.mubr.f32.mxu0 %v5168_v16  ;;  %20502 = vmatprep.mubr.f32.mxu1 %v6952_v32  ;;  %v5354_v16 = vld [vmem:[#allocation2 + $0x1ea] sm:$0xff] }
 0x251   :  { %23435 = vmatprep.subr.bf16.mxu0 %v23434_v47  ;;  %23723 = vmatprep.subr.bf16.mxu1 %v23434_v47  ;;  %v7138_v32 = vld [vmem:[#allocation2 + $0x2aa] sm:$0xff] }
 0x252   :  { %19999 = vmatmul.mubr.f32.gmra.mrb[24].mxu0 %v5169_v39  ;;  %20503 = vmatmul.mubr.f32.gmra.mrb[24].mxu1 %v6953_v42  ;;  %v7140_v39 = vld [vmem:[#allocation2 + $0x2c2] sm:$0xff]  ;;  %v5357_v42 = vld [vmem:[#allocation2 + $0x212] sm:$0xff] }
 0x253   :  { %23437 = vmatpush3.bf16.msra.mxu0 %v23434_v47  ;;  %23725 = vmatpush3.bf16.msra.mxu1 %v23434_v47  ;;  %v5355_v47 = vld [vmem:[#allocation2 + $0x1fa] sm:$0xff] }
 0x254   :  { %20001 = vmatprep.mubr.f32.mxu0 %v5170_v44  ;;  %20505 = vmatprep.mubr.f32.mxu1 %v6954_v31  ;;  %v7141_v44 = vld [vmem:[#allocation2 + $0x2d2] sm:$0xff]  ;;  %v5358_v31 = vld [vmem:[#allocation2 + $0x21a] sm:$0xff] }
 0x255   :  { %23439 = vmatprep.subr.bf16.mxu0 %v23438_v26  ;;  %23727 = vmatprep.subr.bf16.mxu1 %v23438_v26 }
 0x256   :  { %20002 = vmatmul.mubr.f32.gmra.mrb[26].mxu0 %v5171_v1  ;;  %20506 = vmatmul.mubr.f32.gmra.mrb[26].mxu1 %v6955_v33  ;;  %v5360_v1 = vld [vmem:[#allocation2 + $0x232] sm:$0xff] }
 0x257   :  { %23441 = vmatpush3.bf16.msra.mxu0 %v23438_v26  ;;  %23729 = vmatpush3.bf16.msra.mxu1 %v23438_v26  ;;  %v7142_v26 = vld [vmem:[#allocation2 + $0x2da] sm:$0xff]  ;;  %v7144_v33 = vld [vmem:[#allocation2 + $0x2f2] sm:$0xff] }
 0x258   :  { %20004 = vmatprep.mubr.f32.mxu0 %v5172_v17  ;;  %20508 = vmatprep.mubr.f32.mxu1 %v6956_v18  ;;  %v5361_v17 = vld [vmem:[#allocation2 + $0x242] sm:$0xff] }
 0x259   :  { %23443 = vmatprep.subr.bf16.mxu0 %v23442_v10  ;;  %23731 = vmatprep.subr.bf16.mxu1 %v23442_v10  ;;  %v7145_v18 = vld [vmem:[#allocation2 + $0x302] sm:$0xff] }
 0x25a   :  { %20005 = vmatmul.mubr.f32.gmra.mrb[28].mxu0 %v5173_v28  ;;  %20509 = vmatmul.mubr.f32.gmra.mrb[28].mxu1 %v6957_v29  ;;  %v7147_v28 = vld [vmem:[#allocation2 + $0x31a] sm:$0xff]  ;;  %v5364_v29 = vld [vmem:[#allocation2 + $0x262] sm:$0xff] }
 0x25b   :  { %23445 = vmatpush3.bf16.msra.mxu0 %v23442_v10  ;;  %23733 = vmatpush3.bf16.msra.mxu1 %v23442_v10  ;;  %v5362_v10 = vld [vmem:[#allocation2 + $0x24a] sm:$0xff] }
 0x25c   :  { %20007 = vmatprep.mubr.f32.mxu0 %v5174_v34  ;;  %20511 = vmatprep.mubr.f32.mxu1 %v6958_v57  ;;  %v7148_v34 = vld [vmem:[#allocation2 + $0x322] sm:$0xff]  ;;  %v5365_v57 = vld [vmem:[#allocation2 + $0x272] sm:$0xff] }
 0x25d   :  { %23447 = vmatprep.subr.bf16.mxu0 %v23446_v8  ;;  %23735 = vmatprep.subr.bf16.mxu1 %v23446_v8 }
 0x25e   :  { %20008 = vmatmul.mubr.f32.gmra.mrb[30].mxu0 %v5175_v13  ;;  %20512 = vmatmul.mubr.f32.gmra.mrb[30].mxu1 %v6959_v35  ;;  %v5367_v13 = vld [vmem:[#allocation2 + $0x28a] sm:$0xff] }
 0x25f   :  { %23449 = vmatpush3.bf16.msra.mxu0 %v23446_v8  ;;  %23737 = vmatpush3.bf16.msra.mxu1 %v23446_v8  ;;  %v7149_v8 = vld [vmem:[#allocation2 + $0x332] sm:$0xff]  ;;  %v7151_v35 = vld [vmem:[#allocation2 + $0x34a] sm:$0xff] }
 0x260   :  { %20042 = vmatprep.mubr.f32.mxu0 %v5353_v45  ;;  %20546 = vmatprep.mubr.f32.mxu1 %v7137_v14  ;;  %v5368_v45 = vld [vmem:[#allocation2 + $0x292] sm:$0xff] }
 0x261   :  { %v7152_v14 = vld [vmem:[#allocation2 + $0x352] sm:$0xff] }
 0x262   :  { %20043 = vmatmul.mubr.f32.vlgmr.msra.gmra.mrb[16].mxu0 %v5354_v16  ;;  %20547 = vmatmul.mubr.f32.vlgmr.msra.gmra.mrb[16].mxu1 %v7138_v32  ;;  %v15738_v16 = vld [vmem:[%s31002_s4 + $0x80] sm:$0xff]  ;;  %v15739_v32 = vld [vmem:[%s31002_s4 + $0x88] sm:$0xff] }
 0x263   :  { %20045 = vmatprep.mubr.f32.mxu0 %v5355_v47  ;;  %20549 = vmatprep.mubr.f32.mxu1 %v7139_v25  ;;  %v23738_v47 = vpack.c.bf16 %v15739_v32, %v15738_v16  ;;  %v7767_v16 = vld [vmem:[%s31002_s4 + $0x18] sm:$0xff] }
 0x265   :  { %23739 = vmatprep.subr.bf16.mxu0 %v23738_v47  ;;  %24027 = vmatprep.subr.bf16.mxu1 %v23738_v47 }
 0x266   :  { %20046 = vmatmul.mubr.f32.gmra.mrb[18].mxu0 %v5356_v51  ;;  %20550 = vmatmul.mubr.f32.gmra.mrb[18].mxu1 %v7140_v39  ;;  %v15742_v51 = vld [vmem:[%s31002_s4 + $0xa0] sm:$0xff]  ;;  %v15743_v39 = vld [vmem:[%s31002_s4 + $0xa8] sm:$0xff] }
 0x267   :  { %20048 = vmatprep.mubr.f32.mxu0 %v5357_v42  ;;  %20552 = vmatprep.mubr.f32.mxu1 %v7141_v44  ;;  %v23746_v42 = vpack.c.bf16 %v15743_v39, %v15742_v51  ;;  %v15744_v44 = vld [vmem:[%s31002_s4 + $0xb0] sm:$0xff]  ;;  %v7771_v51 = vld [vmem:[%s31002_s4 + $0x38] sm:$0xff] }
 0x268   :  { %23741 = vmatpush3.bf16.msra.mxu0 %v23738_v47  ;;  %24029 = vmatpush3.bf16.msra.mxu1 %v23738_v47  ;;  %v7768_v47 = vld [vmem:[%s31002_s4 + $0x20] sm:$0xff] }
 0x26a   :  { %20049 = vmatmul.mubr.f32.gmra.mrb[20].mxu0 %v5358_v31  ;;  %20553 = vmatmul.mubr.f32.gmra.mrb[20].mxu1 %v7142_v26  ;;  %v15745_v31 = vld [vmem:[%s31002_s4 + $0xb8] sm:$0xff] }
 0x26b   :  { %20051 = vmatprep.mubr.f32.mxu0 %v5359_v41  ;;  %20555 = vmatprep.mubr.f32.mxu1 %v7143_v60  ;;  %v23750_v26 = vpack.c.bf16 %v15745_v31, %v15744_v44  ;;  %v15746_v41 = vld [vmem:[%s31002_s4 + $0xc0] sm:$0xff]  ;;  %v15747_v60 = vld [vmem:[%s31002_s4 + $0xc8] sm:$0xff] }
 0x26e   :  { %20052 = vmatmul.mubr.f32.gmra.mrb[22].mxu0 %v5360_v1  ;;  %20556 = vmatmul.mubr.f32.gmra.mrb[22].mxu1 %v7144_v33  ;;  %v23754_v1 = vpack.c.bf16 %v15747_v60, %v15746_v41  ;;  %v15748_v33 = vld [vmem:[%s31002_s4 + $0xd0] sm:$0xff] }
 0x26f   :  { %20054 = vmatprep.mubr.f32.mxu0 %v5361_v17  ;;  %20558 = vmatprep.mubr.f32.mxu1 %v7145_v18  ;;  %v15749_v17 = vld [vmem:[%s31002_s4 + $0xd8] sm:$0xff] }
 0x270   :  { %v23758_v18 = vpack.c.bf16 %v15749_v17, %v15748_v33  ;;  %v7773_v33 = vld [vmem:[%s31002_s4 + $0x48] sm:$0xff] }
 0x272   :  { %20055 = vmatmul.mubr.f32.gmra.mrb[24].mxu0 %v5362_v10  ;;  %20559 = vmatmul.mubr.f32.gmra.mrb[24].mxu1 %v7146_v50  ;;  %v15750_v10 = vld [vmem:[%s31002_s4 + $0xe0] sm:$0xff]  ;;  %v15751_v50 = vld [vmem:[%s31002_s4 + $0xe8] sm:$0xff] }
 0x273   :  { %20057 = vmatprep.mubr.f32.mxu0 %v5363_v63  ;;  %20561 = vmatprep.mubr.f32.mxu1 %v7147_v28  ;;  %v23762_v63 = vpack.c.bf16 %v15751_v50, %v15750_v10  ;;  %v15752_v28 = vld [vmem:[%s31002_s4 + $0xf0] sm:$0xff] }
 0x276   :  { %20058 = vmatmul.mubr.f32.gmra.mrb[26].mxu0 %v5364_v29  ;;  %20562 = vmatmul.mubr.f32.gmra.mrb[26].mxu1 %v7148_v34  ;;  %v15753_v29 = vld [vmem:[%s31002_s4 + $0xf8] sm:$0xff] }
 0x277   :  { %20060 = vmatprep.mubr.f32.mxu0 %v5365_v57  ;;  %20564 = vmatprep.mubr.f32.mxu1 %v7149_v8  ;;  %v23766_v34 = vpack.c.bf16 %v15753_v29, %v15752_v28  ;;  %v7764_v57 = vld [vmem:[%s31002_s4] sm:$0xff]  ;;  %v7765_v8 = vld [vmem:[%s31002_s4 + $0x8] sm:$0xff] }
 0x27a   :  { %20061 = vmatmul.mubr.f32.gmra.mrb[28].mxu0 %v27748_v15  ;;  %20565 = vmatmul.mubr.f32.gmra.mrb[28].mxu1 %v27752_v59  ;;  %v15740_v15 = vld [vmem:[%s31002_s4 + $0x90] sm:$0xff]  ;;  %v15741_v59 = vld [vmem:[%s31002_s4 + $0x98] sm:$0xff] }
 0x27b   :  { %20063 = vmatprep.mubr.f32.mxu0 %v5367_v13  ;;  %20567 = vmatprep.mubr.f32.mxu1 %v7151_v35  ;;  %v23742_v25 = vpack.c.bf16 %v15741_v59, %v15740_v15  ;;  %v7780_v13 = vld [vmem:[#allocation2 + $0x1] sm:$0xff]  ;;  %v28036_v35 = vpack.c.bf16 %v7765_v8, %v7764_v57  ;;  %v7770_v59 = vld [vmem:[%s31002_s4 + $0x30] sm:$0xff] }
 0x27c   :  { %v7769_v15 = vld [vmem:[%s31002_s4 + $0x28] sm:$0xff]  ;;  %v28070_v44 = vpack.c.bf16 %v7771_v51, %v7770_v59  ;;  %v7774_v8 = vld [vmem:[%s31002_s4 + $0x50] sm:$0xff] }
 0x27d   :  { %23743 = vmatprep.subr.bf16.mxu0 %v23742_v25  ;;  %24031 = vmatprep.subr.bf16.mxu1 %v23742_v25  ;;  %31099 = vst [vmem:[#allocation4_spill] sm:$0xff] %v28036_v35 }
 0x27e   :  { %20064 = vmatmul.mubr.f32.gmra.mrb[30].mxu0 %v5368_v45  ;;  %20568 = vmatmul.mubr.f32.gmra.mrb[30].mxu1 %v7152_v14  ;;  %v7781_v45 = vld [vmem:[#allocation2 + $0x9] sm:$0xff]  ;;  %31103 = vst [vmem:[#allocation7_spill] sm:$0xff] %v28070_v44 }
 0x27f   :  { %23745 = vmatpush3.bf16.msra.mxu0 %v23742_v25  ;;  %24033 = vmatpush3.bf16.msra.mxu1 %v23742_v25  ;;  %v7766_v14 = vld [vmem:[%s31002_s4 + $0x10] sm:$0xff]  ;;  %v28059_v25 = vpack.c.bf16 %v7769_v15, %v7768_v47 }
 0x280   :  { %23747 = vmatprep.subr.bf16.mxu0 %v23746_v42  ;;  %24035 = vmatprep.subr.bf16.mxu1 %v23746_v42  ;;  %v28047_v32 = vpack.c.bf16 %v7767_v16, %v7766_v14 }
 0x281   :  { %20602 = vmatprep.mubr.f32.mxu0 %v7780_v13  ;;  %31101 = vst [vmem:[#allocation5_spill] sm:$0xff] %v28059_v25  ;;  %v7775_v13 = vld [vmem:[%s31002_s4 + $0x58] sm:$0xff] }
 0x282   :  { %31100 = vst [vmem:[#allocation3_spill] sm:$0xff] %v28047_v32 }
 0x283   :  { %23749 = vmatpush3.bf16.msra.mxu0 %v23746_v42  ;;  %24037 = vmatpush3.bf16.msra.mxu1 %v23746_v42 }
 0x284   :  { %23751 = vmatprep.subr.bf16.mxu0 %v23750_v26  ;;  %24039 = vmatprep.subr.bf16.mxu1 %v23750_v26 }
 0x287   :  { %23753 = vmatpush3.bf16.msra.mxu0 %v23750_v26  ;;  %24041 = vmatpush3.bf16.msra.mxu1 %v23750_v26 }
 0x288   :  { %23755 = vmatprep.subr.bf16.mxu0 %v23754_v1  ;;  %24043 = vmatprep.subr.bf16.mxu1 %v23754_v1 }
 0x28b   :  { %23757 = vmatpush3.bf16.msra.mxu0 %v23754_v1  ;;  %24045 = vmatpush3.bf16.msra.mxu1 %v23754_v1  ;;  %v7772_v1 = vld [vmem:[%s31002_s4 + $0x40] sm:$0xff] }
 0x28c   :  { %23759 = vmatprep.subr.bf16.mxu0 %v23758_v18  ;;  %24047 = vmatprep.subr.bf16.mxu1 %v23758_v18  ;;  %v28100_v57 = vpack.c.bf16 %v7773_v33, %v7772_v1 }
 0x28e   :  { %31107 = vst [vmem:[#allocation11_spill] sm:$0xff] %v28100_v57 }
 0x28f   :  { %23761 = vmatpush3.bf16.msra.mxu0 %v23758_v18  ;;  %24049 = vmatpush3.bf16.msra.mxu1 %v23758_v18 }
 0x290   :  { %23763 = vmatprep.subr.bf16.mxu0 %v23762_v63  ;;  %24051 = vmatprep.subr.bf16.mxu1 %v23762_v63 }
 0x293   :  { %23765 = vmatpush3.bf16.msra.mxu0 %v23762_v63  ;;  %24053 = vmatpush3.bf16.msra.mxu1 %v23762_v63 }
 0x294   :  { %23767 = vmatprep.subr.bf16.mxu0 %v23766_v34  ;;  %24055 = vmatprep.subr.bf16.mxu1 %v23766_v34 }
 0x297   :  { %23769 = vmatpush3.bf16.msra.mxu0 %v23766_v34  ;;  %24057 = vmatpush3.bf16.msra.mxu1 %v23766_v34 }
 0x298   :  { %23771 = vmatprep.subr.bf16.mxu0 %v28036_v35  ;;  %24059 = vmatprep.subr.bf16.mxu1 %v28036_v35 }
 0x29a   :  { %20603 = vmatmul.mubr.f32.vlgmr.msra.gmra.mrb[32].mxu0 %v7781_v45 }
 0x29b   :  { %23773 = vmatpush3.bf16.msra.mxu0 %v28036_v35 }
 0x29c   :  { %23775 = vmatprep.subr.bf16.mxu0 %v28047_v32 }
 0x29f   :  { %23777 = vmatpush3.bf16.msra.mxu0 %v28047_v32 }
 0x2a0   :  { %23779 = vmatprep.subr.bf16.mxu0 %v28059_v25 }
 0x2a3   :  { %23781 = vmatpush3.bf16.msra.mxu0 %v28059_v25 }
 0x2a4   :  { %23783 = vmatprep.subr.bf16.mxu0 %v28070_v44 }
 0x2a7   :  { %23785 = vmatpush3.bf16.msra.mxu0 %v28070_v44 }
 0x2a8   :  { %23787 = vmatprep.subr.bf16.mxu0 %v28100_v57 }
 0x2ab   :  { %23789 = vmatpush3.bf16.msra.mxu0 %v28100_v57 }
 0x335   :  { %v28065_v39 = vpop.f32.mrb[16].mxu0  ;;  %v28067_v42 = vpop.f32.mrb[16].mxu1 }
 0x336   :  { %31102 = vst [vmem:[#allocation6_spill] sm:$0xff] %v28067_v42  ;;  %v5585_v31 = vmul.f32 %v28065_v39, %v28065_v39  ;;  %v7369_v26 = vmul.f32 %v28067_v42, %v28067_v42  ;;  %v28076_v41 = vpop.f32.mrb[17].mxu0  ;;  %v28078_v60 = vpop.f32.mrb[17].mxu1 }
 0x337   :  { %31104 = vst [vmem:[#allocation8_spill] sm:$0xff] %v28078_v60  ;;  %v5562_v17 = vadd.f32 %v28065_v39, %v28076_v41  ;;  %v5584_v18 = vmul.f32 %v28076_v41, %v28076_v41  ;;  %v7346_v10 = vadd.f32 %v28067_v42, %v28078_v60  ;;  %v7368_v50 = vmul.f32 %v28078_v60, %v28078_v60 }
 0x339   :  { %v5600_v63 = vadd.f32 %v5585_v31, %v5584_v18  ;;  %v7384_v28 = vadd.f32 %v7369_v26, %v7368_v50  ;;  %v28095_v29 = vpop.f32.mrb[18].mxu0  ;;  %v28097_v34 = vpop.f32.mrb[18].mxu1  ;;  %v28121_v31 = vpack.c.bf16 %v7775_v13, %v7774_v8  ;;  %v7776_v50 = vld [vmem:[%s31002_s4 + $0x60] sm:$0xff]  ;;  %v7777_v8 = vld [vmem:[%s31002_s4 + $0x68] sm:$0xff] }
 0x33a   :  { %31105 = vst [vmem:[#allocation9_spill] sm:$0xff] %v28095_v29  ;;  %31106 = vst [vmem:[#allocation10_spill] sm:$0xff] %v28097_v34  ;;  %v28108_v45 = vpop.f32.mrb[19].mxu0  ;;  %v28110_v14 = vpop.f32.mrb[19].mxu1  ;;  %v5587_v51 = vmul.f32 %v28095_v29, %v28095_v29  ;;  %v28149_v32 = vpack.c.bf16 %v7777_v8, %v7776_v50 }
 0x33b   :  { %31108 = vst [vmem:[#allocation12_spill] sm:$0xff] %v28108_v45  ;;  %31109 = vst [vmem:[#allocation13_spill] sm:$0xff] %v28110_v14  ;;  %v5563_v16 = vadd.f32 %v5562_v17, %v28108_v45  ;;  %v5586_v47 = vmul.f32 %v28108_v45, %v28108_v45  ;;  %v7347_v15 = vadd.f32 %v7346_v10, %v28110_v14  ;;  %23791 = vmatprep.subr.bf16.mxu0 %v28121_v31 }
 0x33c   :  { %v7370_v59 = vmul.f32 %v28110_v14, %v28110_v14  ;;  %31110 = vst [vmem:[#allocation14_spill] sm:$0xff] %v28121_v31  ;;  %31115 = vst [vmem:[#allocation19_spill] sm:$0xff] %v28149_v32  ;;  %23793 = vmatpush3.bf16.msra.mxu0 %v28121_v31 }
 0x33d   :  { %v5601_v26 = vadd.f32 %v5600_v63, %v5586_v47  ;;  %v28123_v33 = vpop.f32.mrb[20].mxu0  ;;  %v28125_v17 = vpop.f32.mrb[20].mxu1  ;;  %v5564_v18 = vadd.f32 %v28095_v29, %v5563_v16  ;;  %v7348_v10 = vadd.f32 %v28097_v34, %v7347_v15  ;;  %v7371_v63 = vmul.f32 %v28097_v34, %v28097_v34  ;;  %23795 = vmatprep.subr.bf16.mxu0 %v28149_v32 }
 0x33e   :  { %v7385_v1 = vadd.f32 %v7384_v28, %v7370_v59  ;;  %31111 = vst [vmem:[#allocation15_spill] sm:$0xff] %v28123_v33  ;;  %31112 = vst [vmem:[#allocation16_spill] sm:$0xff] %v28125_v17  ;;  %v28138_v28 = vpop.f32.mrb[21].mxu0  ;;  %v28140_v13 = vpop.f32.mrb[21].mxu1  ;;  %v5589_v35 = vmul.f32 %v28123_v33, %v28123_v33  ;;  %v7373_v50 = vmul.f32 %v28125_v17, %v28125_v17 }
 0x33f   :  { %31113 = vst [vmem:[#allocation17_spill] sm:$0xff] %v28138_v28  ;;  %31114 = vst [vmem:[#allocation18_spill] sm:$0xff] %v28140_v13  ;;  %v5565_v16 = vadd.f32 %v5564_v18, %v28138_v28  ;;  %v5588_v47 = vmul.f32 %v28138_v28, %v28138_v28  ;;  %v5602_v15 = vadd.f32 %v5601_v26, %v5587_v51 }
 0x340   :  { %v7349_v59 = vadd.f32 %v7348_v10, %v28140_v13  ;;  %v7372_v44 = vmul.f32 %v28140_v13, %v28140_v13  ;;  %v7386_v25 = vadd.f32 %v7385_v1, %v7371_v63  ;;  %v7778_v1 = vld [vmem:[%s31002_s4 + $0x70] sm:$0xff]  ;;  %v7779_v10 = vld [vmem:[%s31002_s4 + $0x78] sm:$0xff]  ;;  %23797 = vmatpush3.bf16.msra.mxu0 %v28149_v32 }
 0x341   :  { %v5603_v34 = vadd.f32 %v5602_v15, %v5588_v47  ;;  %v28153_v14 = vpop.f32.mrb[22].mxu0  ;;  %v28155_v18 = vpop.f32.mrb[22].mxu1  ;;  %v5566_v51 = vadd.f32 %v28123_v33, %v5565_v16 }
 0x342   :  { %31116 = vst [vmem:[#allocation20_spill] sm:$0xff] %v28153_v14  ;;  %31117 = vst [vmem:[#allocation21_spill] sm:$0xff] %v28155_v18  ;;  %v7350_v26 = vadd.f32 %v28125_v17, %v7349_v59  ;;  %v7387_v8 = vadd.f32 %v7386_v25, %v7372_v44  ;;  %v28168_v63 = vpop.f32.mrb[23].mxu0  ;;  %v28170_v47 = vpop.f32.mrb[23].mxu1  ;;  %v28179_v17 = vpack.c.bf16 %v7779_v10, %v7778_v1  ;;  %v15755_v1 = vld [vmem:[%s31002_s4 + $0x108] sm:$0xff] }
 0x343   :  { %31118 = vst [vmem:[#allocation22_spill] sm:$0xff] %v28168_v63  ;;  %31119 = vst [vmem:[#allocation23_spill] sm:$0xff] %v28170_v47  ;;  %v5567_v16 = vadd.f32 %v5566_v51, %v28168_v63  ;;  %v5590_v15 = vmul.f32 %v28168_v63, %v28168_v63  ;;  %v5604_v59 = vadd.f32 %v5603_v34, %v5589_v35 }
 0x344   :  { %v7351_v57 = vadd.f32 %v7350_v26, %v28170_v47  ;;  %v7374_v13 = vmul.f32 %v28170_v47, %v28170_v47  ;;  %v7388_v42 = vadd.f32 %v7387_v8, %v7373_v50  ;;  %31120 = vst [vmem:[#allocation24_spill] sm:$0xff] %v28179_v17  ;;  %v5591_v25 = vmul.f32 %v28153_v14, %v28153_v14  ;;  %v15754_v26 = vld [vmem:[%s31002_s4 + $0x100] sm:$0xff] }
 0x345   :  { %v5605_v44 = vadd.f32 %v5604_v59, %v5590_v15  ;;  %v28183_v60 = vpop.f32.mrb[24].mxu0  ;;  %v28185_v51 = vpop.f32.mrb[24].mxu1  ;;  %v5568_v35 = vadd.f32 %v28153_v14, %v5567_v16  ;;  %v7375_v10 = vmul.f32 %v28155_v18, %v28155_v18  ;;  %23799 = vmatprep.subr.bf16.mxu0 %v28179_v17 }
 0x346   :  { %31121 = vst [vmem:[#allocation25_spill] sm:$0xff] %v28183_v60  ;;  %31122 = vst [vmem:[#allocation26_spill] sm:$0xff] %v28185_v51  ;;  %v7352_v34 = vadd.f32 %v28155_v18, %v7351_v57  ;;  %v7389_v50 = vadd.f32 %v7388_v42, %v7374_v13  ;;  %v28198_v8 = vpop.f32.mrb[25].mxu0  ;;  %v28200_v15 = vpop.f32.mrb[25].mxu1  ;;  %v28209_v18 = vpack.c.bf16 %v15755_v1, %v15754_v26  ;;  %23801 = vmatpush3.bf16.msra.mxu0 %v28179_v17 }
 0x347   :  { %31123 = vst [vmem:[#allocation27_spill] sm:$0xff] %v28198_v8  ;;  %31124 = vst [vmem:[#allocation28_spill] sm:$0xff] %v28200_v15  ;;  %v5569_v57 = vadd.f32 %v5568_v35, %v28198_v8  ;;  %v5592_v16 = vmul.f32 %v28198_v8, %v28198_v8  ;;  %v5606_v59 = vadd.f32 %v5605_v44, %v5591_v25 }
 0x348   :  { %v7353_v31 = vadd.f32 %v7352_v34, %v28200_v15  ;;  %v7376_v47 = vmul.f32 %v28200_v15, %v28200_v15  ;;  %v7390_v14 = vadd.f32 %v7389_v50, %v7375_v10  ;;  %31125 = vst [vmem:[#allocation29_spill] sm:$0xff] %v28209_v18  ;;  %v5593_v42 = vmul.f32 %v28183_v60, %v28183_v60 }
 0x349   :  { %v5607_v13 = vadd.f32 %v5606_v59, %v5592_v16  ;;  %v28213_v63 = vpop.f32.mrb[26].mxu0  ;;  %v28215_v35 = vpop.f32.mrb[26].mxu1  ;;  %v5570_v25 = vadd.f32 %v28183_v60, %v5569_v57  ;;  %v7377_v34 = vmul.f32 %v28185_v51, %v28185_v51  ;;  %23803 = vmatprep.subr.bf16.mxu0 %v28209_v18 }
 0x34a   :  { %31126 = vst [vmem:[#allocation30_spill] sm:$0xff] %v28213_v63  ;;  %31127 = vst [vmem:[#allocation31_spill] sm:$0xff] %v28215_v35  ;;  %v7354_v44 = vadd.f32 %v28185_v51, %v7353_v31  ;;  %v7391_v10 = vadd.f32 %v7390_v14, %v7376_v47  ;;  %v28222_v26 = vpop.f32.mrb[27].mxu0  ;;  %v28224_v1 = vpop.f32.mrb[27].mxu1  ;;  %v5595_v14 = vmul.f32 %v28213_v63, %v28213_v63 }
 0x34b   :  { %31128 = vst [vmem:[#allocation32_spill] sm:$0xff] %v28222_v26  ;;  %31129 = vst [vmem:[#allocation33_spill] sm:$0xff] %v28224_v1  ;;  %v5571_v50 = vadd.f32 %v5570_v25, %v28222_v26  ;;  %v5594_v16 = vmul.f32 %v28222_v26, %v28222_v26  ;;  %v5608_v59 = vadd.f32 %v5607_v13, %v5593_v42 }
 0x34c   :  { %v7355_v57 = vadd.f32 %v7354_v44, %v28224_v1  ;;  %v7378_v31 = vmul.f32 %v28224_v1, %v28224_v1  ;;  %v7392_v32 = vadd.f32 %v7391_v10, %v7377_v34  ;;  %v7379_v13 = vmul.f32 %v28215_v35, %v28215_v35 }
 0x34d   :  { %v5609_v47 = vadd.f32 %v5608_v59, %v5594_v16  ;;  %v28235_v51 = vpop.f32.mrb[28].mxu0  ;;  %v28237_v15 = vpop.f32.mrb[28].mxu1  ;;  %v5572_v25 = vadd.f32 %v28213_v63, %v5571_v50 }
 0x34e   :  { %31130 = vst [vmem:[#allocation34_spill] sm:$0xff] %v28235_v51  ;;  %31131 = vst [vmem:[#allocation35_spill] sm:$0xff] %v28237_v15  ;;  %v7356_v42 = vadd.f32 %v28215_v35, %v7355_v57  ;;  %v7393_v44 = vadd.f32 %v7392_v32, %v7378_v31  ;;  %v28244_v34 = vpop.f32.mrb[29].mxu0  ;;  %v28246_v10 = vpop.f32.mrb[29].mxu1  ;;  %v5597_v35 = vmul.f32 %v28235_v51, %v28235_v51 }
 0x34f   :  { %31132 = vst [vmem:[#allocation36_spill] sm:$0xff] %v28244_v34  ;;  %31133 = vst [vmem:[#allocation37_spill] sm:$0xff] %v28246_v10  ;;  %v5573_v16 = vadd.f32 %v5572_v25, %v28244_v34  ;;  %v5596_v59 = vmul.f32 %v28244_v34, %v28244_v34  ;;  %v5610_v17 = vadd.f32 %v5609_v47, %v5595_v14 }
 0x350   :  { %v7357_v50 = vadd.f32 %v7356_v42, %v28246_v10  ;;  %v7380_v57 = vmul.f32 %v28246_v10, %v28246_v10  ;;  %v7394_v18 = vadd.f32 %v7393_v44, %v7379_v13  ;;  %v7381_v14 = vmul.f32 %v28237_v15, %v28237_v15 }
 0x351   :  { %v5611_v32 = vadd.f32 %v5610_v17, %v5596_v59  ;;  %v28256_v31 = vpop.f32.mrb[30].mxu0  ;;  %v28258_v1 = vpop.f32.mrb[30].mxu1  ;;  %v5574_v25 = vadd.f32 %v28235_v51, %v5573_v16 }
 0x352   :  { %31134 = vst [vmem:[#allocation38_spill] sm:$0xff] %v28256_v31  ;;  %31135 = vst [vmem:[#allocation39_spill] sm:$0xff] %v28258_v1  ;;  %v7358_v63 = vadd.f32 %v28237_v15, %v7357_v50  ;;  %v7395_v47 = vadd.f32 %v7394_v18, %v7380_v57  ;;  %v28264_v42 = vpop.f32.mrb[31].mxu0  ;;  %v7305_v10 = vpop.f32.mrb[31].mxu1  ;;  %v5599_v16 = vmul.f32 %v28256_v31, %v28256_v31 }
 0x353   :  { %31136 = vst [vmem:[#allocation40_spill] sm:$0xff] %v28264_v42  ;;  %v5575_v13 = vadd.f32 %v5574_v25, %v28264_v42  ;;  %v5598_v17 = vmul.f32 %v28264_v42, %v28264_v42  ;;  %v5612_v44 = vadd.f32 %v5611_v32, %v5597_v35  ;;  %v7382_v34 = vmul.f32 %v7305_v10, %v7305_v10 }
 0x354   :  { %v7359_v59 = vadd.f32 %v7358_v63, %v7305_v10  ;;  %v7396_v26 = vadd.f32 %v7395_v47, %v7381_v14  ;;  %v7383_v57 = vmul.f32 %v28258_v1, %v28258_v1 }
 0x355   :  { %v5576_v50 = vadd.f32 %v28256_v31, %v5575_v13  ;;  %v5613_v51 = vadd.f32 %v5612_v44, %v5598_v17 }
 0x356   :  { %v7360_v18 = vadd.f32 %v28258_v1, %v7359_v59  ;;  %v7397_v15 = vadd.f32 %v7396_v26, %v7382_v34 }
 0x357   :  { %v5577_v25 = vrot.slane %v5576_v50, 4  ;;  %v5614_v60 = vadd.f32 %v5613_v51, %v5599_v16 }
 0x358   :  { %v7361_v8 = vrot.slane %v7360_v18, 4  ;;  %v7398_v42 = vadd.f32 %v7397_v15, %v7383_v57 }
 0x359   :  { %v5578_v35 = vadd.f32 %v5577_v25, %v5576_v50  ;;  %v5615_v63 = vrot.slane %v5614_v60, 4 }
 0x35a   :  { %v7362_v32 = vadd.f32 %v7361_v8, %v7360_v18  ;;  %v7399_v14 = vrot.slane %v7398_v42, 4 }
 0x35b   :  { %v5579_v47 = vrot.slane %v5578_v35, 2  ;;  %v5616_v33 = vadd.f32 %v5615_v63, %v5614_v60 }
 0x35c   :  { %v7363_v28 = vrot.slane %v7362_v32, 2  ;;  %v7400_v29 = vadd.f32 %v7399_v14, %v7398_v42  ;;  %v7407_v14 = vld [vmem:[%s31004_s3] sm:$0x1] }
 0x35d   :  { %v5580_v13 = vadd.f32 %v5579_v47, %v5578_v35  ;;  %v5617_v17 = vrot.slane %v5616_v33, 2 }
 0x35e   :  { %v7364_v44 = vadd.f32 %v7363_v28, %v7362_v32  ;;  %v7401_v59 = vrot.slane %v7400_v29, 2 }
 0x35f   :  { %v5581_v31 = vrot.slane %v5580_v13, 1  ;;  %v5618_v45 = vadd.f32 %v5617_v17, %v5616_v33 }
 0x360   :  { %v7365_v1 = vrot.slane %v7364_v44, 1  ;;  %v7402_v26 = vadd.f32 %v7401_v59, %v7400_v29  ;;  %v7434_v29 = vlaneseq }
 0x361   :  { %v5582_v34 = vadd.f32 %v5581_v31, %v5580_v13  ;;  %v5619_v51 = vrot.slane %v5618_v45, 1 }
 0x362   :  { %v7403_v16 = vrot.slane %v7402_v26, 1  ;;  %v7366_v8 = vadd.f32 %v7365_v1, %v7364_v44  ;;  %v7435_v31 = vshrl.u32 %v7434_v29, 7  ;;  %v31146_v29 = vld [vmem:[#allocation32_spill] sm:$0xff] }
 0x363   :  { %v5583_v15 = vadd.f32 %v5582_v34, %v27940_v56  ;;  %v5620_v50 = vadd.f32 %v5619_v51, %v5618_v45  ;;  %v7406_v56 = vld [vmem:[%s31003_s2] sm:$0x1] }
 0x364   :  { %v7404_v57 = vadd.f32 %v7403_v16, %v7402_v26  ;;  %v28280_v45 = vsub.s32 0, %v7435_v31 }
 0x365   :  { %v5621_v18 = vadd.f32 %v5620_v50, %v27948_v53  ;;  %v7367_v60 = vadd.f32 %v7366_v8, %v5583_v15  ;;  %v31138_v8 = vld [vmem:[#allocation12_spill] sm:$0xff] }
 0x366   :  { %31137 = vst [vmem:[#allocation41_spill] sm:$0xff] %v28280_v45 }
 0x367   :  { %v7405_v42 = vadd.f32 %v7404_v57, %v5621_v18  ;;  %v7408_v25 = vmul.f32 0.001953125, %v7367_v60  ;;  %v31140_v60 = vld [vmem:[#allocation17_spill] sm:$0xff]  ;;  %v31141_v57 = vld [vmem:[#allocation15_spill] sm:$0xff] }
 0x369   :  { %v7409_v35 = vmul.f32 0.001953125, %v7405_v42  ;;  %v7410_v28 = vmul.f32 %v7408_v25, %v7408_v25  ;;  %v31142_v42 = vld [vmem:[#allocation22_spill] sm:$0xff] }
 0x36b   :  { %v7411_v63 = vsub.f32 %v7409_v35, %v7410_v28  ;;  %v31144_v28 = vld [vmem:[#allocation27_spill] sm:$0xff] }
 0x36d   :  { %v7412_v32 = vmax.f32 %v7411_v63, 0.0 }
 0x36f   :  { %v7413_v33 = vadd.f32 1e-05, %v7412_v32  ;;  %v31145_v32 = vld [vmem:[#allocation25_spill] sm:$0xff] }
 0x371   :  { %25915 = vrsqrt.f32 %v7413_v33 }
 0x37b   :  { %v25916_v1 = vpop.eup %25915 }
 0x37c   :  { %v7415_v53 = vmul.f32 %v25916_v1, %v7406_v56  ;;  %v31147_v56 = vld [vmem:[#allocation30_spill] sm:$0xff] }
 0x37e   :  { %v7416_v47 = vmul.f32 %v7415_v53, %v7408_v25  ;;  %v28286_v13 = vrot.slane %v7415_v53, %v28280_v45  ;;  %v31143_v25 = vld [vmem:[#allocation20_spill] sm:$0xff] }
 0x37f   :  { %v31148_v53 = vld [vmem:[#allocation36_spill] sm:$0xff] }
 0x380   :  { %v7417_v17 = vsub.f32 %v7407_v14, %v7416_v47  ;;  %v7698_v44 = vmul.f32 %v28286_v13, %v7305_v10  ;;  %v28291_v59 = vmul.f32 %v28286_v13, %v27710_v4  ;;  %v28295_v26 = vmul.f32 %v27702_v58, %v28286_v13  ;;  %v31149_v47 = vld [vmem:[#allocation34_spill] sm:$0xff] }
 0x381   :  { %v28299_v34 = vmul.f32 %v28286_v13, %v27736_v55  ;;  %v28303_v51 = vmul.f32 %v27731_v23, %v28286_v13  ;;  %v28307_v16 = vmul.f32 %v28286_v13, %v27767_v61  ;;  %v28311_v4 = vmul.f32 %v27754_v12, %v28286_v13 }
 0x382   :  { %v28314_v10 = vrot.slane %v7417_v17, %v28280_v45  ;;  %v28318_v58 = vmul.f32 %v28286_v13, %v27795_v11  ;;  %v28322_v55 = vmul.f32 %v27782_v0, %v28286_v13  ;;  %v28326_v23 = vmul.f32 %v28286_v13, %v27821_v38  ;;  %v31165_v45 = vld [vmem:[#allocation28_spill] sm:$0xff] }
 0x383   :  { %v28330_v61 = vmul.f32 %v27814_v19, %v28286_v13  ;;  %v28334_v12 = vmul.f32 %v28286_v13, %v27847_v3  ;;  %v28338_v11 = vmul.f32 %v27840_v5, %v28286_v13  ;;  %v28342_v0 = vmul.f32 %v28286_v13, %v27867_v52 }
 0x384   :  { %v7714_v15 = vadd.f32 %v7698_v44, %v28314_v10  ;;  %v28347_v38 = vmul.f32 %v27859_v9, %v28286_v13  ;;  %v28351_v19 = vmul.f32 %v28286_v13, %v27891_v54  ;;  %v28355_v3 = vmul.f32 %v27885_v20, %v28286_v13  ;;  %v31150_v44 = vld [vmem:[#allocation40_spill] sm:$0xff] }
 0x385   :  { %v28359_v5 = vmul.f32 %v28286_v13, %v27712_v62  ;;  %v28363_v52 = vmul.f32 %v27704_v43, %v28286_v13  ;;  %v28367_v9 = vmul.f32 %v28286_v13, %v27738_v21  ;;  %v28371_v54 = vmul.f32 %v27733_v46, %v28286_v13 }
 0x386   :  { %v7730_v50 = vmax.f32 %v7714_v15, 0.0  ;;  %v28375_v20 = vmul.f32 %v28286_v13, %v27769_v37  ;;  %v28379_v62 = vmul.f32 %v27756_v27, %v28286_v13  ;;  %v28383_v43 = vmul.f32 %v28286_v13, %v27797_v30 }
 0x387   :  { %v28387_v21 = vmul.f32 %v27784_v22, %v28286_v13  ;;  %v28391_v46 = vmul.f32 %v28286_v13, %v27823_v48  ;;  %v28395_v37 = vmul.f32 %v27816_v49, %v28286_v13  ;;  %v28399_v27 = vmul.f32 %v28286_v13, %v27849_v6 }
 0x388   :  { %v28403_v30 = vmul.f32 %v27842_v7, %v28286_v13  ;;  %v28407_v22 = vmul.f32 %v28286_v13, %v27869_v40  ;;  %v28411_v48 = vmul.f32 %v27861_v24, %v28286_v13  ;;  %v28415_v49 = vmul.f32 %v28286_v13, %v27893_v2  ;;  %7746 = vst [vmem:[#allocation2 + $0x331] sm:$0xff] %v7730_v50  ;;  %v31139_v2 = vld [vmem:[#allocation9_spill] sm:$0xff]  ;;  %v31151_v50 = vld [vmem:[#allocation38_spill] sm:$0xff] }
 0x389   :  { %v28419_v6 = vmul.f32 %v27887_v36, %v28286_v13  ;;  %v28423_v7 = vmul.f32 %v28286_v13, %v28076_v41  ;;  %v28427_v40 = vmul.f32 %v28065_v39, %v28286_v13  ;;  %v28431_v24 = vmul.f32 %v28286_v13, %v31138_v8 }
 0x38a   :  { %v28435_v18 = vmul.f32 %v31139_v2, %v28286_v13  ;;  %v28439_v36 = vmul.f32 %v28286_v13, %v31140_v60  ;;  %v28443_v41 = vmul.f32 %v31141_v57, %v28286_v13  ;;  %v28447_v39 = vmul.f32 %v28286_v13, %v31142_v42  ;;  %v31152_v2 = vld [vmem:[#allocation8_spill] sm:$0xff]  ;;  %v31153_v57 = vld [vmem:[#allocation6_spill] sm:$0xff] }
 0x38b   :  { %v28451_v35 = vmul.f32 %v31143_v25, %v28286_v13  ;;  %v28455_v63 = vmul.f32 %v28286_v13, %v31144_v28  ;;  %v28459_v33 = vmul.f32 %v31145_v32, %v28286_v13  ;;  %v28463_v31 = vmul.f32 %v28286_v13, %v31146_v29  ;;  %v31154_v25 = vld [vmem:[#allocation13_spill] sm:$0xff]  ;;  %v31155_v32 = vld [vmem:[#allocation10_spill] sm:$0xff] }
 0x38c   :  { %v28467_v1 = vmul.f32 %v31147_v56, %v28286_v13  ;;  %v28471_v14 = vmul.f32 %v28286_v13, %v31148_v53  ;;  %v28475_v17 = vmul.f32 %v31149_v47, %v28286_v13  ;;  %v28479_v15 = vmul.f32 %v28286_v13, %v31150_v44  ;;  %v31157_v56 = vld [vmem:[#allocation18_spill] sm:$0xff]  ;;  %v31159_v47 = vld [vmem:[#allocation16_spill] sm:$0xff] }
 0x38d   :  { %v28483_v8 = vmul.f32 %v31151_v50, %v28286_v13  ;;  %v28487_v60 = vmul.f32 %v28286_v13, %v31152_v2  ;;  %v28491_v42 = vmul.f32 %v31153_v57, %v28286_v13  ;;  %v28495_v28 = vmul.f32 %v28286_v13, %v31154_v25  ;;  %v31161_v50 = vld [vmem:[#allocation23_spill] sm:$0xff]  ;;  %v31163_v57 = vld [vmem:[#allocation21_spill] sm:$0xff] }
 0x38e   :  { %v28499_v29 = vmul.f32 %v31155_v32, %v28286_v13  ;;  %v28503_v53 = vmul.f32 %v28286_v13, %v31157_v56  ;;  %v28507_v44 = vmul.f32 %v31159_v47, %v28286_v13  ;;  %v28511_v2 = vmul.f32 %v28286_v13, %v31161_v50 }
 0x38f   :  { %v28515_v25 = vmul.f32 %v31163_v57, %v28286_v13  ;;  %v28519_v32 = vmul.f32 %v28286_v13, %v31165_v45 }
 0x390   :  { %31156 = vst [vmem:[#allocation12_spill] sm:$0xff] %v28499_v29  ;;  %31158 = vst [vmem:[#allocation9_spill] sm:$0xff] %v28503_v53  ;;  %v31167_v29 = vld [vmem:[#allocation26_spill] sm:$0xff]  ;;  %v31169_v53 = vld [vmem:[#allocation33_spill] sm:$0xff] }
 0x391   :  { %31160 = vst [vmem:[#allocation17_spill] sm:$0xff] %v28507_v44  ;;  %31162 = vst [vmem:[#allocation15_spill] sm:$0xff] %v28511_v2  ;;  %v28523_v56 = vmul.f32 %v31167_v29, %v28286_v13  ;;  %v28527_v47 = vmul.f32 %v28286_v13, %v31169_v53  ;;  %v31171_v44 = vld [vmem:[#allocation31_spill] sm:$0xff]  ;;  %v31173_v2 = vld [vmem:[#allocation37_spill] sm:$0xff]  ;;  %v7460_v53 = vadd.f32 %v28314_v10, %v28291_v59 }
 0x392   :  { %31164 = vst [vmem:[#allocation22_spill] sm:$0xff] %v28515_v25  ;;  %31166 = vst [vmem:[#allocation20_spill] sm:$0xff] %v28519_v32  ;;  %v28531_v50 = vmul.f32 %v31171_v44, %v28286_v13  ;;  %v28535_v57 = vmul.f32 %v28286_v13, %v31173_v2  ;;  %v31175_v25 = vld [vmem:[#allocation35_spill] sm:$0xff]  ;;  %v7462_v44 = vadd.f32 %v28314_v10, %v28299_v34 }
 0x393   :  { %31168 = vst [vmem:[#allocation27_spill] sm:$0xff] %v28523_v56  ;;  %31170 = vst [vmem:[#allocation25_spill] sm:$0xff] %v28527_v47  ;;  %v28539_v45 = vmul.f32 %v31175_v25, %v28286_v13  ;;  %v31177_v32 = vld [vmem:[#allocation39_spill] sm:$0xff]  ;;  %v7461_v47 = vadd.f32 %v28314_v10, %v28295_v26  ;;  %v28553_v2 = vadd.f32 %v28314_v10, %v28303_v51 }
 0x394   :  { %31172 = vst [vmem:[#allocation32_spill] sm:$0xff] %v28531_v50  ;;  %31174 = vst [vmem:[#allocation30_spill] sm:$0xff] %v28535_v57  ;;  %v28543_v29 = vmul.f32 %v31177_v32, %v28286_v13  ;;  %v28557_v25 = vadd.f32 %v28314_v10, %v28307_v16  ;;  %v28561_v13 = vadd.f32 %v28314_v10, %v28311_v4 }
 0x395   :  { %31176 = vst [vmem:[#allocation36_spill] sm:$0xff] %v28539_v45  ;;  %v28565_v59 = vadd.f32 %v28314_v10, %v28318_v58  ;;  %v28569_v26 = vadd.f32 %v28314_v10, %v28322_v55  ;;  %v28573_v34 = vadd.f32 %v28314_v10, %v28326_v23  ;;  %v28577_v51 = vadd.f32 %v28314_v10, %v28330_v61 }
 0x396   :  { %31178 = vst [vmem:[#allocation34_spill] sm:$0xff] %v28543_v29  ;;  %v28581_v16 = vadd.f32 %v28314_v10, %v28334_v12  ;;  %v28585_v4 = vadd.f32 %v28314_v10, %v28338_v11  ;;  %v28589_v58 = vadd.f32 %v28314_v10, %v28342_v0  ;;  %v28593_v55 = vadd.f32 %v28314_v10, %v28347_v38 }
 0x397   :  { %v7474_v23 = vadd.f32 %v28314_v10, %v28351_v19  ;;  %v7475_v61 = vadd.f32 %v28314_v10, %v28355_v3  ;;  %v7476_v12 = vmax.f32 %v7460_v53, 0.0  ;;  %v7477_v32 = vmax.f32 %v7461_v47, 0.0 }
 0x398   :  { %v7478_v29 = vmax.f32 %v7462_v44, 0.0  ;;  %v7479_v11 = vmax.f32 %v28553_v2, 0.0  ;;  %v7480_v45 = vmax.f32 %v28557_v25, 0.0  ;;  %v7481_v0 = vmax.f32 %v28561_v13, 0.0 }
 0x399   :  { %v7482_v57 = vmax.f32 %v28565_v59, 0.0  ;;  %v7483_v38 = vmax.f32 %v28569_v26, 0.0  ;;  %v7484_v50 = vmax.f32 %v28573_v34, 0.0  ;;  %v7485_v19 = vmax.f32 %v28577_v51, 0.0  ;;  %7492 = vst [vmem:[#allocation2 + $0x19] sm:$0xff] %v7476_v12  ;;  %7493 = vst [vmem:[#allocation2 + $0x21] sm:$0xff] %v7477_v32  ;;  %20605 = vmatprep.mubr.f32.mxu0 %v7476_v12 }
 0x39a   :  { %v7486_v56 = vmax.f32 %v28581_v16, 0.0  ;;  %v31061_v3 = vmax.f32 %v28585_v4, 0.0  ;;  %7494 = vst [vmem:[#allocation2 + $0x31] sm:$0xff] %v7478_v29  ;;  %7495 = vst [vmem:[#allocation2 + $0x39] sm:$0xff] %v7479_v11  ;;  %v31060_v47 = vmax.f32 %v28589_v58, 0.0  ;;  %v31059_v53 = vmax.f32 %v28593_v55, 0.0  ;;  %20606 = vmatmul.mubr.f32.gmra.mrb[34].mxu0 %v7477_v32 }
 0x39b   :  { %v7490_v44 = vmax.f32 %v7474_v23, 0.0  ;;  %v7491_v2 = vmax.f32 %v7475_v61, 0.0  ;;  %7496 = vst [vmem:[#allocation2 + $0x49] sm:$0xff] %v7480_v45  ;;  %7497 = vst [vmem:[#allocation2 + $0x51] sm:$0xff] %v7481_v0  ;;  %v7540_v25 = vadd.f32 %v28359_v5, %v28314_v10  ;;  %v7541_v12 = vadd.f32 %v28363_v52, %v28314_v10  ;;  %20608 = vmatprep.mubr.f32.mxu0 %v7478_v29  ;;  %v31179_v32 = vld [vmem:[#allocation4_spill] sm:$0xff]  ;;  %v31182_v59 = vld [vmem:[#allocation7_spill] sm:$0xff] }
 0x39c   :  { %7498 = vst [vmem:[#allocation2 + $0x61] sm:$0xff] %v7482_v57  ;;  %7499 = vst [vmem:[#allocation2 + $0x69] sm:$0xff] %v7483_v38  ;;  %v28622_v23 = vadd.f32 %v28367_v9, %v28314_v10  ;;  %v28626_v61 = vadd.f32 %v28371_v54, %v28314_v10  ;;  %v28638_v5 = vadd.f32 %v28375_v20, %v28314_v10  ;;  %v31197_v16 = vld [vmem:[#allocation14_spill] sm:$0xff] }
 0x39d   :  { %7500 = vst [vmem:[#allocation2 + $0x79] sm:$0xff] %v7484_v50  ;;  %7501 = vst [vmem:[#allocation2 + $0x81] sm:$0xff] %v7485_v19  ;;  %v28642_v52 = vadd.f32 %v28379_v62, %v28314_v10  ;;  %v28646_v9 = vadd.f32 %v28383_v43, %v28314_v10  ;;  %v28650_v54 = vadd.f32 %v28387_v21, %v28314_v10  ;;  %21106 = vmatprep.mubr.f32.mxu1 %v7490_v44 }
 0x39e   :  { %7502 = vst [vmem:[#allocation2 + $0x91] sm:$0xff] %v7486_v56  ;;  %7503 = vst [vmem:[#allocation2 + $0x99] sm:$0xff] %v31061_v3  ;;  %v28658_v20 = vadd.f32 %v28391_v46, %v28314_v10  ;;  %v28662_v62 = vadd.f32 %v28395_v37, %v28314_v10  ;;  %v28666_v43 = vadd.f32 %v28399_v27, %v28314_v10  ;;  %21107 = vmatmul.mubr.f32.vlgmr.msra.gmra.mrb[32].mxu1 %v7491_v2 }
 0x39f   :  { %7504 = vst [vmem:[#allocation2 + $0xa9] sm:$0xff] %v31060_v47  ;;  %7505 = vst [vmem:[#allocation2 + $0xb1] sm:$0xff] %v31059_v53  ;;  %v28670_v21 = vadd.f32 %v28403_v30, %v28314_v10  ;;  %v28674_v29 = vadd.f32 %v28407_v22, %v28314_v10  ;;  %v28678_v46 = vadd.f32 %v28411_v48, %v28314_v10  ;;  %24061 = vmatpush3.bf16.msra.mxu1 %v31179_v32  ;;  %v31180_v22 = vld [vmem:[#allocation3_spill] sm:$0xff] }
 0x3a0   :  { %7506 = vst [vmem:[#allocation2 + $0xc1] sm:$0xff] %v7490_v44  ;;  %7507 = vst [vmem:[#allocation2 + $0xc9] sm:$0xff] %v7491_v2  ;;  %v7554_v37 = vadd.f32 %v28415_v49, %v28314_v10  ;;  %v7555_v27 = vadd.f32 %v28419_v6, %v28314_v10  ;;  %v7556_v44 = vmax.f32 %v7540_v25, 0.0  ;;  %v7557_v30 = vmax.f32 %v7541_v12, 0.0  ;;  %20609 = vmatmul.mubr.f32.gmra.mrb[36].mxu0 %v7479_v11 }
 0x3a1   :  { %v7558_v2 = vmax.f32 %v28622_v23, 0.0  ;;  %v7559_v53 = vmax.f32 %v28626_v61, 0.0  ;;  %24063 = vmatprep.subr.bf16.mxu1 %v31180_v22  ;;  %v7560_v48 = vmax.f32 %v28638_v5, 0.0  ;;  %v7561_v47 = vmax.f32 %v28642_v52, 0.0  ;;  %20611 = vmatprep.mubr.f32.mxu0 %v7480_v45 }
 0x3a2   :  { %v7562_v49 = vmax.f32 %v28646_v9, 0.0  ;;  %v7563_v3 = vmax.f32 %v28650_v54, 0.0  ;;  %v7564_v6 = vmax.f32 %v28658_v20, 0.0  ;;  %v7565_v25 = vmax.f32 %v28662_v62, 0.0  ;;  %7572 = vst [vmem:[#allocation2 + $0xd9] sm:$0xff] %v7556_v44  ;;  %7573 = vst [vmem:[#allocation2 + $0xe1] sm:$0xff] %v7557_v30  ;;  %21109 = vmatprep.mubr.f32.mxu1 %v7556_v44 }
 0x3a3   :  { %v7566_v12 = vmax.f32 %v28666_v43, 0.0  ;;  %v7567_v23 = vmax.f32 %v28670_v21, 0.0  ;;  %7574 = vst [vmem:[#allocation2 + $0xf1] sm:$0xff] %v7558_v2  ;;  %7575 = vst [vmem:[#allocation2 + $0xf9] sm:$0xff] %v7559_v53  ;;  %v7568_v11 = vmax.f32 %v28674_v29, 0.0  ;;  %v31062_v61 = vmax.f32 %v28678_v46, 0.0  ;;  %21110 = vmatmul.mubr.f32.gmra.mrb[34].mxu1 %v7557_v30 }
 0x3a4   :  { %v7570_v5 = vmax.f32 %v7554_v37, 0.0  ;;  %v7571_v32 = vmax.f32 %v7555_v27, 0.0  ;;  %7576 = vst [vmem:[#allocation2 + $0x109] sm:$0xff] %v7560_v48  ;;  %7577 = vst [vmem:[#allocation2 + $0x111] sm:$0xff] %v7561_v47  ;;  %v7620_v45 = vadd.f32 %v28423_v7, %v28314_v10  ;;  %v7621_v44 = vadd.f32 %v28427_v40, %v28314_v10  ;;  %21112 = vmatprep.mubr.f32.mxu1 %v7558_v2  ;;  %v31188_v9 = vld [vmem:[#allocation20_spill] sm:$0xff]  ;;  %v15757_v62 = vld [vmem:[%s31002_s4 + $0x118] sm:$0xff] }
 0x3a5   :  { %7578 = vst [vmem:[#allocation2 + $0x121] sm:$0xff] %v7562_v49  ;;  %7579 = vst [vmem:[#allocation2 + $0x129] sm:$0xff] %v7563_v3  ;;  %v7622_v37 = vadd.f32 %v28431_v24, %v28314_v10  ;;  %v7623_v27 = vadd.f32 %v28435_v18, %v28314_v10  ;;  %v7624_v7 = vadd.f32 %v28439_v36, %v28314_v10  ;;  %24065 = vmatpush3.bf16.msra.mxu1 %v31180_v22  ;;  %v25921_v43 = vld [vmem:[#allocation2] sm:$0xff] }
 0x3a6   :  { %7580 = vst [vmem:[#allocation2 + $0x139] sm:$0xff] %v7564_v6  ;;  %7581 = vst [vmem:[#allocation2 + $0x141] sm:$0xff] %v7565_v25  ;;  %v7625_v40 = vadd.f32 %v28443_v41, %v28314_v10  ;;  %v7626_v24 = vadd.f32 %v28447_v39, %v28314_v10  ;;  %v7627_v18 = vadd.f32 %v28451_v35, %v28314_v10  ;;  %20612 = vmatmul.mubr.f32.gmra.mrb[38].mxu0 %v7481_v0  ;;  %v15758_v29 = vld [vmem:[%s31002_s4 + $0x120] sm:$0xff] }
 0x3a7   :  { %7582 = vst [vmem:[#allocation2 + $0x151] sm:$0xff] %v7566_v12  ;;  %7583 = vst [vmem:[#allocation2 + $0x159] sm:$0xff] %v7567_v23  ;;  %v7628_v36 = vadd.f32 %v28455_v63, %v28314_v10  ;;  %v7629_v41 = vadd.f32 %v28459_v33, %v28314_v10  ;;  %v7630_v39 = vadd.f32 %v28463_v31, %v28314_v10  ;;  %21113 = vmatmul.mubr.f32.gmra.mrb[36].mxu1 %v7559_v53  ;;  %v28835_v21 = vld [vmem:[#allocation2 + $0xc0] sm:$0xff] }
 0x3a8   :  { %7584 = vst [vmem:[#allocation2 + $0x169] sm:$0xff] %v7568_v11  ;;  %7585 = vst [vmem:[#allocation2 + $0x171] sm:$0xff] %v31062_v61  ;;  %v7631_v35 = vadd.f32 %v28467_v1, %v28314_v10  ;;  %v7632_v30 = vadd.f32 %v28471_v14, %v28314_v10  ;;  %v7633_v2 = vadd.f32 %v28475_v17, %v28314_v10  ;;  %v7636_v31 = vmax.f32 %v7620_v45, 0.0 }
 0x3a9   :  { %7586 = vst [vmem:[#allocation2 + $0x181] sm:$0xff] %v7570_v5  ;;  %7587 = vst [vmem:[#allocation2 + $0x189] sm:$0xff] %v7571_v32  ;;  %v7634_v63 = vadd.f32 %v28479_v15, %v28314_v10  ;;  %v7635_v33 = vadd.f32 %v28483_v8, %v28314_v10  ;;  %v7637_v22 = vmax.f32 %v7621_v44, 0.0  ;;  %v7638_v5 = vmax.f32 %v7622_v37, 0.0  ;;  %v31181_v32 = vld [vmem:[#allocation5_spill] sm:$0xff]  ;;  %20614 = vmatprep.mubr.f32.mxu0 %v7482_v57 }
 0x3aa   :  { %v7639_v1 = vmax.f32 %v7623_v27, 0.0  ;;  %24067 = vmatprep.subr.bf16.mxu1 %v31181_v32  ;;  %v7640_v14 = vmax.f32 %v7624_v7, 0.0  ;;  %v7641_v13 = vmax.f32 %v7625_v40, 0.0  ;;  %v7642_v0 = vmax.f32 %v7626_v24, 0.0  ;;  %21115 = vmatprep.mubr.f32.mxu1 %v7560_v48  ;;  %7652 = vst [vmem:[#allocation2 + $0x1c9] sm:$0xff] %v7636_v31  ;;  %v31183_v27 = vld [vmem:[#allocation12_spill] sm:$0xff] }
 0x3ab   :  { %v7643_v17 = vmax.f32 %v7627_v18, 0.0  ;;  %24069 = vmatpush3.bf16.msra.mxu1 %v31181_v32  ;;  %v7644_v15 = vmax.f32 %v7628_v36, 0.0  ;;  %v7645_v61 = vmax.f32 %v7629_v41, 0.0  ;;  %v7646_v8 = vmax.f32 %v7630_v39, 0.0  ;;  %7653 = vst [vmem:[#allocation2 + $0x1d1] sm:$0xff] %v7637_v22  ;;  %7654 = vst [vmem:[#allocation2 + $0x1e1] sm:$0xff] %v7638_v5  ;;  %20615 = vmatmul.mubr.f32.gmra.mrb[40].mxu0 %v7483_v38 }
 0x3ac   :  { %v7647_v53 = vmax.f32 %v7631_v35, 0.0  ;;  %7655 = vst [vmem:[#allocation2 + $0x1e9] sm:$0xff] %v7639_v1  ;;  %24071 = vmatprep.subr.bf16.mxu1 %v31182_v59  ;;  %v7648_v57 = vmax.f32 %v7632_v30, 0.0  ;;  %v7649_v45 = vmax.f32 %v7633_v2, 0.0  ;;  %v7650_v44 = vmax.f32 %v7634_v63, 0.0  ;;  %7656 = vst [vmem:[#allocation2 + $0x1f9] sm:$0xff] %v7640_v14  ;;  %21116 = vmatmul.mubr.f32.gmra.mrb[38].mxu1 %v7561_v47 }
 0x3ad   :  { %v7651_v37 = vmax.f32 %v7635_v33, 0.0  ;;  %7657 = vst [vmem:[#allocation2 + $0x201] sm:$0xff] %v7641_v13  ;;  %7658 = vst [vmem:[#allocation2 + $0x211] sm:$0xff] %v7642_v0  ;;  %20617 = vmatprep.mubr.f32.mxu0 %v7484_v50  ;;  %v7700_v26 = vadd.f32 %v28487_v60, %v28314_v10  ;;  %v7701_v38 = vadd.f32 %v28491_v42, %v28314_v10  ;;  %21118 = vmatprep.mubr.f32.mxu1 %v7562_v49  ;;  %v31184_v50 = vld [vmem:[#allocation9_spill] sm:$0xff]  ;;  %v31186_v42 = vld [vmem:[#allocation15_spill] sm:$0xff] }
 0x3ae   :  { %7659 = vst [vmem:[#allocation2 + $0x219] sm:$0xff] %v7643_v17  ;;  %v7702_v48 = vadd.f32 %v28495_v28, %v28314_v10  ;;  %v7703_v7 = vadd.f32 %v31183_v27, %v28314_v10  ;;  %7660 = vst [vmem:[#allocation2 + $0x229] sm:$0xff] %v7644_v15  ;;  %v7704_v34 = vadd.f32 %v31184_v50, %v28314_v10  ;;  %v31185_v60 = vld [vmem:[#allocation17_spill] sm:$0xff]  ;;  %v31187_v28 = vld [vmem:[#allocation22_spill] sm:$0xff] }
 0x3af   :  { %7661 = vst [vmem:[#allocation2 + $0x231] sm:$0xff] %v7645_v61  ;;  %7662 = vst [vmem:[#allocation2 + $0x241] sm:$0xff] %v7646_v8  ;;  %v7705_v47 = vadd.f32 %v31185_v60, %v28314_v10  ;;  %v7706_v52 = vadd.f32 %v31186_v42, %v28314_v10  ;;  %v7707_v40 = vadd.f32 %v31187_v28, %v28314_v10  ;;  %24073 = vmatpush3.bf16.msra.mxu1 %v31182_v59  ;;  %v31189_v61 = vld [vmem:[#allocation27_spill] sm:$0xff]  ;;  %v31190_v18 = vld [vmem:[#allocation25_spill] sm:$0xff] }
 0x3b0   :  { %7663 = vst [vmem:[#allocation2 + $0x249] sm:$0xff] %v7647_v53  ;;  %7664 = vst [vmem:[#allocation2 + $0x259] sm:$0xff] %v7648_v57  ;;  %v7708_v49 = vadd.f32 %v31188_v9, %v28314_v10  ;;  %v7709_v24 = vadd.f32 %v31189_v61, %v28314_v10  ;;  %v7710_v36 = vadd.f32 %v31190_v18, %v28314_v10  ;;  %v31191_v41 = vld [vmem:[#allocation32_spill] sm:$0xff]  ;;  %20618 = vmatmul.mubr.f32.gmra.mrb[42].mxu0 %v7485_v19  ;;  %v31192_v35 = vld [vmem:[#allocation30_spill] sm:$0xff] }
 0x3b1   :  { %7665 = vst [vmem:[#allocation2 + $0x261] sm:$0xff] %v7649_v45  ;;  %7666 = vst [vmem:[#allocation2 + $0x271] sm:$0xff] %v7650_v44  ;;  %v7711_v39 = vadd.f32 %v31191_v41, %v28314_v10  ;;  %v7712_v30 = vadd.f32 %v31192_v35, %v28314_v10  ;;  %v31193_v2 = vld [vmem:[#allocation36_spill] sm:$0xff]  ;;  %v31194_v33 = vld [vmem:[#allocation34_spill] sm:$0xff]  ;;  %v7716_v22 = vmax.f32 %v7700_v26, 0.0  ;;  %21119 = vmatmul.mubr.f32.gmra.mrb[40].mxu1 %v7563_v3  ;;  %v7717_v1 = vmax.f32 %v7701_v38, 0.0 }
 0x3b2   :  { %7667 = vst [vmem:[#allocation2 + $0x279] sm:$0xff] %v7651_v37  ;;  %v7713_v63 = vadd.f32 %v31193_v2, %v28314_v10  ;;  %v7715_v31 = vadd.f32 %v31194_v33, %v28314_v10  ;;  %v31195_v5 = vld [vmem:[#allocation11_spill] sm:$0xff]  ;;  %v7718_v32 = vmax.f32 %v7702_v48, 0.0  ;;  %v7719_v14 = vmax.f32 %v7703_v7, 0.0  ;;  %20620 = vmatprep.mubr.f32.mxu0 %v7486_v56  ;;  %21121 = vmatprep.mubr.f32.mxu1 %v7564_v6  ;;  %v28850_v57 = vld [vmem:[#allocation2 + $0x30] sm:$0xff]  ;;  %v28852_v44 = vld [vmem:[#allocation2 + $0xc8] sm:$0xff] }
 0x3b3   :  { %24075 = vmatprep.subr.bf16.mxu1 %v31195_v5  ;;  %v7720_v51 = vmax.f32 %v7704_v34, 0.0  ;;  %v7721_v19 = vmax.f32 %v7705_v47, 0.0  ;;  %v7722_v13 = vmax.f32 %v7706_v52, 0.0  ;;  %v7723_v0 = vmax.f32 %v7707_v40, 0.0  ;;  %7732 = vst [vmem:[#allocation2 + $0x289] sm:$0xff] %v7716_v22  ;;  %7733 = vst [vmem:[#allocation2 + $0x291] sm:$0xff] %v7717_v1 }
 0x3b4   :  { %v7724_v10 = vmax.f32 %v7708_v49, 0.0  ;;  %24077 = vmatpush3.bf16.msra.mxu1 %v31195_v5  ;;  %v7725_v3 = vmax.f32 %v7709_v24, 0.0  ;;  %v7726_v54 = vmax.f32 %v7710_v36, 0.0  ;;  %v7727_v17 = vmax.f32 %v7711_v39, 0.0  ;;  %7734 = vst [vmem:[#allocation2 + $0x2a1] sm:$0xff] %v7718_v32  ;;  %7735 = vst [vmem:[#allocation2 + $0x2a9] sm:$0xff] %v7719_v14 }
 0x3b5   :  { %v7728_v15 = vmax.f32 %v7712_v30, 0.0  ;;  %7736 = vst [vmem:[#allocation2 + $0x2b9] sm:$0xff] %v7720_v51  ;;  %v31196_v56 = vmax.f32 %v28585_v4, 0.0  ;;  %24079 = vmatprep.subr.bf16.mxu1 %v31197_v16  ;;  %v7729_v20 = vmax.f32 %v7713_v63, 0.0  ;;  %v7731_v6 = vmax.f32 %v7715_v31, 0.0  ;;  %7737 = vst [vmem:[#allocation2 + $0x2c1] sm:$0xff] %v7721_v19  ;;  %21122 = vmatmul.mubr.f32.gmra.mrb[42].mxu1 %v7565_v25 }
 0x3b6   :  { %7738 = vst [vmem:[#allocation2 + $0x2d1] sm:$0xff] %v7722_v13  ;;  %7739 = vst [vmem:[#allocation2 + $0x2d9] sm:$0xff] %v7723_v0  ;;  %v31198_v8 = vmax.f32 %v28589_v58, 0.0  ;;  %21124 = vmatprep.mubr.f32.mxu1 %v7566_v12  ;;  %v31199_v4 = vmax.f32 %v28593_v55, 0.0  ;;  %v31200_v53 = vld [vmem:[#allocation19_spill] sm:$0xff]  ;;  %v15756_v58 = vld [vmem:[%s31002_s4 + $0x110] sm:$0xff] }
 0x3b7   :  { %20621 = vmatmul.mubr.f32.gmra.mrb[44].mxu0 %v31196_v56  ;;  %7740 = vst [vmem:[#allocation2 + $0x2e9] sm:$0xff] %v7724_v10  ;;  %7741 = vst [vmem:[#allocation2 + $0x2f1] sm:$0xff] %v7725_v3  ;;  %v23806_v55 = vpack.c.bf16 %v15757_v62, %v15756_v58  ;;  %v31201_v25 = vld [vmem:[#allocation24_spill] sm:$0xff]  ;;  %v28830_v12 = vld [vmem:[#allocation2 + $0x18] sm:$0xff]  ;;  %v31202_v59 = vmax.f32 %v28678_v46, 0.0 }
 0x3b8   :  { %20623 = vmatprep.mubr.f32.mxu0 %v31198_v8  ;;  %7742 = vst [vmem:[#allocation2 + $0x301] sm:$0xff] %v7726_v54  ;;  %7743 = vst [vmem:[#allocation2 + $0x309] sm:$0xff] %v7727_v17  ;;  %24081 = vmatpush3.bf16.msra.mxu1 %v31197_v16  ;;  %v28846_v46 = vld [vmem:[#allocation2 + $0x20] sm:$0xff]  ;;  %v15760_v37 = vld [vmem:[%s31002_s4 + $0x130] sm:$0xff] }
 0x3b9   :  { %7744 = vst [vmem:[#allocation2 + $0x319] sm:$0xff] %v7728_v15  ;;  %7745 = vst [vmem:[#allocation2 + $0x321] sm:$0xff] %v7729_v20  ;;  %24083 = vmatprep.subr.bf16.mxu1 %v31200_v53  ;;  %21125 = vmatmul.mubr.f32.gmra.mrb[44].mxu1 %v7567_v23  ;;  %v15759_v23 = vld [vmem:[%s31002_s4 + $0x128] sm:$0xff]  ;;  %v15761_v26 = vld [vmem:[%s31002_s4 + $0x138] sm:$0xff] }
 0x3ba   :  { %7747 = vst [vmem:[#allocation2 + $0x339] sm:$0xff] %v7731_v6  ;;  %21127 = vmatprep.mubr.f32.mxu1 %v7568_v11  ;;  %v31203_v11 = vld [vmem:[#allocation29_spill] sm:$0xff]  ;;  %v23810_v45 = vpack.c.bf16 %v15759_v23, %v15758_v29  ;;  %v28862_v38 = vld [vmem:[#allocation2 + $0xd8] sm:$0xff]  ;;  %v28869_v27 = vld [vmem:[#allocation2 + $0x48] sm:$0xff]  ;;  %v23814_v7 = vpack.c.bf16 %v15761_v26, %v15760_v37 }
 0x3bb   :  { %20624 = vmatmul.mubr.f32.gmra.mrb[46].mxu0 %v31199_v4  ;;  %v28866_v48 = vld [vmem:[#allocation2 + $0x38] sm:$0xff]  ;;  %v28871_v50 = vld [vmem:[#allocation2 + $0xe0] sm:$0xff]  ;;  %v15763_v60 = vld [vmem:[%s31002_s4 + $0x148] sm:$0xff] }
 0x3bc   :  { %20658 = vmatprep.mubr.f32.mxu0 %v25921_v43  ;;  %24085 = vmatpush3.bf16.msra.mxu1 %v31200_v53  ;;  %v15762_v34 = vld [vmem:[%s31002_s4 + $0x140] sm:$0xff]  ;;  %v28881_v47 = vld [vmem:[#allocation2 + $0xf0] sm:$0xff]  ;;  %v28889_v40 = vld [vmem:[#allocation2 + $0xf8] sm:$0xff] }
 0x3bd   :  { %24087 = vmatprep.subr.bf16.mxu1 %v31201_v25  ;;  %21128 = vmatmul.mubr.f32.gmra.mrb[46].mxu1 %v31202_v59  ;;  %v28884_v42 = vld [vmem:[#allocation2 + $0x50] sm:$0xff]  ;;  %v28887_v52 = vld [vmem:[#allocation2 + $0x60] sm:$0xff]  ;;  %v23818_v28 = vpack.c.bf16 %v15763_v60, %v15762_v34  ;;  %v15765_v49 = vld [vmem:[%s31002_s4 + $0x158] sm:$0xff] }
 0x3be   :  { %21162 = vmatprep.mubr.f32.mxu1 %v28835_v21  ;;  %v15764_v9 = vld [vmem:[%s31002_s4 + $0x150] sm:$0xff]  ;;  %v28899_v61 = vld [vmem:[#allocation2 + $0x108] sm:$0xff]  ;;  %v28905_v18 = vld [vmem:[#allocation2 + $0x78] sm:$0xff] }
 0x3bf   :  { %20659 = vmatmul.mubr.f32.vlgmr.msra.gmra.mrb[32].mxu0 %v25921_v43  ;;  %v28902_v24 = vld [vmem:[#allocation2 + $0x68] sm:$0xff]  ;;  %v23822_v36 = vpack.c.bf16 %v15765_v49, %v15764_v9  ;;  %v28907_v41 = vld [vmem:[#allocation2 + $0x110] sm:$0xff]  ;;  %v15766_v39 = vld [vmem:[%s31002_s4 + $0x160] sm:$0xff] }
 0x3c0   :  { %20661 = vmatprep.mubr.f32.mxu0 %v28830_v12  ;;  %23805 = vmatpush3.bf16.msra.mxu0 %v31203_v11  ;;  %v15767_v35 = vld [vmem:[%s31002_s4 + $0x168] sm:$0xff]  ;;  %v28917_v30 = vld [vmem:[#allocation2 + $0x120] sm:$0xff]  ;;  %v28923_v63 = vld [vmem:[#allocation2 + $0x90] sm:$0xff] }
 0x3c1   :  { %24089 = vmatpush3.bf16.msra.mxu1 %v31201_v25  ;;  %23807 = vmatprep.subr.bf16.mxu0 %v23806_v55  ;;  %v28920_v2 = vld [vmem:[#allocation2 + $0x80] sm:$0xff]  ;;  %v23826_v33 = vpack.c.bf16 %v15767_v35, %v15766_v39  ;;  %v28925_v31 = vld [vmem:[#allocation2 + $0x128] sm:$0xff]  ;;  %v15768_v22 = vld [vmem:[%s31002_s4 + $0x170] sm:$0xff] }
 0x3c2   :  { %24091 = vmatprep.subr.bf16.mxu1 %v31203_v11  ;;  %v15769_v5 = vld [vmem:[%s31002_s4 + $0x178] sm:$0xff]  ;;  %v28941_v14 = vld [vmem:[#allocation2 + $0xa8] sm:$0xff]  ;;  %v28943_v19 = vld [vmem:[#allocation2 + $0x140] sm:$0xff] }
 0x3c3   :  { %20662 = vmatmul.mubr.f32.gmra.mrb[34].mxu0 %v28846_v46  ;;  %v28935_v1 = vld [vmem:[#allocation2 + $0x138] sm:$0xff]  ;;  %v23830_v51 = vpack.c.bf16 %v15769_v5, %v15768_v22  ;;  %v15770_v13 = vld [vmem:[%s31002_s4 + $0x180] sm:$0xff]  ;;  %v15771_v0 = vld [vmem:[%s31002_s4 + $0x188] sm:$0xff] }
 0x3c4   :  { %20664 = vmatprep.mubr.f32.mxu0 %v28850_v57  ;;  %21163 = vmatmul.mubr.f32.vlgmr.msra.gmra.mrb[32].mxu1 %v28852_v44  ;;  %v28938_v32 = vld [vmem:[#allocation2 + $0x98] sm:$0xff]  ;;  %v28953_v10 = vld [vmem:[#allocation2 + $0x150] sm:$0xff]  ;;  %v8103_v3 = vld [vmem:[#allocation2 + $0x2] sm:$0xff]  ;;  %v23834_v17 = vpack.c.bf16 %v15771_v0, %v15770_v13 }
 0x3c5   :  { %23809 = vmatpush3.bf16.msra.mxu0 %v23806_v55  ;;  %21165 = vmatprep.mubr.f32.mxu1 %v28862_v38  ;;  %v28956_v54 = vld [vmem:[#allocation2 + $0xb0] sm:$0xff]  ;;  %v28959_v15 = vld [vmem:[#allocation2 + $0x158] sm:$0xff]  ;;  %v28968_v20 = vld [vmem:[#allocation2 + $0x168] sm:$0xff] }
 0x3c6   :  { %24093 = vmatpush3.bf16.msra.mxu1 %v31203_v11  ;;  %23811 = vmatprep.subr.bf16.mxu0 %v23810_v45  ;;  %v15772_v56 = vld [vmem:[%s31002_s4 + $0x190] sm:$0xff]  ;;  %v15773_v16 = vld [vmem:[%s31002_s4 + $0x198] sm:$0xff]  ;;  %v15774_v4 = vld [vmem:[%s31002_s4 + $0x1a0] sm:$0xff] }
 0x3c7   :  { %20665 = vmatmul.mubr.f32.gmra.mrb[36].mxu0 %v28866_v48  ;;  %24095 = vmatprep.subr.bf16.mxu1 %v23806_v55  ;;  %v8104_v6 = vld [vmem:[#allocation2 + $0xa] sm:$0xff]  ;;  %v23838_v8 = vpack.c.bf16 %v15773_v16, %v15772_v56  ;;  %v28976_v58 = vld [vmem:[#allocation2 + $0x1a] sm:$0xff]  ;;  %v9891_v43 = vld [vmem:[#allocation2 + $0xc2] sm:$0xff] }
 0x3c8   :  { %20667 = vmatprep.mubr.f32.mxu0 %v28869_v27  ;;  %21166 = vmatmul.mubr.f32.gmra.mrb[34].mxu1 %v28871_v50  ;;  %v28974_v53 = vld [vmem:[#allocation2 + $0x170] sm:$0xff]  ;;  %v15775_v62 = vld [vmem:[%s31002_s4 + $0x1a8] sm:$0xff]  ;;  %v15777_v11 = vld [vmem:[%s31002_s4 + $0x1b8] sm:$0xff] }
 0x3c9   :  { %23813 = vmatpush3.bf16.msra.mxu0 %v23810_v45  ;;  %21168 = vmatprep.mubr.f32.mxu1 %v28881_v47  ;;  %v23842_v25 = vpack.c.bf16 %v15775_v62, %v15774_v4  ;;  %v15776_v59 = vld [vmem:[%s31002_s4 + $0x1b0] sm:$0xff]  ;;  %v28998_v37 = vld [vmem:[#allocation2 + $0x3a] sm:$0xff]  ;;  %v29004_v34 = vld [vmem:[#allocation2 + $0xe2] sm:$0xff] }
 0x3ca   :  { %24097 = vmatpush3.bf16.msra.mxu1 %v23806_v55  ;;  %23815 = vmatprep.subr.bf16.mxu0 %v23814_v7  ;;  %v28983_v55 = vld [vmem:[#allocation2 + $0x22] sm:$0xff]  ;;  %v9892_v29 = vld [vmem:[#allocation2 + $0xca] sm:$0xff]  ;;  %v28989_v23 = vld [vmem:[#allocation2 + $0x32] sm:$0xff]  ;;  %v23846_v26 = vpack.c.bf16 %v15777_v11, %v15776_v59 }
 0x3cb   :  { %20668 = vmatmul.mubr.f32.gmra.mrb[38].mxu0 %v28884_v42  ;;  %24099 = vmatprep.subr.bf16.mxu1 %v23810_v45  ;;  %v29006_v60 = vld [vmem:[#allocation2 + $0x4a] sm:$0xff]  ;;  %v29013_v9 = vld [vmem:[#allocation2 + $0xf2] sm:$0xff]  ;;  %v29022_v35 = vld [vmem:[#allocation2 + $0xfa] sm:$0xff] }
 0x3cc   :  { %20670 = vmatprep.mubr.f32.mxu0 %v28887_v52  ;;  %21169 = vmatmul.mubr.f32.gmra.mrb[36].mxu1 %v28889_v40  ;;  %v29016_v49 = vld [vmem:[#allocation2 + $0x52] sm:$0xff]  ;;  %v29031_v5 = vld [vmem:[#allocation2 + $0x10a] sm:$0xff]  ;;  %v15782_v0 = vld [vmem:[%s31002_s4 + $0x1e0] sm:$0xff] }
 0x3cd   :  { %23817 = vmatpush3.bf16.msra.mxu0 %v23814_v7  ;;  %21171 = vmatprep.mubr.f32.mxu1 %v28899_v61  ;;  %v15780_v39 = vld [vmem:[%s31002_s4 + $0x1d0] sm:$0xff]  ;;  %v15781_v22 = vld [vmem:[%s31002_s4 + $0x1d8] sm:$0xff]  ;;  %v15783_v56 = vld [vmem:[%s31002_s4 + $0x1e8] sm:$0xff] }
 0x3ce   :  { %24101 = vmatpush3.bf16.msra.mxu1 %v23810_v45  ;;  %23819 = vmatprep.subr.bf16.mxu0 %v23818_v28  ;;  %v28995_v45 = vld [vmem:[#allocation2 + $0xda] sm:$0xff]  ;;  %v23854_v13 = vpack.c.bf16 %v15781_v22, %v15780_v39  ;;  %v29049_v16 = vld [vmem:[#allocation2 + $0x122] sm:$0xff]  ;;  %v15784_v4 = vld [vmem:[%s31002_s4 + $0x1f0] sm:$0xff] }
 0x3cf   :  { %20671 = vmatmul.mubr.f32.gmra.mrb[40].mxu0 %v28902_v24  ;;  %24103 = vmatprep.subr.bf16.mxu1 %v23814_v7  ;;  %v29058_v62 = vld [vmem:[#allocation2 + $0x12a] sm:$0xff]  ;;  %v29067_v59 = vld [vmem:[#allocation2 + $0x13a] sm:$0xff]  ;;  %v29088_v22 = vld [vmem:[#allocation2 + $0xb2] sm:$0xff] }
 0x3d0   :  { %20673 = vmatprep.mubr.f32.mxu0 %v28905_v18  ;;  %21172 = vmatmul.mubr.f32.gmra.mrb[38].mxu1 %v28907_v41  ;;  %v15787_v39 = vld [vmem:[%s31002_s4 + $0x208] sm:$0xff] }
 0x3d1   :  { %23821 = vmatpush3.bf16.msra.mxu0 %v23818_v28  ;;  %21174 = vmatprep.mubr.f32.mxu1 %v28917_v30 }
 0x3d2   :  { %24105 = vmatpush3.bf16.msra.mxu1 %v23814_v7  ;;  %23823 = vmatprep.subr.bf16.mxu0 %v23822_v36  ;;  %v15778_v7 = vld [vmem:[%s31002_s4 + $0x1c0] sm:$0xff] }
 0x3d3   :  { %20674 = vmatmul.mubr.f32.gmra.mrb[42].mxu0 %v28920_v2  ;;  %24107 = vmatprep.subr.bf16.mxu1 %v23818_v28 }
 0x3d4   :  { %20676 = vmatprep.mubr.f32.mxu0 %v28923_v63  ;;  %21175 = vmatmul.mubr.f32.gmra.mrb[40].mxu1 %v28925_v31 }
 0x3d5   :  { %23825 = vmatpush3.bf16.msra.mxu0 %v23822_v36  ;;  %21177 = vmatprep.mubr.f32.mxu1 %v28935_v1 }
 0x3d6   :  { %24109 = vmatpush3.bf16.msra.mxu1 %v23818_v28  ;;  %23827 = vmatprep.subr.bf16.mxu0 %v23826_v33  ;;  %v15779_v28 = vld [vmem:[%s31002_s4 + $0x1c8] sm:$0xff] }
 0x3d7   :  { %20677 = vmatmul.mubr.f32.gmra.mrb[44].mxu0 %v28938_v32  ;;  %24111 = vmatprep.subr.bf16.mxu1 %v23822_v36 }
 0x3d8   :  { %20679 = vmatprep.mubr.f32.mxu0 %v28941_v14  ;;  %21178 = vmatmul.mubr.f32.gmra.mrb[42].mxu1 %v28943_v19 }
 0x3d9   :  { %23829 = vmatpush3.bf16.msra.mxu0 %v23826_v33  ;;  %21180 = vmatprep.mubr.f32.mxu1 %v28953_v10 }
 0x3da   :  { %24113 = vmatpush3.bf16.msra.mxu1 %v23822_v36  ;;  %23831 = vmatprep.subr.bf16.mxu0 %v23830_v51  ;;  %v23850_v36 = vpack.c.bf16 %v15779_v28, %v15778_v7  ;;  %v29076_v7 = vld [vmem:[#allocation2 + $0x142] sm:$0xff]  ;;  %v29078_v28 = vld [vmem:[#allocation2 + $0xaa] sm:$0xff] }
 0x3db   :  { %20680 = vmatmul.mubr.f32.gmra.mrb[46].mxu0 %v28956_v54  ;;  %24115 = vmatprep.subr.bf16.mxu1 %v23826_v33 }
 0x3dc   :  { %20714 = vmatprep.mubr.f32.mxu0 %v8103_v3  ;;  %21181 = vmatmul.mubr.f32.gmra.mrb[44].mxu1 %v28959_v15  ;;  %v29040_v3 = vld [vmem:[#allocation2 + $0x112] sm:$0xff] }
 0x3dd   :  { %23833 = vmatpush3.bf16.msra.mxu0 %v23830_v51  ;;  %21183 = vmatprep.mubr.f32.mxu1 %v28968_v20 }
 0x3de   :  { %24117 = vmatpush3.bf16.msra.mxu1 %v23826_v33  ;;  %23835 = vmatprep.subr.bf16.mxu0 %v23834_v17  ;;  %v29024_v33 = vld [vmem:[#allocation2 + $0x62] sm:$0xff] }
 0x3df   :  { %24119 = vmatprep.subr.bf16.mxu1 %v23830_v51 }
 0x3e0   :  { %20715 = vmatmul.mubr.f32.vlgmr.msra.gmra.mrb[32].mxu0 %v8104_v6  ;;  %21184 = vmatmul.mubr.f32.gmra.mrb[46].mxu1 %v28974_v53  ;;  %v29052_v6 = vld [vmem:[#allocation2 + $0x82] sm:$0xff] }
 0x3e1   :  { %20717 = vmatprep.mubr.f32.mxu0 %v28976_v58  ;;  %23837 = vmatpush3.bf16.msra.mxu0 %v23834_v17 }
 0x3e2   :  { %24121 = vmatpush3.bf16.msra.mxu1 %v23830_v51  ;;  %21218 = vmatprep.mubr.f32.mxu1 %v9891_v43  ;;  %v29034_v51 = vld [vmem:[#allocation2 + $0x6a] sm:$0xff]  ;;  %v29060_v43 = vld [vmem:[#allocation2 + $0x92] sm:$0xff] }
 0x3e3   :  { %23839 = vmatprep.subr.bf16.mxu0 %v23838_v8  ;;  %24123 = vmatprep.subr.bf16.mxu1 %v23834_v17 }
 0x3e4   :  { %20718 = vmatmul.mubr.f32.gmra.mrb[34].mxu0 %v28983_v55 }
 0x3e5   :  { %21219 = vmatmul.mubr.f32.vlgmr.msra.gmra.mrb[32].mxu1 %v9892_v29  ;;  %20720 = vmatprep.mubr.f32.mxu0 %v28989_v23  ;;  %v29070_v29 = vld [vmem:[#allocation2 + $0x9a] sm:$0xff] }
 0x3e6   :  { %23841 = vmatpush3.bf16.msra.mxu0 %v23838_v8  ;;  %21221 = vmatprep.mubr.f32.mxu1 %v28995_v45 }
 0x3e7   :  { %24125 = vmatpush3.bf16.msra.mxu1 %v23834_v17  ;;  %23843 = vmatprep.subr.bf16.mxu0 %v23842_v25  ;;  %v29042_v17 = vld [vmem:[#allocation2 + $0x7a] sm:$0xff] }
 0x3e8   :  { %20721 = vmatmul.mubr.f32.gmra.mrb[36].mxu0 %v28998_v37  ;;  %24127 = vmatprep.subr.bf16.mxu1 %v23838_v8 }
 0x3e9   :  { %21222 = vmatmul.mubr.f32.gmra.mrb[34].mxu1 %v29004_v34  ;;  %20723 = vmatprep.mubr.f32.mxu0 %v29006_v60 }
 0x3ea   :  { %23845 = vmatpush3.bf16.msra.mxu0 %v23842_v25  ;;  %21224 = vmatprep.mubr.f32.mxu1 %v29013_v9 }
 0x3eb   :  { %24129 = vmatpush3.bf16.msra.mxu1 %v23838_v8  ;;  %23847 = vmatprep.subr.bf16.mxu0 %v23846_v26  ;;  %v23858_v8 = vpack.c.bf16 %v15783_v56, %v15782_v0  ;;  %v29091_v56 = vld [vmem:[#allocation2 + $0x15a] sm:$0xff] }
 0x3ec   :  { %20724 = vmatmul.mubr.f32.gmra.mrb[38].mxu0 %v29016_v49  ;;  %24131 = vmatprep.subr.bf16.mxu1 %v23842_v25  ;;  %31204 = vst [vmem:[#allocation40_spill] sm:$0xff] %v29091_v56 }
 0x3ed   :  { %21225 = vmatmul.mubr.f32.gmra.mrb[36].mxu1 %v29022_v35  ;;  %20726 = vmatprep.mubr.f32.mxu0 %v29024_v33 }
 0x3ee   :  { %23849 = vmatpush3.bf16.msra.mxu0 %v23846_v26  ;;  %21227 = vmatprep.mubr.f32.mxu1 %v29031_v5 }
 0x3ef   :  { %24133 = vmatpush3.bf16.msra.mxu1 %v23842_v25  ;;  %23851 = vmatprep.subr.bf16.mxu0 %v23850_v36  ;;  %v15785_v25 = vld [vmem:[%s31002_s4 + $0x1f8] sm:$0xff] }
 0x3f0   :  { %20727 = vmatmul.mubr.f32.gmra.mrb[40].mxu0 %v29034_v51  ;;  %24135 = vmatprep.subr.bf16.mxu1 %v23846_v26  ;;  %v23862_v11 = vpack.c.bf16 %v15785_v25, %v15784_v4  ;;  %v29095_v4 = vld [vmem:[#allocation2 + $0x16a] sm:$0xff] }
 0x3f1   :  { %21228 = vmatmul.mubr.f32.gmra.mrb[38].mxu1 %v29040_v3  ;;  %20729 = vmatprep.mubr.f32.mxu0 %v29042_v17  ;;  %v15788_v25 = vld [vmem:[%s31002_s4 + $0x210] sm:$0xff] }
 0x3f2   :  { %23853 = vmatpush3.bf16.msra.mxu0 %v23850_v36  ;;  %21230 = vmatprep.mubr.f32.mxu1 %v29049_v16 }
 0x3f3   :  { %24137 = vmatpush3.bf16.msra.mxu1 %v23846_v26  ;;  %23855 = vmatprep.subr.bf16.mxu0 %v23854_v13  ;;  %v15786_v26 = vld [vmem:[%s31002_s4 + $0x200] sm:$0xff] }
 0x3f4   :  { %20730 = vmatmul.mubr.f32.gmra.mrb[42].mxu0 %v29052_v6  ;;  %24139 = vmatprep.subr.bf16.mxu1 %v23850_v36  ;;  %v23866_v0 = vpack.c.bf16 %v15787_v39, %v15786_v26  ;;  %v29104_v26 = vld [vmem:[#allocation2 + $0x172] sm:$0xff] }
 0x3f5   :  { %21231 = vmatmul.mubr.f32.gmra.mrb[40].mxu1 %v29058_v62  ;;  %20732 = vmatprep.mubr.f32.mxu0 %v29060_v43 }
 0x3f6   :  { %23857 = vmatpush3.bf16.msra.mxu0 %v23854_v13  ;;  %21233 = vmatprep.mubr.f32.mxu1 %v29067_v59 }
 0x3f7   :  { %24141 = vmatpush3.bf16.msra.mxu1 %v23850_v36  ;;  %23859 = vmatprep.subr.bf16.mxu0 %v23858_v8  ;;  %v29085_v36 = vld [vmem:[#allocation2 + $0x152] sm:$0xff] }
 0x3f8   :  { %20733 = vmatmul.mubr.f32.gmra.mrb[44].mxu0 %v29070_v29  ;;  %24143 = vmatprep.subr.bf16.mxu1 %v23854_v13 }
 0x3f9   :  { %21234 = vmatmul.mubr.f32.gmra.mrb[42].mxu1 %v29076_v7  ;;  %20735 = vmatprep.mubr.f32.mxu0 %v29078_v28 }
 0x3fa   :  { %23861 = vmatpush3.bf16.msra.mxu0 %v23858_v8  ;;  %21236 = vmatprep.mubr.f32.mxu1 %v29085_v36 }
 0x3fb   :  { %24145 = vmatpush3.bf16.msra.mxu1 %v23854_v13  ;;  %23863 = vmatprep.subr.bf16.mxu0 %v23862_v11  ;;  %v15789_v13 = vld [vmem:[%s31002_s4 + $0x218] sm:$0xff] }
 0x3fc   :  { %20736 = vmatmul.mubr.f32.gmra.mrb[46].mxu0 %v29088_v22  ;;  %24147 = vmatprep.subr.bf16.mxu1 %v23858_v8  ;;  %v23870_v39 = vpack.c.bf16 %v15789_v13, %v15788_v25  ;;  %v15793_v25 = vld [vmem:[%s31002_s4 + $0x238] sm:$0xff]  ;;  %v15808_v13 = vld [vmem:[%s31002_s4 + $0x2b0] sm:$0xff] }
 0x3fd   :  { %21237 = vmatmul.mubr.f32.gmra.mrb[44].mxu1 %v29091_v56  ;;  %20770 = vmatprep.mubr.f32.mxu0 %v28830_v12  ;;  %v15790_v12 = vld [vmem:[%s31002_s4 + $0x220] sm:$0xff]  ;;  %v15791_v56 = vld [vmem:[%s31002_s4 + $0x228] sm:$0xff] }
 0x3fe   :  { %23865 = vmatpush3.bf16.msra.mxu0 %v23862_v11  ;;  %21239 = vmatprep.mubr.f32.mxu1 %v29095_v4 }
 0x3ff   :  { %24149 = vmatpush3.bf16.msra.mxu1 %v23858_v8  ;;  %23867 = vmatprep.subr.bf16.mxu0 %v23866_v0  ;;  %v23874_v8 = vpack.c.bf16 %v15791_v56, %v15790_v12  ;;  %v29202_v56 = vld [vmem:[#allocation2 + $0x49] sm:$0xff]  ;;  %v29211_v12 = vld [vmem:[#allocation2 + $0xf1] sm:$0xff] }
 0x400   :  { %24151 = vmatprep.subr.bf16.mxu1 %v23862_v11 }
 0x401   :  { %20771 = vmatmul.mubr.f32.vlgmr.msra.gmra.mrb[32].mxu0 %v28846_v46  ;;  %21240 = vmatmul.mubr.f32.gmra.mrb[46].mxu1 %v29104_v26  ;;  %v15792_v46 = vld [vmem:[%s31002_s4 + $0x230] sm:$0xff] }
 0x402   :  { %20773 = vmatprep.mubr.f32.mxu0 %v28850_v57  ;;  %23869 = vmatpush3.bf16.msra.mxu0 %v23866_v0  ;;  %v23878_v57 = vpack.c.bf16 %v15793_v25, %v15792_v46  ;;  %v29216_v46 = vld [vmem:[#allocation2 + $0xf9] sm:$0xff] }
 0x403   :  { %24153 = vmatpush3.bf16.msra.mxu1 %v23862_v11  ;;  %21274 = vmatprep.mubr.f32.mxu1 %v28862_v38  ;;  %v15794_v38 = vld [vmem:[%s31002_s4 + $0x240] sm:$0xff] }
 0x404   :  { %23871 = vmatprep.subr.bf16.mxu0 %v23870_v39  ;;  %24155 = vmatprep.subr.bf16.mxu1 %v23866_v0  ;;  %v10278_v11 = vld [vmem:[#allocation2 + $0xe1] sm:$0xff] }
 0x405   :  { %20774 = vmatmul.mubr.f32.gmra.mrb[34].mxu0 %v28866_v48  ;;  %v15795_v48 = vld [vmem:[%s31002_s4 + $0x248] sm:$0xff] }
 0x406   :  { %21275 = vmatmul.mubr.f32.vlgmr.msra.gmra.mrb[32].mxu1 %v28871_v50  ;;  %20776 = vmatprep.mubr.f32.mxu0 %v28869_v27  ;;  %v23882_v27 = vpack.c.bf16 %v15795_v48, %v15794_v38  ;;  %v15796_v50 = vld [vmem:[%s31002_s4 + $0x250] sm:$0xff]  ;;  %v15810_v38 = vld [vmem:[%s31002_s4 + $0x2c0] sm:$0xff]  ;;  %v15811_v48 = vld [vmem:[%s31002_s4 + $0x2c8] sm:$0xff] }
 0x407   :  { %23873 = vmatpush3.bf16.msra.mxu0 %v23870_v39  ;;  %21277 = vmatprep.mubr.f32.mxu1 %v28881_v47  ;;  %v15797_v47 = vld [vmem:[%s31002_s4 + $0x258] sm:$0xff] }
 0x408   :  { %24157 = vmatpush3.bf16.msra.mxu1 %v23866_v0  ;;  %23875 = vmatprep.subr.bf16.mxu0 %v23874_v8 }
 0x409   :  { %20777 = vmatmul.mubr.f32.gmra.mrb[36].mxu0 %v28884_v42  ;;  %24159 = vmatprep.subr.bf16.mxu1 %v23870_v39  ;;  %v23886_v42 = vpack.c.bf16 %v15797_v47, %v15796_v50  ;;  %v29232_v50 = vld [vmem:[#allocation2 + $0x69] sm:$0xff]  ;;  %v29234_v47 = vld [vmem:[#allocation2 + $0x111] sm:$0xff] }
 0x40a   :  { %21278 = vmatmul.mubr.f32.gmra.mrb[34].mxu1 %v28889_v40  ;;  %20779 = vmatprep.mubr.f32.mxu0 %v28887_v52  ;;  %v15798_v52 = vld [vmem:[%s31002_s4 + $0x260] sm:$0xff]  ;;  %v15799_v40 = vld [vmem:[%s31002_s4 + $0x268] sm:$0xff] }
 0x40b   :  { %23877 = vmatpush3.bf16.msra.mxu0 %v23874_v8  ;;  %21280 = vmatprep.mubr.f32.mxu1 %v28899_v61  ;;  %v23890_v61 = vpack.c.bf16 %v15799_v40, %v15798_v52  ;;  %v29237_v52 = vld [vmem:[#allocation2 + $0x79] sm:$0xff]  ;;  %v15812_v40 = vld [vmem:[%s31002_s4 + $0x2d0] sm:$0xff] }
 0x40c   :  { %24161 = vmatpush3.bf16.msra.mxu1 %v23870_v39  ;;  %23879 = vmatprep.subr.bf16.mxu0 %v23878_v57  ;;  %v15809_v39 = vld [vmem:[%s31002_s4 + $0x2b8] sm:$0xff] }
 0x40d   :  { %20780 = vmatmul.mubr.f32.gmra.mrb[38].mxu0 %v28902_v24  ;;  %24163 = vmatprep.subr.bf16.mxu1 %v23874_v8  ;;  %v15800_v24 = vld [vmem:[%s31002_s4 + $0x270] sm:$0xff]  ;;  %v23910_v25 = vpack.c.bf16 %v15809_v39, %v15808_v13  ;;  %v29288_v13 = vld [vmem:[#allocation2 + $0x159] sm:$0xff] }
 0x40e   :  { %21281 = vmatmul.mubr.f32.gmra.mrb[36].mxu1 %v28907_v41  ;;  %20782 = vmatprep.mubr.f32.mxu0 %v28905_v18  ;;  %v15801_v18 = vld [vmem:[%s31002_s4 + $0x278] sm:$0xff] }
 0x40f   :  { %23881 = vmatpush3.bf16.msra.mxu0 %v23878_v57  ;;  %21283 = vmatprep.mubr.f32.mxu1 %v28917_v30  ;;  %v23894_v41 = vpack.c.bf16 %v15801_v18, %v15800_v24  ;;  %v15802_v30 = vld [vmem:[%s31002_s4 + $0x280] sm:$0xff] }
 0x410   :  { %24165 = vmatpush3.bf16.msra.mxu1 %v23874_v8  ;;  %23883 = vmatprep.subr.bf16.mxu0 %v23882_v27  ;;  %v29214_v8 = vld [vmem:[#allocation2 + $0x51] sm:$0xff]  ;;  %v29247_v24 = vld [vmem:[#allocation2 + $0x121] sm:$0xff] }
 0x411   :  { %20783 = vmatmul.mubr.f32.gmra.mrb[40].mxu0 %v28920_v2  ;;  %24167 = vmatprep.subr.bf16.mxu1 %v23878_v57  ;;  %v15803_v2 = vld [vmem:[%s31002_s4 + $0x288] sm:$0xff] }
 0x412   :  { %21284 = vmatmul.mubr.f32.gmra.mrb[38].mxu1 %v28925_v31  ;;  %20785 = vmatprep.mubr.f32.mxu0 %v28923_v63  ;;  %v23898_v63 = vpack.c.bf16 %v15803_v2, %v15802_v30  ;;  %v8491_v31 = vld [vmem:[#allocation2 + $0x19] sm:$0xff]  ;;  %v29250_v18 = vld [vmem:[#allocation2 + $0x81] sm:$0xff]  ;;  %v29255_v2 = vld [vmem:[#allocation2 + $0x91] sm:$0xff] }
 0x413   :  { %23885 = vmatpush3.bf16.msra.mxu0 %v23882_v27  ;;  %21286 = vmatprep.mubr.f32.mxu1 %v28935_v1  ;;  %v29178_v1 = vld [vmem:[#allocation2 + $0x180] sm:$0xff] }
 0x414   :  { %24169 = vmatpush3.bf16.msra.mxu1 %v23878_v57  ;;  %23887 = vmatprep.subr.bf16.mxu0 %v23886_v42  ;;  %v29219_v57 = vld [vmem:[#allocation2 + $0x61] sm:$0xff] }
 0x415   :  { %20786 = vmatmul.mubr.f32.gmra.mrb[42].mxu0 %v28938_v32  ;;  %24171 = vmatprep.subr.bf16.mxu1 %v23882_v27  ;;  %v15804_v32 = vld [vmem:[%s31002_s4 + $0x290] sm:$0xff] }
 0x416   :  { %21287 = vmatmul.mubr.f32.gmra.mrb[40].mxu1 %v28943_v19  ;;  %20788 = vmatprep.mubr.f32.mxu0 %v28941_v14  ;;  %v29187_v14 = vld [vmem:[#allocation2 + $0x188] sm:$0xff] }
 0x417   :  { %23889 = vmatpush3.bf16.msra.mxu0 %v23886_v42  ;;  %21289 = vmatprep.mubr.f32.mxu1 %v28953_v10  ;;  %v29190_v10 = vld [vmem:[#allocation2 + $0x31] sm:$0xff] }
 0x418   :  { %24173 = vmatpush3.bf16.msra.mxu1 %v23882_v27  ;;  %23891 = vmatprep.subr.bf16.mxu0 %v23890_v61  ;;  %v29229_v27 = vld [vmem:[#allocation2 + $0x109] sm:$0xff] }
 0x419   :  { %20789 = vmatmul.mubr.f32.gmra.mrb[44].mxu0 %v28956_v54  ;;  %24175 = vmatprep.subr.bf16.mxu1 %v23886_v42  ;;  %v15806_v54 = vld [vmem:[%s31002_s4 + $0x2a0] sm:$0xff] }
 0x41a   :  { %21290 = vmatmul.mubr.f32.gmra.mrb[42].mxu1 %v28959_v15  ;;  %20791 = vmatprep.mubr.f32.mxu0 %v28835_v21  ;;  %v15805_v21 = vld [vmem:[%s31002_s4 + $0x298] sm:$0xff]  ;;  %v15807_v15 = vld [vmem:[%s31002_s4 + $0x2a8] sm:$0xff] }
 0x41b   :  { %23893 = vmatpush3.bf16.msra.mxu0 %v23890_v61  ;;  %21292 = vmatprep.mubr.f32.mxu1 %v28968_v20  ;;  %v23902_v19 = vpack.c.bf16 %v15805_v21, %v15804_v32  ;;  %v10277_v20 = vld [vmem:[#allocation2 + $0xd9] sm:$0xff]  ;;  %v23906_v0 = vpack.c.bf16 %v15807_v15, %v15806_v54  ;;  %v29273_v54 = vld [vmem:[#allocation2 + $0xa9] sm:$0xff] }
 0x41c   :  { %24177 = vmatpush3.bf16.msra.mxu1 %v23886_v42  ;;  %23895 = vmatprep.subr.bf16.mxu0 %v23894_v41  ;;  %v23914_v42 = vpack.c.bf16 %v15811_v48, %v15810_v38  ;;  %v29265_v32 = vld [vmem:[#allocation2 + $0x139] sm:$0xff]  ;;  %v15816_v15 = vld [vmem:[%s31002_s4 + $0x2f0] sm:$0xff]  ;;  %v15819_v48 = vld [vmem:[%s31002_s4 + $0x308] sm:$0xff] }
 0x41d   :  { %20792 = vmatmul.mubr.f32.gmra.mrb[46].mxu0 %v28852_v44  ;;  %24179 = vmatprep.subr.bf16.mxu1 %v23890_v61  ;;  %v8492_v44 = vld [vmem:[#allocation2 + $0x21] sm:$0xff]  ;;  %v29268_v21 = vld [vmem:[#allocation2 + $0x99] sm:$0xff] }
 0x41e   :  { %21293 = vmatmul.mubr.f32.gmra.mrb[44].mxu1 %v28974_v53  ;;  %20826 = vmatprep.mubr.f32.mxu0 %v8491_v31  ;;  %v29199_v53 = vld [vmem:[#allocation2 + $0x39] sm:$0xff]  ;;  %v15815_v31 = vld [vmem:[%s31002_s4 + $0x2e8] sm:$0xff] }
 0x41f   :  { %23897 = vmatpush3.bf16.msra.mxu0 %v23894_v41  ;;  %21295 = vmatprep.mubr.f32.mxu1 %v29178_v1  ;;  %v15818_v38 = vld [vmem:[%s31002_s4 + $0x300] sm:$0xff] }
 0x420   :  { %24181 = vmatpush3.bf16.msra.mxu1 %v23890_v61  ;;  %23899 = vmatprep.subr.bf16.mxu0 %v23898_v63  ;;  %v15813_v61 = vld [vmem:[%s31002_s4 + $0x2d8] sm:$0xff] }
 0x421   :  { %24183 = vmatprep.subr.bf16.mxu1 %v23894_v41  ;;  %v23918_v30 = vpack.c.bf16 %v15813_v61, %v15812_v40  ;;  %v29304_v40 = vld [vmem:[#allocation2 + $0xc9] sm:$0xff]  ;;  %v23930_v61 = vpack.c.bf16 %v15819_v48, %v15818_v38 }
 0x422   :  { %20827 = vmatmul.mubr.f32.vlgmr.msra.gmra.mrb[32].mxu0 %v8492_v44  ;;  %21296 = vmatmul.mubr.f32.gmra.mrb[46].mxu1 %v29187_v14  ;;  %v29270_v44 = vld [vmem:[#allocation2 + $0x141] sm:$0xff] }
 0x423   :  { %20829 = vmatprep.mubr.f32.mxu0 %v29190_v10  ;;  %23901 = vmatpush3.bf16.msra.mxu0 %v23898_v63  ;;  %v15823_v48 = vld [vmem:[%s31002_s4 + $0x328] sm:$0xff] }
 0x424   :  { %24185 = vmatpush3.bf16.msra.mxu1 %v23894_v41  ;;  %21330 = vmatprep.mubr.f32.mxu1 %v10277_v20  ;;  %v29252_v41 = vld [vmem:[#allocation2 + $0x129] sm:$0xff]  ;;  %v15817_v20 = vld [vmem:[%s31002_s4 + $0x2f8] sm:$0xff] }
 0x425   :  { %23903 = vmatprep.subr.bf16.mxu0 %v23902_v19  ;;  %24187 = vmatprep.subr.bf16.mxu1 %v23898_v63  ;;  %v23926_v39 = vpack.c.bf16 %v15817_v20, %v15816_v15  ;;  %v15820_v15 = vld [vmem:[%s31002_s4 + $0x310] sm:$0xff] }
 0x426   :  { %20830 = vmatmul.mubr.f32.gmra.mrb[34].mxu0 %v29199_v53  ;;  %v29320_v20 = vld [vmem:[#allocation2 + $0x189] sm:$0xff] }
 0x427   :  { %21331 = vmatmul.mubr.f32.vlgmr.msra.gmra.mrb[32].mxu1 %v10278_v11  ;;  %20832 = vmatprep.mubr.f32.mxu0 %v29202_v56  ;;  %v29283_v11 = vld [vmem:[#allocation2 + $0x151] sm:$0xff] }
 0x428   :  { %23905 = vmatpush3.bf16.msra.mxu0 %v23902_v19  ;;  %21333 = vmatprep.mubr.f32.mxu1 %v29211_v12 }
 0x429   :  { %24189 = vmatpush3.bf16.msra.mxu1 %v23898_v63  ;;  %23907 = vmatprep.subr.bf16.mxu0 %v23906_v0  ;;  %v15814_v63 = vld [vmem:[%s31002_s4 + $0x2e0] sm:$0xff] }
 0x42a   :  { %20833 = vmatmul.mubr.f32.gmra.mrb[36].mxu0 %v29214_v8  ;;  %24191 = vmatprep.subr.bf16.mxu1 %v23902_v19 }
 0x42b   :  { %21334 = vmatmul.mubr.f32.gmra.mrb[34].mxu1 %v29216_v46  ;;  %20835 = vmatprep.mubr.f32.mxu0 %v29219_v57 }
 0x42c   :  { %23909 = vmatpush3.bf16.msra.mxu0 %v23906_v0  ;;  %21336 = vmatprep.mubr.f32.mxu1 %v29229_v27 }
 0x42d   :  { %24193 = vmatpush3.bf16.msra.mxu1 %v23902_v19  ;;  %23911 = vmatprep.subr.bf16.mxu0 %v23910_v25  ;;  %v23922_v19 = vpack.c.bf16 %v15815_v31, %v15814_v63  ;;  %v29307_v63 = vld [vmem:[#allocation2 + $0x171] sm:$0xff]  ;;  %v29311_v31 = vld [vmem:[#allocation2 + $0x181] sm:$0xff] }
 0x42e   :  { %20836 = vmatmul.mubr.f32.gmra.mrb[38].mxu0 %v29232_v50  ;;  %24195 = vmatprep.subr.bf16.mxu1 %v23906_v0 }
 0x42f   :  { %21337 = vmatmul.mubr.f32.gmra.mrb[36].mxu1 %v29234_v47  ;;  %20838 = vmatprep.mubr.f32.mxu0 %v29237_v52 }
 0x430   :  { %23913 = vmatpush3.bf16.msra.mxu0 %v23910_v25  ;;  %21339 = vmatprep.mubr.f32.mxu1 %v29247_v24 }
 0x431   :  { %24197 = vmatpush3.bf16.msra.mxu1 %v23906_v0  ;;  %23915 = vmatprep.subr.bf16.mxu0 %v23914_v42  ;;  %v29286_v0 = vld [vmem:[#allocation2 + $0xb1] sm:$0xff] }
 0x432   :  { %20839 = vmatmul.mubr.f32.gmra.mrb[40].mxu0 %v29250_v18  ;;  %24199 = vmatprep.subr.bf16.mxu1 %v23910_v25 }
 0x433   :  { %21340 = vmatmul.mubr.f32.gmra.mrb[38].mxu1 %v29252_v41  ;;  %20841 = vmatprep.mubr.f32.mxu0 %v29255_v2 }
 0x434   :  { %23917 = vmatpush3.bf16.msra.mxu0 %v23914_v42  ;;  %21342 = vmatprep.mubr.f32.mxu1 %v29265_v32 }
 0x435   :  { %24201 = vmatpush3.bf16.msra.mxu1 %v23910_v25  ;;  %23919 = vmatprep.subr.bf16.mxu0 %v23918_v30  ;;  %v29291_v25 = vld [vmem:[#allocation2 + $0xc1] sm:$0xff] }
 0x436   :  { %20842 = vmatmul.mubr.f32.gmra.mrb[42].mxu0 %v29268_v21  ;;  %24203 = vmatprep.subr.bf16.mxu1 %v23914_v42 }
 0x437   :  { %21343 = vmatmul.mubr.f32.gmra.mrb[40].mxu1 %v29270_v44  ;;  %20844 = vmatprep.mubr.f32.mxu0 %v29273_v54 }
 0x438   :  { %23921 = vmatpush3.bf16.msra.mxu0 %v23918_v30  ;;  %21345 = vmatprep.mubr.f32.mxu1 %v29283_v11 }
 0x439   :  { %24205 = vmatpush3.bf16.msra.mxu1 %v23914_v42  ;;  %23923 = vmatprep.subr.bf16.mxu0 %v23922_v19  ;;  %v29301_v42 = vld [vmem:[#allocation2 + $0x169] sm:$0xff] }
 0x43a   :  { %20845 = vmatmul.mubr.f32.gmra.mrb[44].mxu0 %v29286_v0  ;;  %24207 = vmatprep.subr.bf16.mxu1 %v23918_v30 }
 0x43b   :  { %21346 = vmatmul.mubr.f32.gmra.mrb[42].mxu1 %v29288_v13  ;;  %20847 = vmatprep.mubr.f32.mxu0 %v29291_v25 }
 0x43c   :  { %23925 = vmatpush3.bf16.msra.mxu0 %v23922_v19  ;;  %21348 = vmatprep.mubr.f32.mxu1 %v29301_v42 }
 0x43d   :  { %24209 = vmatpush3.bf16.msra.mxu1 %v23918_v30  ;;  %23927 = vmatprep.subr.bf16.mxu0 %v23926_v39  ;;  %v15821_v30 = vld [vmem:[%s31002_s4 + $0x318] sm:$0xff] }
 0x43e   :  { %20848 = vmatmul.mubr.f32.gmra.mrb[46].mxu0 %v29304_v40  ;;  %24211 = vmatprep.subr.bf16.mxu1 %v23922_v19  ;;  %v23934_v38 = vpack.c.bf16 %v15821_v30, %v15820_v15  ;;  %v15825_v15 = vld [vmem:[%s31002_s4 + $0x338] sm:$0xff]  ;;  %v15838_v30 = vld [vmem:[%s31002_s4 + $0x3a0] sm:$0xff] }
 0x43f   :  { %21349 = vmatmul.mubr.f32.gmra.mrb[44].mxu1 %v29307_v63  ;;  %20882 = vmatprep.mubr.f32.mxu0 %v28976_v58  ;;  %v15822_v58 = vld [vmem:[%s31002_s4 + $0x320] sm:$0xff] }
 0x440   :  { %23929 = vmatpush3.bf16.msra.mxu0 %v23926_v39  ;;  %21351 = vmatprep.mubr.f32.mxu1 %v29311_v31 }
 0x441   :  { %24213 = vmatpush3.bf16.msra.mxu1 %v23922_v19  ;;  %23931 = vmatprep.subr.bf16.mxu0 %v23930_v61  ;;  %v23938_v19 = vpack.c.bf16 %v15823_v48, %v15822_v58  ;;  %v10663_v58 = vld [vmem:[#allocation2 + $0xf0] sm:$0xff] }
 0x442   :  { %24215 = vmatprep.subr.bf16.mxu1 %v23926_v39  ;;  %v8882_v48 = vld [vmem:[#allocation2 + $0x50] sm:$0xff] }
 0x443   :  { %20883 = vmatmul.mubr.f32.vlgmr.msra.gmra.mrb[32].mxu0 %v28983_v55  ;;  %21352 = vmatmul.mubr.f32.gmra.mrb[46].mxu1 %v29320_v20  ;;  %v15824_v55 = vld [vmem:[%s31002_s4 + $0x330] sm:$0xff] }
 0x444   :  { %20885 = vmatprep.mubr.f32.mxu0 %v28989_v23  ;;  %23933 = vmatpush3.bf16.msra.mxu0 %v23930_v61  ;;  %v23942_v23 = vpack.c.bf16 %v15825_v15, %v15824_v55  ;;  %v8883_v15 = vld [vmem:[#allocation2 + $0x60] sm:$0xff] }
 0x445   :  { %24217 = vmatpush3.bf16.msra.mxu1 %v23926_v39  ;;  %21386 = vmatprep.mubr.f32.mxu1 %v28995_v45  ;;  %v15826_v45 = vld [vmem:[%s31002_s4 + $0x340] sm:$0xff]  ;;  %v29407_v39 = vld [vmem:[#allocation2 + $0x18a] sm:$0xff] }
 0x446   :  { %23935 = vmatprep.subr.bf16.mxu0 %v23934_v38  ;;  %24219 = vmatprep.subr.bf16.mxu1 %v23930_v61 }
 0x447   :  { %20886 = vmatmul.mubr.f32.gmra.mrb[34].mxu0 %v28998_v37  ;;  %v15827_v37 = vld [vmem:[%s31002_s4 + $0x348] sm:$0xff] }
 0x448   :  { %21387 = vmatmul.mubr.f32.vlgmr.msra.gmra.mrb[32].mxu1 %v29004_v34  ;;  %20888 = vmatprep.mubr.f32.mxu0 %v29006_v60  ;;  %v23946_v34 = vpack.c.bf16 %v15827_v37, %v15826_v45  ;;  %v15828_v60 = vld [vmem:[%s31002_s4 + $0x350] sm:$0xff]  ;;  %v15841_v45 = vld [vmem:[%s31002_s4 + $0x3b8] sm:$0xff]  ;;  %v10665_v37 = vld [vmem:[#allocation2 + $0x108] sm:$0xff] }
 0x449   :  { %23937 = vmatpush3.bf16.msra.mxu0 %v23934_v38  ;;  %21389 = vmatprep.mubr.f32.mxu1 %v29013_v9  ;;  %v15829_v9 = vld [vmem:[%s31002_s4 + $0x358] sm:$0xff] }
 0x44a   :  { %24221 = vmatpush3.bf16.msra.mxu1 %v23930_v61  ;;  %23939 = vmatprep.subr.bf16.mxu0 %v23938_v19  ;;  %v8881_v61 = vld [vmem:[#allocation2 + $0x48] sm:$0xff] }
 0x44b   :  { %20889 = vmatmul.mubr.f32.gmra.mrb[36].mxu0 %v29016_v49  ;;  %24223 = vmatprep.subr.bf16.mxu1 %v23934_v38  ;;  %v23950_v49 = vpack.c.bf16 %v15829_v9, %v15828_v60  ;;  %v10666_v60 = vld [vmem:[#allocation2 + $0x110] sm:$0xff] }
 0x44c   :  { %21390 = vmatmul.mubr.f32.gmra.mrb[34].mxu1 %v29022_v35  ;;  %20891 = vmatprep.mubr.f32.mxu0 %v29024_v33  ;;  %v15830_v35 = vld [vmem:[%s31002_s4 + $0x360] sm:$0xff]  ;;  %v15831_v33 = vld [vmem:[%s31002_s4 + $0x368] sm:$0xff] }
 0x44d   :  { %23941 = vmatpush3.bf16.msra.mxu0 %v23938_v19  ;;  %21392 = vmatprep.mubr.f32.mxu1 %v29031_v5  ;;  %v23954_v5 = vpack.c.bf16 %v15831_v33, %v15830_v35  ;;  %v15842_v35 = vld [vmem:[%s31002_s4 + $0x3c0] sm:$0xff]  ;;  %v15843_v33 = vld [vmem:[%s31002_s4 + $0x3c8] sm:$0xff] }
 0x44e   :  { %24225 = vmatpush3.bf16.msra.mxu1 %v23934_v38  ;;  %23943 = vmatprep.subr.bf16.mxu0 %v23942_v23  ;;  %v15839_v38 = vld [vmem:[%s31002_s4 + $0x3a8] sm:$0xff] }
 0x44f   :  { %20892 = vmatmul.mubr.f32.gmra.mrb[38].mxu0 %v29034_v51  ;;  %24227 = vmatprep.subr.bf16.mxu1 %v23938_v19  ;;  %v15832_v51 = vld [vmem:[%s31002_s4 + $0x370] sm:$0xff]  ;;  %v23970_v55 = vpack.c.bf16 %v15839_v38, %v15838_v30 }
 0x450   :  { %21393 = vmatmul.mubr.f32.gmra.mrb[36].mxu1 %v29040_v3  ;;  %20894 = vmatprep.mubr.f32.mxu0 %v29042_v17  ;;  %v15833_v3 = vld [vmem:[%s31002_s4 + $0x378] sm:$0xff]  ;;  %v10671_v30 = vld [vmem:[#allocation2 + $0x150] sm:$0xff] }
 0x451   :  { %23945 = vmatpush3.bf16.msra.mxu0 %v23942_v23  ;;  %21395 = vmatprep.mubr.f32.mxu1 %v29049_v16  ;;  %v23958_v17 = vpack.c.bf16 %v15833_v3, %v15832_v51  ;;  %v29383_v16 = vld [vmem:[#allocation2 + $0xc2] sm:$0xff]  ;;  %v8890_v38 = vld [vmem:[#allocation2 + $0xb0] sm:$0xff] }
 0x452   :  { %24229 = vmatpush3.bf16.msra.mxu1 %v23938_v19  ;;  %23947 = vmatprep.subr.bf16.mxu0 %v23946_v34  ;;  %v10664_v19 = vld [vmem:[#allocation2 + $0xf8] sm:$0xff]  ;;  %v8886_v51 = vld [vmem:[#allocation2 + $0x80] sm:$0xff]  ;;  %v10668_v3 = vld [vmem:[#allocation2 + $0x128] sm:$0xff] }
 0x453   :  { %20895 = vmatmul.mubr.f32.gmra.mrb[40].mxu0 %v29052_v6  ;;  %24231 = vmatprep.subr.bf16.mxu1 %v23942_v23  ;;  %v15834_v6 = vld [vmem:[%s31002_s4 + $0x380] sm:$0xff] }
 0x454   :  { %21396 = vmatmul.mubr.f32.gmra.mrb[38].mxu1 %v29058_v62  ;;  %20897 = vmatprep.mubr.f32.mxu0 %v29060_v43  ;;  %v15835_v62 = vld [vmem:[%s31002_s4 + $0x388] sm:$0xff] }
 0x455   :  { %23949 = vmatpush3.bf16.msra.mxu0 %v23946_v34  ;;  %21398 = vmatprep.mubr.f32.mxu1 %v29067_v59  ;;  %v31205_v43 = vld [vmem:[#allocation40_spill] sm:$0xff] }
 0x456   :  { %24233 = vmatpush3.bf16.msra.mxu1 %v23942_v23  ;;  %23951 = vmatprep.subr.bf16.mxu0 %v23950_v49  ;;  %v29394_v59 = vld [vmem:[#allocation2 + $0xca] sm:$0xff] }
 0x457   :  { %20898 = vmatmul.mubr.f32.gmra.mrb[42].mxu0 %v29070_v29  ;;  %24235 = vmatprep.subr.bf16.mxu1 %v23946_v34  ;;  %v23962_v29 = vpack.c.bf16 %v15835_v62, %v15834_v6  ;;  %v15840_v23 = vld [vmem:[%s31002_s4 + $0x3b0] sm:$0xff] }
 0x458   :  { %21399 = vmatmul.mubr.f32.gmra.mrb[40].mxu1 %v29076_v7  ;;  %20900 = vmatprep.mubr.f32.mxu0 %v29078_v28  ;;  %v8879_v7 = vld [vmem:[#allocation2 + $0x30] sm:$0xff]  ;;  %v29398_v28 = vld [vmem:[#allocation2 + $0x182] sm:$0xff]  ;;  %v23974_v9 = vpack.c.bf16 %v15841_v45, %v15840_v23 }
 0x459   :  { %23953 = vmatpush3.bf16.msra.mxu0 %v23950_v49  ;;  %21401 = vmatprep.mubr.f32.mxu1 %v29085_v36  ;;  %v15836_v36 = vld [vmem:[%s31002_s4 + $0x390] sm:$0xff]  ;;  %v10673_v23 = vld [vmem:[#allocation2 + $0x168] sm:$0xff] }
 0x45a   :  { %24237 = vmatpush3.bf16.msra.mxu1 %v23946_v34  ;;  %23955 = vmatprep.subr.bf16.mxu0 %v23954_v5  ;;  %v8884_v34 = vld [vmem:[#allocation2 + $0x68] sm:$0xff]  ;;  %v8887_v6 = vld [vmem:[#allocation2 + $0x90] sm:$0xff] }
 0x45b   :  { %20901 = vmatmul.mubr.f32.gmra.mrb[44].mxu0 %v29088_v22  ;;  %24239 = vmatprep.subr.bf16.mxu1 %v23950_v49  ;;  %v15837_v22 = vld [vmem:[%s31002_s4 + $0x398] sm:$0xff]  ;;  %v15844_v62 = vld [vmem:[%s31002_s4 + $0x3d0] sm:$0xff]  ;;  %v8892_v45 = vld [vmem:[#allocation2 + $0xc8] sm:$0xff] }
 0x45c   :  { %21402 = vmatmul.mubr.f32.gmra.mrb[42].mxu1 %v31205_v43  ;;  %20903 = vmatprep.mubr.f32.mxu0 %v29383_v16  ;;  %v15845_v43 = vld [vmem:[%s31002_s4 + $0x3d8] sm:$0xff] }
 0x45d   :  { %23957 = vmatpush3.bf16.msra.mxu0 %v23954_v5  ;;  %21404 = vmatprep.mubr.f32.mxu1 %v29095_v4  ;;  %v8880_v4 = vld [vmem:[#allocation2 + $0x38] sm:$0xff] }
 0x45e   :  { %24241 = vmatpush3.bf16.msra.mxu1 %v23950_v49  ;;  %23959 = vmatprep.subr.bf16.mxu0 %v23958_v17  ;;  %v8885_v49 = vld [vmem:[#allocation2 + $0x78] sm:$0xff] }
 0x45f   :  { %20904 = vmatmul.mubr.f32.gmra.mrb[46].mxu0 %v29394_v59  ;;  %24243 = vmatprep.subr.bf16.mxu1 %v23954_v5 }
 0x460   :  { %21405 = vmatmul.mubr.f32.gmra.mrb[44].mxu1 %v29104_v26  ;;  %20938 = vmatprep.mubr.f32.mxu0 %v8879_v7  ;;  %v23966_v26 = vpack.c.bf16 %v15837_v22, %v15836_v36  ;;  %v8888_v7 = vld [vmem:[#allocation2 + $0x98] sm:$0xff]  ;;  %v10670_v36 = vld [vmem:[#allocation2 + $0x140] sm:$0xff]  ;;  %v23982_v22 = vpack.c.bf16 %v15845_v43, %v15844_v62 }
 0x461   :  { %23961 = vmatpush3.bf16.msra.mxu0 %v23958_v17  ;;  %21407 = vmatprep.mubr.f32.mxu1 %v29398_v28  ;;  %v15998_v43 = vld [vmem:[%s31002_s4 + $0xa0] sm:$0xff] }
 0x462   :  { %24245 = vmatpush3.bf16.msra.mxu1 %v23954_v5  ;;  %23963 = vmatprep.subr.bf16.mxu0 %v23962_v29  ;;  %v10667_v5 = vld [vmem:[#allocation2 + $0x120] sm:$0xff] }
 0x463   :  { %24247 = vmatprep.subr.bf16.mxu1 %v23958_v17 }
 0x464   :  { %20939 = vmatmul.mubr.f32.vlgmr.msra.gmra.mrb[32].mxu0 %v8880_v4  ;;  %21408 = vmatmul.mubr.f32.gmra.mrb[46].mxu1 %v29407_v39  ;;  %v8889_v4 = vld [vmem:[#allocation2 + $0xa8] sm:$0xff] }
 0x465   :  { %20941 = vmatprep.mubr.f32.mxu0 %v8881_v61  ;;  %23965 = vmatpush3.bf16.msra.mxu0 %v23962_v29  ;;  %v15847_v61 = vld [vmem:[%s31002_s4 + $0x3e8] sm:$0xff] }
 0x466   :  { %24249 = vmatpush3.bf16.msra.mxu1 %v23958_v17  ;;  %21442 = vmatprep.mubr.f32.mxu1 %v10663_v58  ;;  %v23978_v17 = vpack.c.bf16 %v15843_v33, %v15842_v35  ;;  %v10672_v58 = vld [vmem:[#allocation2 + $0x158] sm:$0xff]  ;;  %v8894_v35 = vld [vmem:[#allocation2 + $0xe0] sm:$0xff] }
 0x467   :  { %23967 = vmatprep.subr.bf16.mxu0 %v23966_v26  ;;  %24251 = vmatprep.subr.bf16.mxu1 %v23962_v29 }
 0x468   :  { %20942 = vmatmul.mubr.f32.gmra.mrb[34].mxu0 %v8882_v48 }
 0x469   :  { %21443 = vmatmul.mubr.f32.vlgmr.msra.gmra.mrb[32].mxu1 %v10664_v19  ;;  %20944 = vmatprep.mubr.f32.mxu0 %v8883_v15  ;;  %v8891_v19 = vld [vmem:[#allocation2 + $0xc0] sm:$0xff]  ;;  %v15849_v15 = vld [vmem:[%s31002_s4 + $0x3f8] sm:$0xff] }
 0x46a   :  { %23969 = vmatpush3.bf16.msra.mxu0 %v23966_v26  ;;  %21445 = vmatprep.mubr.f32.mxu1 %v10665_v37  ;;  %v10674_v37 = vld [vmem:[#allocation2 + $0x170] sm:$0xff] }
 0x46b   :  { %24253 = vmatpush3.bf16.msra.mxu1 %v23962_v29  ;;  %23971 = vmatprep.subr.bf16.mxu0 %v23970_v55  ;;  %v10669_v29 = vld [vmem:[#allocation2 + $0x138] sm:$0xff] }
 0x46c   :  { %20945 = vmatmul.mubr.f32.gmra.mrb[36].mxu0 %v8884_v34  ;;  %24255 = vmatprep.subr.bf16.mxu1 %v23966_v26 }
 0x46d   :  { %21446 = vmatmul.mubr.f32.gmra.mrb[34].mxu1 %v10666_v60  ;;  %20947 = vmatprep.mubr.f32.mxu0 %v8885_v49  ;;  %v8893_v60 = vld [vmem:[#allocation2 + $0xd8] sm:$0xff]  ;;  %v15851_v49 = vld [vmem:[%s31002_s4 + $0x408] sm:$0xff] }
 0x46e   :  { %23973 = vmatpush3.bf16.msra.mxu0 %v23970_v55  ;;  %21448 = vmatprep.mubr.f32.mxu1 %v10667_v5  ;;  %v15852_v5 = vld [vmem:[%s31002_s4 + $0x410] sm:$0xff] }
 0x46f   :  { %24257 = vmatpush3.bf16.msra.mxu1 %v23966_v26  ;;  %23975 = vmatprep.subr.bf16.mxu0 %v23974_v9  ;;  %v15846_v26 = vld [vmem:[%s31002_s4 + $0x3e0] sm:$0xff] }
 0x470   :  { %20948 = vmatmul.mubr.f32.gmra.mrb[38].mxu0 %v8886_v51  ;;  %24259 = vmatprep.subr.bf16.mxu1 %v23970_v55  ;;  %v23986_v48 = vpack.c.bf16 %v15847_v61, %v15846_v26  ;;  %v15853_v51 = vld [vmem:[%s31002_s4 + $0x418] sm:$0xff]  ;;  %v16000_v26 = vld [vmem:[%s31002_s4 + $0xb0] sm:$0xff] }
 0x471   :  { %21449 = vmatmul.mubr.f32.gmra.mrb[36].mxu1 %v10668_v3  ;;  %20950 = vmatprep.mubr.f32.mxu0 %v8887_v6  ;;  %v23998_v3 = vpack.c.bf16 %v15853_v51, %v15852_v5  ;;  %v15857_v6 = vld [vmem:[%s31002_s4 + $0x438] sm:$0xff]  ;;  %v11056_v5 = vld [vmem:[#allocation2 + $0x142] sm:$0xff] }
 0x472   :  { %23977 = vmatpush3.bf16.msra.mxu0 %v23974_v9  ;;  %21451 = vmatprep.mubr.f32.mxu1 %v10669_v29  ;;  %v15999_v29 = vld [vmem:[%s31002_s4 + $0xa8] sm:$0xff]  ;;  %v16001_v61 = vld [vmem:[%s31002_s4 + $0xb8] sm:$0xff] }
 0x473   :  { %24261 = vmatpush3.bf16.msra.mxu1 %v23970_v55  ;;  %23979 = vmatprep.subr.bf16.mxu0 %v23978_v17  ;;  %v15848_v55 = vld [vmem:[%s31002_s4 + $0x3f0] sm:$0xff] }
 0x474   :  { %20951 = vmatmul.mubr.f32.gmra.mrb[40].mxu0 %v8888_v7  ;;  %24263 = vmatprep.subr.bf16.mxu1 %v23974_v9  ;;  %v23990_v34 = vpack.c.bf16 %v15849_v15, %v15848_v55  ;;  %v9270_v7 = vld [vmem:[#allocation2 + $0x52] sm:$0xff]  ;;  %v16002_v55 = vld [vmem:[%s31002_s4 + $0xc0] sm:$0xff]  ;;  %v16003_v15 = vld [vmem:[%s31002_s4 + $0xc8] sm:$0xff] }
 0x475   :  { %21452 = vmatmul.mubr.f32.gmra.mrb[38].mxu1 %v10670_v36  ;;  %20953 = vmatprep.mubr.f32.mxu0 %v8889_v4  ;;  %v11050_v36 = vld [vmem:[#allocation2 + $0xfa] sm:$0xff]  ;;  %v9271_v4 = vld [vmem:[#allocation2 + $0x62] sm:$0xff] }
 0x476   :  { %23981 = vmatpush3.bf16.msra.mxu0 %v23978_v17  ;;  %21454 = vmatprep.mubr.f32.mxu1 %v10671_v30  ;;  %v11051_v30 = vld [vmem:[#allocation2 + $0x10a] sm:$0xff] }
 0x477   :  { %24265 = vmatpush3.bf16.msra.mxu1 %v23974_v9  ;;  %23983 = vmatprep.subr.bf16.mxu0 %v23982_v22  ;;  %v15850_v9 = vld [vmem:[%s31002_s4 + $0x400] sm:$0xff] }
 0x478   :  { %20954 = vmatmul.mubr.f32.gmra.mrb[42].mxu0 %v8890_v38  ;;  %24267 = vmatprep.subr.bf16.mxu1 %v23978_v17  ;;  %v23994_v33 = vpack.c.bf16 %v15851_v49, %v15850_v9  ;;  %v9272_v38 = vld [vmem:[#allocation2 + $0x6a] sm:$0xff]  ;;  %v16005_v49 = vld [vmem:[%s31002_s4 + $0xd8] sm:$0xff] }
 0x479   :  { %21455 = vmatmul.mubr.f32.gmra.mrb[40].mxu1 %v10672_v58  ;;  %20956 = vmatprep.mubr.f32.mxu0 %v8891_v19  ;;  %v11052_v58 = vld [vmem:[#allocation2 + $0x112] sm:$0xff]  ;;  %v9273_v19 = vld [vmem:[#allocation2 + $0x7a] sm:$0xff] }
 0x47a   :  { %23985 = vmatpush3.bf16.msra.mxu0 %v23982_v22  ;;  %21457 = vmatprep.mubr.f32.mxu1 %v10673_v23  ;;  %v11053_v23 = vld [vmem:[#allocation2 + $0x122] sm:$0xff]  ;;  %v16004_v9 = vld [vmem:[%s31002_s4 + $0xd0] sm:$0xff] }
 0x47b   :  { %24269 = vmatpush3.bf16.msra.mxu1 %v23978_v17  ;;  %23987 = vmatprep.subr.bf16.mxu0 %v23986_v48  ;;  %v24334_v51 = vpack.c.bf16 %v16005_v49, %v16004_v9  ;;  %v13140_v9 = vld [vmem:[#allocation2 + $0x2d9] sm:$0xff] }
 0x47c   :  { %20957 = vmatmul.mubr.f32.gmra.mrb[44].mxu0 %v8892_v45  ;;  %24271 = vmatprep.subr.bf16.mxu1 %v23982_v22  ;;  %v9274_v45 = vld [vmem:[#allocation2 + $0x82] sm:$0xff] }
 0x47d   :  { %21458 = vmatmul.mubr.f32.gmra.mrb[42].mxu1 %v10674_v37  ;;  %20959 = vmatprep.mubr.f32.mxu0 %v8893_v60  ;;  %v11054_v37 = vld [vmem:[#allocation2 + $0x12a] sm:$0xff]  ;;  %v9275_v60 = vld [vmem:[#allocation2 + $0x92] sm:$0xff] }
 0x47e   :  { %23989 = vmatpush3.bf16.msra.mxu0 %v23986_v48  ;;  %21460 = vmatprep.mubr.f32.mxu1 %v29178_v1  ;;  %v29461_v1 = vld [vmem:[#allocation2] sm:$0xff] }
 0x47f   :  { %24273 = vmatpush3.bf16.msra.mxu1 %v23982_v22  ;;  %23991 = vmatprep.subr.bf16.mxu0 %v23990_v34  ;;  %v24322_v22 = vpack.c.bf16 %v15999_v29, %v15998_v43  ;;  %v11356_v29 = vld [vmem:[#allocation2 + $0x1f9] sm:$0xff] }
 0x480   :  { %20960 = vmatmul.mubr.f32.gmra.mrb[46].mxu0 %v8894_v35  ;;  %24275 = vmatprep.subr.bf16.mxu1 %v23986_v48  ;;  %v11055_v35 = vld [vmem:[#allocation2 + $0x13a] sm:$0xff] }
 0x481   :  { %21461 = vmatmul.mubr.f32.gmra.mrb[44].mxu1 %v29187_v14  ;;  %20994 = vmatprep.mubr.f32.mxu0 %v29190_v10  ;;  %v15854_v14 = vld [vmem:[%s31002_s4 + $0x420] sm:$0xff]  ;;  %v15855_v10 = vld [vmem:[%s31002_s4 + $0x428] sm:$0xff] }
 0x482   :  { %23993 = vmatpush3.bf16.msra.mxu0 %v23990_v34  ;;  %21463 = vmatprep.mubr.f32.mxu1 %v29461_v1  ;;  %v24002_v17 = vpack.c.bf16 %v15855_v10, %v15854_v14  ;;  %v16006_v14 = vld [vmem:[%s31002_s4 + $0xe0] sm:$0xff]  ;;  %v16007_v10 = vld [vmem:[%s31002_s4 + $0xe8] sm:$0xff] }
 0x483   :  { %24277 = vmatpush3.bf16.msra.mxu1 %v23986_v48  ;;  %23995 = vmatprep.subr.bf16.mxu0 %v23994_v33  ;;  %v24326_v48 = vpack.c.bf16 %v16001_v61, %v16000_v26  ;;  %v13136_v26 = vld [vmem:[#allocation2 + $0x2a9] sm:$0xff] }
 0x484   :  { %24279 = vmatprep.subr.bf16.mxu1 %v23990_v34 }
 0x485   :  { %20995 = vmatmul.mubr.f32.vlgmr.msra.gmra.mrb[32].mxu0 %v29199_v53  ;;  %21464 = vmatmul.mubr.f32.gmra.mrb[46].mxu1 %v29461_v1  ;;  %v15856_v53 = vld [vmem:[%s31002_s4 + $0x430] sm:$0xff] }
 0x486   :  { %20997 = vmatprep.mubr.f32.mxu0 %v29202_v56  ;;  %23997 = vmatpush3.bf16.msra.mxu0 %v23994_v33  ;;  %v24006_v56 = vpack.c.bf16 %v15857_v6, %v15856_v53  ;;  %v9278_v53 = vld [vmem:[#allocation2 + $0xb2] sm:$0xff]  ;;  %v24338_v6 = vpack.c.bf16 %v16007_v10, %v16006_v14 }
 0x487   :  { %24281 = vmatpush3.bf16.msra.mxu1 %v23990_v34  ;;  %21498 = vmatprep.mubr.f32.mxu1 %v29211_v12  ;;  %v15858_v12 = vld [vmem:[%s31002_s4 + $0x440] sm:$0xff]  ;;  %v24330_v34 = vpack.c.bf16 %v16003_v15, %v16002_v55  ;;  %v13142_v14 = vld [vmem:[#allocation2 + $0x2f1] sm:$0xff] }
 0x488   :  { %23999 = vmatprep.subr.bf16.mxu0 %v23998_v3  ;;  %24283 = vmatprep.subr.bf16.mxu1 %v23994_v33  ;;  %v13138_v55 = vld [vmem:[#allocation2 + $0x2c1] sm:$0xff] }
 0x489   :  { %20998 = vmatmul.mubr.f32.gmra.mrb[34].mxu0 %v29214_v8  ;;  %v15859_v8 = vld [vmem:[%s31002_s4 + $0x448] sm:$0xff] }
 0x48a   :  { %21499 = vmatmul.mubr.f32.vlgmr.msra.gmra.mrb[32].mxu1 %v29216_v46  ;;  %21000 = vmatprep.mubr.f32.mxu0 %v29219_v57  ;;  %v24010_v46 = vpack.c.bf16 %v15859_v8, %v15858_v12  ;;  %v15860_v57 = vld [vmem:[%s31002_s4 + $0x450] sm:$0xff]  ;;  %v16009_v8 = vld [vmem:[%s31002_s4 + $0xf8] sm:$0xff] }
 0x48b   :  { %24001 = vmatpush3.bf16.msra.mxu0 %v23998_v3  ;;  %21501 = vmatprep.mubr.f32.mxu1 %v29229_v27  ;;  %v15861_v27 = vld [vmem:[%s31002_s4 + $0x458] sm:$0xff]  ;;  %v16008_v12 = vld [vmem:[%s31002_s4 + $0xf0] sm:$0xff] }
 0x48c   :  { %24285 = vmatpush3.bf16.msra.mxu1 %v23994_v33  ;;  %24003 = vmatprep.subr.bf16.mxu0 %v24002_v17  ;;  %v9276_v33 = vld [vmem:[#allocation2 + $0x9a] sm:$0xff] }
 0x48d   :  { %21001 = vmatmul.mubr.f32.gmra.mrb[36].mxu0 %v29232_v50  ;;  %24287 = vmatprep.subr.bf16.mxu1 %v23998_v3  ;;  %v24014_v50 = vpack.c.bf16 %v15861_v27, %v15860_v57  ;;  %v11060_v57 = vld [vmem:[#allocation2 + $0x172] sm:$0xff]  ;;  %v24342_v27 = vpack.c.bf16 %v16009_v8, %v16008_v12  ;;  %v11365_v12 = vld [vmem:[#allocation2 + $0x261] sm:$0xff] }
 0x48e   :  { %21502 = vmatmul.mubr.f32.gmra.mrb[34].mxu1 %v29234_v47  ;;  %21003 = vmatprep.mubr.f32.mxu0 %v29237_v52  ;;  %v15862_v47 = vld [vmem:[%s31002_s4 + $0x460] sm:$0xff]  ;;  %v15863_v52 = vld [vmem:[%s31002_s4 + $0x468] sm:$0xff] }
 0x48f   :  { %24005 = vmatpush3.bf16.msra.mxu0 %v24002_v17  ;;  %21504 = vmatprep.mubr.f32.mxu1 %v29247_v24  ;;  %v24018_v24 = vpack.c.bf16 %v15863_v52, %v15862_v47  ;;  %v11334_v47 = vld [vmem:[%s31002_s4] sm:$0xff]  ;;  %v11335_v52 = vld [vmem:[%s31002_s4 + $0x8] sm:$0xff] }
 0x490   :  { %24289 = vmatpush3.bf16.msra.mxu1 %v23998_v3  ;;  %24007 = vmatprep.subr.bf16.mxu0 %v24006_v56  ;;  %v9277_v3 = vld [vmem:[#allocation2 + $0xaa] sm:$0xff] }
 0x491   :  { %21004 = vmatmul.mubr.f32.gmra.mrb[38].mxu0 %v29250_v18  ;;  %24291 = vmatprep.subr.bf16.mxu1 %v24002_v17  ;;  %v15864_v18 = vld [vmem:[%s31002_s4 + $0x470] sm:$0xff] }
 0x492   :  { %21505 = vmatmul.mubr.f32.gmra.mrb[36].mxu1 %v29252_v41  ;;  %21006 = vmatprep.mubr.f32.mxu0 %v29255_v2  ;;  %v15865_v41 = vld [vmem:[%s31002_s4 + $0x478] sm:$0xff] }
 0x493   :  { %24009 = vmatpush3.bf16.msra.mxu0 %v24006_v56  ;;  %21507 = vmatprep.mubr.f32.mxu1 %v29265_v32  ;;  %v24022_v2 = vpack.c.bf16 %v15865_v41, %v15864_v18  ;;  %v9087_v32 = vld [vmem:[#allocation2 + $0xd9] sm:$0xff]  ;;  %v24346_v18 = vpack.c.bf16 %v11335_v52, %v11334_v47  ;;  %v11336_v41 = vld [vmem:[%s31002_s4 + $0x10] sm:$0xff]  ;;  %v13146_v47 = vld [vmem:[#allocation2 + $0x321] sm:$0xff] }
 0x494   :  { %24293 = vmatpush3.bf16.msra.mxu1 %v24002_v17  ;;  %24011 = vmatprep.subr.bf16.mxu0 %v24010_v46  ;;  %v11057_v17 = vld [vmem:[#allocation2 + $0x152] sm:$0xff] }
 0x495   :  { %21007 = vmatmul.mubr.f32.gmra.mrb[40].mxu0 %v29268_v21  ;;  %24295 = vmatprep.subr.bf16.mxu1 %v24006_v56  ;;  %v15994_v21 = vld [vmem:[%s31002_s4 + $0x80] sm:$0xff] }
 0x496   :  { %21508 = vmatmul.mubr.f32.gmra.mrb[38].mxu1 %v29270_v44  ;;  %21009 = vmatprep.mubr.f32.mxu0 %v29273_v54  ;;  %v15995_v44 = vld [vmem:[%s31002_s4 + $0x88] sm:$0xff] }
 0x497   :  { %24013 = vmatpush3.bf16.msra.mxu0 %v24010_v46  ;;  %21510 = vmatprep.mubr.f32.mxu1 %v29283_v11  ;;  %v9088_v54 = vld [vmem:[#allocation2 + $0xe1] sm:$0xff]  ;;  %v10870_v11 = vld [vmem:[#allocation2 + $0x199] sm:$0xff] }
 0x498   :  { %24297 = vmatpush3.bf16.msra.mxu1 %v24006_v56  ;;  %24015 = vmatprep.subr.bf16.mxu0 %v24014_v50  ;;  %v11058_v56 = vld [vmem:[#allocation2 + $0x15a] sm:$0xff] }
 0x499   :  { %21010 = vmatmul.mubr.f32.gmra.mrb[42].mxu0 %v29286_v0  ;;  %24299 = vmatprep.subr.bf16.mxu1 %v24010_v46  ;;  %v24314_v0 = vpack.c.bf16 %v15995_v44, %v15994_v21  ;;  %v11338_v44 = vld [vmem:[%s31002_s4 + $0x20] sm:$0xff] }
 0x49a   :  { %21511 = vmatmul.mubr.f32.gmra.mrb[40].mxu1 %v29288_v13  ;;  %21012 = vmatprep.mubr.f32.mxu0 %v29291_v25  ;;  %v9267_v13 = vld [vmem:[#allocation2 + $0x32] sm:$0xff] }
 0x49b   :  { %24017 = vmatpush3.bf16.msra.mxu0 %v24014_v50  ;;  %21513 = vmatprep.mubr.f32.mxu1 %v29301_v42  ;;  %v15996_v25 = vld [vmem:[%s31002_s4 + $0x90] sm:$0xff]  ;;  %v15997_v42 = vld [vmem:[%s31002_s4 + $0x98] sm:$0xff] }
 0x49c   :  { %24301 = vmatpush3.bf16.msra.mxu1 %v24010_v46  ;;  %24019 = vmatprep.subr.bf16.mxu0 %v24018_v24  ;;  %v24318_v62 = vpack.c.bf16 %v15997_v42, %v15996_v25  ;;  %v11059_v46 = vld [vmem:[#allocation2 + $0x16a] sm:$0xff]  ;;  %v11354_v42 = vld [vmem:[#allocation2 + $0x1e1] sm:$0xff] }
 0x49d   :  { %21013 = vmatmul.mubr.f32.gmra.mrb[44].mxu0 %v29304_v40  ;;  %24303 = vmatprep.subr.bf16.mxu1 %v24014_v50  ;;  %v10871_v40 = vld [vmem:[#allocation2 + $0x1a1] sm:$0xff] }
 0x49e   :  { %21514 = vmatmul.mubr.f32.gmra.mrb[42].mxu1 %v29307_v63  ;;  %21015 = vmatprep.mubr.f32.mxu0 %v9087_v32  ;;  %v9268_v63 = vld [vmem:[#allocation2 + $0x3a] sm:$0xff] }
 0x49f   :  { %24021 = vmatpush3.bf16.msra.mxu0 %v24018_v24  ;;  %21516 = vmatprep.mubr.f32.mxu1 %v29311_v31  ;;  %v9269_v31 = vld [vmem:[#allocation2 + $0x4a] sm:$0xff]  ;;  %v11351_v32 = vld [vmem:[#allocation2 + $0x1b9] sm:$0xff] }
 0x4a0   :  { %24305 = vmatpush3.bf16.msra.mxu1 %v24014_v50  ;;  %24023 = vmatprep.subr.bf16.mxu0 %v24022_v2  ;;  %v9281_v50 = vld [vmem:[#allocation2 + $0xda] sm:$0xff] }
 0x4a1   :  { %21016 = vmatmul.mubr.f32.gmra.mrb[46].mxu0 %v9088_v54  ;;  %24307 = vmatprep.subr.bf16.mxu1 %v24018_v24  ;;  %v11339_v54 = vld [vmem:[%s31002_s4 + $0x28] sm:$0xff] }
 0x4a2   :  { %21517 = vmatmul.mubr.f32.gmra.mrb[44].mxu1 %v29320_v20  ;;  %21050 = vmatprep.mubr.f32.mxu0 %v9267_v13  ;;  %v11049_v20 = vld [vmem:[#allocation2 + $0xf2] sm:$0xff]  ;;  %v24354_v25 = vpack.c.bf16 %v11339_v54, %v11338_v44  ;;  %v29672_v44 = vld [vmem:[#allocation2 + $0x1e8] sm:$0xff] }
 0x4a3   :  { %24025 = vmatpush3.bf16.msra.mxu0 %v24022_v2  ;;  %21519 = vmatprep.mubr.f32.mxu1 %v10870_v11  ;;  %v13131_v11 = vld [vmem:[#allocation2 + $0x271] sm:$0xff]  ;;  %v13132_v13 = vld [vmem:[#allocation2 + $0x279] sm:$0xff] }
 0x4a4   :  { %24309 = vmatpush3.bf16.msra.mxu1 %v24018_v24  ;;  %24315 = vmatprep.subr.bf16.mxu0 %v24314_v0  ;;  %v9282_v24 = vld [vmem:[#allocation2 + $0xe2] sm:$0xff]  ;;  %v29674_v54 = vld [vmem:[#allocation2 + $0x290] sm:$0xff] }
 0x4a5   :  { %24311 = vmatprep.subr.bf16.mxu1 %v24022_v2 }
 0x4a6   :  { %21051 = vmatmul.mubr.f32.vlgmr.msra.gmra.mrb[32].mxu0 %v9268_v63  ;;  %21520 = vmatmul.mubr.f32.gmra.mrb[46].mxu1 %v10871_v40  ;;  %v11340_v40 = vld [vmem:[%s31002_s4 + $0x30] sm:$0xff]  ;;  %v11341_v63 = vld [vmem:[%s31002_s4 + $0x38] sm:$0xff] }
 0x4a7   :  { %21053 = vmatprep.mubr.f32.mxu0 %v9269_v31  ;;  %21554 = vmatprep.mubr.f32.mxu1 %v11049_v20  ;;  %v13133_v31 = vld [vmem:[#allocation2 + $0x289] sm:$0xff]  ;;  %v13134_v20 = vld [vmem:[#allocation2 + $0x291] sm:$0xff]  ;;  %v24358_v43 = vpack.c.bf16 %v11341_v63, %v11340_v40  ;;  %v29690_v40 = vld [vmem:[#allocation2 + $0x200] sm:$0xff] }
 0x4a8   :  { %24313 = vmatpush3.bf16.msra.mxu1 %v24022_v2  ;;  %24317 = vmatpush3.bf16.msra.mxu0 %v24314_v0  ;;  %v11064_v2 = vld [vmem:[#allocation2 + $0x1a2] sm:$0xff] }
 0x4a9   :  { %24319 = vmatprep.subr.bf16.mxu0 %v24318_v62  ;;  %24603 = vmatprep.subr.bf16.mxu1 %v24314_v0  ;;  %v29692_v63 = vld [vmem:[#allocation2 + $0x2a8] sm:$0xff] }
 0x4aa   :  { %21054 = vmatmul.mubr.f32.gmra.mrb[34].mxu0 %v9270_v7  ;;  %v11342_v7 = vld [vmem:[%s31002_s4 + $0x40] sm:$0xff] }
 0x4ab   :  { %21555 = vmatmul.mubr.f32.vlgmr.msra.gmra.mrb[32].mxu1 %v11050_v36  ;;  %21056 = vmatprep.mubr.f32.mxu0 %v9271_v4  ;;  %v11343_v36 = vld [vmem:[%s31002_s4 + $0x48] sm:$0xff] }
 0x4ac   :  { %21557 = vmatprep.mubr.f32.mxu1 %v11051_v30  ;;  %24321 = vmatpush3.bf16.msra.mxu0 %v24318_v62  ;;  %v11357_v4 = vld [vmem:[#allocation2 + $0x201] sm:$0xff]  ;;  %v24362_v61 = vpack.c.bf16 %v11343_v36, %v11342_v7  ;;  %v11358_v30 = vld [vmem:[#allocation2 + $0x211] sm:$0xff] }
 0x4ad   :  { %24605 = vmatpush3.bf16.msra.mxu1 %v24314_v0  ;;  %24323 = vmatprep.subr.bf16.mxu0 %v24322_v22  ;;  %v11353_v0 = vld [vmem:[#allocation2 + $0x1d1] sm:$0xff]  ;;  %v29710_v36 = vld [vmem:[#allocation2 + $0x2c0] sm:$0xff] }
 0x4ae   :  { %21057 = vmatmul.mubr.f32.gmra.mrb[36].mxu0 %v9272_v38  ;;  %24607 = vmatprep.subr.bf16.mxu1 %v24318_v62  ;;  %v11344_v38 = vld [vmem:[%s31002_s4 + $0x50] sm:$0xff]  ;;  %v29708_v7 = vld [vmem:[#allocation2 + $0x218] sm:$0xff] }
 0x4af   :  { %21558 = vmatmul.mubr.f32.gmra.mrb[34].mxu1 %v11052_v58  ;;  %21059 = vmatprep.mubr.f32.mxu0 %v9273_v19  ;;  %v11345_v58 = vld [vmem:[%s31002_s4 + $0x58] sm:$0xff] }
 0x4b0   :  { %21560 = vmatprep.mubr.f32.mxu1 %v11053_v23  ;;  %24325 = vmatpush3.bf16.msra.mxu0 %v24322_v22  ;;  %v11359_v19 = vld [vmem:[#allocation2 + $0x219] sm:$0xff]  ;;  %v24366_v15 = vpack.c.bf16 %v11345_v58, %v11344_v38  ;;  %v11360_v23 = vld [vmem:[#allocation2 + $0x229] sm:$0xff] }
 0x4b1   :  { %24609 = vmatpush3.bf16.msra.mxu1 %v24318_v62  ;;  %24327 = vmatprep.subr.bf16.mxu0 %v24326_v48  ;;  %v11355_v62 = vld [vmem:[#allocation2 + $0x1e9] sm:$0xff]  ;;  %v29728_v58 = vld [vmem:[#allocation2 + $0x2d8] sm:$0xff] }
 0x4b2   :  { %21060 = vmatmul.mubr.f32.gmra.mrb[38].mxu0 %v9274_v45  ;;  %24611 = vmatprep.subr.bf16.mxu1 %v24322_v22  ;;  %v11346_v45 = vld [vmem:[%s31002_s4 + $0x60] sm:$0xff]  ;;  %v29726_v38 = vld [vmem:[#allocation2 + $0x230] sm:$0xff] }
 0x4b3   :  { %21561 = vmatmul.mubr.f32.gmra.mrb[36].mxu1 %v11054_v37  ;;  %21062 = vmatprep.mubr.f32.mxu0 %v9275_v60  ;;  %v11347_v37 = vld [vmem:[%s31002_s4 + $0x68] sm:$0xff]  ;;  %v11361_v60 = vld [vmem:[#allocation2 + $0x231] sm:$0xff] }
 0x4b4   :  { %21563 = vmatprep.mubr.f32.mxu1 %v11055_v35  ;;  %24329 = vmatpush3.bf16.msra.mxu0 %v24326_v48  ;;  %v24370_v49 = vpack.c.bf16 %v11347_v37, %v11346_v45  ;;  %v11362_v35 = vld [vmem:[#allocation2 + $0x241] sm:$0xff]  ;;  %v29746_v37 = vld [vmem:[#allocation2 + $0x2f0] sm:$0xff] }
 0x4b5   :  { %24613 = vmatpush3.bf16.msra.mxu1 %v24322_v22  ;;  %24331 = vmatprep.subr.bf16.mxu0 %v24330_v34  ;;  %v13135_v22 = vld [vmem:[#allocation2 + $0x2a1] sm:$0xff] }
 0x4b6   :  { %21063 = vmatmul.mubr.f32.gmra.mrb[40].mxu0 %v9276_v33  ;;  %24615 = vmatprep.subr.bf16.mxu1 %v24326_v48  ;;  %v11348_v33 = vld [vmem:[%s31002_s4 + $0x70] sm:$0xff]  ;;  %v29744_v45 = vld [vmem:[#allocation2 + $0x248] sm:$0xff] }
 0x4b7   :  { %21564 = vmatmul.mubr.f32.gmra.mrb[38].mxu1 %v11056_v5  ;;  %21065 = vmatprep.mubr.f32.mxu0 %v9277_v3  ;;  %v11349_v5 = vld [vmem:[%s31002_s4 + $0x78] sm:$0xff]  ;;  %v11363_v3 = vld [vmem:[#allocation2 + $0x249] sm:$0xff] }
 0x4b8   :  { %21566 = vmatprep.mubr.f32.mxu1 %v11057_v17  ;;  %24333 = vmatpush3.bf16.msra.mxu0 %v24330_v34  ;;  %v24374_v10 = vpack.c.bf16 %v11349_v5, %v11348_v33  ;;  %v11364_v17 = vld [vmem:[#allocation2 + $0x259] sm:$0xff] }
 0x4b9   :  { %24617 = vmatpush3.bf16.msra.mxu1 %v24326_v48  ;;  %24335 = vmatprep.subr.bf16.mxu0 %v24334_v51  ;;  %v13137_v48 = vld [vmem:[#allocation2 + $0x2b9] sm:$0xff] }
 0x4ba   :  { %21066 = vmatmul.mubr.f32.gmra.mrb[42].mxu0 %v9278_v53  ;;  %24619 = vmatprep.subr.bf16.mxu1 %v24330_v34  ;;  %v16010_v53 = vld [vmem:[%s31002_s4 + $0x100] sm:$0xff]  ;;  %v11672_v33 = vld [vmem:[#allocation2 + $0x1b2] sm:$0xff] }
 0x4bb   :  { %21567 = vmatmul.mubr.f32.gmra.mrb[40].mxu1 %v11058_v56  ;;  %21068 = vmatprep.mubr.f32.mxu0 %v29383_v16  ;;  %v11350_v16 = vld [vmem:[#allocation2 + $0x1b1] sm:$0xff]  ;;  %v13143_v56 = vld [vmem:[#allocation2 + $0x301] sm:$0xff] }
 0x4bc   :  { %21569 = vmatprep.mubr.f32.mxu1 %v11059_v46  ;;  %24337 = vmatpush3.bf16.msra.mxu0 %v24334_v51  ;;  %v13144_v46 = vld [vmem:[#allocation2 + $0x309] sm:$0xff]  ;;  %v29762_v5 = vld [vmem:[#allocation2 + $0x260] sm:$0xff] }
 0x4bd   :  { %24621 = vmatpush3.bf16.msra.mxu1 %v24330_v34  ;;  %24339 = vmatprep.subr.bf16.mxu0 %v24338_v6  ;;  %v13139_v34 = vld [vmem:[#allocation2 + $0x2d1] sm:$0xff] }
 0x4be   :  { %21069 = vmatmul.mubr.f32.gmra.mrb[44].mxu0 %v29394_v59  ;;  %24623 = vmatprep.subr.bf16.mxu1 %v24334_v51  ;;  %v11063_v59 = vld [vmem:[#allocation2 + $0x19a] sm:$0xff] }
 0x4bf   :  { %21570 = vmatmul.mubr.f32.gmra.mrb[42].mxu1 %v11060_v57  ;;  %21071 = vmatprep.mubr.f32.mxu0 %v9281_v50  ;;  %v13145_v57 = vld [vmem:[#allocation2 + $0x319] sm:$0xff] }
 0x4c0   :  { %21572 = vmatprep.mubr.f32.mxu1 %v29398_v28  ;;  %24341 = vmatpush3.bf16.msra.mxu0 %v24338_v6  ;;  %v11337_v28 = vld [vmem:[%s31002_s4 + $0x18] sm:$0xff] }
 0x4c1   :  { %24625 = vmatpush3.bf16.msra.mxu1 %v24334_v51  ;;  %24343 = vmatprep.subr.bf16.mxu0 %v24342_v27  ;;  %v24350_v21 = vpack.c.bf16 %v11337_v28, %v11336_v41  ;;  %v13141_v51 = vld [vmem:[#allocation2 + $0x2e9] sm:$0xff]  ;;  %v16013_v50 = vld [vmem:[%s31002_s4 + $0x118] sm:$0xff] }
 0x4c2   :  { %21072 = vmatmul.mubr.f32.gmra.mrb[46].mxu0 %v9282_v24  ;;  %24627 = vmatprep.subr.bf16.mxu1 %v24338_v6  ;;  %v16014_v24 = vld [vmem:[%s31002_s4 + $0x120] sm:$0xff]  ;;  %v29656_v41 = vld [vmem:[#allocation2 + $0x278] sm:$0xff] }
 0x4c3   :  { %21573 = vmatmul.mubr.f32.gmra.mrb[44].mxu1 %v29407_v39  ;;  %21610 = vmatprep.mubr.f32.mxu0 %v11350_v16  ;;  %v11352_v39 = vld [vmem:[#allocation2 + $0x1c9] sm:$0xff] }
 0x4c4   :  { %24345 = vmatpush3.bf16.msra.mxu0 %v24342_v27  ;;  %21575 = vmatprep.mubr.f32.mxu1 %v11063_v59  ;;  %v29642_v16 = vld [vmem:[#allocation2 + $0x1c8] sm:$0xff] }
 0x4c5   :  { %24629 = vmatpush3.bf16.msra.mxu1 %v24338_v6  ;;  %24347 = vmatprep.subr.bf16.mxu0 %v24346_v18  ;;  %v16011_v6 = vld [vmem:[%s31002_s4 + $0x108] sm:$0xff] }
 0x4c6   :  { %24631 = vmatprep.subr.bf16.mxu1 %v24342_v27  ;;  %v24378_v8 = vpack.c.bf16 %v16011_v6, %v16010_v53  ;;  %v16015_v59 = vld [vmem:[%s31002_s4 + $0x128] sm:$0xff]  ;;  %v11673_v53 = vld [vmem:[#allocation2 + $0x1ba] sm:$0xff] }
 0x4c7   :  { %21576 = vmatmul.mubr.f32.gmra.mrb[46].mxu1 %v11064_v2  ;;  %21611 = vmatmul.mubr.f32.vlgmr.msra.gmra.mrb[48].mxu0 %v11351_v32  ;;  %v24386_v28 = vpack.c.bf16 %v16015_v59, %v16014_v24  ;;  %v29659_v2 = vld [vmem:[#allocation2 + $0x1e0] sm:$0xff]  ;;  %v16016_v32 = vld [vmem:[%s31002_s4 + $0x130] sm:$0xff]  ;;  %v16033_v59 = vld [vmem:[%s31002_s4 + $0x1b8] sm:$0xff] }
 0x4c8   :  { %21613 = vmatprep.mubr.f32.mxu0 %v11352_v39  ;;  %24349 = vmatpush3.bf16.msra.mxu0 %v24346_v18  ;;  %v29669_v39 = vld [vmem:[#allocation2 + $0x288] sm:$0xff]  ;;  %v29777_v6 = vld [vmem:[#allocation2 + $0x320] sm:$0xff]  ;;  %v16032_v24 = vld [vmem:[%s31002_s4 + $0x1b0] sm:$0xff] }
 0x4c9   :  { %24633 = vmatpush3.bf16.msra.mxu1 %v24342_v27  ;;  %22114 = vmatprep.mubr.f32.mxu1 %v13131_v11  ;;  %v16012_v27 = vld [vmem:[%s31002_s4 + $0x110] sm:$0xff] }
 0x4ca   :  { %24351 = vmatprep.subr.bf16.mxu0 %v24350_v21  ;;  %24635 = vmatprep.subr.bf16.mxu1 %v24346_v18  ;;  %v24382_v52 = vpack.c.bf16 %v16013_v50, %v16012_v27  ;;  %v29789_v27 = vld [vmem:[#allocation2 + $0x1d2] sm:$0xff]  ;;  %v13454_v50 = vld [vmem:[#allocation2 + $0x27a] sm:$0xff] }
 0x4cb   :  { %21614 = vmatmul.mubr.f32.gmra.mrb[50].mxu0 %v11353_v0  ;;  %v29677_v0 = vld [vmem:[#allocation2 + $0x1f8] sm:$0xff] }
 0x4cc   :  { %22115 = vmatmul.mubr.f32.vlgmr.msra.gmra.mrb[48].mxu1 %v13132_v13  ;;  %21616 = vmatprep.mubr.f32.mxu0 %v11354_v42  ;;  %v16018_v13 = vld [vmem:[%s31002_s4 + $0x140] sm:$0xff] }
 0x4cd   :  { %24353 = vmatpush3.bf16.msra.mxu0 %v24350_v21  ;;  %22117 = vmatprep.mubr.f32.mxu1 %v13133_v31  ;;  %v29687_v42 = vld [vmem:[#allocation2 + $0x2a0] sm:$0xff] }
 0x4ce   :  { %24637 = vmatpush3.bf16.msra.mxu1 %v24346_v18  ;;  %24355 = vmatprep.subr.bf16.mxu0 %v24354_v25  ;;  %v29651_v18 = vld [vmem:[#allocation2 + $0x270] sm:$0xff] }
 0x4cf   :  { %21617 = vmatmul.mubr.f32.gmra.mrb[52].mxu0 %v11355_v62  ;;  %24639 = vmatprep.subr.bf16.mxu1 %v24350_v21  ;;  %v29695_v62 = vld [vmem:[#allocation2 + $0x210] sm:$0xff] }
 0x4d0   :  { %22118 = vmatmul.mubr.f32.gmra.mrb[50].mxu1 %v13134_v20  ;;  %21619 = vmatprep.mubr.f32.mxu0 %v11356_v29  ;;  %v16020_v20 = vld [vmem:[%s31002_s4 + $0x150] sm:$0xff]  ;;  %v29705_v29 = vld [vmem:[#allocation2 + $0x2b8] sm:$0xff] }
 0x4d1   :  { %24357 = vmatpush3.bf16.msra.mxu0 %v24354_v25  ;;  %22120 = vmatprep.mubr.f32.mxu1 %v13135_v22 }
 0x4d2   :  { %24641 = vmatpush3.bf16.msra.mxu1 %v24350_v21  ;;  %24359 = vmatprep.subr.bf16.mxu0 %v24358_v43  ;;  %v16017_v21 = vld [vmem:[%s31002_s4 + $0x138] sm:$0xff] }
 0x4d3   :  { %21620 = vmatmul.mubr.f32.gmra.mrb[54].mxu0 %v11357_v4  ;;  %24643 = vmatprep.subr.bf16.mxu1 %v24354_v25  ;;  %v24390_v11 = vpack.c.bf16 %v16017_v21, %v16016_v32  ;;  %v29713_v4 = vld [vmem:[#allocation2 + $0x228] sm:$0xff]  ;;  %v29806_v21 = vld [vmem:[#allocation2 + $0x292] sm:$0xff] }
 0x4d4   :  { %22121 = vmatmul.mubr.f32.gmra.mrb[52].mxu1 %v13136_v26  ;;  %21622 = vmatprep.mubr.f32.mxu0 %v11358_v30  ;;  %v16022_v26 = vld [vmem:[%s31002_s4 + $0x160] sm:$0xff]  ;;  %v29723_v30 = vld [vmem:[#allocation2 + $0x2d0] sm:$0xff] }
 0x4d5   :  { %24361 = vmatpush3.bf16.msra.mxu0 %v24358_v43  ;;  %22123 = vmatprep.mubr.f32.mxu1 %v13137_v48  ;;  %v29804_v32 = vld [vmem:[#allocation2 + $0x1ea] sm:$0xff] }
 0x4d6   :  { %24645 = vmatpush3.bf16.msra.mxu1 %v24354_v25  ;;  %24363 = vmatprep.subr.bf16.mxu0 %v24362_v61  ;;  %v16019_v25 = vld [vmem:[%s31002_s4 + $0x148] sm:$0xff] }
 0x4d7   :  { %21623 = vmatmul.mubr.f32.gmra.mrb[56].mxu0 %v11359_v19  ;;  %24647 = vmatprep.subr.bf16.mxu1 %v24358_v43  ;;  %v24394_v31 = vpack.c.bf16 %v16019_v25, %v16018_v13  ;;  %v29731_v19 = vld [vmem:[#allocation2 + $0x240] sm:$0xff] }
 0x4d8   :  { %22124 = vmatmul.mubr.f32.gmra.mrb[54].mxu1 %v13138_v55  ;;  %21625 = vmatprep.mubr.f32.mxu0 %v11360_v23  ;;  %v16024_v55 = vld [vmem:[%s31002_s4 + $0x170] sm:$0xff]  ;;  %v29741_v23 = vld [vmem:[#allocation2 + $0x2e8] sm:$0xff]  ;;  %v29809_v13 = vld [vmem:[#allocation2 + $0x1fa] sm:$0xff] }
 0x4d9   :  { %24365 = vmatpush3.bf16.msra.mxu0 %v24362_v61  ;;  %22126 = vmatprep.mubr.f32.mxu1 %v13139_v34  ;;  %v16034_v25 = vld [vmem:[%s31002_s4 + $0x1c0] sm:$0xff] }
 0x4da   :  { %24649 = vmatpush3.bf16.msra.mxu1 %v24358_v43  ;;  %24367 = vmatprep.subr.bf16.mxu0 %v24366_v15  ;;  %v16021_v43 = vld [vmem:[%s31002_s4 + $0x158] sm:$0xff] }
 0x4db   :  { %21626 = vmatmul.mubr.f32.gmra.mrb[58].mxu0 %v11361_v60  ;;  %24651 = vmatprep.subr.bf16.mxu1 %v24362_v61  ;;  %v24398_v22 = vpack.c.bf16 %v16021_v43, %v16020_v20  ;;  %v29749_v60 = vld [vmem:[#allocation2 + $0x258] sm:$0xff]  ;;  %v29819_v20 = vld [vmem:[#allocation2 + $0x2a2] sm:$0xff] }
 0x4dc   :  { %22127 = vmatmul.mubr.f32.gmra.mrb[56].mxu1 %v13140_v9  ;;  %21628 = vmatprep.mubr.f32.mxu0 %v11362_v35  ;;  %v16026_v9 = vld [vmem:[%s31002_s4 + $0x180] sm:$0xff] }
 0x4dd   :  { %24369 = vmatpush3.bf16.msra.mxu0 %v24366_v15  ;;  %22129 = vmatprep.mubr.f32.mxu1 %v13141_v51  ;;  %v29759_v35 = vld [vmem:[#allocation2 + $0x300] sm:$0xff] }
 0x4de   :  { %24653 = vmatpush3.bf16.msra.mxu1 %v24362_v61  ;;  %24371 = vmatprep.subr.bf16.mxu0 %v24370_v49  ;;  %v16023_v61 = vld [vmem:[%s31002_s4 + $0x168] sm:$0xff] }
 0x4df   :  { %21629 = vmatmul.mubr.f32.gmra.mrb[60].mxu0 %v11363_v3  ;;  %24655 = vmatprep.subr.bf16.mxu1 %v24366_v15  ;;  %v24402_v48 = vpack.c.bf16 %v16023_v61, %v16022_v26  ;;  %v29765_v3 = vld [vmem:[#allocation2 + $0x308] sm:$0xff]  ;;  %v29827_v61 = vld [vmem:[#allocation2 + $0x212] sm:$0xff] }
 0x4e0   :  { %22130 = vmatmul.mubr.f32.gmra.mrb[58].mxu1 %v13142_v14  ;;  %21631 = vmatprep.mubr.f32.mxu0 %v11364_v17  ;;  %v29768_v14 = vld [vmem:[#allocation2 + $0x318] sm:$0xff]  ;;  %v29822_v43 = vld [vmem:[#allocation2 + $0x202] sm:$0xff] }
 0x4e1   :  { %24373 = vmatpush3.bf16.msra.mxu0 %v24370_v49  ;;  %22132 = vmatprep.mubr.f32.mxu1 %v13143_v56  ;;  %v16029_v17 = vld [vmem:[%s31002_s4 + $0x198] sm:$0xff] }
 0x4e2   :  { %24657 = vmatpush3.bf16.msra.mxu1 %v24366_v15  ;;  %24375 = vmatprep.subr.bf16.mxu0 %v24374_v10  ;;  %v16025_v15 = vld [vmem:[%s31002_s4 + $0x178] sm:$0xff] }
 0x4e3   :  { %21632 = vmatmul.mubr.f32.gmra.mrb[62].mxu0 %v11365_v12  ;;  %24659 = vmatprep.subr.bf16.mxu1 %v24370_v49  ;;  %v24406_v34 = vpack.c.bf16 %v16025_v15, %v16024_v55  ;;  %v29780_v12 = vld [vmem:[#allocation2 + $0x1ca] sm:$0xff]  ;;  %v16037_v55 = vld [vmem:[%s31002_s4 + $0x1d8] sm:$0xff] }
 0x4e4   :  { %22133 = vmatmul.mubr.f32.gmra.mrb[60].mxu1 %v13144_v46  ;;  %21666 = vmatprep.mubr.f32.mxu0 %v29461_v1  ;;  %v16031_v46 = vld [vmem:[%s31002_s4 + $0x1a8] sm:$0xff]  ;;  %v29837_v15 = vld [vmem:[#allocation2 + $0x2ba] sm:$0xff] }
 0x4e5   :  { %24377 = vmatpush3.bf16.msra.mxu0 %v24374_v10  ;;  %22135 = vmatprep.mubr.f32.mxu1 %v13145_v57  ;;  %v13453_v57 = vld [vmem:[#allocation2 + $0x272] sm:$0xff] }
 0x4e6   :  { %24661 = vmatpush3.bf16.msra.mxu1 %v24370_v49  ;;  %24379 = vmatprep.subr.bf16.mxu0 %v24378_v8  ;;  %v16027_v49 = vld [vmem:[%s31002_s4 + $0x188] sm:$0xff] }
 0x4e7   :  { %24663 = vmatprep.subr.bf16.mxu1 %v24374_v10  ;;  %v24410_v51 = vpack.c.bf16 %v16027_v49, %v16026_v9  ;;  %v29842_v9 = vld [vmem:[#allocation2 + $0x2c2] sm:$0xff] }
 0x4e8   :  { %21667 = vmatmul.mubr.f32.vlgmr.msra.gmra.mrb[48].mxu0 %v29461_v1  ;;  %22136 = vmatmul.mubr.f32.gmra.mrb[62].mxu1 %v13146_v47  ;;  %v29654_v1 = vld [vmem:[#allocation2 + $0x1d0] sm:$0xff] }
 0x4e9   :  { %21669 = vmatprep.mubr.f32.mxu0 %v29642_v16  ;;  %24381 = vmatpush3.bf16.msra.mxu0 %v24378_v8 }
 0x4ea   :  { %24665 = vmatpush3.bf16.msra.mxu1 %v24374_v10  ;;  %22170 = vmatprep.mubr.f32.mxu1 %v29651_v18  ;;  %v16028_v10 = vld [vmem:[%s31002_s4 + $0x190] sm:$0xff] }
 0x4eb   :  { %24383 = vmatprep.subr.bf16.mxu0 %v24382_v52  ;;  %24667 = vmatprep.subr.bf16.mxu1 %v24378_v8  ;;  %v24414_v56 = vpack.c.bf16 %v16029_v17, %v16028_v10  ;;  %v16039_v10 = vld [vmem:[%s31002_s4 + $0x1e8] sm:$0xff]  ;;  %v29855_v17 = vld [vmem:[#allocation2 + $0x2d2] sm:$0xff] }
 0x4ec   :  { %21670 = vmatmul.mubr.f32.gmra.mrb[50].mxu0 %v29654_v1 }
 0x4ed   :  { %22171 = vmatmul.mubr.f32.vlgmr.msra.gmra.mrb[48].mxu1 %v29656_v41  ;;  %21672 = vmatprep.mubr.f32.mxu0 %v29659_v2 }
 0x4ee   :  { %24385 = vmatpush3.bf16.msra.mxu0 %v24382_v52  ;;  %22173 = vmatprep.mubr.f32.mxu1 %v29669_v39 }
 0x4ef   :  { %24669 = vmatpush3.bf16.msra.mxu1 %v24378_v8  ;;  %24387 = vmatprep.subr.bf16.mxu0 %v24386_v28  ;;  %v16030_v8 = vld [vmem:[%s31002_s4 + $0x1a0] sm:$0xff] }
 0x4f0   :  { %21673 = vmatmul.mubr.f32.gmra.mrb[52].mxu0 %v29672_v44  ;;  %24671 = vmatprep.subr.bf16.mxu1 %v24382_v52  ;;  %v24418_v47 = vpack.c.bf16 %v16031_v46, %v16030_v8  ;;  %v29863_v46 = vld [vmem:[#allocation2 + $0x242] sm:$0xff] }
 0x4f1   :  { %22174 = vmatmul.mubr.f32.gmra.mrb[50].mxu1 %v29674_v54  ;;  %21675 = vmatprep.mubr.f32.mxu0 %v29677_v0 }
 0x4f2   :  { %24389 = vmatpush3.bf16.msra.mxu0 %v24386_v28  ;;  %22176 = vmatprep.mubr.f32.mxu1 %v29687_v42 }
 0x4f3   :  { %24673 = vmatpush3.bf16.msra.mxu1 %v24382_v52  ;;  %24391 = vmatprep.subr.bf16.mxu0 %v24390_v11  ;;  %v29792_v52 = vld [vmem:[#allocation2 + $0x1e2] sm:$0xff] }
 0x4f4   :  { %21676 = vmatmul.mubr.f32.gmra.mrb[54].mxu0 %v29690_v40  ;;  %24675 = vmatprep.subr.bf16.mxu1 %v24386_v28 }
 0x4f5   :  { %22177 = vmatmul.mubr.f32.gmra.mrb[52].mxu1 %v29692_v63  ;;  %21678 = vmatprep.mubr.f32.mxu0 %v29695_v62 }
 0x4f6   :  { %24393 = vmatpush3.bf16.msra.mxu0 %v24390_v11  ;;  %22179 = vmatprep.mubr.f32.mxu1 %v29705_v29 }
 0x4f7   :  { %24677 = vmatpush3.bf16.msra.mxu1 %v24386_v28  ;;  %24395 = vmatprep.subr.bf16.mxu0 %v24394_v31  ;;  %v29801_v28 = vld [vmem:[#allocation2 + $0x28a] sm:$0xff] }
 0x4f8   :  { %21679 = vmatmul.mubr.f32.gmra.mrb[56].mxu0 %v29708_v7  ;;  %24679 = vmatprep.subr.bf16.mxu1 %v24390_v11 }
 0x4f9   :  { %22180 = vmatmul.mubr.f32.gmra.mrb[54].mxu1 %v29710_v36  ;;  %21681 = vmatprep.mubr.f32.mxu0 %v29713_v4 }
 0x4fa   :  { %24397 = vmatpush3.bf16.msra.mxu0 %v24394_v31  ;;  %22182 = vmatprep.mubr.f32.mxu1 %v29723_v30 }
 0x4fb   :  { %24681 = vmatpush3.bf16.msra.mxu1 %v24390_v11  ;;  %24399 = vmatprep.subr.bf16.mxu0 %v24398_v22  ;;  %v24422_v11 = vpack.c.bf16 %v16033_v59, %v16032_v24  ;;  %v29876_v24 = vld [vmem:[#allocation2 + $0x24a] sm:$0xff]  ;;  %v29878_v59 = vld [vmem:[#allocation2 + $0x2f2] sm:$0xff] }
 0x4fc   :  { %21682 = vmatmul.mubr.f32.gmra.mrb[58].mxu0 %v29726_v38  ;;  %24683 = vmatprep.subr.bf16.mxu1 %v24394_v31 }
 0x4fd   :  { %22183 = vmatmul.mubr.f32.gmra.mrb[56].mxu1 %v29728_v58  ;;  %21684 = vmatprep.mubr.f32.mxu0 %v29731_v19 }
 0x4fe   :  { %24401 = vmatpush3.bf16.msra.mxu0 %v24398_v22  ;;  %22185 = vmatprep.mubr.f32.mxu1 %v29741_v23 }
 0x4ff   :  { %24685 = vmatpush3.bf16.msra.mxu1 %v24394_v31  ;;  %24403 = vmatprep.subr.bf16.mxu0 %v24402_v48  ;;  %v16035_v31 = vld [vmem:[%s31002_s4 + $0x1c8] sm:$0xff] }
 0x500   :  { %21685 = vmatmul.mubr.f32.gmra.mrb[60].mxu0 %v29744_v45  ;;  %24687 = vmatprep.subr.bf16.mxu1 %v24398_v22  ;;  %v24426_v26 = vpack.c.bf16 %v16035_v31, %v16034_v25  ;;  %v29881_v25 = vld [vmem:[#allocation2 + $0x25a] sm:$0xff] }
 0x501   :  { %22186 = vmatmul.mubr.f32.gmra.mrb[58].mxu1 %v29746_v37  ;;  %21687 = vmatprep.mubr.f32.mxu0 %v29749_v60  ;;  %v16042_v31 = vld [vmem:[%s31002_s4 + $0x200] sm:$0xff] }
 0x502   :  { %24405 = vmatpush3.bf16.msra.mxu0 %v24402_v48  ;;  %22188 = vmatprep.mubr.f32.mxu1 %v29759_v35 }
 0x503   :  { %24689 = vmatpush3.bf16.msra.mxu1 %v24398_v22  ;;  %24407 = vmatprep.subr.bf16.mxu0 %v24406_v34  ;;  %v29824_v22 = vld [vmem:[#allocation2 + $0x2aa] sm:$0xff] }
 0x504   :  { %21688 = vmatmul.mubr.f32.gmra.mrb[62].mxu0 %v29762_v5  ;;  %24691 = vmatprep.subr.bf16.mxu1 %v24402_v48 }
 0x505   :  { %22189 = vmatmul.mubr.f32.gmra.mrb[60].mxu1 %v29765_v3  ;;  %21722 = vmatprep.mubr.f32.mxu0 %v11672_v33  ;;  %v29845_v33 = vld [vmem:[#allocation2 + $0x22a] sm:$0xff] }
 0x506   :  { %24409 = vmatpush3.bf16.msra.mxu0 %v24406_v34  ;;  %22191 = vmatprep.mubr.f32.mxu1 %v29768_v14 }
 0x507   :  { %24693 = vmatpush3.bf16.msra.mxu1 %v24402_v48  ;;  %24411 = vmatprep.subr.bf16.mxu0 %v24410_v51  ;;  %v16036_v48 = vld [vmem:[%s31002_s4 + $0x1d0] sm:$0xff] }
 0x508   :  { %24695 = vmatprep.subr.bf16.mxu1 %v24406_v34  ;;  %v24430_v49 = vpack.c.bf16 %v16037_v55, %v16036_v48  ;;  %v16043_v48 = vld [vmem:[%s31002_s4 + $0x208] sm:$0xff] }
 0x509   :  { %21723 = vmatmul.mubr.f32.vlgmr.msra.gmra.mrb[48].mxu0 %v11673_v53  ;;  %22192 = vmatmul.mubr.f32.gmra.mrb[62].mxu1 %v29777_v6  ;;  %v29858_v53 = vld [vmem:[#allocation2 + $0x232] sm:$0xff]  ;;  %v29894_v55 = vld [vmem:[#allocation2 + $0x262] sm:$0xff] }
 0x50a   :  { %21725 = vmatprep.mubr.f32.mxu0 %v29780_v12  ;;  %24413 = vmatpush3.bf16.msra.mxu0 %v24410_v51 }
 0x50b   :  { %24697 = vmatpush3.bf16.msra.mxu1 %v24406_v34  ;;  %22226 = vmatprep.mubr.f32.mxu1 %v13453_v57  ;;  %v29840_v34 = vld [vmem:[#allocation2 + $0x21a] sm:$0xff]  ;;  %v16040_v57 = vld [vmem:[%s31002_s4 + $0x1f0] sm:$0xff] }
 0x50c   :  { %24415 = vmatprep.subr.bf16.mxu0 %v24414_v56  ;;  %24699 = vmatprep.subr.bf16.mxu1 %v24410_v51 }
 0x50d   :  { %21726 = vmatmul.mubr.f32.gmra.mrb[50].mxu0 %v29789_v27 }
 0x50e   :  { %22227 = vmatmul.mubr.f32.vlgmr.msra.gmra.mrb[48].mxu1 %v13454_v50  ;;  %21728 = vmatprep.mubr.f32.mxu0 %v29792_v52  ;;  %v16041_v50 = vld [vmem:[%s31002_s4 + $0x1f8] sm:$0xff] }
 0x50f   :  { %24417 = vmatpush3.bf16.msra.mxu0 %v24414_v56  ;;  %22229 = vmatprep.mubr.f32.mxu1 %v29801_v28 }
 0x510   :  { %24701 = vmatpush3.bf16.msra.mxu1 %v24410_v51  ;;  %24419 = vmatprep.subr.bf16.mxu0 %v24418_v47  ;;  %v16038_v51 = vld [vmem:[%s31002_s4 + $0x1e0] sm:$0xff] }
 0x511   :  { %21729 = vmatmul.mubr.f32.gmra.mrb[52].mxu0 %v29804_v32  ;;  %24703 = vmatprep.subr.bf16.mxu1 %v24414_v56  ;;  %v24434_v8 = vpack.c.bf16 %v16039_v10, %v16038_v51  ;;  %v24442_v51 = vpack.c.bf16 %v16043_v48, %v16042_v31  ;;  %v29897_v10 = vld [vmem:[#allocation2 + $0x30a] sm:$0xff]  ;;  %v29910_v31 = vld [vmem:[#allocation2 + $0x322] sm:$0xff] }
 0x512   :  { %22230 = vmatmul.mubr.f32.gmra.mrb[50].mxu1 %v29806_v21  ;;  %21731 = vmatprep.mubr.f32.mxu0 %v29809_v13  ;;  %31206 = vst [vmem:[#allocation38_spill] sm:$0xff] %v29897_v10 }
 0x513   :  { %24421 = vmatpush3.bf16.msra.mxu0 %v24418_v47  ;;  %22232 = vmatprep.mubr.f32.mxu1 %v29819_v20 }
 0x514   :  { %24705 = vmatpush3.bf16.msra.mxu1 %v24414_v56  ;;  %24423 = vmatprep.subr.bf16.mxu0 %v24422_v11  ;;  %v29860_v56 = vld [vmem:[#allocation2 + $0x2da] sm:$0xff] }
 0x515   :  { %21732 = vmatmul.mubr.f32.gmra.mrb[54].mxu0 %v29822_v43  ;;  %24707 = vmatprep.subr.bf16.mxu1 %v24418_v47 }
 0x516   :  { %22233 = vmatmul.mubr.f32.gmra.mrb[52].mxu1 %v29824_v22  ;;  %21734 = vmatprep.mubr.f32.mxu0 %v29827_v61 }
 0x517   :  { %24425 = vmatpush3.bf16.msra.mxu0 %v24422_v11  ;;  %22235 = vmatprep.mubr.f32.mxu1 %v29837_v15 }
 0x518   :  { %24709 = vmatpush3.bf16.msra.mxu1 %v24418_v47  ;;  %24427 = vmatprep.subr.bf16.mxu0 %v24426_v26  ;;  %v29873_v47 = vld [vmem:[#allocation2 + $0x2ea] sm:$0xff] }
 0x519   :  { %21735 = vmatmul.mubr.f32.gmra.mrb[56].mxu0 %v29840_v34  ;;  %24711 = vmatprep.subr.bf16.mxu1 %v24422_v11 }
 0x51a   :  { %22236 = vmatmul.mubr.f32.gmra.mrb[54].mxu1 %v29842_v9  ;;  %21737 = vmatprep.mubr.f32.mxu0 %v29845_v33 }
 0x51b   :  { %24429 = vmatpush3.bf16.msra.mxu0 %v24426_v26  ;;  %22238 = vmatprep.mubr.f32.mxu1 %v29855_v17 }
 0x51c   :  { %24713 = vmatpush3.bf16.msra.mxu1 %v24422_v11  ;;  %24431 = vmatprep.subr.bf16.mxu0 %v24430_v49  ;;  %v24438_v11 = vpack.c.bf16 %v16041_v50, %v16040_v57  ;;  %v29901_v57 = vld [vmem:[#allocation2 + $0x31a] sm:$0xff]  ;;  %v16044_v50 = vld [vmem:[%s31002_s4 + $0x210] sm:$0xff] }
 0x51d   :  { %21738 = vmatmul.mubr.f32.gmra.mrb[58].mxu0 %v29858_v53  ;;  %24715 = vmatprep.subr.bf16.mxu1 %v24426_v26 }
 0x51e   :  { %22239 = vmatmul.mubr.f32.gmra.mrb[56].mxu1 %v29860_v56  ;;  %21740 = vmatprep.mubr.f32.mxu0 %v29863_v46 }
 0x51f   :  { %24433 = vmatpush3.bf16.msra.mxu0 %v24430_v49  ;;  %22241 = vmatprep.mubr.f32.mxu1 %v29873_v47 }
 0x520   :  { %24717 = vmatpush3.bf16.msra.mxu1 %v24426_v26  ;;  %24435 = vmatprep.subr.bf16.mxu0 %v24434_v8  ;;  %v29891_v26 = vld [vmem:[#allocation2 + $0x302] sm:$0xff] }
 0x521   :  { %21741 = vmatmul.mubr.f32.gmra.mrb[60].mxu0 %v29876_v24  ;;  %24719 = vmatprep.subr.bf16.mxu1 %v24430_v49 }
 0x522   :  { %22242 = vmatmul.mubr.f32.gmra.mrb[58].mxu1 %v29878_v59  ;;  %21743 = vmatprep.mubr.f32.mxu0 %v29881_v25 }
 0x523   :  { %24437 = vmatpush3.bf16.msra.mxu0 %v24434_v8  ;;  %22244 = vmatprep.mubr.f32.mxu1 %v29891_v26 }
 0x524   :  { %24721 = vmatpush3.bf16.msra.mxu1 %v24430_v49  ;;  %24439 = vmatprep.subr.bf16.mxu0 %v24438_v11  ;;  %v16045_v49 = vld [vmem:[%s31002_s4 + $0x218] sm:$0xff] }
 0x525   :  { %21744 = vmatmul.mubr.f32.gmra.mrb[62].mxu0 %v29894_v55  ;;  %24723 = vmatprep.subr.bf16.mxu1 %v24434_v8  ;;  %v24446_v48 = vpack.c.bf16 %v16045_v49, %v16044_v50  ;;  %v16049_v50 = vld [vmem:[%s31002_s4 + $0x238] sm:$0xff]  ;;  %v16064_v49 = vld [vmem:[%s31002_s4 + $0x2b0] sm:$0xff] }
 0x526   :  { %22245 = vmatmul.mubr.f32.gmra.mrb[60].mxu1 %v29897_v10  ;;  %21778 = vmatprep.mubr.f32.mxu0 %v29642_v16  ;;  %v16046_v16 = vld [vmem:[%s31002_s4 + $0x220] sm:$0xff]  ;;  %v16047_v10 = vld [vmem:[%s31002_s4 + $0x228] sm:$0xff] }
 0x527   :  { %24441 = vmatpush3.bf16.msra.mxu0 %v24438_v11  ;;  %22247 = vmatprep.mubr.f32.mxu1 %v29901_v57 }
 0x528   :  { %24725 = vmatpush3.bf16.msra.mxu1 %v24434_v8  ;;  %24443 = vmatprep.subr.bf16.mxu0 %v24442_v51  ;;  %v24450_v8 = vpack.c.bf16 %v16047_v10, %v16046_v16  ;;  %v12062_v10 = vld [vmem:[#allocation2 + $0x1f9] sm:$0xff]  ;;  %v13841_v16 = vld [vmem:[#allocation2 + $0x2a1] sm:$0xff] }
 0x529   :  { %24727 = vmatprep.subr.bf16.mxu1 %v24438_v11 }
 0x52a   :  { %21779 = vmatmul.mubr.f32.vlgmr.msra.gmra.mrb[48].mxu0 %v29654_v1  ;;  %22248 = vmatmul.mubr.f32.gmra.mrb[62].mxu1 %v29910_v31  ;;  %v16048_v1 = vld [vmem:[%s31002_s4 + $0x230] sm:$0xff] }
 0x52b   :  { %21781 = vmatprep.mubr.f32.mxu0 %v29659_v2  ;;  %24445 = vmatpush3.bf16.msra.mxu0 %v24442_v51  ;;  %v24454_v2 = vpack.c.bf16 %v16049_v50, %v16048_v1  ;;  %v13842_v1 = vld [vmem:[#allocation2 + $0x2a9] sm:$0xff] }
 0x52c   :  { %24729 = vmatpush3.bf16.msra.mxu1 %v24438_v11  ;;  %22282 = vmatprep.mubr.f32.mxu1 %v29669_v39  ;;  %v16050_v39 = vld [vmem:[%s31002_s4 + $0x240] sm:$0xff]  ;;  %v13840_v11 = vld [vmem:[#allocation2 + $0x291] sm:$0xff] }
 0x52d   :  { %24447 = vmatprep.subr.bf16.mxu0 %v24446_v48  ;;  %24731 = vmatprep.subr.bf16.mxu1 %v24442_v51 }
 0x52e   :  { %21782 = vmatmul.mubr.f32.gmra.mrb[50].mxu0 %v29672_v44  ;;  %v16051_v44 = vld [vmem:[%s31002_s4 + $0x248] sm:$0xff] }
 0x52f   :  { %22283 = vmatmul.mubr.f32.vlgmr.msra.gmra.mrb[48].mxu1 %v29674_v54  ;;  %21784 = vmatprep.mubr.f32.mxu0 %v29677_v0  ;;  %v24458_v54 = vpack.c.bf16 %v16051_v44, %v16050_v39  ;;  %v16052_v0 = vld [vmem:[%s31002_s4 + $0x250] sm:$0xff]  ;;  %v16066_v39 = vld [vmem:[%s31002_s4 + $0x2c0] sm:$0xff]  ;;  %v16067_v44 = vld [vmem:[%s31002_s4 + $0x2c8] sm:$0xff] }
 0x530   :  { %24449 = vmatpush3.bf16.msra.mxu0 %v24446_v48  ;;  %22285 = vmatprep.mubr.f32.mxu1 %v29687_v42  ;;  %v16053_v42 = vld [vmem:[%s31002_s4 + $0x258] sm:$0xff] }
 0x531   :  { %24733 = vmatpush3.bf16.msra.mxu1 %v24442_v51  ;;  %24451 = vmatprep.subr.bf16.mxu0 %v24450_v8 }
 0x532   :  { %21785 = vmatmul.mubr.f32.gmra.mrb[52].mxu0 %v29690_v40  ;;  %24735 = vmatprep.subr.bf16.mxu1 %v24446_v48  ;;  %v24462_v40 = vpack.c.bf16 %v16053_v42, %v16052_v0  ;;  %v12065_v0 = vld [vmem:[#allocation2 + $0x219] sm:$0xff]  ;;  %v13844_v42 = vld [vmem:[#allocation2 + $0x2c1] sm:$0xff] }
 0x533   :  { %22286 = vmatmul.mubr.f32.gmra.mrb[50].mxu1 %v29692_v63  ;;  %21787 = vmatprep.mubr.f32.mxu0 %v29695_v62  ;;  %v16054_v63 = vld [vmem:[%s31002_s4 + $0x260] sm:$0xff]  ;;  %v16055_v62 = vld [vmem:[%s31002_s4 + $0x268] sm:$0xff] }
 0x534   :  { %24453 = vmatpush3.bf16.msra.mxu0 %v24450_v8  ;;  %22288 = vmatprep.mubr.f32.mxu1 %v29705_v29  ;;  %v24466_v29 = vpack.c.bf16 %v16055_v62, %v16054_v63  ;;  %v12066_v63 = vld [vmem:[#allocation2 + $0x229] sm:$0xff] }
 0x535   :  { %24737 = vmatpush3.bf16.msra.mxu1 %v24446_v48  ;;  %24455 = vmatprep.subr.bf16.mxu0 %v24454_v2  ;;  %v16065_v48 = vld [vmem:[%s31002_s4 + $0x2b8] sm:$0xff]  ;;  %v16068_v62 = vld [vmem:[%s31002_s4 + $0x2d0] sm:$0xff] }
 0x536   :  { %21788 = vmatmul.mubr.f32.gmra.mrb[54].mxu0 %v29708_v7  ;;  %24739 = vmatprep.subr.bf16.mxu1 %v24450_v8  ;;  %v16056_v7 = vld [vmem:[%s31002_s4 + $0x270] sm:$0xff]  ;;  %v24486_v50 = vpack.c.bf16 %v16065_v48, %v16064_v49  ;;  %v13851_v49 = vld [vmem:[#allocation2 + $0x319] sm:$0xff] }
 0x537   :  { %22289 = vmatmul.mubr.f32.gmra.mrb[52].mxu1 %v29710_v36  ;;  %21790 = vmatprep.mubr.f32.mxu0 %v29713_v4  ;;  %v16057_v36 = vld [vmem:[%s31002_s4 + $0x278] sm:$0xff] }
 0x538   :  { %24457 = vmatpush3.bf16.msra.mxu0 %v24454_v2  ;;  %22291 = vmatprep.mubr.f32.mxu1 %v29723_v30  ;;  %v24470_v4 = vpack.c.bf16 %v16057_v36, %v16056_v7  ;;  %v16058_v30 = vld [vmem:[%s31002_s4 + $0x280] sm:$0xff]  ;;  %v13845_v7 = vld [vmem:[#allocation2 + $0x2d1] sm:$0xff] }
 0x539   :  { %24741 = vmatpush3.bf16.msra.mxu1 %v24450_v8  ;;  %24459 = vmatprep.subr.bf16.mxu0 %v24458_v54  ;;  %v12063_v8 = vld [vmem:[#allocation2 + $0x201] sm:$0xff]  ;;  %v12067_v36 = vld [vmem:[#allocation2 + $0x231] sm:$0xff]  ;;  %v12073_v48 = vld [vmem:[#allocation2 + $0x279] sm:$0xff] }
 0x53a   :  { %21791 = vmatmul.mubr.f32.gmra.mrb[56].mxu0 %v29726_v38  ;;  %24743 = vmatprep.subr.bf16.mxu1 %v24454_v2  ;;  %v16059_v38 = vld [vmem:[%s31002_s4 + $0x288] sm:$0xff] }
 0x53b   :  { %22292 = vmatmul.mubr.f32.gmra.mrb[54].mxu1 %v29728_v58  ;;  %21793 = vmatprep.mubr.f32.mxu0 %v29731_v19  ;;  %v24474_v58 = vpack.c.bf16 %v16059_v38, %v16058_v30  ;;  %v12058_v19 = vld [vmem:[#allocation2 + $0x1c9] sm:$0xff]  ;;  %v12068_v38 = vld [vmem:[#allocation2 + $0x241] sm:$0xff] }
 0x53c   :  { %24461 = vmatpush3.bf16.msra.mxu0 %v24458_v54  ;;  %22294 = vmatprep.mubr.f32.mxu1 %v29741_v23  ;;  %v13660_v23 = vld [vmem:[#allocation2 + $0x330] sm:$0xff] }
 0x53d   :  { %24745 = vmatpush3.bf16.msra.mxu1 %v24454_v2  ;;  %24463 = vmatprep.subr.bf16.mxu0 %v24462_v40  ;;  %v12064_v2 = vld [vmem:[#allocation2 + $0x211] sm:$0xff] }
 0x53e   :  { %21794 = vmatmul.mubr.f32.gmra.mrb[58].mxu0 %v29744_v45  ;;  %24747 = vmatprep.subr.bf16.mxu1 %v24458_v54  ;;  %v16060_v45 = vld [vmem:[%s31002_s4 + $0x290] sm:$0xff] }
 0x53f   :  { %22295 = vmatmul.mubr.f32.gmra.mrb[56].mxu1 %v29746_v37  ;;  %21796 = vmatprep.mubr.f32.mxu0 %v29749_v60  ;;  %v12059_v37 = vld [vmem:[#allocation2 + $0x1d1] sm:$0xff] }
 0x540   :  { %24465 = vmatpush3.bf16.msra.mxu0 %v24462_v40  ;;  %22297 = vmatprep.mubr.f32.mxu1 %v29759_v35  ;;  %v12060_v35 = vld [vmem:[#allocation2 + $0x1e1] sm:$0xff] }
 0x541   :  { %24749 = vmatpush3.bf16.msra.mxu1 %v24458_v54  ;;  %24467 = vmatprep.subr.bf16.mxu0 %v24466_v29  ;;  %v13843_v54 = vld [vmem:[#allocation2 + $0x2b9] sm:$0xff] }
 0x542   :  { %21797 = vmatmul.mubr.f32.gmra.mrb[60].mxu0 %v29762_v5  ;;  %24751 = vmatprep.subr.bf16.mxu1 %v24462_v40  ;;  %v16062_v5 = vld [vmem:[%s31002_s4 + $0x2a0] sm:$0xff] }
 0x543   :  { %22298 = vmatmul.mubr.f32.gmra.mrb[58].mxu1 %v29765_v3  ;;  %21799 = vmatprep.mubr.f32.mxu0 %v29651_v18  ;;  %v16061_v18 = vld [vmem:[%s31002_s4 + $0x298] sm:$0xff]  ;;  %v16063_v3 = vld [vmem:[%s31002_s4 + $0x2a8] sm:$0xff] }
 0x544   :  { %24469 = vmatpush3.bf16.msra.mxu0 %v24466_v29  ;;  %22300 = vmatprep.mubr.f32.mxu1 %v29768_v14  ;;  %v24478_v60 = vpack.c.bf16 %v16061_v18, %v16060_v45  ;;  %v13839_v14 = vld [vmem:[#allocation2 + $0x289] sm:$0xff]  ;;  %v24482_v51 = vpack.c.bf16 %v16063_v3, %v16062_v5  ;;  %v13848_v18 = vld [vmem:[#allocation2 + $0x2f1] sm:$0xff]  ;;  %v13849_v5 = vld [vmem:[#allocation2 + $0x301] sm:$0xff] }
 0x545   :  { %24753 = vmatpush3.bf16.msra.mxu1 %v24462_v40  ;;  %24471 = vmatprep.subr.bf16.mxu0 %v24470_v4  ;;  %v24490_v40 = vpack.c.bf16 %v16067_v44, %v16066_v39  ;;  %v12069_v45 = vld [vmem:[#allocation2 + $0x249] sm:$0xff]  ;;  %v12071_v3 = vld [vmem:[#allocation2 + $0x261] sm:$0xff]  ;;  %v13854_v39 = vld [vmem:[#allocation2 + $0x339] sm:$0xff] }
 0x546   :  { %21800 = vmatmul.mubr.f32.gmra.mrb[62].mxu0 %v29656_v41  ;;  %24755 = vmatprep.subr.bf16.mxu1 %v24466_v29  ;;  %v13661_v41 = vld [vmem:[#allocation2 + $0x338] sm:$0xff] }
 0x547   :  { %22301 = vmatmul.mubr.f32.gmra.mrb[60].mxu1 %v29777_v6  ;;  %21834 = vmatprep.mubr.f32.mxu0 %v12058_v19  ;;  %v12061_v6 = vld [vmem:[#allocation2 + $0x1e9] sm:$0xff] }
 0x548   :  { %24473 = vmatpush3.bf16.msra.mxu0 %v24470_v4  ;;  %22303 = vmatprep.mubr.f32.mxu1 %v13660_v23  ;;  %v16071_v19 = vld [vmem:[%s31002_s4 + $0x2e8] sm:$0xff] }
 0x549   :  { %24757 = vmatpush3.bf16.msra.mxu1 %v24466_v29  ;;  %24475 = vmatprep.subr.bf16.mxu0 %v24474_v58  ;;  %v16069_v29 = vld [vmem:[%s31002_s4 + $0x2d8] sm:$0xff]  ;;  %v13847_v23 = vld [vmem:[#allocation2 + $0x2e9] sm:$0xff] }
 0x54a   :  { %24759 = vmatprep.subr.bf16.mxu1 %v24470_v4  ;;  %v24494_v30 = vpack.c.bf16 %v16069_v29, %v16068_v62 }
 0x54b   :  { %21835 = vmatmul.mubr.f32.vlgmr.msra.gmra.mrb[48].mxu0 %v12059_v37  ;;  %22304 = vmatmul.mubr.f32.gmra.mrb[62].mxu1 %v13661_v41  ;;  %v12070_v41 = vld [vmem:[#allocation2 + $0x259] sm:$0xff] }
 0x54c   :  { %21837 = vmatprep.mubr.f32.mxu0 %v12060_v35  ;;  %24477 = vmatpush3.bf16.msra.mxu0 %v24474_v58  ;;  %v16073_v35 = vld [vmem:[%s31002_s4 + $0x2f8] sm:$0xff] }
 0x54d   :  { %24761 = vmatpush3.bf16.msra.mxu1 %v24470_v4  ;;  %22338 = vmatprep.mubr.f32.mxu1 %v13839_v14  ;;  %v13846_v4 = vld [vmem:[#allocation2 + $0x2d9] sm:$0xff]  ;;  %v13850_v14 = vld [vmem:[#allocation2 + $0x309] sm:$0xff] }
 0x54e   :  { %24479 = vmatprep.subr.bf16.mxu0 %v24478_v60  ;;  %24763 = vmatprep.subr.bf16.mxu1 %v24474_v58 }
 0x54f   :  { %21838 = vmatmul.mubr.f32.gmra.mrb[50].mxu0 %v12061_v6 }
 0x550   :  { %22339 = vmatmul.mubr.f32.vlgmr.msra.gmra.mrb[48].mxu1 %v13840_v11  ;;  %21840 = vmatprep.mubr.f32.mxu0 %v12062_v10  ;;  %v12072_v11 = vld [vmem:[#allocation2 + $0x271] sm:$0xff]  ;;  %v16075_v10 = vld [vmem:[%s31002_s4 + $0x308] sm:$0xff] }
 0x551   :  { %24481 = vmatpush3.bf16.msra.mxu0 %v24478_v60  ;;  %22341 = vmatprep.mubr.f32.mxu1 %v13841_v16 }
 0x552   :  { %24765 = vmatpush3.bf16.msra.mxu1 %v24474_v58  ;;  %24483 = vmatprep.subr.bf16.mxu0 %v24482_v51  ;;  %v16070_v58 = vld [vmem:[%s31002_s4 + $0x2e0] sm:$0xff] }
 0x553   :  { %21841 = vmatmul.mubr.f32.gmra.mrb[52].mxu0 %v12063_v8  ;;  %24767 = vmatprep.subr.bf16.mxu1 %v24478_v60  ;;  %v24498_v37 = vpack.c.bf16 %v16071_v19, %v16070_v58  ;;  %v13852_v8 = vld [vmem:[#allocation2 + $0x321] sm:$0xff] }
 0x554   :  { %22342 = vmatmul.mubr.f32.gmra.mrb[50].mxu1 %v13842_v1  ;;  %21843 = vmatprep.mubr.f32.mxu0 %v12064_v2  ;;  %v13853_v1 = vld [vmem:[#allocation2 + $0x331] sm:$0xff] }
 0x555   :  { %24485 = vmatpush3.bf16.msra.mxu0 %v24482_v51  ;;  %22344 = vmatprep.mubr.f32.mxu1 %v13843_v54  ;;  %v16077_v2 = vld [vmem:[%s31002_s4 + $0x318] sm:$0xff]  ;;  %v16079_v54 = vld [vmem:[%s31002_s4 + $0x328] sm:$0xff] }
 0x556   :  { %24769 = vmatpush3.bf16.msra.mxu1 %v24478_v60  ;;  %24487 = vmatprep.subr.bf16.mxu0 %v24486_v50  ;;  %v16072_v60 = vld [vmem:[%s31002_s4 + $0x2f0] sm:$0xff] }
 0x557   :  { %21844 = vmatmul.mubr.f32.gmra.mrb[54].mxu0 %v12065_v0  ;;  %24771 = vmatprep.subr.bf16.mxu1 %v24482_v51  ;;  %v24502_v6 = vpack.c.bf16 %v16073_v35, %v16072_v60 }
 0x558   :  { %22345 = vmatmul.mubr.f32.gmra.mrb[52].mxu1 %v13844_v42  ;;  %21846 = vmatprep.mubr.f32.mxu0 %v12066_v63  ;;  %v16081_v42 = vld [vmem:[%s31002_s4 + $0x338] sm:$0xff] }
 0x559   :  { %24489 = vmatpush3.bf16.msra.mxu0 %v24486_v50  ;;  %22347 = vmatprep.mubr.f32.mxu1 %v13845_v7 }
 0x55a   :  { %24773 = vmatpush3.bf16.msra.mxu1 %v24482_v51  ;;  %24491 = vmatprep.subr.bf16.mxu0 %v24490_v40  ;;  %v16074_v51 = vld [vmem:[%s31002_s4 + $0x300] sm:$0xff] }
 0x55b   :  { %21847 = vmatmul.mubr.f32.gmra.mrb[56].mxu0 %v12067_v36  ;;  %24775 = vmatprep.subr.bf16.mxu1 %v24486_v50  ;;  %v24506_v16 = vpack.c.bf16 %v16075_v10, %v16074_v51  ;;  %v31207_v10 = vld [vmem:[#allocation38_spill] sm:$0xff] }
 0x55c   :  { %22348 = vmatmul.mubr.f32.gmra.mrb[54].mxu1 %v13846_v4  ;;  %21849 = vmatprep.mubr.f32.mxu0 %v12068_v38  ;;  %v16089_v38 = vld [vmem:[%s31002_s4 + $0x378] sm:$0xff] }
 0x55d   :  { %24493 = vmatpush3.bf16.msra.mxu0 %v24490_v40  ;;  %22350 = vmatprep.mubr.f32.mxu1 %v13847_v23  ;;  %v16090_v23 = vld [vmem:[%s31002_s4 + $0x380] sm:$0xff] }
 0x55e   :  { %24777 = vmatpush3.bf16.msra.mxu1 %v24486_v50  ;;  %24495 = vmatprep.subr.bf16.mxu0 %v24494_v30  ;;  %v16076_v50 = vld [vmem:[%s31002_s4 + $0x310] sm:$0xff] }
 0x55f   :  { %21850 = vmatmul.mubr.f32.gmra.mrb[58].mxu0 %v12069_v45  ;;  %24779 = vmatprep.subr.bf16.mxu1 %v24490_v40  ;;  %v24510_v44 = vpack.c.bf16 %v16077_v2, %v16076_v50 }
 0x560   :  { %22351 = vmatmul.mubr.f32.gmra.mrb[56].mxu1 %v13848_v18  ;;  %21852 = vmatprep.mubr.f32.mxu0 %v12070_v41  ;;  %v16092_v41 = vld [vmem:[%s31002_s4 + $0x390] sm:$0xff] }
 0x561   :  { %24497 = vmatpush3.bf16.msra.mxu0 %v24494_v30  ;;  %22353 = vmatprep.mubr.f32.mxu1 %v13849_v5 }
 0x562   :  { %24781 = vmatpush3.bf16.msra.mxu1 %v24490_v40  ;;  %24499 = vmatprep.subr.bf16.mxu0 %v24498_v37 }
 0x563   :  { %21853 = vmatmul.mubr.f32.gmra.mrb[60].mxu0 %v12071_v3  ;;  %24783 = vmatprep.subr.bf16.mxu1 %v24494_v30 }
 0x564   :  { %22354 = vmatmul.mubr.f32.gmra.mrb[58].mxu1 %v13850_v14  ;;  %21855 = vmatprep.mubr.f32.mxu0 %v12072_v11  ;;  %v12265_v14 = vld [vmem:[#allocation2 + $0x272] sm:$0xff] }
 0x565   :  { %24501 = vmatpush3.bf16.msra.mxu0 %v24498_v37  ;;  %22356 = vmatprep.mubr.f32.mxu1 %v13851_v49 }
 0x566   :  { %24785 = vmatpush3.bf16.msra.mxu1 %v24494_v30  ;;  %24503 = vmatprep.subr.bf16.mxu0 %v24502_v6  ;;  %v16088_v30 = vld [vmem:[%s31002_s4 + $0x370] sm:$0xff] }
 0x567   :  { %21856 = vmatmul.mubr.f32.gmra.mrb[62].mxu0 %v12073_v48  ;;  %24787 = vmatprep.subr.bf16.mxu1 %v24498_v37  ;;  %v30158_v3 = vpack.c.bf16 %v16089_v38, %v16088_v30  ;;  %v12445_v38 = vld [vmem:[#allocation2 + $0x1e8] sm:$0xff] }
 0x568   :  { %22357 = vmatmul.mubr.f32.gmra.mrb[60].mxu1 %v13852_v8  ;;  %21890 = vmatprep.mubr.f32.mxu0 %v29780_v12  ;;  %v16078_v12 = vld [vmem:[%s31002_s4 + $0x320] sm:$0xff] }
 0x569   :  { %24505 = vmatpush3.bf16.msra.mxu0 %v24502_v6  ;;  %22359 = vmatprep.mubr.f32.mxu1 %v13853_v1  ;;  %v24514_v0 = vpack.c.bf16 %v16079_v54, %v16078_v12  ;;  %v16095_v12 = vld [vmem:[%s31002_s4 + $0x3a8] sm:$0xff]  ;;  %v12266_v54 = vld [vmem:[#allocation2 + $0x27a] sm:$0xff] }
 0x56a   :  { %24789 = vmatpush3.bf16.msra.mxu1 %v24498_v37  ;;  %24507 = vmatprep.subr.bf16.mxu0 %v24506_v16  ;;  %v16091_v37 = vld [vmem:[%s31002_s4 + $0x388] sm:$0xff] }
 0x56b   :  { %24791 = vmatprep.subr.bf16.mxu1 %v24502_v6 }
 0x56c   :  { %21891 = vmatmul.mubr.f32.vlgmr.msra.gmra.mrb[48].mxu0 %v29789_v27  ;;  %22360 = vmatmul.mubr.f32.gmra.mrb[62].mxu1 %v13854_v39  ;;  %v16080_v27 = vld [vmem:[%s31002_s4 + $0x330] sm:$0xff] }
 0x56d   :  { %21893 = vmatprep.mubr.f32.mxu0 %v29792_v52  ;;  %24509 = vmatpush3.bf16.msra.mxu0 %v24506_v16  ;;  %v24518_v52 = vpack.c.bf16 %v16081_v42, %v16080_v27 }
 0x56e   :  { %24793 = vmatpush3.bf16.msra.mxu1 %v24502_v6  ;;  %22394 = vmatprep.mubr.f32.mxu1 %v29801_v28  ;;  %v16082_v28 = vld [vmem:[%s31002_s4 + $0x340] sm:$0xff] }
 0x56f   :  { %24511 = vmatprep.subr.bf16.mxu0 %v24510_v44  ;;  %24795 = vmatprep.subr.bf16.mxu1 %v24506_v16 }
 0x570   :  { %21894 = vmatmul.mubr.f32.gmra.mrb[50].mxu0 %v29804_v32  ;;  %v16083_v32 = vld [vmem:[%s31002_s4 + $0x348] sm:$0xff] }
 0x571   :  { %22395 = vmatmul.mubr.f32.vlgmr.msra.gmra.mrb[48].mxu1 %v29806_v21  ;;  %21896 = vmatprep.mubr.f32.mxu0 %v29809_v13  ;;  %v24522_v21 = vpack.c.bf16 %v16083_v32, %v16082_v28  ;;  %v16084_v13 = vld [vmem:[%s31002_s4 + $0x350] sm:$0xff] }
 0x572   :  { %24513 = vmatpush3.bf16.msra.mxu0 %v24510_v44  ;;  %22397 = vmatprep.mubr.f32.mxu1 %v29819_v20  ;;  %v16085_v20 = vld [vmem:[%s31002_s4 + $0x358] sm:$0xff] }
 0x573   :  { %24797 = vmatpush3.bf16.msra.mxu1 %v24506_v16  ;;  %24515 = vmatprep.subr.bf16.mxu0 %v24514_v0  ;;  %v30169_v16 = vpack.c.bf16 %v16091_v37, %v16090_v23 }
 0x574   :  { %21897 = vmatmul.mubr.f32.gmra.mrb[52].mxu0 %v29822_v43  ;;  %24799 = vmatprep.subr.bf16.mxu1 %v24510_v44 }
 0x575   :  { %22398 = vmatmul.mubr.f32.gmra.mrb[50].mxu1 %v29824_v22  ;;  %21899 = vmatprep.mubr.f32.mxu0 %v29827_v61 }
 0x576   :  { %24517 = vmatpush3.bf16.msra.mxu0 %v24514_v0  ;;  %22400 = vmatprep.mubr.f32.mxu1 %v29837_v15 }
 0x577   :  { %24801 = vmatpush3.bf16.msra.mxu1 %v24510_v44  ;;  %24519 = vmatprep.subr.bf16.mxu0 %v24518_v52  ;;  %v16094_v44 = vld [vmem:[%s31002_s4 + $0x3a0] sm:$0xff] }
 0x578   :  { %21900 = vmatmul.mubr.f32.gmra.mrb[54].mxu0 %v29840_v34  ;;  %24803 = vmatprep.subr.bf16.mxu1 %v24514_v0 }
 0x579   :  { %22401 = vmatmul.mubr.f32.gmra.mrb[52].mxu1 %v29842_v9  ;;  %21902 = vmatprep.mubr.f32.mxu0 %v29845_v33  ;;  %v30077_v43 = vpop.f32.mrb[32].mxu0  ;;  %v30088_v9 = vpack.c.bf16 %v16085_v20, %v16084_v13  ;;  %v16086_v33 = vld [vmem:[%s31002_s4 + $0x360] sm:$0xff]  ;;  %v30201_v13 = vld [vmem:[#allocation2 + $0x332] sm:$0xff] }
 0x57a   :  { %24521 = vmatpush3.bf16.msra.mxu0 %v24518_v52  ;;  %22403 = vmatprep.mubr.f32.mxu1 %v29855_v17  ;;  %v9500_v22 = vmul.f32 %v30077_v43, %v30077_v43  ;;  %v30082_v61 = vpop.f32.mrb[33].mxu0  ;;  %v16087_v17 = vld [vmem:[%s31002_s4 + $0x368] sm:$0xff] }
 0x57b   :  { %24805 = vmatpush3.bf16.msra.mxu1 %v24514_v0  ;;  %24523 = vmatprep.subr.bf16.mxu0 %v24522_v21  ;;  %v9477_v15 = vadd.f32 %v30077_v43, %v30082_v61  ;;  %v9499_v34 = vmul.f32 %v30082_v61, %v30082_v61  ;;  %v30106_v7 = vpack.c.bf16 %v16087_v17, %v16086_v33 }
 0x57c   :  { %21903 = vmatmul.mubr.f32.gmra.mrb[56].mxu0 %v29858_v53  ;;  %24807 = vmatprep.subr.bf16.mxu1 %v24518_v52 }
 0x57d   :  { %22404 = vmatmul.mubr.f32.gmra.mrb[54].mxu1 %v29860_v56  ;;  %21905 = vmatprep.mubr.f32.mxu0 %v29863_v46  ;;  %v9515_v40 = vadd.f32 %v9500_v22, %v9499_v34  ;;  %v30099_v63 = vpop.f32.mrb[34].mxu0  ;;  %v30206_v34 = vpack.c.bf16 %v16095_v12, %v16094_v44 }
 0x57e   :  { %24525 = vmatpush3.bf16.msra.mxu0 %v24522_v21  ;;  %22406 = vmatprep.mubr.f32.mxu1 %v29873_v47  ;;  %v30102_v62 = vpop.f32.mrb[32].mxu1  ;;  %v30104_v29 = vpop.f32.mrb[35].mxu0  ;;  %v9502_v45 = vmul.f32 %v30099_v63, %v30099_v63 }
 0x57f   :  { %24809 = vmatpush3.bf16.msra.mxu1 %v24518_v52  ;;  %24527 = vmatprep.subr.bf16.mxu0 %v30088_v9  ;;  %v11281_v53 = vmul.f32 %v30102_v62, %v30102_v62  ;;  %v9478_v56 = vadd.f32 %v9477_v15, %v30104_v29  ;;  %v9501_v46 = vmul.f32 %v30104_v29, %v30104_v29  ;;  %v30114_v36 = vpop.f32.mrb[33].mxu1  ;;  %v12444_v52 = vld [vmem:[#allocation2 + $0x1e0] sm:$0xff] }
 0x580   :  { %21906 = vmatmul.mubr.f32.gmra.mrb[58].mxu0 %v29876_v24  ;;  %24811 = vmatprep.subr.bf16.mxu1 %v24522_v21  ;;  %v11258_v47 = vadd.f32 %v30102_v62, %v30114_v36  ;;  %v11280_v4 = vmul.f32 %v30114_v36, %v30114_v36 }
 0x581   :  { %22407 = vmatmul.mubr.f32.gmra.mrb[56].mxu1 %v29878_v59  ;;  %21908 = vmatprep.mubr.f32.mxu0 %v29881_v25  ;;  %v9516_v24 = vadd.f32 %v9515_v40, %v9501_v46  ;;  %v30129_v58 = vpop.f32.mrb[36].mxu0  ;;  %v9479_v19 = vadd.f32 %v30099_v63, %v9478_v56  ;;  %v16097_v56 = vld [vmem:[%s31002_s4 + $0x3b8] sm:$0xff] }
 0x582   :  { %24529 = vmatpush3.bf16.msra.mxu0 %v30088_v9  ;;  %22409 = vmatprep.mubr.f32.mxu1 %v29891_v26  ;;  %v11296_v18 = vadd.f32 %v11281_v53, %v11280_v4  ;;  %v30139_v59 = vpop.f32.mrb[34].mxu1  ;;  %v30141_v25 = vpop.f32.mrb[37].mxu0  ;;  %v16093_v26 = vld [vmem:[%s31002_s4 + $0x398] sm:$0xff]  ;;  %v16096_v53 = vld [vmem:[%s31002_s4 + $0x3b0] sm:$0xff] }
 0x583   :  { %24813 = vmatpush3.bf16.msra.mxu1 %v24522_v21  ;;  %24531 = vmatprep.subr.bf16.mxu0 %v30106_v7  ;;  %v9480_v60 = vadd.f32 %v9479_v19, %v30141_v25  ;;  %v9503_v35 = vmul.f32 %v30141_v25, %v30141_v25  ;;  %v30156_v5 = vpop.f32.mrb[35].mxu1  ;;  %v9517_v6 = vadd.f32 %v9516_v24, %v9502_v45  ;;  %v30230_v24 = vld [vmem:[#allocation2 + $0x33a] sm:$0xff] }
 0x584   :  { %21909 = vmatmul.mubr.f32.gmra.mrb[60].mxu0 %v29894_v55  ;;  %24815 = vmatprep.subr.bf16.mxu1 %v30088_v9  ;;  %v11259_v11 = vadd.f32 %v11258_v47, %v30156_v5  ;;  %v11282_v51 = vmul.f32 %v30156_v5, %v30156_v5  ;;  %v30171_v8 = vpack.c.bf16 %v16093_v26, %v16092_v41 }
 0x585   :  { %22410 = vmatmul.mubr.f32.gmra.mrb[58].mxu1 %v31207_v10  ;;  %21911 = vmatprep.mubr.f32.mxu0 %v12265_v14  ;;  %v30166_v49 = vpop.f32.mrb[38].mxu0  ;;  %v9481_v48 = vadd.f32 %v30129_v58, %v9480_v60  ;;  %v9504_v55 = vmul.f32 %v30129_v58, %v30129_v58  ;;  %v9518_v1 = vadd.f32 %v9517_v6, %v9503_v35  ;;  %v14225_v35 = vld [vmem:[#allocation2 + $0x2a0] sm:$0xff] }
 0x586   :  { %24533 = vmatpush3.bf16.msra.mxu0 %v30106_v7  ;;  %22412 = vmatprep.mubr.f32.mxu1 %v29901_v57  ;;  %v11297_v50 = vadd.f32 %v11296_v18, %v11282_v51  ;;  %v30177_v2 = vpop.f32.mrb[36].mxu1  ;;  %v30179_v39 = vpop.f32.mrb[39].mxu0  ;;  %v11283_v57 = vmul.f32 %v30139_v59, %v30139_v59  ;;  %v11260_v32 = vadd.f32 %v30139_v59, %v11259_v11  ;;  %v12446_v18 = vld [vmem:[#allocation2 + $0x1f8] sm:$0xff] }
 0x587   :  { %24817 = vmatpush3.bf16.msra.mxu1 %v30088_v9  ;;  %24535 = vmatprep.subr.bf16.mxu0 %v30158_v3  ;;  %v9482_v0 = vadd.f32 %v9481_v48, %v30179_v39  ;;  %v9505_v27 = vmul.f32 %v30179_v39, %v30179_v39  ;;  %v30194_v42 = vpop.f32.mrb[37].mxu1  ;;  %v9519_v28 = vadd.f32 %v9518_v1, %v9504_v55  ;;  %v16098_v48 = vld [vmem:[%s31002_s4 + $0x3c0] sm:$0xff]  ;;  %v16099_v55 = vld [vmem:[%s31002_s4 + $0x3c8] sm:$0xff] }
 0x588   :  { %21912 = vmatmul.mubr.f32.gmra.mrb[62].mxu0 %v12266_v54  ;;  %24819 = vmatprep.subr.bf16.mxu1 %v30106_v7  ;;  %v11284_v21 = vmul.f32 %v30194_v42, %v30194_v42  ;;  %v11298_v20 = vadd.f32 %v11297_v50, %v11283_v57  ;;  %v9506_v9 = vmul.f32 %v30166_v49, %v30166_v49  ;;  %v12447_v57 = vld [vmem:[#allocation2 + $0x200] sm:$0xff] }
 0x589   :  { %22413 = vmatmul.mubr.f32.gmra.mrb[60].mxu1 %v29910_v31  ;;  %21946 = vmatprep.mubr.f32.mxu0 %v12444_v52  ;;  %v30203_v22 = vpop.f32.mrb[40].mxu0  ;;  %v9483_v15 = vadd.f32 %v30166_v49, %v9482_v0  ;;  %v9520_v33 = vadd.f32 %v9519_v28, %v9505_v27  ;;  %v11261_v31 = vadd.f32 %v11260_v32, %v30194_v42  ;;  %v14226_v27 = vld [vmem:[#allocation2 + $0x2a8] sm:$0xff]  ;;  %v12448_v52 = vld [vmem:[#allocation2 + $0x210] sm:$0xff] }
 0x58a   :  { %24537 = vmatpush3.bf16.msra.mxu0 %v30158_v3  ;;  %22415 = vmatprep.mubr.f32.mxu1 %v30201_v13  ;;  %v30213_v17 = vpop.f32.mrb[38].mxu1  ;;  %v30215_v40 = vpop.f32.mrb[41].mxu0  ;;  %v11285_v46 = vmul.f32 %v30177_v2, %v30177_v2  ;;  %v11299_v47 = vadd.f32 %v11298_v20, %v11284_v21  ;;  %v30242_v60 = vpack.c.bf16 %v16097_v56, %v16096_v53 }
 0x58b   :  { %24821 = vmatpush3.bf16.msra.mxu1 %v30106_v7  ;;  %24539 = vmatprep.subr.bf16.mxu0 %v30169_v16  ;;  %v9484_v4 = vadd.f32 %v9483_v15, %v30215_v40  ;;  %v30228_v30 = vpop.f32.mrb[39].mxu1  ;;  %v9507_v19 = vmul.f32 %v30215_v40, %v30215_v40  ;;  %v9521_v23 = vadd.f32 %v9520_v33, %v9506_v9  ;;  %v14227_v9 = vld [vmem:[#allocation2 + $0x2b8] sm:$0xff] }
 0x58c   :  { %24823 = vmatprep.subr.bf16.mxu1 %v30158_v3  ;;  %v11262_v7 = vadd.f32 %v30177_v2, %v11261_v31  ;;  %v11286_v45 = vmul.f32 %v30228_v30, %v30228_v30  ;;  %v11300_v37 = vadd.f32 %v11299_v47, %v11285_v46  ;;  %v9508_v14 = vmul.f32 %v30203_v22, %v30203_v22 }
 0x58d   :  { %21947 = vmatmul.mubr.f32.vlgmr.msra.gmra.mrb[48].mxu0 %v12445_v38  ;;  %22416 = vmatmul.mubr.f32.gmra.mrb[62].mxu1 %v30230_v24  ;;  %v30239_v41 = vpop.f32.mrb[42].mxu0  ;;  %v9485_v26 = vadd.f32 %v30203_v22, %v9484_v4  ;;  %v9522_v6 = vadd.f32 %v9521_v23, %v9507_v19  ;;  %v11287_v1 = vmul.f32 %v30213_v17, %v30213_v17  ;;  %v12449_v23 = vld [vmem:[#allocation2 + $0x218] sm:$0xff] }
 0x58e   :  { %21949 = vmatprep.mubr.f32.mxu0 %v12446_v18  ;;  %24541 = vmatpush3.bf16.msra.mxu0 %v30169_v16  ;;  %v11263_v11 = vadd.f32 %v11262_v7, %v30228_v30  ;;  %v30248_v51 = vpop.f32.mrb[40].mxu1  ;;  %v30250_v10 = vpop.f32.mrb[43].mxu0  ;;  %v11301_v50 = vadd.f32 %v11300_v37, %v11286_v45  ;;  %v30274_v15 = vpack.c.bf16 %v16099_v55, %v16098_v48  ;;  %v14228_v37 = vld [vmem:[#allocation2 + $0x2c0] sm:$0xff] }
 0x58f   :  { %24825 = vmatpush3.bf16.msra.mxu1 %v30158_v3  ;;  %22450 = vmatprep.mubr.f32.mxu1 %v14225_v35  ;;  %v9486_v44 = vadd.f32 %v9485_v26, %v30250_v10  ;;  %v30262_v12 = vpop.f32.mrb[41].mxu1  ;;  %v9509_v54 = vmul.f32 %v30250_v10, %v30250_v10  ;;  %v9523_v0 = vadd.f32 %v9522_v6, %v9508_v14  ;;  %v12450_v26 = vld [vmem:[#allocation2 + $0x228] sm:$0xff] }
 0x590   :  { %24543 = vmatprep.subr.bf16.mxu0 %v30171_v8  ;;  %24827 = vmatprep.subr.bf16.mxu1 %v30169_v16  ;;  %v11264_v3 = vadd.f32 %v30213_v17, %v11263_v11  ;;  %v11288_v28 = vmul.f32 %v30262_v12, %v30262_v12  ;;  %v11302_v32 = vadd.f32 %v11301_v50, %v11287_v1  ;;  %v14229_v11 = vld [vmem:[#allocation2 + $0x2d0] sm:$0xff] }
 0x591   :  { %21950 = vmatmul.mubr.f32.gmra.mrb[50].mxu0 %v12447_v57  ;;  %v30271_v21 = vpop.f32.mrb[44].mxu0  ;;  %v9487_v20 = vadd.f32 %v30239_v41, %v9486_v44  ;;  %v9510_v33 = vmul.f32 %v30239_v41, %v30239_v41  ;;  %v9524_v31 = vadd.f32 %v9523_v0, %v9509_v54  ;;  %v11289_v47 = vmul.f32 %v30248_v51, %v30248_v51 }
 0x592   :  { %22451 = vmatmul.mubr.f32.vlgmr.msra.gmra.mrb[48].mxu1 %v14226_v27  ;;  %21952 = vmatprep.mubr.f32.mxu0 %v12448_v52  ;;  %v11265_v53 = vadd.f32 %v11264_v3, %v30262_v12  ;;  %v30279_v56 = vpop.f32.mrb[42].mxu1  ;;  %v30281_v46 = vpop.f32.mrb[45].mxu0  ;;  %v11303_v4 = vadd.f32 %v11302_v32, %v11288_v28  ;;  %v9512_v48 = vmul.f32 %v30271_v21, %v30271_v21  ;;  %v12451_v27 = vld [vmem:[#allocation2 + $0x230] sm:$0xff] }
 0x593   :  { %24545 = vmatpush3.bf16.msra.mxu0 %v30171_v8  ;;  %22453 = vmatprep.mubr.f32.mxu1 %v14227_v9  ;;  %v9488_v38 = vadd.f32 %v9487_v20, %v30281_v46  ;;  %v30287_v19 = vpop.f32.mrb[43].mxu1  ;;  %v9511_v7 = vmul.f32 %v30281_v46, %v30281_v46  ;;  %v9525_v45 = vadd.f32 %v9524_v31, %v9510_v33  ;;  %v16100_v20 = vld [vmem:[%s31002_s4 + $0x3d0] sm:$0xff]  ;;  %v16101_v9 = vld [vmem:[%s31002_s4 + $0x3d8] sm:$0xff] }
 0x594   :  { %24829 = vmatpush3.bf16.msra.mxu1 %v30169_v16  ;;  %24547 = vmatprep.subr.bf16.mxu0 %v30206_v34  ;;  %v11266_v18 = vadd.f32 %v30248_v51, %v11265_v53  ;;  %v11290_v35 = vmul.f32 %v30287_v19, %v30287_v19  ;;  %v11304_v14 = vadd.f32 %v11303_v4, %v11289_v47  ;;  %v14230_v33 = vld [vmem:[#allocation2 + $0x2d8] sm:$0xff]  ;;  %v14231_v4 = vld [vmem:[#allocation2 + $0x2e8] sm:$0xff] }
 0x595   :  { %21953 = vmatmul.mubr.f32.gmra.mrb[52].mxu0 %v12449_v23  ;;  %24831 = vmatprep.subr.bf16.mxu1 %v30171_v8  ;;  %v30297_v6 = vpop.f32.mrb[46].mxu0  ;;  %v9489_v16 = vadd.f32 %v30271_v21, %v9488_v38  ;;  %v9526_v55 = vadd.f32 %v9525_v45, %v9511_v7  ;;  %v11291_v57 = vmul.f32 %v30279_v56, %v30279_v56 }
 0x596   :  { %22454 = vmatmul.mubr.f32.gmra.mrb[50].mxu1 %v14228_v37  ;;  %21955 = vmatprep.mubr.f32.mxu0 %v12450_v26  ;;  %v11267_v1 = vadd.f32 %v11266_v18, %v30287_v19  ;;  %v30303_v50 = vpop.f32.mrb[44].mxu1  ;;  %v30305_v44 = vpop.f32.mrb[47].mxu0  ;;  %v11305_v54 = vadd.f32 %v11304_v14, %v11290_v35  ;;  %v9514_v38 = vmul.f32 %v30297_v6, %v30297_v6 }
 0x597   :  { %24549 = vmatpush3.bf16.msra.mxu0 %v30206_v34  ;;  %22456 = vmatprep.mubr.f32.mxu1 %v14229_v11  ;;  %v9490_v0 = vadd.f32 %v9489_v16, %v30305_v44  ;;  %v30311_v3 = vpop.f32.mrb[45].mxu1  ;;  %v9513_v52 = vmul.f32 %v30305_v44, %v30305_v44  ;;  %v9527_v28 = vadd.f32 %v9526_v55, %v9512_v48  ;;  %v12453_v11 = vld [vmem:[#allocation2 + $0x248] sm:$0xff]  ;;  %v14232_v48 = vld [vmem:[#allocation2 + $0x2f0] sm:$0xff] }
 0x598   :  { %24833 = vmatpush3.bf16.msra.mxu1 %v30171_v8  ;;  %24551 = vmatprep.subr.bf16.mxu0 %v30242_v60  ;;  %v11268_v32 = vadd.f32 %v30279_v56, %v11267_v1  ;;  %v12452_v8 = vld [vmem:[#allocation2 + $0x240] sm:$0xff]  ;;  %v11292_v53 = vmul.f32 %v30311_v3, %v30311_v3  ;;  %v11306_v47 = vadd.f32 %v11305_v54, %v11291_v57  ;;  %v12454_v54 = vld [vmem:[#allocation2 + $0x258] sm:$0xff] }
 0x599   :  { %21956 = vmatmul.mubr.f32.gmra.mrb[54].mxu0 %v12451_v27  ;;  %24835 = vmatprep.subr.bf16.mxu1 %v30206_v34  ;;  %v9491_v31 = vadd.f32 %v30297_v6, %v9490_v0  ;;  %v9528_v23 = vadd.f32 %v9527_v28, %v9513_v52  ;;  %v11293_v18 = vmul.f32 %v30303_v50, %v30303_v50  ;;  %v16103_v27 = vld [vmem:[%s31002_s4 + $0x3e8] sm:$0xff]  ;;  %v14233_v28 = vld [vmem:[#allocation2 + $0x300] sm:$0xff] }
 0x59a   :  { %22457 = vmatmul.mubr.f32.gmra.mrb[52].mxu1 %v14230_v33  ;;  %21958 = vmatprep.mubr.f32.mxu0 %v12452_v8  ;;  %v11269_v7 = vadd.f32 %v11268_v32, %v30311_v3  ;;  %v30331_v45 = vpop.f32.mrb[46].mxu1  ;;  %v11307_v26 = vadd.f32 %v11306_v47, %v11292_v53  ;;  %v30338_v14 = vpack.c.bf16 %v16101_v9, %v16100_v20  ;;  %v12455_v53 = vld [vmem:[#allocation2 + $0x260] sm:$0xff]  ;;  %v14234_v47 = vld [vmem:[#allocation2 + $0x308] sm:$0xff] }
 0x59b   :  { %24553 = vmatpush3.bf16.msra.mxu0 %v30242_v60  ;;  %22459 = vmatprep.mubr.f32.mxu1 %v14231_v4  ;;  %v9492_v37 = vrot.slane %v9491_v31, 4  ;;  %v30336_v35 = vpop.f32.mrb[47].mxu1  ;;  %v9529_v16 = vadd.f32 %v9528_v23, %v9514_v38  ;;  %v11295_v20 = vmul.f32 %v30331_v45, %v30331_v45  ;;  %v12456_v23 = vld [vmem:[#allocation2 + $0x270] sm:$0xff] }
 0x59c   :  { %24837 = vmatpush3.bf16.msra.mxu1 %v30206_v34  ;;  %24555 = vmatprep.subr.bf16.mxu0 %v30274_v15  ;;  %v11270_v55 = vadd.f32 %v30303_v50, %v11269_v7  ;;  %v11294_v1 = vmul.f32 %v30336_v35, %v30336_v35  ;;  %v11308_v0 = vadd.f32 %v11307_v26, %v11293_v18  ;;  %v16102_v34 = vld [vmem:[%s31002_s4 + $0x3e0] sm:$0xff]  ;;  %v16104_v7 = vld [vmem:[%s31002_s4 + $0x3f0] sm:$0xff]  ;;  %v14235_v26 = vld [vmem:[#allocation2 + $0x318] sm:$0xff] }
 0x59d   :  { %v9493_v57 = vadd.f32 %v9492_v37, %v9491_v31  ;;  %21959 = vmatmul.mubr.f32.gmra.mrb[56].mxu0 %v12453_v11  ;;  %24839 = vmatprep.subr.bf16.mxu1 %v30242_v60  ;;  %v9530_v52 = vrot.slane %v9529_v16, 4  ;;  %v24562_v4 = vpack.c.bf16 %v16103_v27, %v16102_v34  ;;  %v12458_v27 = vld [vmem:[#allocation2 + $0x288] sm:$0xff] }
 0x59e   :  { %22460 = vmatmul.mubr.f32.gmra.mrb[54].mxu1 %v14232_v48  ;;  %21961 = vmatprep.mubr.f32.mxu0 %v12454_v54  ;;  %v11271_v32 = vadd.f32 %v11270_v55, %v30336_v35  ;;  %v11309_v9 = vadd.f32 %v11308_v0, %v11294_v1  ;;  %v12457_v55 = vld [vmem:[#allocation2 + $0x278] sm:$0xff]  ;;  %v14236_v1 = vld [vmem:[#allocation2 + $0x320] sm:$0xff] }
 0x59f   :  { %24557 = vmatpush3.bf16.msra.mxu0 %v30274_v15  ;;  %22462 = vmatprep.mubr.f32.mxu1 %v14233_v28  ;;  %v9494_v33 = vrot.slane %v9493_v57, 2  ;;  %v9531_v8 = vadd.f32 %v9530_v52, %v9529_v16  ;;  %v16106_v52 = vld [vmem:[%s31002_s4 + $0x400] sm:$0xff] }
 0x5a0   :  { %24841 = vmatpush3.bf16.msra.mxu1 %v30242_v60  ;;  %v11272_v31 = vadd.f32 %v30331_v45, %v11271_v32  ;;  %24559 = vmatprep.subr.bf16.mxu0 %v30338_v14  ;;  %v11310_v38 = vadd.f32 %v11309_v9, %v11295_v20  ;;  %v16105_v60 = vld [vmem:[%s31002_s4 + $0x3f8] sm:$0xff] }
 0x5a1   :  { %21962 = vmatmul.mubr.f32.gmra.mrb[58].mxu0 %v12455_v53  ;;  %24843 = vmatprep.subr.bf16.mxu1 %v30274_v15  ;;  %v9532_v18 = vrot.slane %v9531_v8, 2  ;;  %v9495_v11 = vadd.f32 %v9494_v33, %v9493_v57  ;;  %v24566_v54 = vpack.c.bf16 %v16105_v60, %v16104_v7  ;;  %v16107_v57 = vld [vmem:[%s31002_s4 + $0x408] sm:$0xff]  ;;  %v12459_v33 = vld [vmem:[#allocation2 + $0x290] sm:$0xff] }
 0x5a2   :  { %v11273_v37 = vrot.slane %v11272_v31, 4  ;;  %22463 = vmatmul.mubr.f32.gmra.mrb[56].mxu1 %v14234_v47  ;;  %21964 = vmatprep.mubr.f32.mxu0 %v12456_v23  ;;  %v11311_v16 = vrot.slane %v11310_v38, 4  ;;  %v14238_v47 = vld [vmem:[#allocation2 + $0x338] sm:$0xff]  ;;  %v16108_v7 = vld [vmem:[%s31002_s4 + $0x410] sm:$0xff] }
 0x5a3   :  { %24561 = vmatpush3.bf16.msra.mxu0 %v30338_v14  ;;  %22465 = vmatprep.mubr.f32.mxu1 %v14235_v26  ;;  %v9533_v0 = vadd.f32 %v9532_v18, %v9531_v8  ;;  %v9496_v20 = vrot.slane %v9495_v11, 1  ;;  %v24570_v8 = vpack.c.bf16 %v16107_v57, %v16106_v52  ;;  %v25923_v18 = vld [vmem:[#allocation2] sm:$0xff] }
 0x5a4   :  { %v11274_v48 = vadd.f32 %v11273_v37, %v11272_v31  ;;  %24845 = vmatpush3.bf16.msra.mxu1 %v30274_v15  ;;  %24563 = vmatprep.subr.bf16.mxu0 %v24562_v4  ;;  %v11312_v34 = vadd.f32 %v11311_v16, %v11310_v38  ;;  %v14237_v15 = vld [vmem:[#allocation2 + $0x330] sm:$0xff]  ;;  %v12637_v38 = vld [vmem:[#allocation2 + $0x1e1] sm:$0xff] }
 0x5a5   :  { %21965 = vmatmul.mubr.f32.gmra.mrb[60].mxu0 %v12457_v55  ;;  %24847 = vmatprep.subr.bf16.mxu1 %v30338_v14  ;;  %v9534_v31 = vrot.slane %v9533_v0, 1  ;;  %v9497_v37 = vadd.f32 %v9496_v20, %v9495_v11  ;;  %v12638_v55 = vld [vmem:[#allocation2 + $0x1e9] sm:$0xff]  ;;  %v16110_v52 = vld [vmem:[%s31002_s4 + $0x420] sm:$0xff] }
 0x5a6   :  { %v11275_v28 = vrot.slane %v11274_v48, 2  ;;  %22466 = vmatmul.mubr.f32.gmra.mrb[58].mxu1 %v14236_v1  ;;  %21967 = vmatprep.mubr.f32.mxu0 %v12458_v27  ;;  %v11313_v32 = vrot.slane %v11312_v34, 2  ;;  %v12639_v27 = vld [vmem:[#allocation2 + $0x1f9] sm:$0xff]  ;;  %v16111_v11 = vld [vmem:[%s31002_s4 + $0x428] sm:$0xff]  ;;  %v16112_v20 = vld [vmem:[%s31002_s4 + $0x430] sm:$0xff] }
 0x5a7   :  { %24565 = vmatpush3.bf16.msra.mxu0 %v24562_v4  ;;  %22468 = vmatprep.mubr.f32.mxu1 %v14237_v15  ;;  %v9535_v16 = vadd.f32 %v9534_v31, %v9533_v0  ;;  %v14418_v0 = vld [vmem:[#allocation2 + $0x2a1] sm:$0xff]  ;;  %v24578_v15 = vpack.c.bf16 %v16111_v11, %v16110_v52 }
 0x5a8   :  { %v11276_v9 = vadd.f32 %v11275_v28, %v11274_v48  ;;  %24849 = vmatpush3.bf16.msra.mxu1 %v30338_v14  ;;  %24567 = vmatprep.subr.bf16.mxu0 %v24566_v54  ;;  %v11314_v53 = vadd.f32 %v11313_v32, %v11312_v34  ;;  %v16109_v14 = vld [vmem:[%s31002_s4 + $0x418] sm:$0xff]  ;;  %v12640_v57 = vld [vmem:[#allocation2 + $0x201] sm:$0xff]  ;;  %v14419_v28 = vld [vmem:[#allocation2 + $0x2a9] sm:$0xff] }
 0x5a9   :  { %21968 = vmatmul.mubr.f32.gmra.mrb[62].mxu0 %v12459_v33  ;;  %24851 = vmatprep.subr.bf16.mxu1 %v24562_v4  ;;  %v24574_v1 = vpack.c.bf16 %v16109_v14, %v16108_v7  ;;  %v12641_v32 = vld [vmem:[#allocation2 + $0x211] sm:$0xff]  ;;  %v14420_v33 = vld [vmem:[#allocation2 + $0x2b9] sm:$0xff]  ;;  %v14421_v31 = vld [vmem:[#allocation2 + $0x2c1] sm:$0xff] }
 0x5aa   :  { %v11277_v23 = vrot.slane %v11276_v9, 1  ;;  %22469 = vmatmul.mubr.f32.gmra.mrb[60].mxu1 %v14238_v47  ;;  %22002 = vmatprep.mubr.f32.mxu0 %v12637_v38  ;;  %v11315_v60 = vrot.slane %v11314_v53, 1  ;;  %v12643_v47 = vld [vmem:[#allocation2 + $0x229] sm:$0xff]  ;;  %v16114_v38 = vld [vmem:[%s31002_s4 + $0x440] sm:$0xff]  ;;  %v14422_v7 = vld [vmem:[#allocation2 + $0x2d1] sm:$0xff] }
 0x5ab   :  { %24569 = vmatpush3.bf16.msra.mxu0 %v24566_v54  ;;  %22471 = vmatprep.mubr.f32.mxu1 %v25923_v18  ;;  %v14423_v14 = vld [vmem:[#allocation2 + $0x2d9] sm:$0xff]  ;;  %v16119_v11 = vld [vmem:[%s31002_s4 + $0x468] sm:$0xff] }
 0x5ac   :  { %v11278_v26 = vadd.f32 %v11277_v23, %v11276_v9  ;;  %24853 = vmatpush3.bf16.msra.mxu1 %v24562_v4  ;;  %24571 = vmatprep.subr.bf16.mxu0 %v24570_v8  ;;  %v11316_v48 = vadd.f32 %v11315_v60, %v11314_v53  ;;  %v16113_v9 = vld [vmem:[%s31002_s4 + $0x438] sm:$0xff]  ;;  %v16115_v23 = vld [vmem:[%s31002_s4 + $0x448] sm:$0xff]  ;;  %v16118_v52 = vld [vmem:[%s31002_s4 + $0x460] sm:$0xff] }
 0x5ad   :  { %24855 = vmatprep.subr.bf16.mxu1 %v24566_v54  ;;  %v24582_v53 = vpack.c.bf16 %v16113_v9, %v16112_v20  ;;  %v24586_v60 = vpack.c.bf16 %v16115_v23, %v16114_v38  ;;  %v16120_v20 = vld [vmem:[%s31002_s4 + $0x470] sm:$0xff]  ;;  %v16121_v9 = vld [vmem:[%s31002_s4 + $0x478] sm:$0xff] }
 0x5ae   :  { %v30382_v34 = vadd.f32 %v11278_v26, %v9497_v37  ;;  %22003 = vmatmul.mubr.f32.vlgmr.msra.gmra.mrb[48].mxu0 %v12638_v55  ;;  %22472 = vmatmul.mubr.f32.gmra.mrb[62].mxu1 %v25923_v18  ;;  %v30390_v4 = vadd.f32 %v11316_v48, %v9535_v16  ;;  %v12645_v18 = vld [vmem:[#allocation2 + $0x241] sm:$0xff]  ;;  %v16116_v37 = vld [vmem:[%s31002_s4 + $0x450] sm:$0xff]  ;;  %v16117_v26 = vld [vmem:[%s31002_s4 + $0x458] sm:$0xff] }
 0x5af   :  { %22005 = vmatprep.mubr.f32.mxu0 %v12639_v27  ;;  %24573 = vmatpush3.bf16.msra.mxu0 %v24570_v8  ;;  %v14424_v16 = vld [vmem:[#allocation2 + $0x2e9] sm:$0xff]  ;;  %v14425_v55 = vld [vmem:[#allocation2 + $0x2f1] sm:$0xff]  ;;  %v12647_v27 = vld [vmem:[#allocation2 + $0x259] sm:$0xff] }
 0x5b0   :  { %24857 = vmatpush3.bf16.msra.mxu1 %v24566_v54  ;;  %22506 = vmatprep.mubr.f32.mxu1 %v14418_v0  ;;  %v12642_v54 = vld [vmem:[#allocation2 + $0x219] sm:$0xff]  ;;  %v12646_v48 = vld [vmem:[#allocation2 + $0x249] sm:$0xff]  ;;  %v14426_v0 = vld [vmem:[#allocation2 + $0x301] sm:$0xff] }
 0x5b1   :  { %24575 = vmatprep.subr.bf16.mxu0 %v24574_v1  ;;  %24859 = vmatprep.subr.bf16.mxu1 %v24570_v8  ;;  %v14430_v38 = vld [vmem:[#allocation2 + $0x331] sm:$0xff] }
 0x5b2   :  { %22006 = vmatmul.mubr.f32.gmra.mrb[50].mxu0 %v12640_v57  ;;  %v12648_v57 = vld [vmem:[#allocation2 + $0x261] sm:$0xff]  ;;  %v12652_v23 = vld [vmem:[#allocation2 + $0x291] sm:$0xff] }
 0x5b3   :  { %22507 = vmatmul.mubr.f32.vlgmr.msra.gmra.mrb[48].mxu1 %v14419_v28  ;;  %22008 = vmatprep.mubr.f32.mxu0 %v12641_v32  ;;  %v14427_v28 = vld [vmem:[#allocation2 + $0x309] sm:$0xff]  ;;  %v12649_v32 = vld [vmem:[#allocation2 + $0x271] sm:$0xff] }
 0x5b4   :  { %24577 = vmatpush3.bf16.msra.mxu0 %v24574_v1  ;;  %22509 = vmatprep.mubr.f32.mxu1 %v14420_v33  ;;  %v14428_v33 = vld [vmem:[#allocation2 + $0x319] sm:$0xff] }
 0x5b5   :  { %24861 = vmatpush3.bf16.msra.mxu1 %v24570_v8  ;;  %24579 = vmatprep.subr.bf16.mxu0 %v24578_v15  ;;  %v12644_v8 = vld [vmem:[#allocation2 + $0x231] sm:$0xff] }
 0x5b6   :  { %22009 = vmatmul.mubr.f32.gmra.mrb[52].mxu0 %v12642_v54  ;;  %24863 = vmatprep.subr.bf16.mxu1 %v24574_v1  ;;  %v12650_v54 = vld [vmem:[#allocation2 + $0x279] sm:$0xff] }
 0x5b7   :  { %22510 = vmatmul.mubr.f32.gmra.mrb[50].mxu1 %v14421_v31  ;;  %22011 = vmatprep.mubr.f32.mxu0 %v12643_v47  ;;  %v24598_v31 = vpack.c.bf16 %v16121_v9, %v16120_v20  ;;  %v12651_v47 = vld [vmem:[#allocation2 + $0x289] sm:$0xff]  ;;  %v14618_v9 = vld [vmem:[#allocation2 + $0x2f2] sm:$0xff] }
 0x5b8   :  { %24581 = vmatpush3.bf16.msra.mxu0 %v24578_v15  ;;  %22512 = vmatprep.mubr.f32.mxu1 %v14422_v7  ;;  %v14432_v7 = vld [vmem:[#allocation2 + $0x349] sm:$0xff] }
 0x5b9   :  { %24865 = vmatpush3.bf16.msra.mxu1 %v24574_v1  ;;  %24583 = vmatprep.subr.bf16.mxu0 %v24582_v53  ;;  %v24590_v1 = vpack.c.bf16 %v16117_v26, %v16116_v37  ;;  %v12832_v37 = vld [vmem:[#allocation2 + $0x1fa] sm:$0xff]  ;;  %v14611_v26 = vld [vmem:[#allocation2 + $0x2a2] sm:$0xff]  ;;  %v12839_v20 = vld [vmem:[#allocation2 + $0x24a] sm:$0xff] }
 0x5ba   :  { %22012 = vmatmul.mubr.f32.gmra.mrb[54].mxu0 %v12644_v8  ;;  %24867 = vmatprep.subr.bf16.mxu1 %v24578_v15  ;;  %v14431_v8 = vld [vmem:[#allocation2 + $0x339] sm:$0xff] }
 0x5bb   :  { %22513 = vmatmul.mubr.f32.gmra.mrb[52].mxu1 %v14423_v14  ;;  %22014 = vmatprep.mubr.f32.mxu0 %v12645_v18  ;;  %v12830_v14 = vld [vmem:[#allocation2 + $0x1e2] sm:$0xff]  ;;  %v12831_v18 = vld [vmem:[#allocation2 + $0x1ea] sm:$0xff] }
 0x5bc   :  { %24585 = vmatpush3.bf16.msra.mxu0 %v24582_v53  ;;  %22515 = vmatprep.mubr.f32.mxu1 %v14424_v16  ;;  %v12833_v16 = vld [vmem:[#allocation2 + $0x202] sm:$0xff] }
 0x5bd   :  { %24869 = vmatpush3.bf16.msra.mxu1 %v24578_v15  ;;  %24587 = vmatprep.subr.bf16.mxu0 %v24586_v60  ;;  %v24594_v15 = vpack.c.bf16 %v16119_v11, %v16118_v52  ;;  %v14614_v52 = vld [vmem:[#allocation2 + $0x2c2] sm:$0xff]  ;;  %v12836_v11 = vld [vmem:[#allocation2 + $0x22a] sm:$0xff] }
 0x5be   :  { %22015 = vmatmul.mubr.f32.gmra.mrb[56].mxu0 %v12646_v48  ;;  %24871 = vmatprep.subr.bf16.mxu1 %v24582_v53  ;;  %v14612_v48 = vld [vmem:[#allocation2 + $0x2aa] sm:$0xff] }
 0x5bf   :  { %22516 = vmatmul.mubr.f32.gmra.mrb[54].mxu1 %v14425_v55  ;;  %22017 = vmatprep.mubr.f32.mxu0 %v12647_v27  ;;  %v12834_v55 = vld [vmem:[#allocation2 + $0x212] sm:$0xff]  ;;  %v12835_v27 = vld [vmem:[#allocation2 + $0x21a] sm:$0xff] }
 0x5c0   :  { %24589 = vmatpush3.bf16.msra.mxu0 %v24586_v60  ;;  %22518 = vmatprep.mubr.f32.mxu1 %v14426_v0  ;;  %v14615_v0 = vld [vmem:[#allocation2 + $0x2d2] sm:$0xff] }
 0x5c1   :  { %24873 = vmatpush3.bf16.msra.mxu1 %v24582_v53  ;;  %24591 = vmatprep.subr.bf16.mxu0 %v24590_v1  ;;  %v14429_v53 = vld [vmem:[#allocation2 + $0x321] sm:$0xff] }
 0x5c2   :  { %22018 = vmatmul.mubr.f32.gmra.mrb[58].mxu0 %v12648_v57  ;;  %24875 = vmatprep.subr.bf16.mxu1 %v24586_v60  ;;  %v12837_v57 = vld [vmem:[#allocation2 + $0x232] sm:$0xff] }
 0x5c3   :  { %22519 = vmatmul.mubr.f32.gmra.mrb[56].mxu1 %v14427_v28  ;;  %22020 = vmatprep.mubr.f32.mxu0 %v12649_v32  ;;  %v14616_v28 = vld [vmem:[#allocation2 + $0x2da] sm:$0xff]  ;;  %v14617_v32 = vld [vmem:[#allocation2 + $0x2ea] sm:$0xff] }
 0x5c4   :  { %24593 = vmatpush3.bf16.msra.mxu0 %v24590_v1  ;;  %22521 = vmatprep.mubr.f32.mxu1 %v14428_v33  ;;  %v12840_v33 = vld [vmem:[#allocation2 + $0x25a] sm:$0xff] }
 0x5c5   :  { %24877 = vmatpush3.bf16.msra.mxu1 %v24586_v60  ;;  %24595 = vmatprep.subr.bf16.mxu0 %v24594_v15  ;;  %v14433_v60 = vld [vmem:[#allocation2 + $0x351] sm:$0xff] }
 0x5c6   :  { %22021 = vmatmul.mubr.f32.gmra.mrb[60].mxu0 %v12650_v54  ;;  %24879 = vmatprep.subr.bf16.mxu1 %v24590_v1  ;;  %v14619_v54 = vld [vmem:[#allocation2 + $0x302] sm:$0xff] }
 0x5c7   :  { %22522 = vmatmul.mubr.f32.gmra.mrb[58].mxu1 %v14429_v53  ;;  %22023 = vmatprep.mubr.f32.mxu0 %v12651_v47  ;;  %v14620_v53 = vld [vmem:[#allocation2 + $0x30a] sm:$0xff]  ;;  %v12842_v47 = vld [vmem:[#allocation2 + $0x272] sm:$0xff] }
 0x5c8   :  { %24597 = vmatpush3.bf16.msra.mxu0 %v24594_v15  ;;  %22524 = vmatprep.mubr.f32.mxu1 %v14430_v38  ;;  %v14621_v38 = vld [vmem:[#allocation2 + $0x31a] sm:$0xff] }
 0x5c9   :  { %24881 = vmatpush3.bf16.msra.mxu1 %v24590_v1  ;;  %24599 = vmatprep.subr.bf16.mxu0 %v24598_v31  ;;  %v14613_v1 = vld [vmem:[#allocation2 + $0x2ba] sm:$0xff] }
 0x5ca   :  { %22024 = vmatmul.mubr.f32.gmra.mrb[62].mxu0 %v12652_v23  ;;  %24883 = vmatprep.subr.bf16.mxu1 %v24594_v15  ;;  %v12843_v23 = vld [vmem:[#allocation2 + $0x27a] sm:$0xff] }
 0x5cb   :  { %22525 = vmatmul.mubr.f32.gmra.mrb[60].mxu1 %v14431_v8  ;;  %22058 = vmatprep.mubr.f32.mxu0 %v12830_v14  ;;  %v12844_v8 = vld [vmem:[#allocation2 + $0x28a] sm:$0xff]  ;;  %v12845_v14 = vld [vmem:[#allocation2 + $0x292] sm:$0xff] }
 0x5cc   :  { %24601 = vmatpush3.bf16.msra.mxu0 %v24598_v31  ;;  %22527 = vmatprep.mubr.f32.mxu1 %v14432_v7  ;;  %v14622_v7 = vld [vmem:[#allocation2 + $0x322] sm:$0xff] }
 0x5cd   :  { %24885 = vmatpush3.bf16.msra.mxu1 %v24594_v15  ;;  %v12838_v15 = vld [vmem:[#allocation2 + $0x242] sm:$0xff] }
 0x5ce   :  { %24887 = vmatprep.subr.bf16.mxu1 %v24598_v31 }
 0x5cf   :  { %22059 = vmatmul.mubr.f32.vlgmr.msra.gmra.mrb[48].mxu0 %v12831_v18  ;;  %22528 = vmatmul.mubr.f32.gmra.mrb[62].mxu1 %v14433_v60  ;;  %v14625_v60 = vld [vmem:[#allocation2 + $0x34a] sm:$0xff]  ;;  %v14626_v18 = vld [vmem:[#allocation2 + $0x352] sm:$0xff] }
 0x5d0   :  { %22061 = vmatprep.mubr.f32.mxu0 %v12832_v37  ;;  %22562 = vmatprep.mubr.f32.mxu1 %v14611_v26 }
 0x5d1   :  { %24889 = vmatpush3.bf16.msra.mxu1 %v24598_v31  ;;  %v12841_v31 = vld [vmem:[#allocation2 + $0x262] sm:$0xff] }
 0x5d3   :  { %22062 = vmatmul.mubr.f32.gmra.mrb[50].mxu0 %v12833_v16 }
 0x5d4   :  { %22563 = vmatmul.mubr.f32.vlgmr.msra.gmra.mrb[48].mxu1 %v14612_v48  ;;  %22064 = vmatprep.mubr.f32.mxu0 %v12834_v55 }
 0x5d5   :  { %22565 = vmatprep.mubr.f32.mxu1 %v14613_v1 }
 0x5d7   :  { %22065 = vmatmul.mubr.f32.gmra.mrb[52].mxu0 %v12835_v27 }
 0x5d8   :  { %22566 = vmatmul.mubr.f32.gmra.mrb[50].mxu1 %v14614_v52  ;;  %22067 = vmatprep.mubr.f32.mxu0 %v12836_v11 }
 0x5d9   :  { %22568 = vmatprep.mubr.f32.mxu1 %v14615_v0 }
 0x5db   :  { %22068 = vmatmul.mubr.f32.gmra.mrb[54].mxu0 %v12837_v57 }
 0x5dc   :  { %22569 = vmatmul.mubr.f32.gmra.mrb[52].mxu1 %v14616_v28  ;;  %22070 = vmatprep.mubr.f32.mxu0 %v12838_v15 }
 0x5dd   :  { %22571 = vmatprep.mubr.f32.mxu1 %v14617_v32 }
 0x5df   :  { %22071 = vmatmul.mubr.f32.gmra.mrb[56].mxu0 %v12839_v20 }
 0x5e0   :  { %22572 = vmatmul.mubr.f32.gmra.mrb[54].mxu1 %v14618_v9  ;;  %22073 = vmatprep.mubr.f32.mxu0 %v12840_v33 }
 0x5e1   :  { %22574 = vmatprep.mubr.f32.mxu1 %v14619_v54 }
 0x5e3   :  { %22074 = vmatmul.mubr.f32.gmra.mrb[58].mxu0 %v12841_v31 }
 0x5e4   :  { %22575 = vmatmul.mubr.f32.gmra.mrb[56].mxu1 %v14620_v53  ;;  %22076 = vmatprep.mubr.f32.mxu0 %v12842_v47 }
 0x5e5   :  { %22577 = vmatprep.mubr.f32.mxu1 %v14621_v38 }
 0x5e7   :  { %22077 = vmatmul.mubr.f32.gmra.mrb[60].mxu0 %v12843_v23 }
 0x5e8   :  { %22578 = vmatmul.mubr.f32.gmra.mrb[58].mxu1 %v14622_v7  ;;  %22079 = vmatprep.mubr.f32.mxu0 %v12844_v8 }
 0x5e9   :  { %22580 = vmatprep.mubr.f32.mxu1 %v30201_v13 }
 0x5eb   :  { %22080 = vmatmul.mubr.f32.gmra.mrb[62].mxu0 %v12845_v14 }
 0x5ec   :  { %22581 = vmatmul.mubr.f32.gmra.mrb[60].mxu1 %v30230_v24 }
 0x5ed   :  { %22583 = vmatprep.mubr.f32.mxu1 %v14625_v60 }
 0x5f0   :  { %22584 = vmatmul.mubr.f32.gmra.mrb[62].mxu1 %v14626_v18 }
 0x6a2   :  { %v30424_v37 = vpop.f32.mrb[48].mxu0 }
 0x6a3   :  { %v13062_v26 = vmul.f32 %v30424_v37, %v30424_v37  ;;  %v30428_v16 = vpop.f32.mrb[49].mxu0 }
 0x6a4   :  { %v13039_v48 = vadd.f32 %v30424_v37, %v30428_v16  ;;  %v13061_v13 = vmul.f32 %v30428_v16, %v30428_v16 }
 0x6a6   :  { %v13077_v55 = vadd.f32 %v13062_v26, %v13061_v13  ;;  %v30434_v1 = vpop.f32.mrb[50].mxu0 }
 0x6a7   :  { %31208 = vst [vmem:[#allocation8_spill] sm:$0xff] %v30434_v1  ;;  %v30436_v24 = vpop.f32.mrb[48].mxu1  ;;  %v30438_v27 = vpop.f32.mrb[51].mxu0  ;;  %v13064_v32 = vmul.f32 %v30434_v1, %v30434_v1 }
 0x6a8   :  { %31209 = vst [vmem:[#allocation6_spill] sm:$0xff] %v30436_v24  ;;  %v14843_v52 = vmul.f32 %v30436_v24, %v30436_v24  ;;  %v13040_v11 = vadd.f32 %v13039_v48, %v30438_v27  ;;  %v13063_v0 = vmul.f32 %v30438_v27, %v30438_v27  ;;  %v30445_v57 = vpop.f32.mrb[49].mxu1 }
 0x6a9   :  { %31210 = vst [vmem:[#allocation13_spill] sm:$0xff] %v30445_v57  ;;  %v14820_v28 = vadd.f32 %v30436_v24, %v30445_v57  ;;  %v14842_v15 = vmul.f32 %v30445_v57, %v30445_v57 }
 0x6aa   :  { %v13078_v20 = vadd.f32 %v13077_v55, %v13063_v0  ;;  %v30453_v9 = vpop.f32.mrb[52].mxu0  ;;  %v13041_v33 = vadd.f32 %v30434_v1, %v13040_v11 }
 0x6ab   :  { %31211 = vst [vmem:[#allocation10_spill] sm:$0xff] %v30453_v9  ;;  %v14858_v54 = vadd.f32 %v14843_v52, %v14842_v15  ;;  %v30456_v31 = vpop.f32.mrb[50].mxu1  ;;  %v30458_v53 = vpop.f32.mrb[53].mxu0  ;;  %v13066_v60 = vmul.f32 %v30453_v9, %v30453_v9 }
 0x6ac   :  { %31212 = vst [vmem:[#allocation18_spill] sm:$0xff] %v30456_v31  ;;  %31213 = vst [vmem:[#allocation16_spill] sm:$0xff] %v30458_v53  ;;  %v13042_v47 = vadd.f32 %v13041_v33, %v30458_v53  ;;  %v13065_v38 = vmul.f32 %v30458_v53, %v30458_v53  ;;  %v13079_v23 = vadd.f32 %v13078_v20, %v13064_v32  ;;  %v30463_v7 = vpop.f32.mrb[51].mxu1 }
 0x6ad   :  { %31214 = vst [vmem:[#allocation23_spill] sm:$0xff] %v30463_v7  ;;  %v14821_v8 = vadd.f32 %v14820_v28, %v30463_v7  ;;  %v14844_v14 = vmul.f32 %v30463_v7, %v30463_v7  ;;  %v14845_v13 = vmul.f32 %v30456_v31, %v30456_v31 }
 0x6ae   :  { %v13080_v18 = vadd.f32 %v13079_v23, %v13065_v38  ;;  %v30470_v26 = vpop.f32.mrb[54].mxu0  ;;  %v13043_v48 = vadd.f32 %v30453_v9, %v13042_v47 }
 0x6af   :  { %31215 = vst [vmem:[#allocation21_spill] sm:$0xff] %v30470_v26  ;;  %v14859_v55 = vadd.f32 %v14858_v54, %v14844_v14  ;;  %v30475_v52 = vpop.f32.mrb[52].mxu1  ;;  %v30477_v11 = vpop.f32.mrb[55].mxu0  ;;  %v14822_v0 = vadd.f32 %v30456_v31, %v14821_v8  ;;  %v13068_v38 = vmul.f32 %v30470_v26, %v30470_v26 }
 0x6b0   :  { %31216 = vst [vmem:[#allocation28_spill] sm:$0xff] %v30475_v52  ;;  %31217 = vst [vmem:[#allocation26_spill] sm:$0xff] %v30477_v11  ;;  %v13044_v28 = vadd.f32 %v13043_v48, %v30477_v11  ;;  %v13067_v15 = vmul.f32 %v30477_v11, %v30477_v11  ;;  %v13081_v32 = vadd.f32 %v13080_v18, %v13066_v60  ;;  %v30483_v20 = vpop.f32.mrb[53].mxu1 }
 0x6b1   :  { %31218 = vst [vmem:[#allocation33_spill] sm:$0xff] %v30483_v20  ;;  %v14823_v33 = vadd.f32 %v14822_v0, %v30483_v20  ;;  %v14846_v47 = vmul.f32 %v30483_v20, %v30483_v20  ;;  %v14860_v54 = vadd.f32 %v14859_v55, %v14845_v13  ;;  %v14847_v48 = vmul.f32 %v30475_v52, %v30475_v52 }
 0x6b2   :  { %v13082_v23 = vadd.f32 %v13081_v32, %v13067_v15  ;;  %v30490_v14 = vpop.f32.mrb[56].mxu0  ;;  %v13045_v8 = vadd.f32 %v30470_v26, %v13044_v28 }
 0x6b3   :  { %31219 = vst [vmem:[#allocation31_spill] sm:$0xff] %v30490_v14  ;;  %v14861_v60 = vadd.f32 %v14860_v54, %v14846_v47  ;;  %v30495_v18 = vpop.f32.mrb[54].mxu1  ;;  %v30497_v31 = vpop.f32.mrb[57].mxu0  ;;  %v14824_v0 = vadd.f32 %v30475_v52, %v14823_v33  ;;  %v13070_v54 = vmul.f32 %v30490_v14, %v30490_v14 }
 0x6b4   :  { %31220 = vst [vmem:[#allocation37_spill] sm:$0xff] %v30495_v18  ;;  %31221 = vst [vmem:[#allocation35_spill] sm:$0xff] %v30497_v31  ;;  %v13046_v13 = vadd.f32 %v13045_v8, %v30497_v31  ;;  %v13069_v55 = vmul.f32 %v30497_v31, %v30497_v31  ;;  %v13083_v15 = vadd.f32 %v13082_v23, %v13068_v38  ;;  %v30503_v32 = vpop.f32.mrb[55].mxu1 }
 0x6b5   :  { %31222 = vst [vmem:[#allocation39_spill] sm:$0xff] %v30503_v32  ;;  %v14825_v28 = vadd.f32 %v14824_v0, %v30503_v32  ;;  %v14848_v20 = vmul.f32 %v30503_v32, %v30503_v32  ;;  %v14862_v47 = vadd.f32 %v14861_v60, %v14847_v48  ;;  %v14849_v8 = vmul.f32 %v30495_v18, %v30495_v18 }
 0x6b6   :  { %v13084_v7 = vadd.f32 %v13083_v15, %v13069_v55  ;;  %v30510_v24 = vpop.f32.mrb[58].mxu0  ;;  %v13047_v33 = vadd.f32 %v30490_v14, %v13046_v13 }
 0x6b7   :  { %31223 = vst [vmem:[#allocation4_spill] sm:$0xff] %v30510_v24  ;;  %v14863_v38 = vadd.f32 %v14862_v47, %v14848_v20  ;;  %v30515_v23 = vpop.f32.mrb[56].mxu1  ;;  %v30517_v52 = vpop.f32.mrb[59].mxu0  ;;  %v14826_v0 = vadd.f32 %v30495_v18, %v14825_v28  ;;  %v13072_v47 = vmul.f32 %v30510_v24, %v30510_v24 }
 0x6b8   :  { %31224 = vst [vmem:[#allocation3_spill] sm:$0xff] %v30515_v23  ;;  %31225 = vst [vmem:[#allocation5_spill] sm:$0xff] %v30517_v52  ;;  %v13048_v48 = vadd.f32 %v13047_v33, %v30517_v52  ;;  %v13071_v60 = vmul.f32 %v30517_v52, %v30517_v52  ;;  %v13085_v55 = vadd.f32 %v13084_v7, %v13070_v54  ;;  %v30523_v15 = vpop.f32.mrb[57].mxu1 }
 0x6b9   :  { %31226 = vst [vmem:[#allocation7_spill] sm:$0xff] %v30523_v15  ;;  %v14827_v13 = vadd.f32 %v14826_v0, %v30523_v15  ;;  %v14850_v32 = vmul.f32 %v30523_v15, %v30523_v15  ;;  %v14864_v20 = vadd.f32 %v14863_v38, %v14849_v8  ;;  %v14851_v33 = vmul.f32 %v30515_v23, %v30515_v23 }
 0x6ba   :  { %v13086_v57 = vadd.f32 %v13085_v55, %v13071_v60  ;;  %v30530_v14 = vpop.f32.mrb[60].mxu0  ;;  %v13049_v28 = vadd.f32 %v30510_v24, %v13048_v48 }
 0x6bb   :  { %31227 = vst [vmem:[#allocation12_spill] sm:$0xff] %v30530_v14  ;;  %v14865_v7 = vadd.f32 %v14864_v20, %v14850_v32  ;;  %v30535_v54 = vpop.f32.mrb[58].mxu1  ;;  %v30537_v18 = vpop.f32.mrb[61].mxu0  ;;  %v14828_v0 = vadd.f32 %v30515_v23, %v14827_v13  ;;  %v13074_v20 = vmul.f32 %v30530_v14, %v30530_v14 }
 0x6bc   :  { %31228 = vst [vmem:[#allocation9_spill] sm:$0xff] %v30535_v54  ;;  %31229 = vst [vmem:[#allocation17_spill] sm:$0xff] %v30537_v18  ;;  %v13050_v8 = vadd.f32 %v13049_v28, %v30537_v18  ;;  %v13073_v38 = vmul.f32 %v30537_v18, %v30537_v18  ;;  %v13087_v60 = vadd.f32 %v13086_v57, %v13072_v47  ;;  %v30543_v55 = vpop.f32.mrb[59].mxu1 }
 0x6bd   :  { %31230 = vst [vmem:[#allocation15_spill] sm:$0xff] %v30543_v55  ;;  %v14829_v48 = vadd.f32 %v14828_v0, %v30543_v55  ;;  %v14852_v15 = vmul.f32 %v30543_v55, %v30543_v55  ;;  %v14866_v32 = vadd.f32 %v14865_v7, %v14851_v33  ;;  %v14853_v28 = vmul.f32 %v30535_v54, %v30535_v54 }
 0x6be   :  { %v13088_v24 = vadd.f32 %v13087_v60, %v13073_v38  ;;  %v30550_v52 = vpop.f32.mrb[62].mxu0  ;;  %v13051_v13 = vadd.f32 %v30530_v14, %v13050_v8 }
 0x6bf   :  { %31231 = vst [vmem:[#allocation22_spill] sm:$0xff] %v30550_v52  ;;  %v14867_v57 = vadd.f32 %v14866_v32, %v14852_v15  ;;  %v30555_v47 = vpop.f32.mrb[60].mxu1  ;;  %v30557_v23 = vpop.f32.mrb[63].mxu0  ;;  %v14830_v0 = vadd.f32 %v30535_v54, %v14829_v48  ;;  %v13076_v32 = vmul.f32 %v30550_v52, %v30550_v52 }
 0x6c0   :  { %31232 = vst [vmem:[#allocation20_spill] sm:$0xff] %v30555_v47  ;;  %31233 = vst [vmem:[#allocation27_spill] sm:$0xff] %v30557_v23  ;;  %v13052_v33 = vadd.f32 %v13051_v13, %v30557_v23  ;;  %v13075_v7 = vmul.f32 %v30557_v23, %v30557_v23  ;;  %v13089_v38 = vadd.f32 %v13088_v24, %v13074_v20  ;;  %v30563_v60 = vpop.f32.mrb[61].mxu1 }
 0x6c1   :  { %31234 = vst [vmem:[#allocation25_spill] sm:$0xff] %v30563_v60  ;;  %v14831_v8 = vadd.f32 %v14830_v0, %v30563_v60  ;;  %v14854_v55 = vmul.f32 %v30563_v60, %v30563_v60  ;;  %v14868_v15 = vadd.f32 %v14867_v57, %v14853_v28  ;;  %v14855_v13 = vmul.f32 %v30555_v47, %v30555_v47 }
 0x6c2   :  { %v13053_v14 = vadd.f32 %v30550_v52, %v13052_v33  ;;  %v13090_v48 = vadd.f32 %v13089_v38, %v13075_v7 }
 0x6c3   :  { %v14869_v54 = vadd.f32 %v14868_v15, %v14854_v55  ;;  %v30573_v23 = vpop.f32.mrb[62].mxu1  ;;  %v14832_v24 = vadd.f32 %v30555_v47, %v14831_v8 }
 0x6c4   :  { %v13054_v20 = vrot.slane %v13053_v14, 4  ;;  %v13091_v0 = vadd.f32 %v13090_v48, %v13076_v32  ;;  %v30576_v18 = vpop.f32.mrb[63].mxu1  ;;  %v14857_v38 = vmul.f32 %v30573_v23, %v30573_v23 }
 0x6c5   :  { %31235 = vst [vmem:[#allocation32_spill] sm:$0xff] %v30576_v18  ;;  %v14833_v28 = vadd.f32 %v14832_v24, %v30576_v18  ;;  %v14856_v57 = vmul.f32 %v30576_v18, %v30576_v18  ;;  %v14870_v60 = vadd.f32 %v14869_v54, %v14855_v13 }
 0x6c6   :  { %v13055_v33 = vadd.f32 %v13054_v20, %v13053_v14  ;;  %v13092_v7 = vrot.slane %v13091_v0, 4 }
 0x6c7   :  { %v14834_v55 = vadd.f32 %v30573_v23, %v14833_v28  ;;  %v14871_v15 = vadd.f32 %v14870_v60, %v14856_v57 }
 0x6c8   :  { %v13056_v52 = vrot.slane %v13055_v33, 2  ;;  %v13093_v8 = vadd.f32 %v13092_v7, %v13091_v0 }
 0x6c9   :  { %v14835_v47 = vrot.slane %v14834_v55, 4  ;;  %v14872_v32 = vadd.f32 %v14871_v15, %v14857_v38 }
 0x6ca   :  { %v13057_v48 = vadd.f32 %v13056_v52, %v13055_v33  ;;  %v13094_v31 = vrot.slane %v13093_v8, 2 }
 0x6cb   :  { %v14836_v26 = vadd.f32 %v14835_v47, %v14834_v55  ;;  %v14873_v24 = vrot.slane %v14872_v32, 4 }
 0x6cc   :  { %v13058_v11 = vrot.slane %v13057_v48, 1  ;;  %v13095_v9 = vadd.f32 %v13094_v31, %v13093_v8 }
 0x6cd   :  { %v14837_v18 = vrot.slane %v14836_v26, 2  ;;  %v14874_v54 = vadd.f32 %v14873_v24, %v14872_v32 }
 0x6ce   :  { %v13059_v14 = vadd.f32 %v13058_v11, %v13057_v48  ;;  %v13096_v13 = vrot.slane %v13095_v9, 1 }
 0x6cf   :  { %v14838_v20 = vadd.f32 %v14837_v18, %v14836_v26  ;;  %v14875_v53 = vrot.slane %v14874_v54, 2  ;;  %v31236_v26 = vld [vmem:[#allocation41_spill] sm:$0xff] }
 0x6d0   :  { %v13060_v1 = vadd.f32 %v13059_v14, %v30382_v34  ;;  %v13097_v28 = vadd.f32 %v13096_v13, %v13095_v9  ;;  %v14880_v34 = vld [vmem:[%s31005_s5] sm:$0x1] }
 0x6d1   :  { %v14839_v60 = vrot.slane %v14838_v20, 1  ;;  %v14876_v57 = vadd.f32 %v14875_v53, %v14874_v54 }
 0x6d2   :  { %v13098_v0 = vadd.f32 %v13097_v28, %v30390_v4  ;;  %v14881_v4 = vld [vmem:[%s31006_s6] sm:$0x1] }
 0x6d3   :  { %v14840_v7 = vadd.f32 %v14839_v60, %v14838_v20  ;;  %v14877_v52 = vrot.slane %v14876_v57, 1 }
 0x6d5   :  { %v14841_v33 = vadd.f32 %v14840_v7, %v13060_v1  ;;  %v14878_v47 = vadd.f32 %v14877_v52, %v14876_v57 }
 0x6d7   :  { %v14879_v38 = vadd.f32 %v14878_v47, %v13098_v0  ;;  %v14882_v55 = vmul.f32 0.001953125, %v14841_v33 }
 0x6d9   :  { %v14883_v31 = vmul.f32 0.001953125, %v14879_v38  ;;  %v14884_v15 = vmul.f32 %v14882_v55, %v14882_v55 }
 0x6db   :  { %v14885_v8 = vsub.f32 %v14883_v31, %v14884_v15 }
 0x6dd   :  { %v14886_v11 = vmax.f32 %v14885_v8, 0.0 }
 0x6df   :  { %v14887_v32 = vadd.f32 1e-05, %v14886_v11 }
 0x6e1   :  { %25917 = vrsqrt.f32 %v14887_v32 }
 0x6eb   :  { %v25918_v9 = vpop.eup %25917 }
 0x6ec   :  { %v14889_v53 = vmul.f32 %v25918_v9, %v14880_v34 }
 0x6ee   :  { %v14890_v1 = vmul.f32 %v14889_v53, %v14882_v55  ;;  %v30593_v18 = vrot.slane %v14889_v53, %v31236_v26 }
 0x6f0   :  { %v14891_v48 = vsub.f32 %v14881_v4, %v14890_v1  ;;  %v14912_v24 = vmul.f32 %v30593_v18, %v30082_v61  ;;  %v14913_v54 = vmul.f32 %v30077_v43, %v30593_v18  ;;  %v14914_v14 = vmul.f32 %v30593_v18, %v30104_v29 }
 0x6f1   :  { %v14915_v13 = vmul.f32 %v30099_v63, %v30593_v18  ;;  %v14916_v20 = vmul.f32 %v30593_v18, %v30141_v25  ;;  %v14917_v28 = vmul.f32 %v30129_v58, %v30593_v18  ;;  %v14918_v60 = vmul.f32 %v30593_v18, %v30179_v39 }
 0x6f2   :  { %v14919_v61 = vmul.f32 %v30166_v49, %v30593_v18  ;;  %v14920_v43 = vmul.f32 %v30593_v18, %v30215_v40  ;;  %v14921_v29 = vmul.f32 %v30203_v22, %v30593_v18  ;;  %v14922_v63 = vmul.f32 %v30593_v18, %v30250_v10 }
 0x6f3   :  { %v14923_v25 = vmul.f32 %v30239_v41, %v30593_v18  ;;  %v14924_v58 = vmul.f32 %v30593_v18, %v30281_v46  ;;  %v14925_v39 = vmul.f32 %v30271_v21, %v30593_v18  ;;  %v14926_v49 = vmul.f32 %v30593_v18, %v30305_v44 }
 0x6f4   :  { %v14927_v40 = vmul.f32 %v30297_v6, %v30593_v18  ;;  %v30628_v22 = vrot.slane %v14891_v48, %v31236_v26  ;;  %v30632_v10 = vmul.f32 %v30593_v18, %v30114_v36  ;;  %v30636_v41 = vmul.f32 %v30102_v62, %v30593_v18 }
 0x6f5   :  { %v30640_v21 = vmul.f32 %v30593_v18, %v30156_v5  ;;  %v30644_v46 = vmul.f32 %v30139_v59, %v30593_v18  ;;  %v30648_v6 = vmul.f32 %v30593_v18, %v30194_v42  ;;  %v30652_v36 = vmul.f32 %v30177_v2, %v30593_v18 }
 0x6f6   :  { %v14934_v44 = vadd.f32 %v30628_v22, %v14912_v24  ;;  %v14935_v62 = vadd.f32 %v30628_v22, %v14913_v54  ;;  %v14936_v57 = vadd.f32 %v30628_v22, %v14914_v14  ;;  %v14937_v5 = vadd.f32 %v30628_v22, %v14915_v13 }
 0x6f7   :  { %v14938_v0 = vadd.f32 %v30628_v22, %v14916_v20  ;;  %v14939_v59 = vadd.f32 %v30628_v22, %v14917_v28  ;;  %v14940_v7 = vadd.f32 %v30628_v22, %v14918_v60  ;;  %v14941_v42 = vadd.f32 %v30628_v22, %v14919_v61 }
 0x6f8   :  { %v14942_v52 = vadd.f32 %v30628_v22, %v14920_v43  ;;  %v14943_v2 = vadd.f32 %v30628_v22, %v14921_v29  ;;  %v14944_v33 = vadd.f32 %v30628_v22, %v14922_v63  ;;  %v14945_v47 = vadd.f32 %v30628_v22, %v14923_v25 }
 0x6f9   :  { %v14946_v38 = vadd.f32 %v30628_v22, %v14924_v58  ;;  %v14947_v55 = vadd.f32 %v30628_v22, %v14925_v39  ;;  %v14948_v31 = vadd.f32 %v30628_v22, %v14926_v49  ;;  %v14949_v15 = vadd.f32 %v30628_v22, %v14927_v40 }
 0x6fa   :  { %v14950_v8 = vmax.f32 %v14934_v44, 0.0  ;;  %v14951_v11 = vmax.f32 %v14935_v62, 0.0  ;;  %v14952_v32 = vmax.f32 %v14936_v57, 0.0  ;;  %v14953_v34 = vmax.f32 %v14937_v5, 0.0 }
 0x6fb   :  { %v14954_v9 = vmax.f32 %v14938_v0, 0.0  ;;  %v14955_v53 = vmax.f32 %v14939_v59, 0.0  ;;  %v14956_v4 = vmax.f32 %v14940_v7, 0.0  ;;  %v14957_v1 = vmax.f32 %v14941_v42, 0.0 }
 0x6fc   :  { %v14958_v26 = vmax.f32 %v14942_v52, 0.0  ;;  %v14959_v48 = vmax.f32 %v14943_v2, 0.0  ;;  %v14960_v24 = vmax.f32 %v14944_v33, 0.0  ;;  %v14961_v54 = vmax.f32 %v14945_v47, 0.0  ;;  %14966 = vst [vmem:[%s31007_s7] sm:$0xff] %v14950_v8  ;;  %14967 = vst [vmem:[%s31007_s7 + $0x8] sm:$0xff] %v14951_v11 }
 0x6fd   :  { %14968 = vst [vmem:[%s31007_s7 + $0x10] sm:$0xff] %v14952_v32  ;;  %14969 = vst [vmem:[%s31007_s7 + $0x18] sm:$0xff] %v14953_v34  ;;  %v14962_v14 = vmax.f32 %v14946_v38, 0.0  ;;  %v14963_v13 = vmax.f32 %v14947_v55, 0.0  ;;  %v14964_v20 = vmax.f32 %v14948_v31, 0.0  ;;  %v14965_v28 = vmax.f32 %v14949_v15, 0.0 }
 0x6fe   :  { %14970 = vst [vmem:[%s31007_s7 + $0x20] sm:$0xff] %v14954_v9  ;;  %14971 = vst [vmem:[%s31007_s7 + $0x28] sm:$0xff] %v14955_v53  ;;  %v15004_v60 = vmul.f32 %v30593_v18, %v30228_v30  ;;  %v15005_v61 = vmul.f32 %v30213_v17, %v30593_v18  ;;  %v15006_v43 = vmul.f32 %v30593_v18, %v30262_v12  ;;  %v31238_v34 = vld [vmem:[#allocation16_spill] sm:$0xff]  ;;  %v31239_v53 = vld [vmem:[#allocation10_spill] sm:$0xff] }
 0x6ff   :  { %14972 = vst [vmem:[%s31007_s7 + $0x30] sm:$0xff] %v14956_v4  ;;  %14973 = vst [vmem:[%s31007_s7 + $0x38] sm:$0xff] %v14957_v1  ;;  %v15007_v29 = vmul.f32 %v30248_v51, %v30593_v18  ;;  %v15008_v17 = vmul.f32 %v30593_v18, %v30287_v19  ;;  %v15009_v30 = vmul.f32 %v30279_v56, %v30593_v18  ;;  %v31240_v1 = vld [vmem:[#allocation26_spill] sm:$0xff] }
 0x700   :  { %14974 = vst [vmem:[%s31007_s7 + $0x40] sm:$0xff] %v14958_v26  ;;  %14975 = vst [vmem:[%s31007_s7 + $0x48] sm:$0xff] %v14959_v48  ;;  %v15010_v51 = vmul.f32 %v30593_v18, %v30311_v3  ;;  %v15011_v12 = vmul.f32 %v30303_v50, %v30593_v18  ;;  %v15012_v63 = vmul.f32 %v30593_v18, %v30336_v35  ;;  %v31241_v26 = vld [vmem:[#allocation21_spill] sm:$0xff] }
 0x701   :  { %14976 = vst [vmem:[%s31007_s7 + $0x50] sm:$0xff] %v14960_v24  ;;  %14977 = vst [vmem:[%s31007_s7 + $0x58] sm:$0xff] %v14961_v54  ;;  %v15013_v25 = vmul.f32 %v30331_v45, %v30593_v18  ;;  %v15014_v58 = vadd.f32 %v30632_v10, %v30628_v22  ;;  %v15015_v19 = vadd.f32 %v30636_v41, %v30628_v22  ;;  %v31242_v24 = vld [vmem:[#allocation35_spill] sm:$0xff] }
 0x702   :  { %14978 = vst [vmem:[%s31007_s7 + $0x60] sm:$0xff] %v14962_v14  ;;  %14979 = vst [vmem:[%s31007_s7 + $0x68] sm:$0xff] %v14963_v13  ;;  %v15016_v56 = vadd.f32 %v30640_v21, %v30628_v22  ;;  %v15017_v3 = vadd.f32 %v30644_v46, %v30628_v22  ;;  %v15018_v50 = vadd.f32 %v30648_v6, %v30628_v22  ;;  %v31243_v14 = vld [vmem:[#allocation31_spill] sm:$0xff] }
 0x703   :  { %14980 = vst [vmem:[%s31007_s7 + $0x70] sm:$0xff] %v14964_v20  ;;  %14981 = vst [vmem:[%s31007_s7 + $0x78] sm:$0xff] %v14965_v28  ;;  %v15019_v35 = vadd.f32 %v30652_v36, %v30628_v22  ;;  %v15020_v45 = vadd.f32 %v15004_v60, %v30628_v22  ;;  %v15021_v39 = vadd.f32 %v15005_v61, %v30628_v22  ;;  %v15030_v44 = vmax.f32 %v15014_v58, 0.0  ;;  %v31244_v20 = vld [vmem:[#allocation5_spill] sm:$0xff]  ;;  %v31245_v60 = vld [vmem:[#allocation4_spill] sm:$0xff] }
 0x704   :  { %v15022_v49 = vadd.f32 %v15006_v43, %v30628_v22  ;;  %v15023_v40 = vadd.f32 %v15007_v29, %v30628_v22  ;;  %v15024_v10 = vadd.f32 %v15008_v17, %v30628_v22  ;;  %v15025_v41 = vadd.f32 %v15009_v30, %v30628_v22  ;;  %v31246_v43 = vld [vmem:[#allocation17_spill] sm:$0xff]  ;;  %v31247_v17 = vld [vmem:[#allocation12_spill] sm:$0xff] }
 0x705   :  { %v15026_v21 = vadd.f32 %v15010_v51, %v30628_v22  ;;  %v15027_v46 = vadd.f32 %v15011_v12, %v30628_v22  ;;  %v15028_v6 = vadd.f32 %v15012_v63, %v30628_v22  ;;  %v15029_v36 = vadd.f32 %v15013_v25, %v30628_v22  ;;  %15046 = vst [vmem:[%s31007_s7 + $0x80] sm:$0xff] %v15030_v44  ;;  %v31248_v51 = vld [vmem:[#allocation27_spill] sm:$0xff]  ;;  %v31249_v63 = vld [vmem:[#allocation22_spill] sm:$0xff] }
 0x706   :  { %v15031_v62 = vmax.f32 %v15015_v19, 0.0  ;;  %v15032_v57 = vmax.f32 %v15016_v56, 0.0  ;;  %v15033_v5 = vmax.f32 %v15017_v3, 0.0  ;;  %v15034_v0 = vmax.f32 %v15018_v50, 0.0 }
 0x707   :  { %v15035_v59 = vmax.f32 %v15019_v35, 0.0  ;;  %v15036_v7 = vmax.f32 %v15020_v45, 0.0  ;;  %v15037_v42 = vmax.f32 %v15021_v39, 0.0  ;;  %v15038_v52 = vmax.f32 %v15022_v49, 0.0 }
 0x708   :  { %v15039_v2 = vmax.f32 %v15023_v40, 0.0  ;;  %15047 = vst [vmem:[%s31007_s7 + $0x88] sm:$0xff] %v15031_v62  ;;  %v15040_v33 = vmax.f32 %v15024_v10, 0.0  ;;  %v15041_v47 = vmax.f32 %v15025_v41, 0.0  ;;  %v15042_v38 = vmax.f32 %v15026_v21, 0.0  ;;  %15048 = vst [vmem:[%s31007_s7 + $0x90] sm:$0xff] %v15032_v57 }
 0x709   :  { %v15043_v55 = vmax.f32 %v15027_v46, 0.0  ;;  %15049 = vst [vmem:[%s31007_s7 + $0x98] sm:$0xff] %v15033_v5  ;;  %15050 = vst [vmem:[%s31007_s7 + $0xa0] sm:$0xff] %v15034_v0  ;;  %v15044_v31 = vmax.f32 %v15028_v6, 0.0  ;;  %v15045_v15 = vmax.f32 %v15029_v36, 0.0  ;;  %v15078_v8 = vmul.f32 %v30593_v18, %v30428_v16 }
 0x70a   :  { %15051 = vst [vmem:[%s31007_s7 + $0xa8] sm:$0xff] %v15035_v59  ;;  %15052 = vst [vmem:[%s31007_s7 + $0xb0] sm:$0xff] %v15036_v7  ;;  %v15079_v11 = vmul.f32 %v30424_v37, %v30593_v18  ;;  %v15080_v16 = vmul.f32 %v30593_v18, %v30438_v27  ;;  %v31237_v37 = vld [vmem:[#allocation8_spill] sm:$0xff]  ;;  %v15082_v9 = vmul.f32 %v30593_v18, %v31238_v34 }
 0x70b   :  { %15053 = vst [vmem:[%s31007_s7 + $0xb8] sm:$0xff] %v15037_v42  ;;  %15054 = vst [vmem:[%s31007_s7 + $0xc0] sm:$0xff] %v15038_v52  ;;  %v15081_v32 = vmul.f32 %v31237_v37, %v30593_v18  ;;  %v15083_v4 = vmul.f32 %v31239_v53, %v30593_v18  ;;  %v15084_v27 = vmul.f32 %v30593_v18, %v31240_v1 }
 0x70c   :  { %15055 = vst [vmem:[%s31007_s7 + $0xc8] sm:$0xff] %v15039_v2  ;;  %15056 = vst [vmem:[%s31007_s7 + $0xd0] sm:$0xff] %v15040_v33  ;;  %v15085_v48 = vmul.f32 %v31241_v26, %v30593_v18  ;;  %v15086_v54 = vmul.f32 %v30593_v18, %v31242_v24  ;;  %v15087_v13 = vmul.f32 %v31243_v14, %v30593_v18 }
 0x70d   :  { %15057 = vst [vmem:[%s31007_s7 + $0xd8] sm:$0xff] %v15041_v47  ;;  %15058 = vst [vmem:[%s31007_s7 + $0xe0] sm:$0xff] %v15042_v38  ;;  %v15088_v28 = vmul.f32 %v30593_v18, %v31244_v20  ;;  %v15089_v61 = vmul.f32 %v31245_v60, %v30593_v18  ;;  %v15090_v29 = vmul.f32 %v30593_v18, %v31246_v43 }
 0x70e   :  { %15059 = vst [vmem:[%s31007_s7 + $0xe8] sm:$0xff] %v15043_v55  ;;  %15060 = vst [vmem:[%s31007_s7 + $0xf0] sm:$0xff] %v15044_v31  ;;  %v15091_v30 = vmul.f32 %v31247_v17, %v30593_v18  ;;  %v15092_v12 = vmul.f32 %v30593_v18, %v31248_v51  ;;  %v15093_v25 = vmul.f32 %v31249_v63, %v30593_v18 }
 0x70f   :  { %15061 = vst [vmem:[%s31007_s7 + $0xf8] sm:$0xff] %v15045_v15  ;;  %v15094_v58 = vadd.f32 %v15078_v8, %v30628_v22  ;;  %v15095_v19 = vadd.f32 %v15079_v11, %v30628_v22  ;;  %v15096_v56 = vadd.f32 %v15080_v16, %v30628_v22  ;;  %v15097_v3 = vadd.f32 %v15081_v32, %v30628_v22  ;;  %v31250_v8 = vld [vmem:[#allocation13_spill] sm:$0xff]  ;;  %v31251_v16 = vld [vmem:[#allocation6_spill] sm:$0xff]  ;;  %v31252_v32 = vld [vmem:[#allocation23_spill] sm:$0xff] }
 0x710   :  { %v15098_v50 = vadd.f32 %v15082_v9, %v30628_v22  ;;  %v15099_v35 = vadd.f32 %v15083_v4, %v30628_v22  ;;  %v15100_v45 = vadd.f32 %v15084_v27, %v30628_v22  ;;  %v15101_v39 = vadd.f32 %v15085_v48, %v30628_v22  ;;  %v31253_v9 = vld [vmem:[#allocation18_spill] sm:$0xff]  ;;  %v31254_v4 = vld [vmem:[#allocation33_spill] sm:$0xff]  ;;  %v31255_v27 = vld [vmem:[#allocation28_spill] sm:$0xff] }
 0x711   :  { %v15102_v49 = vadd.f32 %v15086_v54, %v30628_v22  ;;  %v15103_v40 = vadd.f32 %v15087_v13, %v30628_v22  ;;  %v15104_v10 = vadd.f32 %v15088_v28, %v30628_v22  ;;  %v15105_v41 = vadd.f32 %v15089_v61, %v30628_v22  ;;  %v31256_v48 = vld [vmem:[#allocation39_spill] sm:$0xff]  ;;  %v31257_v54 = vld [vmem:[#allocation37_spill] sm:$0xff] }
 0x712   :  { %v15106_v21 = vadd.f32 %v15090_v29, %v30628_v22  ;;  %v15107_v46 = vadd.f32 %v15091_v30, %v30628_v22  ;;  %v15108_v6 = vadd.f32 %v15092_v12, %v30628_v22  ;;  %v15109_v36 = vadd.f32 %v15093_v25, %v30628_v22  ;;  %v31258_v13 = vld [vmem:[#allocation7_spill] sm:$0xff]  ;;  %v31261_v29 = vld [vmem:[#allocation9_spill] sm:$0xff]  ;;  %v31263_v12 = vld [vmem:[#allocation20_spill] sm:$0xff] }
 0x713   :  { %v15110_v44 = vmax.f32 %v15094_v58, 0.0  ;;  %v15111_v62 = vmax.f32 %v15095_v19, 0.0  ;;  %v15112_v57 = vmax.f32 %v15096_v56, 0.0  ;;  %v15113_v5 = vmax.f32 %v15097_v3, 0.0  ;;  %v31259_v28 = vld [vmem:[#allocation3_spill] sm:$0xff]  ;;  %v31262_v30 = vld [vmem:[#allocation25_spill] sm:$0xff] }
 0x714   :  { %v15114_v0 = vmax.f32 %v15098_v50, 0.0  ;;  %v15115_v59 = vmax.f32 %v15099_v35, 0.0  ;;  %v15116_v7 = vmax.f32 %v15100_v45, 0.0  ;;  %v15117_v42 = vmax.f32 %v15101_v39, 0.0  ;;  %v31260_v61 = vld [vmem:[#allocation15_spill] sm:$0xff]  ;;  %v31264_v25 = vld [vmem:[#allocation32_spill] sm:$0xff] }
 0x715   :  { %v15118_v52 = vmax.f32 %v15102_v49, 0.0  ;;  %v15119_v2 = vmax.f32 %v15103_v40, 0.0  ;;  %15126 = vst [vmem:[%s31007_s7 + $0x100] sm:$0xff] %v15110_v44  ;;  %15127 = vst [vmem:[%s31007_s7 + $0x108] sm:$0xff] %v15111_v62  ;;  %v15120_v33 = vmax.f32 %v15104_v10, 0.0  ;;  %v15121_v47 = vmax.f32 %v15105_v41, 0.0 }
 0x716   :  { %v15122_v38 = vmax.f32 %v15106_v21, 0.0  ;;  %v15123_v55 = vmax.f32 %v15107_v46, 0.0  ;;  %15128 = vst [vmem:[%s31007_s7 + $0x110] sm:$0xff] %v15112_v57  ;;  %15129 = vst [vmem:[%s31007_s7 + $0x118] sm:$0xff] %v15113_v5  ;;  %v15124_v31 = vmax.f32 %v15108_v6, 0.0  ;;  %v15125_v15 = vmax.f32 %v15109_v36, 0.0 }
 0x717   :  { %15130 = vst [vmem:[%s31007_s7 + $0x120] sm:$0xff] %v15114_v0  ;;  %15131 = vst [vmem:[%s31007_s7 + $0x128] sm:$0xff] %v15115_v59  ;;  %v15158_v11 = vmul.f32 %v30593_v18, %v31250_v8  ;;  %v15159_v37 = vmul.f32 %v31251_v16, %v30593_v18  ;;  %v15160_v34 = vmul.f32 %v30593_v18, %v31252_v32 }
 0x718   :  { %15132 = vst [vmem:[%s31007_s7 + $0x130] sm:$0xff] %v15116_v7  ;;  %15133 = vst [vmem:[%s31007_s7 + $0x138] sm:$0xff] %v15117_v42  ;;  %v15161_v53 = vmul.f32 %v31253_v9, %v30593_v18  ;;  %v15162_v1 = vmul.f32 %v30593_v18, %v31254_v4  ;;  %v15163_v26 = vmul.f32 %v31255_v27, %v30593_v18 }
 0x719   :  { %15134 = vst [vmem:[%s31007_s7 + $0x140] sm:$0xff] %v15118_v52  ;;  %15135 = vst [vmem:[%s31007_s7 + $0x148] sm:$0xff] %v15119_v2  ;;  %v15164_v24 = vmul.f32 %v30593_v18, %v31256_v48  ;;  %v15165_v14 = vmul.f32 %v31257_v54, %v30593_v18  ;;  %v15166_v20 = vmul.f32 %v30593_v18, %v31258_v13 }
 0x71a   :  { %15136 = vst [vmem:[%s31007_s7 + $0x150] sm:$0xff] %v15120_v33  ;;  %15137 = vst [vmem:[%s31007_s7 + $0x158] sm:$0xff] %v15121_v47  ;;  %v15167_v60 = vmul.f32 %v31259_v28, %v30593_v18  ;;  %v15168_v43 = vmul.f32 %v30593_v18, %v31260_v61  ;;  %v15169_v17 = vmul.f32 %v31261_v29, %v30593_v18 }
 0x71b   :  { %15138 = vst [vmem:[%s31007_s7 + $0x160] sm:$0xff] %v15122_v38  ;;  %15139 = vst [vmem:[%s31007_s7 + $0x168] sm:$0xff] %v15123_v55  ;;  %v15170_v51 = vmul.f32 %v30593_v18, %v31262_v30  ;;  %v15171_v63 = vmul.f32 %v31263_v12, %v30593_v18  ;;  %v15172_v58 = vmul.f32 %v30593_v18, %v31264_v25 }
 0x71c   :  { %15140 = vst [vmem:[%s31007_s7 + $0x170] sm:$0xff] %v15124_v31  ;;  %15141 = vst [vmem:[%s31007_s7 + $0x178] sm:$0xff] %v15125_v15  ;;  %v15173_v19 = vmul.f32 %v30573_v23, %v30593_v18  ;;  %v15174_v56 = vadd.f32 %v15158_v11, %v30628_v22  ;;  %v15175_v3 = vadd.f32 %v15159_v37, %v30628_v22 }
 0x71d   :  { %v15176_v50 = vadd.f32 %v15160_v34, %v30628_v22  ;;  %v15177_v35 = vadd.f32 %v15161_v53, %v30628_v22  ;;  %v15178_v45 = vadd.f32 %v15162_v1, %v30628_v22  ;;  %v15179_v39 = vadd.f32 %v15163_v26, %v30628_v22 }
 0x71e   :  { %v15180_v49 = vadd.f32 %v15164_v24, %v30628_v22  ;;  %v15181_v40 = vadd.f32 %v15165_v14, %v30628_v22  ;;  %v15182_v10 = vadd.f32 %v15166_v20, %v30628_v22  ;;  %v15183_v23 = vadd.f32 %v15167_v60, %v30628_v22 }
 0x71f   :  { %v15184_v18 = vadd.f32 %v15168_v43, %v30628_v22  ;;  %v15185_v41 = vadd.f32 %v15169_v17, %v30628_v22  ;;  %v15186_v21 = vadd.f32 %v15170_v51, %v30628_v22  ;;  %v15187_v46 = vadd.f32 %v15171_v63, %v30628_v22 }
 0x720   :  { %v15188_v6 = vadd.f32 %v15172_v58, %v30628_v22  ;;  %v15189_v36 = vadd.f32 %v15173_v19, %v30628_v22  ;;  %v15190_v44 = vmax.f32 %v15174_v56, 0.0  ;;  %v15191_v62 = vmax.f32 %v15175_v3, 0.0 }
 0x721   :  { %v15192_v57 = vmax.f32 %v15176_v50, 0.0  ;;  %v15193_v5 = vmax.f32 %v15177_v35, 0.0  ;;  %v15194_v0 = vmax.f32 %v15178_v45, 0.0  ;;  %v15195_v59 = vmax.f32 %v15179_v39, 0.0 }
 0x722   :  { %v15196_v7 = vmax.f32 %v15180_v49, 0.0  ;;  %v15197_v42 = vmax.f32 %v15181_v40, 0.0  ;;  %v15198_v52 = vmax.f32 %v15182_v10, 0.0  ;;  %v15199_v2 = vmax.f32 %v15183_v23, 0.0  ;;  %15206 = vst [vmem:[%s31007_s7 + $0x180] sm:$0xff] %v15190_v44  ;;  %15207 = vst [vmem:[%s31007_s7 + $0x188] sm:$0xff] %v15191_v62 }
 0x723   :  { %v15200_v33 = vmax.f32 %v15184_v18, 0.0  ;;  %v15201_v22 = vmax.f32 %v15185_v41, 0.0  ;;  %v15202_v47 = vmax.f32 %v15186_v21, 0.0  ;;  %v15203_v38 = vmax.f32 %v15187_v46, 0.0  ;;  %15208 = vst [vmem:[%s31007_s7 + $0x190] sm:$0xff] %v15192_v57  ;;  %15209 = vst [vmem:[%s31007_s7 + $0x198] sm:$0xff] %v15193_v5 }
 0x724   :  { %15210 = vst [vmem:[%s31007_s7 + $0x1a0] sm:$0xff] %v15194_v0  ;;  %15211 = vst [vmem:[%s31007_s7 + $0x1a8] sm:$0xff] %v15195_v59  ;;  %v15204_v55 = vmax.f32 %v15188_v6, 0.0  ;;  %v15205_v31 = vmax.f32 %v15189_v36, 0.0 }
 0x725   :  { %15212 = vst [vmem:[%s31007_s7 + $0x1b0] sm:$0xff] %v15196_v7  ;;  %15213 = vst [vmem:[%s31007_s7 + $0x1b8] sm:$0xff] %v15197_v42 }
 0x726   :  { %15214 = vst [vmem:[%s31007_s7 + $0x1c0] sm:$0xff] %v15198_v52  ;;  %15215 = vst [vmem:[%s31007_s7 + $0x1c8] sm:$0xff] %v15199_v2 }
 0x727   :  { %15216 = vst [vmem:[%s31007_s7 + $0x1d0] sm:$0xff] %v15200_v33  ;;  %15217 = vst [vmem:[%s31007_s7 + $0x1d8] sm:$0xff] %v15201_v22 }
 0x728   :  { %15218 = vst [vmem:[%s31007_s7 + $0x1e0] sm:$0xff] %v15202_v47  ;;  %15219 = vst [vmem:[%s31007_s7 + $0x1e8] sm:$0xff] %v15203_v38 }
 0x729   :  { %15220 = vst [vmem:[%s31007_s7 + $0x1f0] sm:$0xff] %v15204_v55  ;;  %15221 = vst [vmem:[%s31007_s7 + $0x1f8] sm:$0xff] %v15205_v31 }

</bundles_post_ra>
